<compile_context>
chip_gen: v7x
topology: tpu7x:2x2x1
jax: 0.10.0
libtpu: 0.0.40
codegen_flags: <defaults>
</compile_context>

<pallas_src>
import math
import functools

import jax
import jax.numpy as jnp
from jax.experimental import pallas as pl
from jax.experimental.pallas import tpu as pltpu

NEG_INF = -1e30      # additive-mask "minus infinity" (exp underflows to 0 in f32)
LN_EPS = 1e-5        # matches nn.LayerNorm(eps=1e-05)
LANE = 128


def _round_up(n, m):
    return ((n + m - 1) // m) * m


# ----------------------------- BlockSpec helpers -----------------------------

def _const_spec(shape):
    nd = len(shape)
    return pl.BlockSpec(tuple(shape), lambda l, nd=nd: (0,) * nd)


def _layer_spec(shape):
    # shape = (L, ...); kernel sees shape[1:], block index selects layer l.
    nd = len(shape) - 1
    return pl.BlockSpec((None,) + tuple(shape[1:]),
                        lambda l, nd=nd: (l,) + (0,) * nd)


# -------------------------- in-kernel helpers (traced) --------------------------

def _matmul_bias(x, w_t, b):
    # w_t already transposed to (K, N); bias is (1, N).
    return jnp.dot(x, w_t, preferred_element_type=jnp.float32) + b


def _layernorm(x, g, b, lmask, inv_d):
    # Statistics over only the d_real real lanes; padded lanes of the output are 0
    # because gamma/beta are zero-padded and xc is masked.
    xm = x * lmask
    mu = jnp.sum(xm, axis=-1, keepdims=True) * inv_d
    xc = (xm - mu) * lmask
    var = jnp.sum(xc * xc, axis=-1, keepdims=True) * inv_d
    return xc * jax.lax.rsqrt(var + LN_EPS) * g + b


def _gated_layernorm(x, g, b, lmask, inv_d):
    # LayerNorm(sigmoid(x) * x + x) -- gating BEFORE normalization, as in the reference.
    return _layernorm(jax.nn.sigmoid(x) * x + x, g, b, lmask, inv_d)


def _mha(q, k, v, attn_mask, nhead, hd, lane):
    """Multi-head attention without lane slicing or scratch stores.

    q: (Nq, Dp) already scaled by 1/sqrt(hd); k, v: (Nk, Dp).
    attn_mask: (Nq, Nk) additive mask that also encodes the batch block-diagonal
    structure (and causality, when applicable).  Heads are isolated with lane masks:
    (q*m_h) . k over all Dp lanes == q_h . k_h, and p @ (v*m_h) places the head's
    context in its own lanes, so the sum over heads is the full context.
    """
    ctx = jnp.zeros_like(q)
    for h in range(nhead):
        m = ((lane >= h * hd) & (lane < (h + 1) * hd)).astype(jnp.float32)
        s = jax.lax.dot_general(q * m, k, (((1,), (1,)), ((), ())),
                                preferred_element_type=jnp.float32)      # (Nq, Nk)
        s = s + attn_mask
        s = s - jnp.max(s, axis=-1, keepdims=True)
        p = jnp.exp(s)
        p = p * pl.reciprocal(jnp.sum(p, axis=-1, keepdims=True), approx=True)
        ctx = ctx + jnp.dot(p, v * m, preferred_element_type=jnp.float32)
    return ctx


# ------------------------------ fused stack kernels ------------------------------

def _stack1_kernel(nhead, hd, d_real, n_layers,
                   x0_ref, mem_ref, cmask_ref,
                   ca_wq_ref, ca_bq_ref, ca_wkv_ref, ca_bkv_ref,
                   ca_wout_ref, ca_bout_ref,
                   w1_ref, b1_ref, w2_ref, b2_ref, norms_ref,
                   hw_ref, hb_ref,
                   logits_ref, x_ref):
    """Whole Mesh_TransformerDecoderLayer stack (cross-attn + FFN) + wdc1 head.

    grid = (n_layers,); activation carried in x_ref (VMEM scratch) across layers.
    NOTE: the reference also computes norm1(tgt + self_attn(tgt)) which is dead code
    in its forward path; skipped here (output identical).
    """
    layer = pl.program_id(0)
    dp = x_ref.shape[-1]
    lane = jax.lax.broadcasted_iota(jnp.int32, (1, dp), 1)
    lmask = (lane < d_real).astype(jnp.float32)
    inv_d = 1.0 / d_real

    @pl.when(layer == 0)
    def _():
        x_ref[...] = x0_ref[...]

    x = x_ref[...]
    mem = mem_ref[...]
    norms = norms_ref[...]
    n2g, n2b = norms[0:1, :], norms[1:2, :]
    n3g, n3b = norms[2:3, :], norms[3:4, :]

    # ---- cross-attention on memory, residual, norm2 ----
    q = _matmul_bias(x, ca_wq_ref[...], ca_bq_ref[...])
    kv = _matmul_bias(mem, ca_wkv_ref[...], ca_bkv_ref[...])              # (Nk, 2Dp)
    ctx = _mha(q, kv[:, :dp], kv[:, dp:], cmask_ref[...], nhead, hd, lane)
    enc_att = _matmul_bias(ctx, ca_wout_ref[...], ca_bout_ref[...])
    xx = _layernorm(x + enc_att, n2g, n2b, lmask, inv_d)

    # ---- FFN, residual, norm3 ----
    h1 = jnp.maximum(_matmul_bias(xx, w1_ref[...], b1_ref[...]), 0.0)
    ff = _matmul_bias(h1, w2_ref[...], b2_ref[...])
    out = _layernorm(xx + ff, n3g, n3b, lmask, inv_d)
    x_ref[...] = out

    @pl.when(layer == n_layers - 1)
    def _():
        logits_ref[...] = jnp.dot(out, hw_ref[...],
                                  preferred_element_type=jnp.float32) + hb_ref[...]


def _stack2_kernel(nhead, hd, d_real, n_layers,
                   x0_ref, mem_ref, smask_ref, cmask_ref,
                   sa_win_ref, sa_bin_ref, sa_wout_ref, sa_bout_ref,
                   ca_wq_ref, ca_bq_ref, ca_wkv_ref, ca_bkv_ref,
                   ca_wout_ref, ca_bout_ref,
                   w1_ref, b1_ref, w2_ref, b2_ref, norms_ref,
                   hw_ref, hb_ref,
                   logits_ref, x_ref):
    """Whole Mesh_TransformerDecoderLayer2 stack (self-attn + cross-attn + gated branches
    + FFN) + wdc head, one layer per grid iteration."""
    layer = pl.program_id(0)
    dp = x_ref.shape[-1]
    lane = jax.lax.broadcasted_iota(jnp.int32, (1, dp), 1)
    lmask = (lane < d_real).astype(jnp.float32)
    inv_d = 1.0 / d_real

    @pl.when(layer == 0)
    def _():
        x_ref[...] = x0_ref[...]

    x = x_ref[...]
    mem = mem_ref[...]
    norms = norms_ref[...]
    n1g, n1b = norms[0:1, :], norms[1:2, :]
    n2g, n2b = norms[2:3, :], norms[3:4, :]
    n3g, n3b = norms[4:5, :], norms[5:6, :]

    # ---- masked self-attention (fused QKV projection), residual, norm1 ----
    qkv = _matmul_bias(x, sa_win_ref[...], sa_bin_ref[...])               # (Nq, 3Dp)
    sa_ctx = _mha(qkv[:, :dp], qkv[:, dp:2 * dp], qkv[:, 2 * dp:],
                  smask_ref[...], nhead, hd, lane)
    sa = _matmul_bias(sa_ctx, sa_wout_ref[...], sa_bout_ref[...])
    self_att = _layernorm(x + sa, n1g, n1b, lmask, inv_d)

    # ---- cross-attention on memory ----
    qc = _matmul_bias(self_att, ca_wq_ref[...], ca_bq_ref[...])
    kv = _matmul_bias(mem, ca_wkv_ref[...], ca_bkv_ref[...])              # (Nk, 2Dp)
    ca_ctx = _mha(qc, kv[:, :dp], kv[:, dp:], cmask_ref[...], nhead, hd, lane)
    enc_att1 = _matmul_bias(ca_ctx, ca_wout_ref[...], ca_bout_ref[...])

    # ---- gated branches (norm1/norm2 parameter sharing matches the reference) ----
    branch1 = _gated_layernorm(enc_att1, n1g, n1b, lmask, inv_d)
    branch2 = _gated_layernorm(self_att, n2g, n2b, lmask, inv_d)
    xx = _layernorm(self_att + branch1 + branch2, n2g, n2b, lmask, inv_d)

    # ---- FFN ----
    h1 = jnp.maximum(_matmul_bias(xx, w1_ref[...], b1_ref[...]), 0.0)
    ff = _matmul_bias(h1, w2_ref[...], b2_ref[...])
    out = _layernorm(xx + ff, n3g, n3b, lmask, inv_d)
    x_ref[...] = out

    @pl.when(layer == n_layers - 1)
    def _():
        logits_ref[...] = jnp.dot(out, hw_ref[...],
                                  preferred_element_type=jnp.float32) + hb_ref[...]


# ------------------------------ pallas_call wrappers ------------------------------

def fused_stack1(x0, mem, cmask, sp, head_w, head_b, *, nhead, d_real):
    n_layers = sp['norms'].shape[0]
    nq, dp = x0.shape
    hd = d_real // nhead
    vp = head_w.shape[1]
    const_args = [x0, mem, cmask]
    layer_args = [sp['ca']['wq_t'], sp['ca']['bq'], sp['ca']['wkv_t'], sp['ca']['bkv'],
                  sp['ca']['wout_t'], sp['ca']['bout'],
                  sp['w1_t'], sp['b1'], sp['w2_t'], sp['b2'], sp['norms']]
    head_args = [head_w, head_b]
    in_specs = ([_const_spec(a.shape) for a in const_args]
                + [_layer_spec(a.shape) for a in layer_args]
                + [_const_spec(a.shape) for a in head_args])
    return pl.pallas_call(
        functools.partial(_stack1_kernel, nhead, hd, d_real, n_layers),
        out_shape=jax.ShapeDtypeStruct((nq, vp), jnp.float32),
        grid=(n_layers,),
        in_specs=in_specs,
        out_specs=_const_spec((nq, vp)),
        scratch_shapes=[pltpu.VMEM((nq, dp), jnp.float32)],
        compiler_params=pltpu.CompilerParams(dimension_semantics=("arbitrary",)),
    )(*const_args, *layer_args, *head_args)


def fused_stack2(x0, mem, smask, cmask, sp, head_w, head_b, *, nhead, d_real):
    n_layers = sp['norms'].shape[0]
    nq, dp = x0.shape
    hd = d_real // nhead
    vp = head_w.shape[1]
    const_args = [x0, mem, smask, cmask]
    layer_args = [sp['sa']['win_t'], sp['sa']['bin'], sp['sa']['wout_t'], sp['sa']['bout'],
                  sp['ca']['wq_t'], sp['ca']['bq'], sp['ca']['wkv_t'], sp['ca']['bkv'],
                  sp['ca']['wout_t'], sp['ca']['bout'],
                  sp['w1_t'], sp['b1'], sp['w2_t'], sp['b2'], sp['norms']]
    head_args = [head_w, head_b]
    in_specs = ([_const_spec(a.shape) for a in const_args]
                + [_layer_spec(a.shape) for a in layer_args]
                + [_const_spec(a.shape) for a in head_args])
    return pl.pallas_call(
        functools.partial(_stack2_kernel, nhead, hd, d_real, n_layers),
        out_shape=jax.ShapeDtypeStruct((nq, vp), jnp.float32),
        grid=(n_layers,),
        in_specs=in_specs,
        out_specs=_const_spec((nq, vp)),
        scratch_shapes=[pltpu.VMEM((nq, dp), jnp.float32)],
        compiler_params=pltpu.CompilerParams(dimension_semantics=("arbitrary",)),
    )(*const_args, *layer_args, *head_args)


# --------------------------------- parameter init ---------------------------------

def _uniform(key, shape, bound):
    return jax.random.uniform(key, shape, jnp.float32, -bound, bound)


def init_linear(key, out_d, in_d):
    k1, k2 = jax.random.split(key)
    bound = 1.0 / math.sqrt(in_d)
    return {'w': _uniform(k1, (out_d, in_d), bound),
            'b': _uniform(k2, (out_d,), bound)}


def init_mha(key, d):
    k1, k2 = jax.random.split(key)
    xb = math.sqrt(6.0 / (3 * d + d))           # xavier_uniform for in_proj
    return {'w_in': _uniform(k1, (3 * d, d), xb),
            'b_in': jnp.zeros((3 * d,), jnp.float32),
            'w_out': _uniform(k2, (d, d), 1.0 / math.sqrt(d)),
            'b_out': jnp.zeros((d,), jnp.float32)}


def init_layernorm(d):
    return {'g': jnp.ones((d,), jnp.float32), 'b': jnp.zeros((d,), jnp.float32)}


def make_sinusoid_pe(max_len, d):
    position = jnp.arange(max_len, dtype=jnp.float32)[:, None]
    div_term = jnp.exp(jnp.arange(0, d, 2, dtype=jnp.float32)
                       * (-math.log(10000.0) / d))
    pe = jnp.zeros((max_len, d), jnp.float32)
    pe = pe.at[:, 0::2].set(jnp.sin(position * div_term))
    pe = pe.at[:, 1::2].set(jnp.cos(position * div_term))
    return pe[:, None, :]                       # (max_len, 1, d)


def init_params(key, feature_dim, vocab_size, n_layers):
    d = feature_dim
    keys = jax.random.split(key, 8)
    params = {
        'vocab_embedding': _uniform(keys[0], (vocab_size, d), 0.1),
        'pe': make_sinusoid_pe(64, d),          # PositionalEncoding buffer
        'pe1': make_sinusoid_pe(64, d),         # PositionalEncoding1 buffer
        'pos_emb_27': jax.random.normal(keys[1], (27, d), jnp.float32),
        'pos_emb_14': jax.random.normal(keys[2], (14, d), jnp.float32),
        'wdc': {'w': _uniform(keys[3], (vocab_size, d), 0.1),
                'b': jnp.zeros((vocab_size,), jnp.float32)},
        'wdc1': init_linear(keys[4], vocab_size, d),
    }
    # fc1/fc2, self_attn2, multihead_attn{,3,4}, fc_alpha1..3 are defined in __init__
    # but unused in the forward path, so they are not instantiated.

    def layer1_params(k):
        ks = jax.random.split(k, 3)
        return {'mha2': init_mha(ks[0], d),
                'linear1': init_linear(ks[1], 4 * d, d),
                'linear2': init_linear(ks[2], d, 4 * d),
                'norm2': init_layernorm(d),
                'norm3': init_layernorm(d)}

    def layer2_params(k):
        ks = jax.random.split(k, 4)
        return {'self_attn': init_mha(ks[0], d),
                'mha1': init_mha(ks[1], d),
                'linear1': init_linear(ks[2], 4 * d, d),
                'linear2': init_linear(ks[3], d, 4 * d),
                'norm1': init_layernorm(d),
                'norm2': init_layernorm(d),
                'norm3': init_layernorm(d)}

    params['transformer'] = [layer1_params(k)
                             for k in jax.random.split(keys[5], n_layers)]
    params['transformer1'] = [layer2_params(k)
                              for k in jax.random.split(keys[6], n_layers)]
    return params


# ------------- one-time param prep (transpose / scale-fold / lane-pad / stack) -------------

def _pad_vec(v, target):
    return jnp.pad(v, (0, target - v.shape[0]))


def _prep_mha(p, nhead, d, dp, fused_qkv):
    hd = d // nhead
    scale = 1.0 / math.sqrt(hd)
    w_in, b_in = p['w_in'], p['b_in']
    wq, wk, wv = w_in[:d] * scale, w_in[d:2 * d], w_in[2 * d:]   # fold softmax scale into q
    bq, bk, bv = b_in[:d] * scale, b_in[d:2 * d], b_in[2 * d:]

    def pwt(w):   # (out=d, in=d) weight -> transposed (in, out), zero-padded to (dp, dp)
        return jnp.pad(w.T, ((0, dp - d), (0, dp - d)))

    def pb(b):
        return jnp.pad(b[None, :], ((0, 0), (0, dp - d)))

    out = {'wout_t': pwt(p['w_out']), 'bout': pb(p['b_out'])}
    if fused_qkv:
        out['win_t'] = jnp.concatenate([pwt(wq), pwt(wk), pwt(wv)], axis=1)   # (dp, 3dp)
        out['bin'] = jnp.concatenate([pb(bq), pb(bk), pb(bv)], axis=1)
    else:
        out['wq_t'] = pwt(wq)
        out['bq'] = pb(bq)
        out['wkv_t'] = jnp.concatenate([pwt(wk), pwt(wv)], axis=1)            # (dp, 2dp)
        out['bkv'] = jnp.concatenate([pb(bk), pb(bv)], axis=1)
    return out


def _prep_ffn(lp, d, dp):
    f = lp['linear1']['w'].shape[0]
    fp = _round_up(f, LANE)
    return {'w1_t': jnp.pad(lp['linear1']['w'].T, ((0, dp - d), (0, fp - f))),
            'b1': jnp.pad(lp['linear1']['b'][None, :], ((0, 0), (0, fp - f))),
            'w2_t': jnp.pad(lp['linear2']['w'].T, ((0, fp - f), (0, dp - d))),
            'b2': jnp.pad(lp['linear2']['b'][None, :], ((0, 0), (0, dp - d)))}


def _prep_head(p, d, dp, vp):
    vocab = p['w'].shape[0]
    return {'w_t': jnp.pad(p['w'].T, ((0, dp - d), (0, vp - vocab))),
            'b': jnp.pad(p['b'][None, :], ((0, 0), (0, vp - vocab)))}


def prepare_params(params, nhead):
    d = params['vocab_embedding'].shape[1]
    vocab = params['vocab_embedding'].shape[0]
    dp = _round_up(d, LANE)
    vp = _round_up(vocab, LANE)

    def pad_cols(x):
        return jnp.pad(x, ((0, 0), (0, dp - x.shape[1])))

    def prep_layer1(lp):
        out = {'ca': _prep_mha(lp['mha2'], nhead, d, dp, fused_qkv=False)}
        out.update(_prep_ffn(lp, d, dp))
        out['norms'] = jnp.stack([_pad_vec(lp['norm2']['g'], dp), _pad_vec(lp['norm2']['b'], dp),
                                  _pad_vec(lp['norm3']['g'], dp), _pad_vec(lp['norm3']['b'], dp)],
                                 axis=0)
        return out

    def prep_layer2(lp):
        out = {'sa': _prep_mha(lp['self_attn'], nhead, d, dp, fused_qkv=True),
               'ca': _prep_mha(lp['mha1'], nhead, d, dp, fused_qkv=False)}
        out.update(_prep_ffn(lp, d, dp))
        out['norms'] = jnp.stack([_pad_vec(lp['norm1']['g'], dp), _pad_vec(lp['norm1']['b'], dp),
                                  _pad_vec(lp['norm2']['g'], dp), _pad_vec(lp['norm2']['b'], dp),
                                  _pad_vec(lp['norm3']['g'], dp), _pad_vec(lp['norm3']['b'], dp)],
                                 axis=0)
        return out

    def stack(layers):   # list of identically-structured dicts -> dict of (L, ...) arrays
        return jax.tree_util.tree_map(lambda *xs: jnp.stack(xs, axis=0), *layers)

    return {
        'vocab_embedding': pad_cols(params['vocab_embedding']),
        'pos_cap': pad_cols(params['pe'][:27, 0, :] + params['pos_emb_27']),
        'pos_word': pad_cols(params['pe1'][:14, 0, :] + params['pos_emb_14']),
        'wdc': _prep_head(params['wdc'], d, dp, vp),
        'wdc1': _prep_head(params['wdc1'], d, dp, vp),
        'transformer': stack([prep_layer1(lp) for lp in params['transformer']]),
        'transformer1': stack([prep_layer2(lp) for lp in params['transformer1']]),
    }


# ------------------------------------ full forward ------------------------------------

def _block_causal_mask(b, t):
    # (b*t, b*t): block-diagonal over batches + causal within each batch.
    idx = jnp.arange(b * t)
    bb, tt = idx // t, idx % t
    allowed = (bb[:, None] == bb[None, :]) & (tt[None, :] <= tt[:, None])
    return jnp.where(allowed, 0.0, NEG_INF).astype(jnp.float32)


def _block_cross_mask(b, tq, tk):
    # (b*tq, b*tk): block-diagonal over batches (no causality for cross-attention).
    qb = jnp.arange(b * tq) // tq
    kb = jnp.arange(b * tk) // tk
    return jnp.where(qb[:, None] == kb[None, :], 0.0, NEG_INF).astype(jnp.float32)


def decoder_transformer_forward(prep, memory, encoded_captions, encoded_words,
                                caption_lengths, word_lengths, nhead, d_real):
    dp = prep['vocab_embedding'].shape[1]
    vocab = prep['vocab_embedding'].shape[0]
    B, T = encoded_captions.shape
    W = encoded_words.shape[1]
    S = memory.shape[0]

    # memory (S, B, D) -> batch-major (B*S, Dp) with zero-padded lanes
    mem = jnp.transpose(memory, (1, 0, 2)).reshape(B * S, d_real)
    mem = jnp.pad(mem, ((0, 0), (0, dp - d_real)))

    emb = prep['vocab_embedding']
    # batch-major (B*T, Dp) layout end-to-end (numerically identical to PyTorch (T, B, D))
    tgt = (jnp.take(emb, encoded_captions, axis=0) + prep['pos_cap'][None]).reshape(B * T, dp)
    wrd = (jnp.take(emb, encoded_words, axis=0) + prep['pos_word'][None]).reshape(B * W, dp)
    # TODO(synk): nn.Dropout layers are stochastic in train mode; treated as eval-mode identity.

    smask = _block_causal_mask(B, T)
    cmask_cap = _block_cross_mask(B, T, S)
    cmask_word = _block_cross_mask(B, W, S)

    # words -> Mesh_TransformerDecoderLayer stack -> wdc1 head (fused, 1 launch)
    logits_word = fused_stack1(wrd, mem, cmask_word, prep['transformer'],
                               prep['wdc1']['w_t'], prep['wdc1']['b'],
                               nhead=nhead, d_real=d_real)
    # captions -> Mesh_TransformerDecoderLayer2 stack -> wdc head (fused, 1 launch)
    logits_cap = fused_stack2(tgt, mem, smask, cmask_cap, prep['transformer1'],
                              prep['wdc']['w_t'], prep['wdc']['b'],
                              nhead=nhead, d_real=d_real)
    # TODO(synk): on v7x the two independent stacks could run concurrently on the two
    # TensorCores via pl.core_map; kept as two sequential fused calls for v5e/v6e portability.

    pred = logits_cap[:, :vocab].reshape(B, T, vocab)        # == permute(1,0,2) of PyTorch
    pred_word = logits_word[:, :vocab].reshape(B, W, vocab)

    cl = caption_lengths[:, 0]
    sort_ind = jnp.argsort(-cl)
    caption_lengths_s = cl[sort_ind]
    encoded_captions_s = encoded_captions[sort_ind]
    pred = pred[sort_ind]
    decode_lengths = caption_lengths_s - 1      # TODO(synk): reference returns .tolist()

    wl = word_lengths[:, 0]
    sort_ind1 = jnp.argsort(-wl)
    word_lengths_s = wl[sort_ind1]
    encoded_words_s = encoded_words[sort_ind1]
    pred_word = pred_word[sort_ind1]
    decode2_lengths = word_lengths_s - 1

    return (pred, encoded_captions_s, decode_lengths, sort_ind,
            pred_word, encoded_words_s, decode2_lengths, sort_ind1)


# ----------------------------------------- main -----------------------------------------

if __name__ == "__main__":
    feature_dim, vocab_size, n_head, n_layers = 32, 50, 4, 2
    B, S_mem = 2, 10
    T_cap, T_word = 27, 14   # fixed by PositionalEncoding / PositionalEncoding1

    key = jax.random.PRNGKey(0)
    kp, k1, k2, k3 = jax.random.split(key, 4)
    raw_params = init_params(kp, feature_dim, vocab_size, n_layers)
    prep = prepare_params(raw_params, n_head)

    memory = jax.random.normal(k1, (S_mem, B, feature_dim), jnp.float32)
    encoded_captions = jax.random.randint(k2, (B, T_cap), 0, vocab_size)
    encoded_words = jax.random.randint(k3, (B, T_word), 0, vocab_size)
    caption_lengths = jnp.array([[20], [27]], dtype=jnp.int32)
    word_lengths = jnp.array([[14], [9]], dtype=jnp.int32)

    fwd = jax.jit(functools.partial(decoder_transformer_forward,
                                    nhead=n_head, d_real=feature_dim))
    outs = fwd(prep, memory, encoded_captions, encoded_words,
               caption_lengths, word_lengths)
    jax.block_until_ready(outs)
    assert outs[0].shape == (B, T_cap, vocab_size)
    assert outs[4].shape == (B, T_word, vocab_size)
    print("KERNEL_OK")
</pallas_src>

<mosaic_0001>
module attributes {stable_mosaic.version = 11 : i64} {
  func.func @_stack2_kernel(%arg0: i32, %arg1: memref<54x128xf32, #tpu.memory_space<vmem>>, %arg2: memref<20x128xf32, #tpu.memory_space<vmem>>, %arg3: memref<54x54xf32, #tpu.memory_space<vmem>>, %arg4: memref<54x20xf32, #tpu.memory_space<vmem>>, %arg5: memref<1x128x384xf32, #tpu.memory_space<vmem>>, %arg6: memref<1x1x384xf32, #tpu.memory_space<vmem>>, %arg7: memref<1x128x128xf32, #tpu.memory_space<vmem>>, %arg8: memref<1x1x128xf32, #tpu.memory_space<vmem>>, %arg9: memref<1x128x128xf32, #tpu.memory_space<vmem>>, %arg10: memref<1x1x128xf32, #tpu.memory_space<vmem>>, %arg11: memref<1x128x256xf32, #tpu.memory_space<vmem>>, %arg12: memref<1x1x256xf32, #tpu.memory_space<vmem>>, %arg13: memref<1x128x128xf32, #tpu.memory_space<vmem>>, %arg14: memref<1x1x128xf32, #tpu.memory_space<vmem>>, %arg15: memref<1x128x128xf32, #tpu.memory_space<vmem>>, %arg16: memref<1x1x128xf32, #tpu.memory_space<vmem>>, %arg17: memref<1x128x128xf32, #tpu.memory_space<vmem>>, %arg18: memref<1x1x128xf32, #tpu.memory_space<vmem>>, %arg19: memref<1x6x128xf32, #tpu.memory_space<vmem>>, %arg20: memref<128x128xf32, #tpu.memory_space<vmem>>, %arg21: memref<1x128xf32, #tpu.memory_space<vmem>>, %arg22: memref<54x128xf32, #tpu.memory_space<vmem>>, %arg23: memref<54x128xf32, #tpu.memory_space<vmem>>) attributes {dimension_semantics = [#tpu.dimension_semantics<arbitrary>], iteration_bounds = array<i64: 2>, scalar_prefetch = 0 : i64, scratch_operands = 1 : i64, tpu.core_type = #tpu.core_type<tc>, window_params = [{pipeline_mode = #tpu.pipeline_mode<synchronous>, transform_indices = @transform_0, window_bounds = array<i64: 54, 128>}, {pipeline_mode = #tpu.pipeline_mode<synchronous>, transform_indices = @transform_1, window_bounds = array<i64: 20, 128>}, {pipeline_mode = #tpu.pipeline_mode<synchronous>, transform_indices = @transform_2, window_bounds = array<i64: 54, 54>}, {pipeline_mode = #tpu.pipeline_mode<synchronous>, transform_indices = @transform_3, window_bounds = array<i64: 54, 20>}, {transform_indices = @transform_4, window_bounds = array<i64: 1, 128, 384>}, {transform_indices = @transform_5, window_bounds = array<i64: 1, 1, 384>}, {transform_indices = @transform_6, window_bounds = array<i64: 1, 128, 128>}, {transform_indices = @transform_7, window_bounds = array<i64: 1, 1, 128>}, {transform_indices = @transform_8, window_bounds = array<i64: 1, 128, 128>}, {transform_indices = @transform_9, window_bounds = array<i64: 1, 1, 128>}, {transform_indices = @transform_10, window_bounds = array<i64: 1, 128, 256>}, {transform_indices = @transform_11, window_bounds = array<i64: 1, 1, 256>}, {transform_indices = @transform_12, window_bounds = array<i64: 1, 128, 128>}, {transform_indices = @transform_13, window_bounds = array<i64: 1, 1, 128>}, {transform_indices = @transform_14, window_bounds = array<i64: 1, 128, 128>}, {transform_indices = @transform_15, window_bounds = array<i64: 1, 1, 128>}, {transform_indices = @transform_16, window_bounds = array<i64: 1, 128, 128>}, {transform_indices = @transform_17, window_bounds = array<i64: 1, 1, 128>}, {transform_indices = @transform_18, window_bounds = array<i64: 1, 6, 128>}, {pipeline_mode = #tpu.pipeline_mode<synchronous>, transform_indices = @transform_19, window_bounds = array<i64: 128, 128>}, {pipeline_mode = #tpu.pipeline_mode<synchronous>, transform_indices = @transform_20, window_bounds = array<i64: 1, 128>}, {pipeline_mode = #tpu.pipeline_mode<synchronous>, transform_indices = @transform_21, window_bounds = array<i64: 54, 128>}]} {
    %0 = tpu.iota {dimensions = array<i32: 1>} : vector<1x128xi32>
    %c32_i32 = arith.constant 32 : i32
    %1 = vector.broadcast %c32_i32 : i32 to vector<1x128xi32>
    %2 = arith.cmpi slt, %0, %1 : vector<1x128xi32>
    %3 = arith.extui %2 : vector<1x128xi1> to vector<1x128xi32>
    %4 = arith.sitofp %3 : vector<1x128xi32> to vector<1x128xf32>
    %c0_i32 = arith.constant 0 : i32
    %5 = arith.cmpi eq, %arg0, %c0_i32 : i32
    %6 = arith.extui %5 : i1 to i32
    %c0_i32_0 = arith.constant 0 : i32
    %7 = arith.cmpi ne, %6, %c0_i32_0 : i32
    scf.if %7 {
      %c0_137 = arith.constant 0 : index
      %c0_138 = arith.constant 0 : index
      %420 = vector.load %arg1[%c0_137, %c0_138] : memref<54x128xf32, #tpu.memory_space<vmem>>, vector<54x128xf32>
      %c0_139 = arith.constant 0 : index
      %c0_140 = arith.constant 0 : index
      %421 = vector.load %arg23[%c0_139, %c0_140] : memref<54x128xf32, #tpu.memory_space<vmem>>, vector<54x128xf32>
      tpu.vector_store %arg23[%c0_139, %c0_140], %420 {strides = array<i32>} : memref<54x128xf32, #tpu.memory_space<vmem>>, vector<54x128xf32>,
    } else {
    }
    %c0 = arith.constant 0 : index
    %c0_1 = arith.constant 0 : index
    %8 = vector.load %arg23[%c0, %c0_1] : memref<54x128xf32, #tpu.memory_space<vmem>>, vector<54x128xf32>
    %c0_2 = arith.constant 0 : index
    %c0_3 = arith.constant 0 : index
    %9 = vector.load %arg2[%c0_2, %c0_3] : memref<20x128xf32, #tpu.memory_space<vmem>>, vector<20x128xf32>
    %c0_4 = arith.constant 0 : index
    %c0_5 = arith.constant 0 : index
    %c0_6 = arith.constant 0 : index
    %10 = vector.load %arg19[%c0_4, %c0_5, %c0_6] : memref<1x6x128xf32, #tpu.memory_space<vmem>>, vector<1x6x128xf32>
    %11 = vector.shape_cast %10 : vector<1x6x128xf32> to vector<6x128xf32>
    %12 = vector.extract_strided_slice %11 {offsets = [0, 0], sizes = [1, 128], strides = [1, 1]} : vector<6x128xf32> to vector<1x128xf32>
    %13 = vector.extract_strided_slice %11 {offsets = [1, 0], sizes = [1, 128], strides = [1, 1]} : vector<6x128xf32> to vector<1x128xf32>
    %14 = vector.extract_strided_slice %11 {offsets = [2, 0], sizes = [1, 128], strides = [1, 1]} : vector<6x128xf32> to vector<1x128xf32>
    %15 = vector.extract_strided_slice %11 {offsets = [3, 0], sizes = [1, 128], strides = [1, 1]} : vector<6x128xf32> to vector<1x128xf32>
    %16 = vector.extract_strided_slice %11 {offsets = [4, 0], sizes = [1, 128], strides = [1, 1]} : vector<6x128xf32> to vector<1x128xf32>
    %17 = vector.extract_strided_slice %11 {offsets = [5, 0], sizes = [1, 128], strides = [1, 1]} : vector<6x128xf32> to vector<1x128xf32>
    %c0_7 = arith.constant 0 : index
    %c0_8 = arith.constant 0 : index
    %c0_9 = arith.constant 0 : index
    %18 = vector.load %arg5[%c0_7, %c0_8, %c0_9] : memref<1x128x384xf32, #tpu.memory_space<vmem>>, vector<1x128x384xf32>
    %19 = vector.shape_cast %18 : vector<1x128x384xf32> to vector<128x384xf32>
    %c0_10 = arith.constant 0 : index
    %c0_11 = arith.constant 0 : index
    %c0_12 = arith.constant 0 : index
    %20 = vector.load %arg6[%c0_10, %c0_11, %c0_12] : memref<1x1x384xf32, #tpu.memory_space<vmem>>, vector<1x1x384xf32>
    %21 = vector.shape_cast %20 : vector<1x1x384xf32> to vector<1x384xf32>
    %cst = arith.constant dense<0.000000e+00> : vector<54x384xf32>
    %22 = tpu.matmul %8, %19, %cst {dimension_numbers = #tpu.dot_dimension_numbers<[1], [0], [0], [1], [0, 0, 1, 1], [], []>} : vector<54x128xf32>, vector<128x384xf32>, vector<54x384xf32> -> vector<54x384xf32>
    %23 = vector.broadcast %21 : vector<1x384xf32> to vector<54x384xf32>
    %24 = arith.addf %22, %23 : vector<54x384xf32>
    %25 = vector.extract_strided_slice %24 {offsets = [0, 0], sizes = [54, 128], strides = [1, 1]} : vector<54x384xf32> to vector<54x128xf32>
    %26 = vector.extract_strided_slice %24 {offsets = [0, 128], sizes = [54, 128], strides = [1, 1]} : vector<54x384xf32> to vector<54x128xf32>
    %27 = vector.extract_strided_slice %24 {offsets = [0, 256], sizes = [54, 128], strides = [1, 1]} : vector<54x384xf32> to vector<54x128xf32>
    %c0_13 = arith.constant 0 : index
    %c0_14 = arith.constant 0 : index
    %28 = vector.load %arg3[%c0_13, %c0_14] : memref<54x54xf32, #tpu.memory_space<vmem>>, vector<54x54xf32>
    %cst_15 = arith.constant 0.000000e+00 : f32
    %29 = vector.broadcast %cst_15 : f32 to vector<54x128xf32>
    %c0_i32_16 = arith.constant 0 : i32
    %30 = vector.broadcast %c0_i32_16 : i32 to vector<1x128xi32>
    %31 = arith.cmpi sge, %0, %30 : vector<1x128xi32>
    %c8_i32 = arith.constant 8 : i32
    %32 = vector.broadcast %c8_i32 : i32 to vector<1x128xi32>
    %33 = arith.cmpi slt, %0, %32 : vector<1x128xi32>
    %34 = arith.andi %31, %33 : vector<1x128xi1>
    %35 = arith.extui %34 : vector<1x128xi1> to vector<1x128xi32>
    %36 = arith.sitofp %35 : vector<1x128xi32> to vector<1x128xf32>
    %37 = vector.broadcast %36 : vector<1x128xf32> to vector<54x128xf32>
    %38 = arith.mulf %25, %37 : vector<54x128xf32>
    %cst_17 = arith.constant dense<0.000000e+00> : vector<54x54xf32>
    %39 = tpu.matmul %38, %26, %cst_17 {dimension_numbers = #tpu.dot_dimension_numbers<[1], [1], [0], [0], [0, 0, 1, 0], [], []>} : vector<54x128xf32>, vector<54x128xf32>, vector<54x54xf32> -> vector<54x54xf32>
    %40 = arith.addf %39, %28 : vector<54x54xf32>
    %cst_18 = arith.constant dense<0xFF800000> : vector<54xf32>
    %41 = vector.multi_reduction <maximumf>, %40, %cst_18 [1] : vector<54x54xf32> to vector<54xf32>
    %42 = vector.shape_cast %41 : vector<54xf32> to vector<54x1xf32>
    %43 = vector.broadcast %42 : vector<54x1xf32> to vector<54x54xf32>
    %44 = arith.subf %40, %43 : vector<54x54xf32>
    %45 = math.exp %44 : vector<54x54xf32>
    %cst_19 = arith.constant dense<0.000000e+00> : vector<54xf32>
    %46 = vector.multi_reduction <add>, %45, %cst_19 [1] : vector<54x54xf32> to vector<54xf32>
    %47 = vector.shape_cast %46 : vector<54xf32> to vector<54x1xf32>
    %48 = tpu.reciprocal %47 {approx = true} : vector<54x1xf32> -> vector<54x1xf32>
    %49 = vector.broadcast %48 : vector<54x1xf32> to vector<54x54xf32>
    %50 = arith.mulf %45, %49 : vector<54x54xf32>
    %51 = vector.broadcast %36 : vector<1x128xf32> to vector<54x128xf32>
    %52 = arith.mulf %27, %51 : vector<54x128xf32>
    %cst_20 = arith.constant dense<0.000000e+00> : vector<54x128xf32>
    %53 = tpu.matmul %50, %52, %cst_20 {dimension_numbers = #tpu.dot_dimension_numbers<[1], [0], [0], [1], [0, 0, 1, 1], [], []>} : vector<54x54xf32>, vector<54x128xf32>, vector<54x128xf32> -> vector<54x128xf32>
    %54 = arith.addf %29, %53 : vector<54x128xf32>
    %c8_i32_21 = arith.constant 8 : i32
    %55 = vector.broadcast %c8_i32_21 : i32 to vector<1x128xi32>
    %56 = arith.cmpi sge, %0, %55 : vector<1x128xi32>
    %c16_i32 = arith.constant 16 : i32
    %57 = vector.broadcast %c16_i32 : i32 to vector<1x128xi32>
    %58 = arith.cmpi slt, %0, %57 : vector<1x128xi32>
    %59 = arith.andi %56, %58 : vector<1x128xi1>
    %60 = arith.extui %59 : vector<1x128xi1> to vector<1x128xi32>
    %61 = arith.sitofp %60 : vector<1x128xi32> to vector<1x128xf32>
    %62 = vector.broadcast %61 : vector<1x128xf32> to vector<54x128xf32>
    %63 = arith.mulf %25, %62 : vector<54x128xf32>
    %cst_22 = arith.constant dense<0.000000e+00> : vector<54x54xf32>
    %64 = tpu.matmul %63, %26, %cst_22 {dimension_numbers = #tpu.dot_dimension_numbers<[1], [1], [0], [0], [0, 0, 1, 0], [], []>} : vector<54x128xf32>, vector<54x128xf32>, vector<54x54xf32> -> vector<54x54xf32>
    %65 = arith.addf %64, %28 : vector<54x54xf32>
    %cst_23 = arith.constant dense<0xFF800000> : vector<54xf32>
    %66 = vector.multi_reduction <maximumf>, %65, %cst_23 [1] : vector<54x54xf32> to vector<54xf32>
    %67 = vector.shape_cast %66 : vector<54xf32> to vector<54x1xf32>
    %68 = vector.broadcast %67 : vector<54x1xf32> to vector<54x54xf32>
    %69 = arith.subf %65, %68 : vector<54x54xf32>
    %70 = math.exp %69 : vector<54x54xf32>
    %cst_24 = arith.constant dense<0.000000e+00> : vector<54xf32>
    %71 = vector.multi_reduction <add>, %70, %cst_24 [1] : vector<54x54xf32> to vector<54xf32>
    %72 = vector.shape_cast %71 : vector<54xf32> to vector<54x1xf32>
    %73 = tpu.reciprocal %72 {approx = true} : vector<54x1xf32> -> vector<54x1xf32>
    %74 = vector.broadcast %73 : vector<54x1xf32> to vector<54x54xf32>
    %75 = arith.mulf %70, %74 : vector<54x54xf32>
    %76 = vector.broadcast %61 : vector<1x128xf32> to vector<54x128xf32>
    %77 = arith.mulf %27, %76 : vector<54x128xf32>
    %cst_25 = arith.constant dense<0.000000e+00> : vector<54x128xf32>
    %78 = tpu.matmul %75, %77, %cst_25 {dimension_numbers = #tpu.dot_dimension_numbers<[1], [0], [0], [1], [0, 0, 1, 1], [], []>} : vector<54x54xf32>, vector<54x128xf32>, vector<54x128xf32> -> vector<54x128xf32>
    %79 = arith.addf %54, %78 : vector<54x128xf32>
    %c16_i32_26 = arith.constant 16 : i32
    %80 = vector.broadcast %c16_i32_26 : i32 to vector<1x128xi32>
    %81 = arith.cmpi sge, %0, %80 : vector<1x128xi32>
    %c24_i32 = arith.constant 24 : i32
    %82 = vector.broadcast %c24_i32 : i32 to vector<1x128xi32>
    %83 = arith.cmpi slt, %0, %82 : vector<1x128xi32>
    %84 = arith.andi %81, %83 : vector<1x128xi1>
    %85 = arith.extui %84 : vector<1x128xi1> to vector<1x128xi32>
    %86 = arith.sitofp %85 : vector<1x128xi32> to vector<1x128xf32>
    %87 = vector.broadcast %86 : vector<1x128xf32> to vector<54x128xf32>
    %88 = arith.mulf %25, %87 : vector<54x128xf32>
    %cst_27 = arith.constant dense<0.000000e+00> : vector<54x54xf32>
    %89 = tpu.matmul %88, %26, %cst_27 {dimension_numbers = #tpu.dot_dimension_numbers<[1], [1], [0], [0], [0, 0, 1, 0], [], []>} : vector<54x128xf32>, vector<54x128xf32>, vector<54x54xf32> -> vector<54x54xf32>
    %90 = arith.addf %89, %28 : vector<54x54xf32>
    %cst_28 = arith.constant dense<0xFF800000> : vector<54xf32>
    %91 = vector.multi_reduction <maximumf>, %90, %cst_28 [1] : vector<54x54xf32> to vector<54xf32>
    %92 = vector.shape_cast %91 : vector<54xf32> to vector<54x1xf32>
    %93 = vector.broadcast %92 : vector<54x1xf32> to vector<54x54xf32>
    %94 = arith.subf %90, %93 : vector<54x54xf32>
    %95 = math.exp %94 : vector<54x54xf32>
    %cst_29 = arith.constant dense<0.000000e+00> : vector<54xf32>
    %96 = vector.multi_reduction <add>, %95, %cst_29 [1] : vector<54x54xf32> to vector<54xf32>
    %97 = vector.shape_cast %96 : vector<54xf32> to vector<54x1xf32>
    %98 = tpu.reciprocal %97 {approx = true} : vector<54x1xf32> -> vector<54x1xf32>
    %99 = vector.broadcast %98 : vector<54x1xf32> to vector<54x54xf32>
    %100 = arith.mulf %95, %99 : vector<54x54xf32>
    %101 = vector.broadcast %86 : vector<1x128xf32> to vector<54x128xf32>
    %102 = arith.mulf %27, %101 : vector<54x128xf32>
    %cst_30 = arith.constant dense<0.000000e+00> : vector<54x128xf32>
    %103 = tpu.matmul %100, %102, %cst_30 {dimension_numbers = #tpu.dot_dimension_numbers<[1], [0], [0], [1], [0, 0, 1, 1], [], []>} : vector<54x54xf32>, vector<54x128xf32>, vector<54x128xf32> -> vector<54x128xf32>
    %104 = arith.addf %79, %103 : vector<54x128xf32>
    %c24_i32_31 = arith.constant 24 : i32
    %105 = vector.broadcast %c24_i32_31 : i32 to vector<1x128xi32>
    %106 = arith.cmpi sge, %0, %105 : vector<1x128xi32>
    %c32_i32_32 = arith.constant 32 : i32
    %107 = vector.broadcast %c32_i32_32 : i32 to vector<1x128xi32>
    %108 = arith.cmpi slt, %0, %107 : vector<1x128xi32>
    %109 = arith.andi %106, %108 : vector<1x128xi1>
    %110 = arith.extui %109 : vector<1x128xi1> to vector<1x128xi32>
    %111 = arith.sitofp %110 : vector<1x128xi32> to vector<1x128xf32>
    %112 = vector.broadcast %111 : vector<1x128xf32> to vector<54x128xf32>
    %113 = arith.mulf %25, %112 : vector<54x128xf32>
    %cst_33 = arith.constant dense<0.000000e+00> : vector<54x54xf32>
    %114 = tpu.matmul %113, %26, %cst_33 {dimension_numbers = #tpu.dot_dimension_numbers<[1], [1], [0], [0], [0, 0, 1, 0], [], []>} : vector<54x128xf32>, vector<54x128xf32>, vector<54x54xf32> -> vector<54x54xf32>
    %115 = arith.addf %114, %28 : vector<54x54xf32>
    %cst_34 = arith.constant dense<0xFF800000> : vector<54xf32>
    %116 = vector.multi_reduction <maximumf>, %115, %cst_34 [1] : vector<54x54xf32> to vector<54xf32>
    %117 = vector.shape_cast %116 : vector<54xf32> to vector<54x1xf32>
    %118 = vector.broadcast %117 : vector<54x1xf32> to vector<54x54xf32>
    %119 = arith.subf %115, %118 : vector<54x54xf32>
    %120 = math.exp %119 : vector<54x54xf32>
    %cst_35 = arith.constant dense<0.000000e+00> : vector<54xf32>
    %121 = vector.multi_reduction <add>, %120, %cst_35 [1] : vector<54x54xf32> to vector<54xf32>
    %122 = vector.shape_cast %121 : vector<54xf32> to vector<54x1xf32>
    %123 = tpu.reciprocal %122 {approx = true} : vector<54x1xf32> -> vector<54x1xf32>
    %124 = vector.broadcast %123 : vector<54x1xf32> to vector<54x54xf32>
    %125 = arith.mulf %120, %124 : vector<54x54xf32>
    %126 = vector.broadcast %111 : vector<1x128xf32> to vector<54x128xf32>
    %127 = arith.mulf %27, %126 : vector<54x128xf32>
    %cst_36 = arith.constant dense<0.000000e+00> : vector<54x128xf32>
    %128 = tpu.matmul %125, %127, %cst_36 {dimension_numbers = #tpu.dot_dimension_numbers<[1], [0], [0], [1], [0, 0, 1, 1], [], []>} : vector<54x54xf32>, vector<54x128xf32>, vector<54x128xf32> -> vector<54x128xf32>
    %129 = arith.addf %104, %128 : vector<54x128xf32>
    %c0_37 = arith.constant 0 : index
    %c0_38 = arith.constant 0 : index
    %c0_39 = arith.constant 0 : index
    %130 = vector.load %arg7[%c0_37, %c0_38, %c0_39] : memref<1x128x128xf32, #tpu.memory_space<vmem>>, vector<1x128x128xf32>
    %131 = vector.shape_cast %130 : vector<1x128x128xf32> to vector<128x128xf32>
    %c0_40 = arith.constant 0 : index
    %c0_41 = arith.constant 0 : index
    %c0_42 = arith.constant 0 : index
    %132 = vector.load %arg8[%c0_40, %c0_41, %c0_42] : memref<1x1x128xf32, #tpu.memory_space<vmem>>, vector<1x1x128xf32>
    %133 = vector.shape_cast %132 : vector<1x1x128xf32> to vector<1x128xf32>
    %cst_43 = arith.constant dense<0.000000e+00> : vector<54x128xf32>
    %134 = tpu.matmul %129, %131, %cst_43 {dimension_numbers = #tpu.dot_dimension_numbers<[1], [0], [0], [1], [0, 0, 1, 1], [], []>} : vector<54x128xf32>, vector<128x128xf32>, vector<54x128xf32> -> vector<54x128xf32>
    %135 = vector.broadcast %133 : vector<1x128xf32> to vector<54x128xf32>
    %136 = arith.addf %134, %135 : vector<54x128xf32>
    %137 = arith.addf %8, %136 : vector<54x128xf32>
    %138 = vector.broadcast %4 : vector<1x128xf32> to vector<54x128xf32>
    %139 = arith.mulf %137, %138 : vector<54x128xf32>
    %cst_44 = arith.constant dense<0.000000e+00> : vector<54xf32>
    %140 = vector.multi_reduction <add>, %139, %cst_44 [1] : vector<54x128xf32> to vector<54xf32>
    %141 = vector.shape_cast %140 : vector<54xf32> to vector<54x1xf32>
    %cst_45 = arith.constant 3.125000e-02 : f32
    %142 = vector.broadcast %cst_45 : f32 to vector<54x1xf32>
    %143 = arith.mulf %141, %142 : vector<54x1xf32>
    %144 = vector.broadcast %143 : vector<54x1xf32> to vector<54x128xf32>
    %145 = arith.subf %139, %144 : vector<54x128xf32>
    %146 = vector.broadcast %4 : vector<1x128xf32> to vector<54x128xf32>
    %147 = arith.mulf %145, %146 : vector<54x128xf32>
    %148 = arith.mulf %147, %147 : vector<54x128xf32>
    %cst_46 = arith.constant dense<0.000000e+00> : vector<54xf32>
    %149 = vector.multi_reduction <add>, %148, %cst_46 [1] : vector<54x128xf32> to vector<54xf32>
    %150 = vector.shape_cast %149 : vector<54xf32> to vector<54x1xf32>
    %cst_47 = arith.constant 3.125000e-02 : f32
    %151 = vector.broadcast %cst_47 : f32 to vector<54x1xf32>
    %152 = arith.mulf %150, %151 : vector<54x1xf32>
    %cst_48 = arith.constant 9.99999974E-6 : f32
    %153 = vector.broadcast %cst_48 : f32 to vector<54x1xf32>
    %154 = arith.addf %152, %153 : vector<54x1xf32>
    %155 = math.rsqrt %154 : vector<54x1xf32>
    %156 = vector.broadcast %155 : vector<54x1xf32> to vector<54x128xf32>
    %157 = arith.mulf %147, %156 : vector<54x128xf32>
    %158 = vector.broadcast %12 : vector<1x128xf32> to vector<54x128xf32>
    %159 = arith.mulf %157, %158 : vector<54x128xf32>
    %160 = vector.broadcast %13 : vector<1x128xf32> to vector<54x128xf32>
    %161 = arith.addf %159, %160 : vector<54x128xf32>
    %c0_49 = arith.constant 0 : index
    %c0_50 = arith.constant 0 : index
    %c0_51 = arith.constant 0 : index
    %162 = vector.load %arg9[%c0_49, %c0_50, %c0_51] : memref<1x128x128xf32, #tpu.memory_space<vmem>>, vector<1x128x128xf32>
    %163 = vector.shape_cast %162 : vector<1x128x128xf32> to vector<128x128xf32>
    %c0_52 = arith.constant 0 : index
    %c0_53 = arith.constant 0 : index
    %c0_54 = arith.constant 0 : index
    %164 = vector.load %arg10[%c0_52, %c0_53, %c0_54] : memref<1x1x128xf32, #tpu.memory_space<vmem>>, vector<1x1x128xf32>
    %165 = vector.shape_cast %164 : vector<1x1x128xf32> to vector<1x128xf32>
    %cst_55 = arith.constant dense<0.000000e+00> : vector<54x128xf32>
    %166 = tpu.matmul %161, %163, %cst_55 {dimension_numbers = #tpu.dot_dimension_numbers<[1], [0], [0], [1], [0, 0, 1, 1], [], []>} : vector<54x128xf32>, vector<128x128xf32>, vector<54x128xf32> -> vector<54x128xf32>
    %167 = vector.broadcast %165 : vector<1x128xf32> to vector<54x128xf32>
    %168 = arith.addf %166, %167 : vector<54x128xf32>
    %c0_56 = arith.constant 0 : index
    %c0_57 = arith.constant 0 : index
    %c0_58 = arith.constant 0 : index
    %169 = vector.load %arg11[%c0_56, %c0_57, %c0_58] : memref<1x128x256xf32, #tpu.memory_space<vmem>>, vector<1x128x256xf32>
    %170 = vector.shape_cast %169 : vector<1x128x256xf32> to vector<128x256xf32>
    %c0_59 = arith.constant 0 : index
    %c0_60 = arith.constant 0 : index
    %c0_61 = arith.constant 0 : index
    %171 = vector.load %arg12[%c0_59, %c0_60, %c0_61] : memref<1x1x256xf32, #tpu.memory_space<vmem>>, vector<1x1x256xf32>
    %172 = vector.shape_cast %171 : vector<1x1x256xf32> to vector<1x256xf32>
    %cst_62 = arith.constant dense<0.000000e+00> : vector<20x256xf32>
    %173 = tpu.matmul %9, %170, %cst_62 {dimension_numbers = #tpu.dot_dimension_numbers<[1], [0], [0], [1], [0, 0, 1, 1], [], []>} : vector<20x128xf32>, vector<128x256xf32>, vector<20x256xf32> -> vector<20x256xf32>
    %174 = vector.broadcast %172 : vector<1x256xf32> to vector<20x256xf32>
    %175 = arith.addf %173, %174 : vector<20x256xf32>
    %176 = vector.extract_strided_slice %175 {offsets = [0, 0], sizes = [20, 128], strides = [1, 1]} : vector<20x256xf32> to vector<20x128xf32>
    %177 = vector.extract_strided_slice %175 {offsets = [0, 128], sizes = [20, 128], strides = [1, 1]} : vector<20x256xf32> to vector<20x128xf32>
    %c0_63 = arith.constant 0 : index
    %c0_64 = arith.constant 0 : index
    %178 = vector.load %arg4[%c0_63, %c0_64] : memref<54x20xf32, #tpu.memory_space<vmem>>, vector<54x20xf32>
    %cst_65 = arith.constant 0.000000e+00 : f32
    %179 = vector.broadcast %cst_65 : f32 to vector<54x128xf32>
    %c0_i32_66 = arith.constant 0 : i32
    %180 = vector.broadcast %c0_i32_66 : i32 to vector<1x128xi32>
    %181 = arith.cmpi sge, %0, %180 : vector<1x128xi32>
    %c8_i32_67 = arith.constant 8 : i32
    %182 = vector.broadcast %c8_i32_67 : i32 to vector<1x128xi32>
    %183 = arith.cmpi slt, %0, %182 : vector<1x128xi32>
    %184 = arith.andi %181, %183 : vector<1x128xi1>
    %185 = arith.extui %184 : vector<1x128xi1> to vector<1x128xi32>
    %186 = arith.sitofp %185 : vector<1x128xi32> to vector<1x128xf32>
    %187 = vector.broadcast %186 : vector<1x128xf32> to vector<54x128xf32>
    %188 = arith.mulf %168, %187 : vector<54x128xf32>
    %cst_68 = arith.constant dense<0.000000e+00> : vector<54x20xf32>
    %189 = tpu.matmul %188, %176, %cst_68 {dimension_numbers = #tpu.dot_dimension_numbers<[1], [1], [0], [0], [0, 0, 1, 0], [], []>} : vector<54x128xf32>, vector<20x128xf32>, vector<54x20xf32> -> vector<54x20xf32>
    %190 = arith.addf %189, %178 : vector<54x20xf32>
    %cst_69 = arith.constant dense<0xFF800000> : vector<54xf32>
    %191 = vector.multi_reduction <maximumf>, %190, %cst_69 [1] : vector<54x20xf32> to vector<54xf32>
    %192 = vector.shape_cast %191 : vector<54xf32> to vector<54x1xf32>
    %193 = vector.broadcast %192 : vector<54x1xf32> to vector<54x20xf32>
    %194 = arith.subf %190, %193 : vector<54x20xf32>
    %195 = math.exp %194 : vector<54x20xf32>
    %cst_70 = arith.constant dense<0.000000e+00> : vector<54xf32>
    %196 = vector.multi_reduction <add>, %195, %cst_70 [1] : vector<54x20xf32> to vector<54xf32>
    %197 = vector.shape_cast %196 : vector<54xf32> to vector<54x1xf32>
    %198 = tpu.reciprocal %197 {approx = true} : vector<54x1xf32> -> vector<54x1xf32>
    %199 = vector.broadcast %198 : vector<54x1xf32> to vector<54x20xf32>
    %200 = arith.mulf %195, %199 : vector<54x20xf32>
    %201 = vector.broadcast %186 : vector<1x128xf32> to vector<20x128xf32>
    %202 = arith.mulf %177, %201 : vector<20x128xf32>
    %cst_71 = arith.constant dense<0.000000e+00> : vector<54x128xf32>
    %203 = tpu.matmul %200, %202, %cst_71 {dimension_numbers = #tpu.dot_dimension_numbers<[1], [0], [0], [1], [0, 0, 1, 1], [], []>} : vector<54x20xf32>, vector<20x128xf32>, vector<54x128xf32> -> vector<54x128xf32>
    %204 = arith.addf %179, %203 : vector<54x128xf32>
    %c8_i32_72 = arith.constant 8 : i32
    %205 = vector.broadcast %c8_i32_72 : i32 to vector<1x128xi32>
    %206 = arith.cmpi sge, %0, %205 : vector<1x128xi32>
    %c16_i32_73 = arith.constant 16 : i32
    %207 = vector.broadcast %c16_i32_73 : i32 to vector<1x128xi32>
    %208 = arith.cmpi slt, %0, %207 : vector<1x128xi32>
    %209 = arith.andi %206, %208 : vector<1x128xi1>
    %210 = arith.extui %209 : vector<1x128xi1> to vector<1x128xi32>
    %211 = arith.sitofp %210 : vector<1x128xi32> to vector<1x128xf32>
    %212 = vector.broadcast %211 : vector<1x128xf32> to vector<54x128xf32>
    %213 = arith.mulf %168, %212 : vector<54x128xf32>
    %cst_74 = arith.constant dense<0.000000e+00> : vector<54x20xf32>
    %214 = tpu.matmul %213, %176, %cst_74 {dimension_numbers = #tpu.dot_dimension_numbers<[1], [1], [0], [0], [0, 0, 1, 0], [], []>} : vector<54x128xf32>, vector<20x128xf32>, vector<54x20xf32> -> vector<54x20xf32>
    %215 = arith.addf %214, %178 : vector<54x20xf32>
    %cst_75 = arith.constant dense<0xFF800000> : vector<54xf32>
    %216 = vector.multi_reduction <maximumf>, %215, %cst_75 [1] : vector<54x20xf32> to vector<54xf32>
    %217 = vector.shape_cast %216 : vector<54xf32> to vector<54x1xf32>
    %218 = vector.broadcast %217 : vector<54x1xf32> to vector<54x20xf32>
    %219 = arith.subf %215, %218 : vector<54x20xf32>
    %220 = math.exp %219 : vector<54x20xf32>
    %cst_76 = arith.constant dense<0.000000e+00> : vector<54xf32>
    %221 = vector.multi_reduction <add>, %220, %cst_76 [1] : vector<54x20xf32> to vector<54xf32>
    %222 = vector.shape_cast %221 : vector<54xf32> to vector<54x1xf32>
    %223 = tpu.reciprocal %222 {approx = true} : vector<54x1xf32> -> vector<54x1xf32>
    %224 = vector.broadcast %223 : vector<54x1xf32> to vector<54x20xf32>
    %225 = arith.mulf %220, %224 : vector<54x20xf32>
    %226 = vector.broadcast %211 : vector<1x128xf32> to vector<20x128xf32>
    %227 = arith.mulf %177, %226 : vector<20x128xf32>
    %cst_77 = arith.constant dense<0.000000e+00> : vector<54x128xf32>
    %228 = tpu.matmul %225, %227, %cst_77 {dimension_numbers = #tpu.dot_dimension_numbers<[1], [0], [0], [1], [0, 0, 1, 1], [], []>} : vector<54x20xf32>, vector<20x128xf32>, vector<54x128xf32> -> vector<54x128xf32>
    %229 = arith.addf %204, %228 : vector<54x128xf32>
    %c16_i32_78 = arith.constant 16 : i32
    %230 = vector.broadcast %c16_i32_78 : i32 to vector<1x128xi32>
    %231 = arith.cmpi sge, %0, %230 : vector<1x128xi32>
    %c24_i32_79 = arith.constant 24 : i32
    %232 = vector.broadcast %c24_i32_79 : i32 to vector<1x128xi32>
    %233 = arith.cmpi slt, %0, %232 : vector<1x128xi32>
    %234 = arith.andi %231, %233 : vector<1x128xi1>
    %235 = arith.extui %234 : vector<1x128xi1> to vector<1x128xi32>
    %236 = arith.sitofp %235 : vector<1x128xi32> to vector<1x128xf32>
    %237 = vector.broadcast %236 : vector<1x128xf32> to vector<54x128xf32>
    %238 = arith.mulf %168, %237 : vector<54x128xf32>
    %cst_80 = arith.constant dense<0.000000e+00> : vector<54x20xf32>
    %239 = tpu.matmul %238, %176, %cst_80 {dimension_numbers = #tpu.dot_dimension_numbers<[1], [1], [0], [0], [0, 0, 1, 0], [], []>} : vector<54x128xf32>, vector<20x128xf32>, vector<54x20xf32> -> vector<54x20xf32>
    %240 = arith.addf %239, %178 : vector<54x20xf32>
    %cst_81 = arith.constant dense<0xFF800000> : vector<54xf32>
    %241 = vector.multi_reduction <maximumf>, %240, %cst_81 [1] : vector<54x20xf32> to vector<54xf32>
    %242 = vector.shape_cast %241 : vector<54xf32> to vector<54x1xf32>
    %243 = vector.broadcast %242 : vector<54x1xf32> to vector<54x20xf32>
    %244 = arith.subf %240, %243 : vector<54x20xf32>
    %245 = math.exp %244 : vector<54x20xf32>
    %cst_82 = arith.constant dense<0.000000e+00> : vector<54xf32>
    %246 = vector.multi_reduction <add>, %245, %cst_82 [1] : vector<54x20xf32> to vector<54xf32>
    %247 = vector.shape_cast %246 : vector<54xf32> to vector<54x1xf32>
    %248 = tpu.reciprocal %247 {approx = true} : vector<54x1xf32> -> vector<54x1xf32>
    %249 = vector.broadcast %248 : vector<54x1xf32> to vector<54x20xf32>
    %250 = arith.mulf %245, %249 : vector<54x20xf32>
    %251 = vector.broadcast %236 : vector<1x128xf32> to vector<20x128xf32>
    %252 = arith.mulf %177, %251 : vector<20x128xf32>
    %cst_83 = arith.constant dense<0.000000e+00> : vector<54x128xf32>
    %253 = tpu.matmul %250, %252, %cst_83 {dimension_numbers = #tpu.dot_dimension_numbers<[1], [0], [0], [1], [0, 0, 1, 1], [], []>} : vector<54x20xf32>, vector<20x128xf32>, vector<54x128xf32> -> vector<54x128xf32>
    %254 = arith.addf %229, %253 : vector<54x128xf32>
    %c24_i32_84 = arith.constant 24 : i32
    %255 = vector.broadcast %c24_i32_84 : i32 to vector<1x128xi32>
    %256 = arith.cmpi sge, %0, %255 : vector<1x128xi32>
    %c32_i32_85 = arith.constant 32 : i32
    %257 = vector.broadcast %c32_i32_85 : i32 to vector<1x128xi32>
    %258 = arith.cmpi slt, %0, %257 : vector<1x128xi32>
    %259 = arith.andi %256, %258 : vector<1x128xi1>
    %260 = arith.extui %259 : vector<1x128xi1> to vector<1x128xi32>
    %261 = arith.sitofp %260 : vector<1x128xi32> to vector<1x128xf32>
    %262 = vector.broadcast %261 : vector<1x128xf32> to vector<54x128xf32>
    %263 = arith.mulf %168, %262 : vector<54x128xf32>
    %cst_86 = arith.constant dense<0.000000e+00> : vector<54x20xf32>
    %264 = tpu.matmul %263, %176, %cst_86 {dimension_numbers = #tpu.dot_dimension_numbers<[1], [1], [0], [0], [0, 0, 1, 0], [], []>} : vector<54x128xf32>, vector<20x128xf32>, vector<54x20xf32> -> vector<54x20xf32>
    %265 = arith.addf %264, %178 : vector<54x20xf32>
    %cst_87 = arith.constant dense<0xFF800000> : vector<54xf32>
    %266 = vector.multi_reduction <maximumf>, %265, %cst_87 [1] : vector<54x20xf32> to vector<54xf32>
    %267 = vector.shape_cast %266 : vector<54xf32> to vector<54x1xf32>
    %268 = vector.broadcast %267 : vector<54x1xf32> to vector<54x20xf32>
    %269 = arith.subf %265, %268 : vector<54x20xf32>
    %270 = math.exp %269 : vector<54x20xf32>
    %cst_88 = arith.constant dense<0.000000e+00> : vector<54xf32>
    %271 = vector.multi_reduction <add>, %270, %cst_88 [1] : vector<54x20xf32> to vector<54xf32>
    %272 = vector.shape_cast %271 : vector<54xf32> to vector<54x1xf32>
    %273 = tpu.reciprocal %272 {approx = true} : vector<54x1xf32> -> vector<54x1xf32>
    %274 = vector.broadcast %273 : vector<54x1xf32> to vector<54x20xf32>
    %275 = arith.mulf %270, %274 : vector<54x20xf32>
    %276 = vector.broadcast %261 : vector<1x128xf32> to vector<20x128xf32>
    %277 = arith.mulf %177, %276 : vector<20x128xf32>
    %cst_89 = arith.constant dense<0.000000e+00> : vector<54x128xf32>
    %278 = tpu.matmul %275, %277, %cst_89 {dimension_numbers = #tpu.dot_dimension_numbers<[1], [0], [0], [1], [0, 0, 1, 1], [], []>} : vector<54x20xf32>, vector<20x128xf32>, vector<54x128xf32> -> vector<54x128xf32>
    %279 = arith.addf %254, %278 : vector<54x128xf32>
    %c0_90 = arith.constant 0 : index
    %c0_91 = arith.constant 0 : index
    %c0_92 = arith.constant 0 : index
    %280 = vector.load %arg13[%c0_90, %c0_91, %c0_92] : memref<1x128x128xf32, #tpu.memory_space<vmem>>, vector<1x128x128xf32>
    %281 = vector.shape_cast %280 : vector<1x128x128xf32> to vector<128x128xf32>
    %c0_93 = arith.constant 0 : index
    %c0_94 = arith.constant 0 : index
    %c0_95 = arith.constant 0 : index
    %282 = vector.load %arg14[%c0_93, %c0_94, %c0_95] : memref<1x1x128xf32, #tpu.memory_space<vmem>>, vector<1x1x128xf32>
    %283 = vector.shape_cast %282 : vector<1x1x128xf32> to vector<1x128xf32>
    %cst_96 = arith.constant dense<0.000000e+00> : vector<54x128xf32>
    %284 = tpu.matmul %279, %281, %cst_96 {dimension_numbers = #tpu.dot_dimension_numbers<[1], [0], [0], [1], [0, 0, 1, 1], [], []>} : vector<54x128xf32>, vector<128x128xf32>, vector<54x128xf32> -> vector<54x128xf32>
    %285 = vector.broadcast %283 : vector<1x128xf32> to vector<54x128xf32>
    %286 = arith.addf %284, %285 : vector<54x128xf32>
    %287 = arith.negf %286 : vector<54x128xf32>
    %288 = math.exp %287 : vector<54x128xf32>
    %cst_97 = arith.constant 1.000000e+00 : f32
    %289 = vector.broadcast %cst_97 : f32 to vector<54x128xf32>
    %290 = arith.addf %289, %288 : vector<54x128xf32>
    %291 = arith.divf %289, %290 : vector<54x128xf32>
    %292 = arith.mulf %291, %286 : vector<54x128xf32>
    %293 = arith.addf %292, %286 : vector<54x128xf32>
    %294 = vector.broadcast %4 : vector<1x128xf32> to vector<54x128xf32>
    %295 = arith.mulf %293, %294 : vector<54x128xf32>
    %cst_98 = arith.constant dense<0.000000e+00> : vector<54xf32>
    %296 = vector.multi_reduction <add>, %295, %cst_98 [1] : vector<54x128xf32> to vector<54xf32>
    %297 = vector.shape_cast %296 : vector<54xf32> to vector<54x1xf32>
    %cst_99 = arith.constant 3.125000e-02 : f32
    %298 = vector.broadcast %cst_99 : f32 to vector<54x1xf32>
    %299 = arith.mulf %297, %298 : vector<54x1xf32>
    %300 = vector.broadcast %299 : vector<54x1xf32> to vector<54x128xf32>
    %301 = arith.subf %295, %300 : vector<54x128xf32>
    %302 = vector.broadcast %4 : vector<1x128xf32> to vector<54x128xf32>
    %303 = arith.mulf %301, %302 : vector<54x128xf32>
    %304 = arith.mulf %303, %303 : vector<54x128xf32>
    %cst_100 = arith.constant dense<0.000000e+00> : vector<54xf32>
    %305 = vector.multi_reduction <add>, %304, %cst_100 [1] : vector<54x128xf32> to vector<54xf32>
    %306 = vector.shape_cast %305 : vector<54xf32> to vector<54x1xf32>
    %cst_101 = arith.constant 3.125000e-02 : f32
    %307 = vector.broadcast %cst_101 : f32 to vector<54x1xf32>
    %308 = arith.mulf %306, %307 : vector<54x1xf32>
    %cst_102 = arith.constant 9.99999974E-6 : f32
    %309 = vector.broadcast %cst_102 : f32 to vector<54x1xf32>
    %310 = arith.addf %308, %309 : vector<54x1xf32>
    %311 = math.rsqrt %310 : vector<54x1xf32>
    %312 = vector.broadcast %311 : vector<54x1xf32> to vector<54x128xf32>
    %313 = arith.mulf %303, %312 : vector<54x128xf32>
    %314 = vector.broadcast %12 : vector<1x128xf32> to vector<54x128xf32>
    %315 = arith.mulf %313, %314 : vector<54x128xf32>
    %316 = vector.broadcast %13 : vector<1x128xf32> to vector<54x128xf32>
    %317 = arith.addf %315, %316 : vector<54x128xf32>
    %318 = arith.negf %161 : vector<54x128xf32>
    %319 = math.exp %318 : vector<54x128xf32>
    %cst_103 = arith.constant 1.000000e+00 : f32
    %320 = vector.broadcast %cst_103 : f32 to vector<54x128xf32>
    %321 = arith.addf %320, %319 : vector<54x128xf32>
    %322 = arith.divf %320, %321 : vector<54x128xf32>
    %323 = arith.mulf %322, %161 : vector<54x128xf32>
    %324 = arith.addf %323, %161 : vector<54x128xf32>
    %325 = vector.broadcast %4 : vector<1x128xf32> to vector<54x128xf32>
    %326 = arith.mulf %324, %325 : vector<54x128xf32>
    %cst_104 = arith.constant dense<0.000000e+00> : vector<54xf32>
    %327 = vector.multi_reduction <add>, %326, %cst_104 [1] : vector<54x128xf32> to vector<54xf32>
    %328 = vector.shape_cast %327 : vector<54xf32> to vector<54x1xf32>
    %cst_105 = arith.constant 3.125000e-02 : f32
    %329 = vector.broadcast %cst_105 : f32 to vector<54x1xf32>
    %330 = arith.mulf %328, %329 : vector<54x1xf32>
    %331 = vector.broadcast %330 : vector<54x1xf32> to vector<54x128xf32>
    %332 = arith.subf %326, %331 : vector<54x128xf32>
    %333 = vector.broadcast %4 : vector<1x128xf32> to vector<54x128xf32>
    %334 = arith.mulf %332, %333 : vector<54x128xf32>
    %335 = arith.mulf %334, %334 : vector<54x128xf32>
    %cst_106 = arith.constant dense<0.000000e+00> : vector<54xf32>
    %336 = vector.multi_reduction <add>, %335, %cst_106 [1] : vector<54x128xf32> to vector<54xf32>
    %337 = vector.shape_cast %336 : vector<54xf32> to vector<54x1xf32>
    %cst_107 = arith.constant 3.125000e-02 : f32
    %338 = vector.broadcast %cst_107 : f32 to vector<54x1xf32>
    %339 = arith.mulf %337, %338 : vector<54x1xf32>
    %cst_108 = arith.constant 9.99999974E-6 : f32
    %340 = vector.broadcast %cst_108 : f32 to vector<54x1xf32>
    %341 = arith.addf %339, %340 : vector<54x1xf32>
    %342 = math.rsqrt %341 : vector<54x1xf32>
    %343 = vector.broadcast %342 : vector<54x1xf32> to vector<54x128xf32>
    %344 = arith.mulf %334, %343 : vector<54x128xf32>
    %345 = vector.broadcast %14 : vector<1x128xf32> to vector<54x128xf32>
    %346 = arith.mulf %344, %345 : vector<54x128xf32>
    %347 = vector.broadcast %15 : vector<1x128xf32> to vector<54x128xf32>
    %348 = arith.addf %346, %347 : vector<54x128xf32>
    %349 = arith.addf %161, %317 : vector<54x128xf32>
    %350 = arith.addf %349, %348 : vector<54x128xf32>
    %351 = vector.broadcast %4 : vector<1x128xf32> to vector<54x128xf32>
    %352 = arith.mulf %350, %351 : vector<54x128xf32>
    %cst_109 = arith.constant dense<0.000000e+00> : vector<54xf32>
    %353 = vector.multi_reduction <add>, %352, %cst_109 [1] : vector<54x128xf32> to vector<54xf32>
    %354 = vector.shape_cast %353 : vector<54xf32> to vector<54x1xf32>
    %cst_110 = arith.constant 3.125000e-02 : f32
    %355 = vector.broadcast %cst_110 : f32 to vector<54x1xf32>
    %356 = arith.mulf %354, %355 : vector<54x1xf32>
    %357 = vector.broadcast %356 : vector<54x1xf32> to vector<54x128xf32>
    %358 = arith.subf %352, %357 : vector<54x128xf32>
    %359 = vector.broadcast %4 : vector<1x128xf32> to vector<54x128xf32>
    %360 = arith.mulf %358, %359 : vector<54x128xf32>
    %361 = arith.mulf %360, %360 : vector<54x128xf32>
    %cst_111 = arith.constant dense<0.000000e+00> : vector<54xf32>
    %362 = vector.multi_reduction <add>, %361, %cst_111 [1] : vector<54x128xf32> to vector<54xf32>
    %363 = vector.shape_cast %362 : vector<54xf32> to vector<54x1xf32>
    %cst_112 = arith.constant 3.125000e-02 : f32
    %364 = vector.broadcast %cst_112 : f32 to vector<54x1xf32>
    %365 = arith.mulf %363, %364 : vector<54x1xf32>
    %cst_113 = arith.constant 9.99999974E-6 : f32
    %366 = vector.broadcast %cst_113 : f32 to vector<54x1xf32>
    %367 = arith.addf %365, %366 : vector<54x1xf32>
    %368 = math.rsqrt %367 : vector<54x1xf32>
    %369 = vector.broadcast %368 : vector<54x1xf32> to vector<54x128xf32>
    %370 = arith.mulf %360, %369 : vector<54x128xf32>
    %371 = vector.broadcast %14 : vector<1x128xf32> to vector<54x128xf32>
    %372 = arith.mulf %370, %371 : vector<54x128xf32>
    %373 = vector.broadcast %15 : vector<1x128xf32> to vector<54x128xf32>
    %374 = arith.addf %372, %373 : vector<54x128xf32>
    %c0_114 = arith.constant 0 : index
    %c0_115 = arith.constant 0 : index
    %c0_116 = arith.constant 0 : index
    %375 = vector.load %arg15[%c0_114, %c0_115, %c0_116] : memref<1x128x128xf32, #tpu.memory_space<vmem>>, vector<1x128x128xf32>
    %376 = vector.shape_cast %375 : vector<1x128x128xf32> to vector<128x128xf32>
    %c0_117 = arith.constant 0 : index
    %c0_118 = arith.constant 0 : index
    %c0_119 = arith.constant 0 : index
    %377 = vector.load %arg16[%c0_117, %c0_118, %c0_119] : memref<1x1x128xf32, #tpu.memory_space<vmem>>, vector<1x1x128xf32>
    %378 = vector.shape_cast %377 : vector<1x1x128xf32> to vector<1x128xf32>
    %cst_120 = arith.constant dense<0.000000e+00> : vector<54x128xf32>
    %379 = tpu.matmul %374, %376, %cst_120 {dimension_numbers = #tpu.dot_dimension_numbers<[1], [0], [0], [1], [0, 0, 1, 1], [], []>} : vector<54x128xf32>, vector<128x128xf32>, vector<54x128xf32> -> vector<54x128xf32>
    %380 = vector.broadcast %378 : vector<1x128xf32> to vector<54x128xf32>
    %381 = arith.addf %379, %380 : vector<54x128xf32>
    %cst_121 = arith.constant 0.000000e+00 : f32
    %382 = vector.broadcast %cst_121 : f32 to vector<54x128xf32>
    %383 = arith.maximumf %381, %382 : vector<54x128xf32>
    %c0_122 = arith.constant 0 : index
    %c0_123 = arith.constant 0 : index
    %c0_124 = arith.constant 0 : index
    %384 = vector.load %arg17[%c0_122, %c0_123, %c0_124] : memref<1x128x128xf32, #tpu.memory_space<vmem>>, vector<1x128x128xf32>
    %385 = vector.shape_cast %384 : vector<1x128x128xf32> to vector<128x128xf32>
    %c0_125 = arith.constant 0 : index
    %c0_126 = arith.constant 0 : index
    %c0_127 = arith.constant 0 : index
    %386 = vector.load %arg18[%c0_125, %c0_126, %c0_127] : memref<1x1x128xf32, #tpu.memory_space<vmem>>, vector<1x1x128xf32>
    %387 = vector.shape_cast %386 : vector<1x1x128xf32> to vector<1x128xf32>
    %cst_128 = arith.constant dense<0.000000e+00> : vector<54x128xf32>
    %388 = tpu.matmul %383, %385, %cst_128 {dimension_numbers = #tpu.dot_dimension_numbers<[1], [0], [0], [1], [0, 0, 1, 1], [], []>} : vector<54x128xf32>, vector<128x128xf32>, vector<54x128xf32> -> vector<54x128xf32>
    %389 = vector.broadcast %387 : vector<1x128xf32> to vector<54x128xf32>
    %390 = arith.addf %388, %389 : vector<54x128xf32>
    %391 = arith.addf %374, %390 : vector<54x128xf32>
    %392 = vector.broadcast %4 : vector<1x128xf32> to vector<54x128xf32>
    %393 = arith.mulf %391, %392 : vector<54x128xf32>
    %cst_129 = arith.constant dense<0.000000e+00> : vector<54xf32>
    %394 = vector.multi_reduction <add>, %393, %cst_129 [1] : vector<54x128xf32> to vector<54xf32>
    %395 = vector.shape_cast %394 : vector<54xf32> to vector<54x1xf32>
    %cst_130 = arith.constant 3.125000e-02 : f32
    %396 = vector.broadcast %cst_130 : f32 to vector<54x1xf32>
    %397 = arith.mulf %395, %396 : vector<54x1xf32>
    %398 = vector.broadcast %397 : vector<54x1xf32> to vector<54x128xf32>
    %399 = arith.subf %393, %398 : vector<54x128xf32>
    %400 = vector.broadcast %4 : vector<1x128xf32> to vector<54x128xf32>
    %401 = arith.mulf %399, %400 : vector<54x128xf32>
    %402 = arith.mulf %401, %401 : vector<54x128xf32>
    %cst_131 = arith.constant dense<0.000000e+00> : vector<54xf32>
    %403 = vector.multi_reduction <add>, %402, %cst_131 [1] : vector<54x128xf32> to vector<54xf32>
    %404 = vector.shape_cast %403 : vector<54xf32> to vector<54x1xf32>
    %cst_132 = arith.constant 3.125000e-02 : f32
    %405 = vector.broadcast %cst_132 : f32 to vector<54x1xf32>
    %406 = arith.mulf %404, %405 : vector<54x1xf32>
    %cst_133 = arith.constant 9.99999974E-6 : f32
    %407 = vector.broadcast %cst_133 : f32 to vector<54x1xf32>
    %408 = arith.addf %406, %407 : vector<54x1xf32>
    %409 = math.rsqrt %408 : vector<54x1xf32>
    %410 = vector.broadcast %409 : vector<54x1xf32> to vector<54x128xf32>
    %411 = arith.mulf %401, %410 : vector<54x128xf32>
    %412 = vector.broadcast %16 : vector<1x128xf32> to vector<54x128xf32>
    %413 = arith.mulf %411, %412 : vector<54x128xf32>
    %414 = vector.broadcast %17 : vector<1x128xf32> to vector<54x128xf32>
    %415 = arith.addf %413, %414 : vector<54x128xf32>
    %c0_134 = arith.constant 0 : index
    %c0_135 = arith.constant 0 : index
    %416 = vector.load %arg23[%c0_134, %c0_135] : memref<54x128xf32, #tpu.memory_space<vmem>>, vector<54x128xf32>
    tpu.vector_store %arg23[%c0_134, %c0_135], %415 {strides = array<i32>} : memref<54x128xf32, #tpu.memory_space<vmem>>, vector<54x128xf32>,
    %c1_i32 = arith.constant 1 : i32
    %417 = arith.cmpi eq, %arg0, %c1_i32 : i32
    %418 = arith.extui %417 : i1 to i32
    %c0_i32_136 = arith.constant 0 : i32
    %419 = arith.cmpi ne, %418, %c0_i32_136 : i32
    scf.if %419 {
      %c0_137 = arith.constant 0 : index
      %c0_138 = arith.constant 0 : index
      %420 = vector.load %arg20[%c0_137, %c0_138] : memref<128x128xf32, #tpu.memory_space<vmem>>, vector<128x128xf32>
      %cst_139 = arith.constant dense<0.000000e+00> : vector<54x128xf32>
      %421 = tpu.matmul %415, %420, %cst_139 {dimension_numbers = #tpu.dot_dimension_numbers<[1], [0], [0], [1], [0, 0, 1, 1], [], []>} : vector<54x128xf32>, vector<128x128xf32>, vector<54x128xf32> -> vector<54x128xf32>
      %c0_140 = arith.constant 0 : index
      %c0_141 = arith.constant 0 : index
      %422 = vector.load %arg21[%c0_140, %c0_141] : memref<1x128xf32, #tpu.memory_space<vmem>>, vector<1x128xf32>
      %423 = vector.broadcast %422 : vector<1x128xf32> to vector<54x128xf32>
      %424 = arith.addf %421, %423 : vector<54x128xf32>
      %c0_142 = arith.constant 0 : index
      %c0_143 = arith.constant 0 : index
      %425 = vector.load %arg22[%c0_142, %c0_143] : memref<54x128xf32, #tpu.memory_space<vmem>>, vector<54x128xf32>
      tpu.vector_store %arg22[%c0_142, %c0_143], %424 {strides = array<i32>} : memref<54x128xf32, #tpu.memory_space<vmem>>, vector<54x128xf32>,
    } else {
    }
    return
  }
  func.func @transform_0(%arg0: i32) -> (i32, i32) {
    %c0_i32 = arith.constant 0 : i32
    %c0_i32_0 = arith.constant 0 : i32
    %c0_i32_1 = arith.constant 0 : i32
    return %c0_i32, %c0_i32_0 : i32, i32
  }
  func.func @transform_1(%arg0: i32) -> (i32, i32) {
    %c0_i32 = arith.constant 0 : i32
    %c0_i32_0 = arith.constant 0 : i32
    %c0_i32_1 = arith.constant 0 : i32
    return %c0_i32, %c0_i32_0 : i32, i32
  }
  func.func @transform_2(%arg0: i32) -> (i32, i32) {
    %c0_i32 = arith.constant 0 : i32
    %c0_i32_0 = arith.constant 0 : i32
    %c0_i32_1 = arith.constant 0 : i32
    return %c0_i32, %c0_i32_0 : i32, i32
  }
  func.func @transform_3(%arg0: i32) -> (i32, i32) {
    %c0_i32 = arith.constant 0 : i32
    %c0_i32_0 = arith.constant 0 : i32
    %c0_i32_1 = arith.constant 0 : i32
    return %c0_i32, %c0_i32_0 : i32, i32
  }
  func.func @transform_4(%arg0: i32) -> (i32, i32, i32) {
    %c0_i32 = arith.constant 0 : i32
    %c0_i32_0 = arith.constant 0 : i32
    %c0_i32_1 = arith.constant 0 : i32
    return %arg0, %c0_i32, %c0_i32_0 : i32, i32, i32
  }
  func.func @transform_5(%arg0: i32) -> (i32, i32, i32) {
    %c0_i32 = arith.constant 0 : i32
    %c0_i32_0 = arith.constant 0 : i32
    %c0_i32_1 = arith.constant 0 : i32
    return %arg0, %c0_i32, %c0_i32_0 : i32, i32, i32
  }
  func.func @transform_6(%arg0: i32) -> (i32, i32, i32) {
    %c0_i32 = arith.constant 0 : i32
    %c0_i32_0 = arith.constant 0 : i32
    %c0_i32_1 = arith.constant 0 : i32
    return %arg0, %c0_i32, %c0_i32_0 : i32, i32, i32
  }
  func.func @transform_7(%arg0: i32) -> (i32, i32, i32) {
    %c0_i32 = arith.constant 0 : i32
    %c0_i32_0 = arith.constant 0 : i32
    %c0_i32_1 = arith.constant 0 : i32
    return %arg0, %c0_i32, %c0_i32_0 : i32, i32, i32
  }
  func.func @transform_8(%arg0: i32) -> (i32, i32, i32) {
    %c0_i32 = arith.constant 0 : i32
    %c0_i32_0 = arith.constant 0 : i32
    %c0_i32_1 = arith.constant 0 : i32
    return %arg0, %c0_i32, %c0_i32_0 : i32, i32, i32
  }
  func.func @transform_9(%arg0: i32) -> (i32, i32, i32) {
    %c0_i32 = arith.constant 0 : i32
    %c0_i32_0 = arith.constant 0 : i32
    %c0_i32_1 = arith.constant 0 : i32
    return %arg0, %c0_i32, %c0_i32_0 : i32, i32, i32
  }
  func.func @transform_10(%arg0: i32) -> (i32, i32, i32) {
    %c0_i32 = arith.constant 0 : i32
    %c0_i32_0 = arith.constant 0 : i32
    %c0_i32_1 = arith.constant 0 : i32
    return %arg0, %c0_i32, %c0_i32_0 : i32, i32, i32
  }
  func.func @transform_11(%arg0: i32) -> (i32, i32, i32) {
    %c0_i32 = arith.constant 0 : i32
    %c0_i32_0 = arith.constant 0 : i32
    %c0_i32_1 = arith.constant 0 : i32
    return %arg0, %c0_i32, %c0_i32_0 : i32, i32, i32
  }
  func.func @transform_12(%arg0: i32) -> (i32, i32, i32) {
    %c0_i32 = arith.constant 0 : i32
    %c0_i32_0 = arith.constant 0 : i32
    %c0_i32_1 = arith.constant 0 : i32
    return %arg0, %c0_i32, %c0_i32_0 : i32, i32, i32
  }
  func.func @transform_13(%arg0: i32) -> (i32, i32, i32) {
    %c0_i32 = arith.constant 0 : i32
    %c0_i32_0 = arith.constant 0 : i32
    %c0_i32_1 = arith.constant 0 : i32
    return %arg0, %c0_i32, %c0_i32_0 : i32, i32, i32
  }
  func.func @transform_14(%arg0: i32) -> (i32, i32, i32) {
    %c0_i32 = arith.constant 0 : i32
    %c0_i32_0 = arith.constant 0 : i32
    %c0_i32_1 = arith.constant 0 : i32
    return %arg0, %c0_i32, %c0_i32_0 : i32, i32, i32
  }
  func.func @transform_15(%arg0: i32) -> (i32, i32, i32) {
    %c0_i32 = arith.constant 0 : i32
    %c0_i32_0 = arith.constant 0 : i32
    %c0_i32_1 = arith.constant 0 : i32
    return %arg0, %c0_i32, %c0_i32_0 : i32, i32, i32
  }
  func.func @transform_16(%arg0: i32) -> (i32, i32, i32) {
    %c0_i32 = arith.constant 0 : i32
    %c0_i32_0 = arith.constant 0 : i32
    %c0_i32_1 = arith.constant 0 : i32
    return %arg0, %c0_i32, %c0_i32_0 : i32, i32, i32
  }
  func.func @transform_17(%arg0: i32) -> (i32, i32, i32) {
    %c0_i32 = arith.constant 0 : i32
    %c0_i32_0 = arith.constant 0 : i32
    %c0_i32_1 = arith.constant 0 : i32
    return %arg0, %c0_i32, %c0_i32_0 : i32, i32, i32
  }
  func.func @transform_18(%arg0: i32) -> (i32, i32, i32) {
    %c0_i32 = arith.constant 0 : i32
    %c0_i32_0 = arith.constant 0 : i32
    %c0_i32_1 = arith.constant 0 : i32
    return %arg0, %c0_i32, %c0_i32_0 : i32, i32, i32
  }
  func.func @transform_19(%arg0: i32) -> (i32, i32) {
    %c0_i32 = arith.constant 0 : i32
    %c0_i32_0 = arith.constant 0 : i32
    %c0_i32_1 = arith.constant 0 : i32
    return %c0_i32, %c0_i32_0 : i32, i32
  }
  func.func @transform_20(%arg0: i32) -> (i32, i32) {
    %c0_i32 = arith.constant 0 : i32
    %c0_i32_0 = arith.constant 0 : i32
    %c0_i32_1 = arith.constant 0 : i32
    return %c0_i32, %c0_i32_0 : i32, i32
  }
  func.func @transform_21(%arg0: i32) -> (i32, i32) {
    %c0_i32 = arith.constant 0 : i32
    %c0_i32_0 = arith.constant 0 : i32
    %c0_i32_1 = arith.constant 0 : i32
    return %c0_i32, %c0_i32_0 : i32, i32
  }
}

module attributes {stable_mosaic.version = 11 : i64} {
  func.func @_stack1_kernel(%arg0: i32, %arg1: memref<28x128xf32, #tpu.memory_space<vmem>>, %arg2: memref<20x128xf32, #tpu.memory_space<vmem>>, %arg3: memref<28x20xf32, #tpu.memory_space<vmem>>, %arg4: memref<1x128x128xf32, #tpu.memory_space<vmem>>, %arg5: memref<1x1x128xf32, #tpu.memory_space<vmem>>, %arg6: memref<1x128x256xf32, #tpu.memory_space<vmem>>, %arg7: memref<1x1x256xf32, #tpu.memory_space<vmem>>, %arg8: memref<1x128x128xf32, #tpu.memory_space<vmem>>, %arg9: memref<1x1x128xf32, #tpu.memory_space<vmem>>, %arg10: memref<1x128x128xf32, #tpu.memory_space<vmem>>, %arg11: memref<1x1x128xf32, #tpu.memory_space<vmem>>, %arg12: memref<1x128x128xf32, #tpu.memory_space<vmem>>, %arg13: memref<1x1x128xf32, #tpu.memory_space<vmem>>, %arg14: memref<1x4x128xf32, #tpu.memory_space<vmem>>, %arg15: memref<128x128xf32, #tpu.memory_space<vmem>>, %arg16: memref<1x128xf32, #tpu.memory_space<vmem>>, %arg17: memref<28x128xf32, #tpu.memory_space<vmem>>, %arg18: memref<28x128xf32, #tpu.memory_space<vmem>>) attributes {dimension_semantics = [#tpu.dimension_semantics<arbitrary>], iteration_bounds = array<i64: 2>, scalar_prefetch = 0 : i64, scratch_operands = 1 : i64, tpu.core_type = #tpu.core_type<tc>, window_params = [{pipeline_mode = #tpu.pipeline_mode<synchronous>, transform_indices = @transform_0, window_bounds = array<i64: 28, 128>}, {pipeline_mode = #tpu.pipeline_mode<synchronous>, transform_indices = @transform_1, window_bounds = array<i64: 20, 128>}, {pipeline_mode = #tpu.pipeline_mode<synchronous>, transform_indices = @transform_2, window_bounds = array<i64: 28, 20>}, {transform_indices = @transform_3, window_bounds = array<i64: 1, 128, 128>}, {transform_indices = @transform_4, window_bounds = array<i64: 1, 1, 128>}, {transform_indices = @transform_5, window_bounds = array<i64: 1, 128, 256>}, {transform_indices = @transform_6, window_bounds = array<i64: 1, 1, 256>}, {transform_indices = @transform_7, window_bounds = array<i64: 1, 128, 128>}, {transform_indices = @transform_8, window_bounds = array<i64: 1, 1, 128>}, {transform_indices = @transform_9, window_bounds = array<i64: 1, 128, 128>}, {transform_indices = @transform_10, window_bounds = array<i64: 1, 1, 128>}, {transform_indices = @transform_11, window_bounds = array<i64: 1, 128, 128>}, {transform_indices = @transform_12, window_bounds = array<i64: 1, 1, 128>}, {transform_indices = @transform_13, window_bounds = array<i64: 1, 4, 128>}, {pipeline_mode = #tpu.pipeline_mode<synchronous>, transform_indices = @transform_14, window_bounds = array<i64: 128, 128>}, {pipeline_mode = #tpu.pipeline_mode<synchronous>, transform_indices = @transform_15, window_bounds = array<i64: 1, 128>}, {pipeline_mode = #tpu.pipeline_mode<synchronous>, transform_indices = @transform_16, window_bounds = array<i64: 28, 128>}]} {
    %0 = tpu.iota {dimensions = array<i32: 1>} : vector<1x128xi32>
    %c32_i32 = arith.constant 32 : i32
    %1 = vector.broadcast %c32_i32 : i32 to vector<1x128xi32>
    %2 = arith.cmpi slt, %0, %1 : vector<1x128xi32>
    %3 = arith.extui %2 : vector<1x128xi1> to vector<1x128xi32>
    %4 = arith.sitofp %3 : vector<1x128xi32> to vector<1x128xf32>
    %c0_i32 = arith.constant 0 : i32
    %5 = arith.cmpi eq, %arg0, %c0_i32 : i32
    %6 = arith.extui %5 : i1 to i32
    %c0_i32_0 = arith.constant 0 : i32
    %7 = arith.cmpi ne, %6, %c0_i32_0 : i32
    scf.if %7 {
      %c0_79 = arith.constant 0 : index
      %c0_80 = arith.constant 0 : index
      %211 = vector.load %arg1[%c0_79, %c0_80] : memref<28x128xf32, #tpu.memory_space<vmem>>, vector<28x128xf32>
      %c0_81 = arith.constant 0 : index
      %c0_82 = arith.constant 0 : index
      %212 = vector.load %arg18[%c0_81, %c0_82] : memref<28x128xf32, #tpu.memory_space<vmem>>, vector<28x128xf32>
      tpu.vector_store %arg18[%c0_81, %c0_82], %211 {strides = array<i32>} : memref<28x128xf32, #tpu.memory_space<vmem>>, vector<28x128xf32>,
    } else {
    }
    %c0 = arith.constant 0 : index
    %c0_1 = arith.constant 0 : index
    %8 = vector.load %arg18[%c0, %c0_1] : memref<28x128xf32, #tpu.memory_space<vmem>>, vector<28x128xf32>
    %c0_2 = arith.constant 0 : index
    %c0_3 = arith.constant 0 : index
    %9 = vector.load %arg2[%c0_2, %c0_3] : memref<20x128xf32, #tpu.memory_space<vmem>>, vector<20x128xf32>
    %c0_4 = arith.constant 0 : index
    %c0_5 = arith.constant 0 : index
    %c0_6 = arith.constant 0 : index
    %10 = vector.load %arg14[%c0_4, %c0_5, %c0_6] : memref<1x4x128xf32, #tpu.memory_space<vmem>>, vector<1x4x128xf32>
    %11 = vector.shape_cast %10 : vector<1x4x128xf32> to vector<4x128xf32>
    %12 = vector.extract_strided_slice %11 {offsets = [0, 0], sizes = [1, 128], strides = [1, 1]} : vector<4x128xf32> to vector<1x128xf32>
    %13 = vector.extract_strided_slice %11 {offsets = [1, 0], sizes = [1, 128], strides = [1, 1]} : vector<4x128xf32> to vector<1x128xf32>
    %14 = vector.extract_strided_slice %11 {offsets = [2, 0], sizes = [1, 128], strides = [1, 1]} : vector<4x128xf32> to vector<1x128xf32>
    %15 = vector.extract_strided_slice %11 {offsets = [3, 0], sizes = [1, 128], strides = [1, 1]} : vector<4x128xf32> to vector<1x128xf32>
    %c0_7 = arith.constant 0 : index
    %c0_8 = arith.constant 0 : index
    %c0_9 = arith.constant 0 : index
    %16 = vector.load %arg4[%c0_7, %c0_8, %c0_9] : memref<1x128x128xf32, #tpu.memory_space<vmem>>, vector<1x128x128xf32>
    %17 = vector.shape_cast %16 : vector<1x128x128xf32> to vector<128x128xf32>
    %c0_10 = arith.constant 0 : index
    %c0_11 = arith.constant 0 : index
    %c0_12 = arith.constant 0 : index
    %18 = vector.load %arg5[%c0_10, %c0_11, %c0_12] : memref<1x1x128xf32, #tpu.memory_space<vmem>>, vector<1x1x128xf32>
    %19 = vector.shape_cast %18 : vector<1x1x128xf32> to vector<1x128xf32>
    %cst = arith.constant dense<0.000000e+00> : vector<28x128xf32>
    %20 = tpu.matmul %8, %17, %cst {dimension_numbers = #tpu.dot_dimension_numbers<[1], [0], [0], [1], [0, 0, 1, 1], [], []>} : vector<28x128xf32>, vector<128x128xf32>, vector<28x128xf32> -> vector<28x128xf32>
    %21 = vector.broadcast %19 : vector<1x128xf32> to vector<28x128xf32>
    %22 = arith.addf %20, %21 : vector<28x128xf32>
    %c0_13 = arith.constant 0 : index
    %c0_14 = arith.constant 0 : index
    %c0_15 = arith.constant 0 : index
    %23 = vector.load %arg6[%c0_13, %c0_14, %c0_15] : memref<1x128x256xf32, #tpu.memory_space<vmem>>, vector<1x128x256xf32>
    %24 = vector.shape_cast %23 : vector<1x128x256xf32> to vector<128x256xf32>
    %c0_16 = arith.constant 0 : index
    %c0_17 = arith.constant 0 : index
    %c0_18 = arith.constant 0 : index
    %25 = vector.load %arg7[%c0_16, %c0_17, %c0_18] : memref<1x1x256xf32, #tpu.memory_space<vmem>>, vector<1x1x256xf32>
    %26 = vector.shape_cast %25 : vector<1x1x256xf32> to vector<1x256xf32>
    %cst_19 = arith.constant dense<0.000000e+00> : vector<20x256xf32>
    %27 = tpu.matmul %9, %24, %cst_19 {dimension_numbers = #tpu.dot_dimension_numbers<[1], [0], [0], [1], [0, 0, 1, 1], [], []>} : vector<20x128xf32>, vector<128x256xf32>, vector<20x256xf32> -> vector<20x256xf32>
    %28 = vector.broadcast %26 : vector<1x256xf32> to vector<20x256xf32>
    %29 = arith.addf %27, %28 : vector<20x256xf32>
    %30 = vector.extract_strided_slice %29 {offsets = [0, 0], sizes = [20, 128], strides = [1, 1]} : vector<20x256xf32> to vector<20x128xf32>
    %31 = vector.extract_strided_slice %29 {offsets = [0, 128], sizes = [20, 128], strides = [1, 1]} : vector<20x256xf32> to vector<20x128xf32>
    %c0_20 = arith.constant 0 : index
    %c0_21 = arith.constant 0 : index
    %32 = vector.load %arg3[%c0_20, %c0_21] : memref<28x20xf32, #tpu.memory_space<vmem>>, vector<28x20xf32>
    %cst_22 = arith.constant 0.000000e+00 : f32
    %33 = vector.broadcast %cst_22 : f32 to vector<28x128xf32>
    %c0_i32_23 = arith.constant 0 : i32
    %34 = vector.broadcast %c0_i32_23 : i32 to vector<1x128xi32>
    %35 = arith.cmpi sge, %0, %34 : vector<1x128xi32>
    %c8_i32 = arith.constant 8 : i32
    %36 = vector.broadcast %c8_i32 : i32 to vector<1x128xi32>
    %37 = arith.cmpi slt, %0, %36 : vector<1x128xi32>
    %38 = arith.andi %35, %37 : vector<1x128xi1>
    %39 = arith.extui %38 : vector<1x128xi1> to vector<1x128xi32>
    %40 = arith.sitofp %39 : vector<1x128xi32> to vector<1x128xf32>
    %41 = vector.broadcast %40 : vector<1x128xf32> to vector<28x128xf32>
    %42 = arith.mulf %22, %41 : vector<28x128xf32>
    %cst_24 = arith.constant dense<0.000000e+00> : vector<28x20xf32>
    %43 = tpu.matmul %42, %30, %cst_24 {dimension_numbers = #tpu.dot_dimension_numbers<[1], [1], [0], [0], [0, 0, 1, 0], [], []>} : vector<28x128xf32>, vector<20x128xf32>, vector<28x20xf32> -> vector<28x20xf32>
    %44 = arith.addf %43, %32 : vector<28x20xf32>
    %cst_25 = arith.constant dense<0xFF800000> : vector<28xf32>
    %45 = vector.multi_reduction <maximumf>, %44, %cst_25 [1] : vector<28x20xf32> to vector<28xf32>
    %46 = vector.shape_cast %45 : vector<28xf32> to vector<28x1xf32>
    %47 = vector.broadcast %46 : vector<28x1xf32> to vector<28x20xf32>
    %48 = arith.subf %44, %47 : vector<28x20xf32>
    %49 = math.exp %48 : vector<28x20xf32>
    %cst_26 = arith.constant dense<0.000000e+00> : vector<28xf32>
    %50 = vector.multi_reduction <add>, %49, %cst_26 [1] : vector<28x20xf32> to vector<28xf32>
    %51 = vector.shape_cast %50 : vector<28xf32> to vector<28x1xf32>
    %52 = tpu.reciprocal %51 {approx = true} : vector<28x1xf32> -> vector<28x1xf32>
    %53 = vector.broadcast %52 : vector<28x1xf32> to vector<28x20xf32>
    %54 = arith.mulf %49, %53 : vector<28x20xf32>
    %55 = vector.broadcast %40 : vector<1x128xf32> to vector<20x128xf32>
    %56 = arith.mulf %31, %55 : vector<20x128xf32>
    %cst_27 = arith.constant dense<0.000000e+00> : vector<28x128xf32>
    %57 = tpu.matmul %54, %56, %cst_27 {dimension_numbers = #tpu.dot_dimension_numbers<[1], [0], [0], [1], [0, 0, 1, 1], [], []>} : vector<28x20xf32>, vector<20x128xf32>, vector<28x128xf32> -> vector<28x128xf32>
    %58 = arith.addf %33, %57 : vector<28x128xf32>
    %c8_i32_28 = arith.constant 8 : i32
    %59 = vector.broadcast %c8_i32_28 : i32 to vector<1x128xi32>
    %60 = arith.cmpi sge, %0, %59 : vector<1x128xi32>
    %c16_i32 = arith.constant 16 : i32
    %61 = vector.broadcast %c16_i32 : i32 to vector<1x128xi32>
    %62 = arith.cmpi slt, %0, %61 : vector<1x128xi32>
    %63 = arith.andi %60, %62 : vector<1x128xi1>
    %64 = arith.extui %63 : vector<1x128xi1> to vector<1x128xi32>
    %65 = arith.sitofp %64 : vector<1x128xi32> to vector<1x128xf32>
    %66 = vector.broadcast %65 : vector<1x128xf32> to vector<28x128xf32>
    %67 = arith.mulf %22, %66 : vector<28x128xf32>
    %cst_29 = arith.constant dense<0.000000e+00> : vector<28x20xf32>
    %68 = tpu.matmul %67, %30, %cst_29 {dimension_numbers = #tpu.dot_dimension_numbers<[1], [1], [0], [0], [0, 0, 1, 0], [], []>} : vector<28x128xf32>, vector<20x128xf32>, vector<28x20xf32> -> vector<28x20xf32>
    %69 = arith.addf %68, %32 : vector<28x20xf32>
    %cst_30 = arith.constant dense<0xFF800000> : vector<28xf32>
    %70 = vector.multi_reduction <maximumf>, %69, %cst_30 [1] : vector<28x20xf32> to vector<28xf32>
    %71 = vector.shape_cast %70 : vector<28xf32> to vector<28x1xf32>
    %72 = vector.broadcast %71 : vector<28x1xf32> to vector<28x20xf32>
    %73 = arith.subf %69, %72 : vector<28x20xf32>
    %74 = math.exp %73 : vector<28x20xf32>
    %cst_31 = arith.constant dense<0.000000e+00> : vector<28xf32>
    %75 = vector.multi_reduction <add>, %74, %cst_31 [1] : vector<28x20xf32> to vector<28xf32>
    %76 = vector.shape_cast %75 : vector<28xf32> to vector<28x1xf32>
    %77 = tpu.reciprocal %76 {approx = true} : vector<28x1xf32> -> vector<28x1xf32>
    %78 = vector.broadcast %77 : vector<28x1xf32> to vector<28x20xf32>
    %79 = arith.mulf %74, %78 : vector<28x20xf32>
    %80 = vector.broadcast %65 : vector<1x128xf32> to vector<20x128xf32>
    %81 = arith.mulf %31, %80 : vector<20x128xf32>
    %cst_32 = arith.constant dense<0.000000e+00> : vector<28x128xf32>
    %82 = tpu.matmul %79, %81, %cst_32 {dimension_numbers = #tpu.dot_dimension_numbers<[1], [0], [0], [1], [0, 0, 1, 1], [], []>} : vector<28x20xf32>, vector<20x128xf32>, vector<28x128xf32> -> vector<28x128xf32>
    %83 = arith.addf %58, %82 : vector<28x128xf32>
    %c16_i32_33 = arith.constant 16 : i32
    %84 = vector.broadcast %c16_i32_33 : i32 to vector<1x128xi32>
    %85 = arith.cmpi sge, %0, %84 : vector<1x128xi32>
    %c24_i32 = arith.constant 24 : i32
    %86 = vector.broadcast %c24_i32 : i32 to vector<1x128xi32>
    %87 = arith.cmpi slt, %0, %86 : vector<1x128xi32>
    %88 = arith.andi %85, %87 : vector<1x128xi1>
    %89 = arith.extui %88 : vector<1x128xi1> to vector<1x128xi32>
    %90 = arith.sitofp %89 : vector<1x128xi32> to vector<1x128xf32>
    %91 = vector.broadcast %90 : vector<1x128xf32> to vector<28x128xf32>
    %92 = arith.mulf %22, %91 : vector<28x128xf32>
    %cst_34 = arith.constant dense<0.000000e+00> : vector<28x20xf32>
    %93 = tpu.matmul %92, %30, %cst_34 {dimension_numbers = #tpu.dot_dimension_numbers<[1], [1], [0], [0], [0, 0, 1, 0], [], []>} : vector<28x128xf32>, vector<20x128xf32>, vector<28x20xf32> -> vector<28x20xf32>
    %94 = arith.addf %93, %32 : vector<28x20xf32>
    %cst_35 = arith.constant dense<0xFF800000> : vector<28xf32>
    %95 = vector.multi_reduction <maximumf>, %94, %cst_35 [1] : vector<28x20xf32> to vector<28xf32>
    %96 = vector.shape_cast %95 : vector<28xf32> to vector<28x1xf32>
    %97 = vector.broadcast %96 : vector<28x1xf32> to vector<28x20xf32>
    %98 = arith.subf %94, %97 : vector<28x20xf32>
    %99 = math.exp %98 : vector<28x20xf32>
    %cst_36 = arith.constant dense<0.000000e+00> : vector<28xf32>
    %100 = vector.multi_reduction <add>, %99, %cst_36 [1] : vector<28x20xf32> to vector<28xf32>
    %101 = vector.shape_cast %100 : vector<28xf32> to vector<28x1xf32>
    %102 = tpu.reciprocal %101 {approx = true} : vector<28x1xf32> -> vector<28x1xf32>
    %103 = vector.broadcast %102 : vector<28x1xf32> to vector<28x20xf32>
    %104 = arith.mulf %99, %103 : vector<28x20xf32>
    %105 = vector.broadcast %90 : vector<1x128xf32> to vector<20x128xf32>
    %106 = arith.mulf %31, %105 : vector<20x128xf32>
    %cst_37 = arith.constant dense<0.000000e+00> : vector<28x128xf32>
    %107 = tpu.matmul %104, %106, %cst_37 {dimension_numbers = #tpu.dot_dimension_numbers<[1], [0], [0], [1], [0, 0, 1, 1], [], []>} : vector<28x20xf32>, vector<20x128xf32>, vector<28x128xf32> -> vector<28x128xf32>
    %108 = arith.addf %83, %107 : vector<28x128xf32>
    %c24_i32_38 = arith.constant 24 : i32
    %109 = vector.broadcast %c24_i32_38 : i32 to vector<1x128xi32>
    %110 = arith.cmpi sge, %0, %109 : vector<1x128xi32>
    %c32_i32_39 = arith.constant 32 : i32
    %111 = vector.broadcast %c32_i32_39 : i32 to vector<1x128xi32>
    %112 = arith.cmpi slt, %0, %111 : vector<1x128xi32>
    %113 = arith.andi %110, %112 : vector<1x128xi1>
    %114 = arith.extui %113 : vector<1x128xi1> to vector<1x128xi32>
    %115 = arith.sitofp %114 : vector<1x128xi32> to vector<1x128xf32>
    %116 = vector.broadcast %115 : vector<1x128xf32> to vector<28x128xf32>
    %117 = arith.mulf %22, %116 : vector<28x128xf32>
    %cst_40 = arith.constant dense<0.000000e+00> : vector<28x20xf32>
    %118 = tpu.matmul %117, %30, %cst_40 {dimension_numbers = #tpu.dot_dimension_numbers<[1], [1], [0], [0], [0, 0, 1, 0], [], []>} : vector<28x128xf32>, vector<20x128xf32>, vector<28x20xf32> -> vector<28x20xf32>
    %119 = arith.addf %118, %32 : vector<28x20xf32>
    %cst_41 = arith.constant dense<0xFF800000> : vector<28xf32>
    %120 = vector.multi_reduction <maximumf>, %119, %cst_41 [1] : vector<28x20xf32> to vector<28xf32>
    %121 = vector.shape_cast %120 : vector<28xf32> to vector<28x1xf32>
    %122 = vector.broadcast %121 : vector<28x1xf32> to vector<28x20xf32>
    %123 = arith.subf %119, %122 : vector<28x20xf32>
    %124 = math.exp %123 : vector<28x20xf32>
    %cst_42 = arith.constant dense<0.000000e+00> : vector<28xf32>
    %125 = vector.multi_reduction <add>, %124, %cst_42 [1] : vector<28x20xf32> to vector<28xf32>
    %126 = vector.shape_cast %125 : vector<28xf32> to vector<28x1xf32>
    %127 = tpu.reciprocal %126 {approx = true} : vector<28x1xf32> -> vector<28x1xf32>
    %128 = vector.broadcast %127 : vector<28x1xf32> to vector<28x20xf32>
    %129 = arith.mulf %124, %128 : vector<28x20xf32>
    %130 = vector.broadcast %115 : vector<1x128xf32> to vector<20x128xf32>
    %131 = arith.mulf %31, %130 : vector<20x128xf32>
    %cst_43 = arith.constant dense<0.000000e+00> : vector<28x128xf32>
    %132 = tpu.matmul %129, %131, %cst_43 {dimension_numbers = #tpu.dot_dimension_numbers<[1], [0], [0], [1], [0, 0, 1, 1], [], []>} : vector<28x20xf32>, vector<20x128xf32>, vector<28x128xf32> -> vector<28x128xf32>
    %133 = arith.addf %108, %132 : vector<28x128xf32>
    %c0_44 = arith.constant 0 : index
    %c0_45 = arith.constant 0 : index
    %c0_46 = arith.constant 0 : index
    %134 = vector.load %arg8[%c0_44, %c0_45, %c0_46] : memref<1x128x128xf32, #tpu.memory_space<vmem>>, vector<1x128x128xf32>
    %135 = vector.shape_cast %134 : vector<1x128x128xf32> to vector<128x128xf32>
    %c0_47 = arith.constant 0 : index
    %c0_48 = arith.constant 0 : index
    %c0_49 = arith.constant 0 : index
    %136 = vector.load %arg9[%c0_47, %c0_48, %c0_49] : memref<1x1x128xf32, #tpu.memory_space<vmem>>, vector<1x1x128xf32>
    %137 = vector.shape_cast %136 : vector<1x1x128xf32> to vector<1x128xf32>
    %cst_50 = arith.constant dense<0.000000e+00> : vector<28x128xf32>
    %138 = tpu.matmul %133, %135, %cst_50 {dimension_numbers = #tpu.dot_dimension_numbers<[1], [0], [0], [1], [0, 0, 1, 1], [], []>} : vector<28x128xf32>, vector<128x128xf32>, vector<28x128xf32> -> vector<28x128xf32>
    %139 = vector.broadcast %137 : vector<1x128xf32> to vector<28x128xf32>
    %140 = arith.addf %138, %139 : vector<28x128xf32>
    %141 = arith.addf %8, %140 : vector<28x128xf32>
    %142 = vector.broadcast %4 : vector<1x128xf32> to vector<28x128xf32>
    %143 = arith.mulf %141, %142 : vector<28x128xf32>
    %cst_51 = arith.constant dense<0.000000e+00> : vector<28xf32>
    %144 = vector.multi_reduction <add>, %143, %cst_51 [1] : vector<28x128xf32> to vector<28xf32>
    %145 = vector.shape_cast %144 : vector<28xf32> to vector<28x1xf32>
    %cst_52 = arith.constant 3.125000e-02 : f32
    %146 = vector.broadcast %cst_52 : f32 to vector<28x1xf32>
    %147 = arith.mulf %145, %146 : vector<28x1xf32>
    %148 = vector.broadcast %147 : vector<28x1xf32> to vector<28x128xf32>
    %149 = arith.subf %143, %148 : vector<28x128xf32>
    %150 = vector.broadcast %4 : vector<1x128xf32> to vector<28x128xf32>
    %151 = arith.mulf %149, %150 : vector<28x128xf32>
    %152 = arith.mulf %151, %151 : vector<28x128xf32>
    %cst_53 = arith.constant dense<0.000000e+00> : vector<28xf32>
    %153 = vector.multi_reduction <add>, %152, %cst_53 [1] : vector<28x128xf32> to vector<28xf32>
    %154 = vector.shape_cast %153 : vector<28xf32> to vector<28x1xf32>
    %cst_54 = arith.constant 3.125000e-02 : f32
    %155 = vector.broadcast %cst_54 : f32 to vector<28x1xf32>
    %156 = arith.mulf %154, %155 : vector<28x1xf32>
    %cst_55 = arith.constant 9.99999974E-6 : f32
    %157 = vector.broadcast %cst_55 : f32 to vector<28x1xf32>
    %158 = arith.addf %156, %157 : vector<28x1xf32>
    %159 = math.rsqrt %158 : vector<28x1xf32>
    %160 = vector.broadcast %159 : vector<28x1xf32> to vector<28x128xf32>
    %161 = arith.mulf %151, %160 : vector<28x128xf32>
    %162 = vector.broadcast %12 : vector<1x128xf32> to vector<28x128xf32>
    %163 = arith.mulf %161, %162 : vector<28x128xf32>
    %164 = vector.broadcast %13 : vector<1x128xf32> to vector<28x128xf32>
    %165 = arith.addf %163, %164 : vector<28x128xf32>
    %c0_56 = arith.constant 0 : index
    %c0_57 = arith.constant 0 : index
    %c0_58 = arith.constant 0 : index
    %166 = vector.load %arg10[%c0_56, %c0_57, %c0_58] : memref<1x128x128xf32, #tpu.memory_space<vmem>>, vector<1x128x128xf32>
    %167 = vector.shape_cast %166 : vector<1x128x128xf32> to vector<128x128xf32>
    %c0_59 = arith.constant 0 : index
    %c0_60 = arith.constant 0 : index
    %c0_61 = arith.constant 0 : index
    %168 = vector.load %arg11[%c0_59, %c0_60, %c0_61] : memref<1x1x128xf32, #tpu.memory_space<vmem>>, vector<1x1x128xf32>
    %169 = vector.shape_cast %168 : vector<1x1x128xf32> to vector<1x128xf32>
    %cst_62 = arith.constant dense<0.000000e+00> : vector<28x128xf32>
    %170 = tpu.matmul %165, %167, %cst_62 {dimension_numbers = #tpu.dot_dimension_numbers<[1], [0], [0], [1], [0, 0, 1, 1], [], []>} : vector<28x128xf32>, vector<128x128xf32>, vector<28x128xf32> -> vector<28x128xf32>
    %171 = vector.broadcast %169 : vector<1x128xf32> to vector<28x128xf32>
    %172 = arith.addf %170, %171 : vector<28x128xf32>
    %cst_63 = arith.constant 0.000000e+00 : f32
    %173 = vector.broadcast %cst_63 : f32 to vector<28x128xf32>
    %174 = arith.maximumf %172, %173 : vector<28x128xf32>
    %c0_64 = arith.constant 0 : index
    %c0_65 = arith.constant 0 : index
    %c0_66 = arith.constant 0 : index
    %175 = vector.load %arg12[%c0_64, %c0_65, %c0_66] : memref<1x128x128xf32, #tpu.memory_space<vmem>>, vector<1x128x128xf32>
    %176 = vector.shape_cast %175 : vector<1x128x128xf32> to vector<128x128xf32>
    %c0_67 = arith.constant 0 : index
    %c0_68 = arith.constant 0 : index
    %c0_69 = arith.constant 0 : index
    %177 = vector.load %arg13[%c0_67, %c0_68, %c0_69] : memref<1x1x128xf32, #tpu.memory_space<vmem>>, vector<1x1x128xf32>
    %178 = vector.shape_cast %177 : vector<1x1x128xf32> to vector<1x128xf32>
    %cst_70 = arith.constant dense<0.000000e+00> : vector<28x128xf32>
    %179 = tpu.matmul %174, %176, %cst_70 {dimension_numbers = #tpu.dot_dimension_numbers<[1], [0], [0], [1], [0, 0, 1, 1], [], []>} : vector<28x128xf32>, vector<128x128xf32>, vector<28x128xf32> -> vector<28x128xf32>
    %180 = vector.broadcast %178 : vector<1x128xf32> to vector<28x128xf32>
    %181 = arith.addf %179, %180 : vector<28x128xf32>
    %182 = arith.addf %165, %181 : vector<28x128xf32>
    %183 = vector.broadcast %4 : vector<1x128xf32> to vector<28x128xf32>
    %184 = arith.mulf %182, %183 : vector<28x128xf32>
    %cst_71 = arith.constant dense<0.000000e+00> : vector<28xf32>
    %185 = vector.multi_reduction <add>, %184, %cst_71 [1] : vector<28x128xf32> to vector<28xf32>
    %186 = vector.shape_cast %185 : vector<28xf32> to vector<28x1xf32>
    %cst_72 = arith.constant 3.125000e-02 : f32
    %187 = vector.broadcast %cst_72 : f32 to vector<28x1xf32>
    %188 = arith.mulf %186, %187 : vector<28x1xf32>
    %189 = vector.broadcast %188 : vector<28x1xf32> to vector<28x128xf32>
    %190 = arith.subf %184, %189 : vector<28x128xf32>
    %191 = vector.broadcast %4 : vector<1x128xf32> to vector<28x128xf32>
    %192 = arith.mulf %190, %191 : vector<28x128xf32>
    %193 = arith.mulf %192, %192 : vector<28x128xf32>
    %cst_73 = arith.constant dense<0.000000e+00> : vector<28xf32>
    %194 = vector.multi_reduction <add>, %193, %cst_73 [1] : vector<28x128xf32> to vector<28xf32>
    %195 = vector.shape_cast %194 : vector<28xf32> to vector<28x1xf32>
    %cst_74 = arith.constant 3.125000e-02 : f32
    %196 = vector.broadcast %cst_74 : f32 to vector<28x1xf32>
    %197 = arith.mulf %195, %196 : vector<28x1xf32>
    %cst_75 = arith.constant 9.99999974E-6 : f32
    %198 = vector.broadcast %cst_75 : f32 to vector<28x1xf32>
    %199 = arith.addf %197, %198 : vector<28x1xf32>
    %200 = math.rsqrt %199 : vector<28x1xf32>
    %201 = vector.broadcast %200 : vector<28x1xf32> to vector<28x128xf32>
    %202 = arith.mulf %192, %201 : vector<28x128xf32>
    %203 = vector.broadcast %14 : vector<1x128xf32> to vector<28x128xf32>
    %204 = arith.mulf %202, %203 : vector<28x128xf32>
    %205 = vector.broadcast %15 : vector<1x128xf32> to vector<28x128xf32>
    %206 = arith.addf %204, %205 : vector<28x128xf32>
    %c0_76 = arith.constant 0 : index
    %c0_77 = arith.constant 0 : index
    %207 = vector.load %arg18[%c0_76, %c0_77] : memref<28x128xf32, #tpu.memory_space<vmem>>, vector<28x128xf32>
    tpu.vector_store %arg18[%c0_76, %c0_77], %206 {strides = array<i32>} : memref<28x128xf32, #tpu.memory_space<vmem>>, vector<28x128xf32>,
    %c1_i32 = arith.constant 1 : i32
    %208 = arith.cmpi eq, %arg0, %c1_i32 : i32
    %209 = arith.extui %208 : i1 to i32
    %c0_i32_78 = arith.constant 0 : i32
    %210 = arith.cmpi ne, %209, %c0_i32_78 : i32
    scf.if %210 {
      %c0_79 = arith.constant 0 : index
      %c0_80 = arith.constant 0 : index
      %211 = vector.load %arg15[%c0_79, %c0_80] : memref<128x128xf32, #tpu.memory_space<vmem>>, vector<128x128xf32>
      %cst_81 = arith.constant dense<0.000000e+00> : vector<28x128xf32>
      %212 = tpu.matmul %206, %211, %cst_81 {dimension_numbers = #tpu.dot_dimension_numbers<[1], [0], [0], [1], [0, 0, 1, 1], [], []>} : vector<28x128xf32>, vector<128x128xf32>, vector<28x128xf32> -> vector<28x128xf32>
      %c0_82 = arith.constant 0 : index
      %c0_83 = arith.constant 0 : index
      %213 = vector.load %arg16[%c0_82, %c0_83] : memref<1x128xf32, #tpu.memory_space<vmem>>, vector<1x128xf32>
      %214 = vector.broadcast %213 : vector<1x128xf32> to vector<28x128xf32>
      %215 = arith.addf %212, %214 : vector<28x128xf32>
      %c0_84 = arith.constant 0 : index
      %c0_85 = arith.constant 0 : index
      %216 = vector.load %arg17[%c0_84, %c0_85] : memref<28x128xf32, #tpu.memory_space<vmem>>, vector<28x128xf32>
      tpu.vector_store %arg17[%c0_84, %c0_85], %215 {strides = array<i32>} : memref<28x128xf32, #tpu.memory_space<vmem>>, vector<28x128xf32>,
    } else {
    }
    return
  }
  func.func @transform_0(%arg0: i32) -> (i32, i32) {
    %c0_i32 = arith.constant 0 : i32
    %c0_i32_0 = arith.constant 0 : i32
    %c0_i32_1 = arith.constant 0 : i32
    return %c0_i32, %c0_i32_0 : i32, i32
  }
  func.func @transform_1(%arg0: i32) -> (i32, i32) {
    %c0_i32 = arith.constant 0 : i32
    %c0_i32_0 = arith.constant 0 : i32
    %c0_i32_1 = arith.constant 0 : i32
    return %c0_i32, %c0_i32_0 : i32, i32
  }
  func.func @transform_2(%arg0: i32) -> (i32, i32) {
    %c0_i32 = arith.constant 0 : i32
    %c0_i32_0 = arith.constant 0 : i32
    %c0_i32_1 = arith.constant 0 : i32
    return %c0_i32, %c0_i32_0 : i32, i32
  }
  func.func @transform_3(%arg0: i32) -> (i32, i32, i32) {
    %c0_i32 = arith.constant 0 : i32
    %c0_i32_0 = arith.constant 0 : i32
    %c0_i32_1 = arith.constant 0 : i32
    return %arg0, %c0_i32, %c0_i32_0 : i32, i32, i32
  }
  func.func @transform_4(%arg0: i32) -> (i32, i32, i32) {
    %c0_i32 = arith.constant 0 : i32
    %c0_i32_0 = arith.constant 0 : i32
    %c0_i32_1 = arith.constant 0 : i32
    return %arg0, %c0_i32, %c0_i32_0 : i32, i32, i32
  }
  func.func @transform_5(%arg0: i32) -> (i32, i32, i32) {
    %c0_i32 = arith.constant 0 : i32
    %c0_i32_0 = arith.constant 0 : i32
    %c0_i32_1 = arith.constant 0 : i32
    return %arg0, %c0_i32, %c0_i32_0 : i32, i32, i32
  }
  func.func @transform_6(%arg0: i32) -> (i32, i32, i32) {
    %c0_i32 = arith.constant 0 : i32
    %c0_i32_0 = arith.constant 0 : i32
    %c0_i32_1 = arith.constant 0 : i32
    return %arg0, %c0_i32, %c0_i32_0 : i32, i32, i32
  }
  func.func @transform_7(%arg0: i32) -> (i32, i32, i32) {
    %c0_i32 = arith.constant 0 : i32
    %c0_i32_0 = arith.constant 0 : i32
    %c0_i32_1 = arith.constant 0 : i32
    return %arg0, %c0_i32, %c0_i32_0 : i32, i32, i32
  }
  func.func @transform_8(%arg0: i32) -> (i32, i32, i32) {
    %c0_i32 = arith.constant 0 : i32
    %c0_i32_0 = arith.constant 0 : i32
    %c0_i32_1 = arith.constant 0 : i32
    return %arg0, %c0_i32, %c0_i32_0 : i32, i32, i32
  }
  func.func @transform_9(%arg0: i32) -> (i32, i32, i32) {
    %c0_i32 = arith.constant 0 : i32
    %c0_i32_0 = arith.constant 0 : i32
    %c0_i32_1 = arith.constant 0 : i32
    return %arg0, %c0_i32, %c0_i32_0 : i32, i32, i32
  }
  func.func @transform_10(%arg0: i32) -> (i32, i32, i32) {
    %c0_i32 = arith.constant 0 : i32
    %c0_i32_0 = arith.constant 0 : i32
    %c0_i32_1 = arith.constant 0 : i32
    return %arg0, %c0_i32, %c0_i32_0 : i32, i32, i32
  }
  func.func @transform_11(%arg0: i32) -> (i32, i32, i32) {
    %c0_i32 = arith.constant 0 : i32
    %c0_i32_0 = arith.constant 0 : i32
    %c0_i32_1 = arith.constant 0 : i32
    return %arg0, %c0_i32, %c0_i32_0 : i32, i32, i32
  }
  func.func @transform_12(%arg0: i32) -> (i32, i32, i32) {
    %c0_i32 = arith.constant 0 : i32
    %c0_i32_0 = arith.constant 0 : i32
    %c0_i32_1 = arith.constant 0 : i32
    return %arg0, %c0_i32, %c0_i32_0 : i32, i32, i32
  }
  func.func @transform_13(%arg0: i32) -> (i32, i32, i32) {
    %c0_i32 = arith.constant 0 : i32
    %c0_i32_0 = arith.constant 0 : i32
    %c0_i32_1 = arith.constant 0 : i32
    return %arg0, %c0_i32, %c0_i32_0 : i32, i32, i32
  }
  func.func @transform_14(%arg0: i32) -> (i32, i32) {
    %c0_i32 = arith.constant 0 : i32
    %c0_i32_0 = arith.constant 0 : i32
    %c0_i32_1 = arith.constant 0 : i32
    return %c0_i32, %c0_i32_0 : i32, i32
  }
  func.func @transform_15(%arg0: i32) -> (i32, i32) {
    %c0_i32 = arith.constant 0 : i32
    %c0_i32_0 = arith.constant 0 : i32
    %c0_i32_1 = arith.constant 0 : i32
    return %c0_i32, %c0_i32_0 : i32, i32
  }
  func.func @transform_16(%arg0: i32) -> (i32, i32) {
    %c0_i32 = arith.constant 0 : i32
    %c0_i32_0 = arith.constant 0 : i32
    %c0_i32_1 = arith.constant 0 : i32
    return %c0_i32, %c0_i32_0 : i32, i32
  }
}

</mosaic_0001>

<bundles_post_ra>
// kernel: decoder_transformer_forward.2
= control target key start
LH: loop header
LB: loop body
LE: loop exit
PB: predicated region body
PF: predicated region fallthrough
CT: control target
= control target key end

     0   :  { %s3579_s21 = smov 0   ;;  %s4183_s0 = inlined_call_operand.vmem [shape: f32[28,128], index: 0, kind: input, shape index: {}]   ;;  %s4184_s1 = inlined_call_operand.vmem [shape: f32[20,128], index: 1, kind: input, shape index: {}]   ;;  %s4185_s2 = inlined_call_operand.vmem [shape: f32[28,20], index: 2, kind: input, shape index: {}]   ;;  %s4186_s3 = inlined_call_operand.vmem [shape: f32[2,128,128], index: 3, kind: input, shape index: {}]   ;;  %s4187_s4 = inlined_call_operand.vmem [shape: f32[2,1,128], index: 4, kind: input, shape index: {}]   ;;  %s4188_s5 = inlined_call_operand.vmem [shape: f32[2,128,256], index: 5, kind: input, shape index: {}]   ;;  %s4189_s6 = inlined_call_operand.vmem [shape: f32[2,1,256], index: 6, kind: input, shape index: {}]   ;;  %s4190_s7 = inlined_call_operand.vmem [shape: f32[2,128,128], index: 7, kind: input, shape index: {}]   ;;  %s4191_s8 = inlined_call_operand.vmem [shape: f32[2,1,128], index: 8, kind: input, shape index: {}]   ;;  %s4192_s9 = inlined_call_operand.vmem [shape: f32[2,128,128], index: 9, kind: input, shape index: {}]   ;;  %s4193_s10 = inlined_call_operand.vmem [shape: f32[2,1,128], index: 10, kind: input, shape index: {}]   ;;  %s4194_s11 = inlined_call_operand.vmem [shape: f32[2,128,128], index: 11, kind: input, shape index: {}]   ;;  %s4195_s12 = inlined_call_operand.vmem [shape: f32[2,1,128], index: 12, kind: input, shape index: {}]   ;;  %s4196_s13 = inlined_call_operand.vmem [shape: f32[2,4,128], index: 13, kind: input, shape index: {}]   ;;  %s4197_s14 = inlined_call_operand.vmem [shape: f32[128,128], index: 14, kind: input, shape index: {}]   ;;  %s4198_s15 = inlined_call_operand.vmem [shape: f32[1,128], index: 15, kind: input, shape index: {}]   ;;  %s4199_s16 = inlined_call_operand.vmem [shape: f32[28,128], index: 16, kind: output, shape index: {}]  }
   0x1   :  { %4205 = sst [smem:[#allocation4_spill]] %s4183_s0 }
   0x2   :  { %4206 = sst [smem:[#allocation5_spill]] %s4185_s2 }
   0x3   :  { %4207 = sst [smem:[#allocation6_spill]] %s4186_s3 }
   0x4   :  { %4208 = sst [smem:[#allocation7_spill]] %s4188_s5 }
   0x5   :  { %4209 = sst [smem:[#allocation8_spill]] %s4189_s6 }
   0x6   :  { %4210 = sst [smem:[#allocation9_spill]] %s4197_s14 }
   0x7   :  { %4211 = sst [smem:[#allocation10_spill]] %s4198_s15 }
   0x8   :  { %4212 = sst [smem:[#allocation11_spill]] %s4199_s16 }
   0x9 LB: > { %4213 = sst [smem:[#allocation3_spill]] %s3491_s21  ;;  %s3585_s22 = sadd.s32 4294967295, %s3491_s21   ;;  %s3491_s21 = sphi %s3579_s21, %s26_s21  }
   0xa   : > { %p2650_p0 = scmp.ge.s32.totalorder %s3491_s21, 1  ;;  %p547_p1 = scmp.lt.s32.totalorder %s3491_s21, 3 }
   0xc   : > { %p548_p2 = pnand %p2650_p0, %p547_p1 }
   0xd   : > { %p632_p3 = scmp.lt.s32.totalorder (!%p548_p2), %s3585_s22, 1  ;;  %v677_v0 = vlaneseq (!%p548_p2)  ;;  %s4214_s3 = sld [smem:[#allocation6_spill]] (!%p548_p2)  ;;  %v3493_v2 = vmov (!%p548_p2), 0.0  }
   0xe   : > { %551 = sbr.rel (%p548_p2) target bundleno = 2598 (0xa26), region = 84  ;;  %s4215_s5 = sld [smem:[#allocation7_spill]] (!%p548_p2) }
   0xf   : > { %v3594_v1 = vand.u32 (!%p548_p2), 127, %v677_v0  ;;  %s4216_s6 = sld [smem:[#allocation8_spill]] (!%p548_p2)  ;;  %p2664_p4 = scmp.ne.s32.totalorder (!%p548_p2), %s3585_s22, 0 }
  0x11   : > { %vm679_vm0 = vcmp.lt.s32.totalorder (!%p548_p2), %v3594_v1, 32 }
  0x12   : > { %v3611_v3 = vsel (!%p548_p2), %vm679_vm0, 1.0, %v3493_v2 }
  0x15   : > { %s3591_s23 = scalar_select %p632_p3, %s3585_s22, 1 }
  0x16   : > { %s4217_s18 = sld [smem:[#allocation4_spill]] (!%p2664_p4) }
  0x17   : > { %s2697_s24 = sshll.u32 %s3591_s23, 7  ;;  %s2698_s0 = sshll.u32 %s3591_s23, 8 }
  0x18   : > { %s3605_s30 = scalar_lea.vmem %s4214_s3, %s2697_s24  ;;  %s3616_s19 = scalar_lea.vmem %s4215_s5, %s2698_s0 }
  0x19   : > { %s2655_s20 = sshll.u32 %s3591_s23, 1  ;;  %s3627_s3 = scalar_lea.vmem %s4190_s7, %s2697_s24 }
  0x1a   : > { %s3622_s27 = scalar_lea.vmem %s4216_s6, %s2655_s20  ;;  %s3636_s0 = scalar_lea.vmem %s4192_s9, %s2697_s24 }
  0x1b   : > { %s664_s25 = scalar_lea.vmem %s4193_s10, %s3591_s23  ;;  %s3645_s5 = scalar_lea.vmem %s4194_s11, %s2697_s24 }
  0x1c   : > { %s672_s6 = scalar_lea.vmem %s4195_s12, %s3591_s23  ;;  %s2662_s16 = sshll.u32 %s3591_s23, 2  ;;  %v686_v4 = vld [vmem:[%s4217_s18] sm:$0xff] (!%p2664_p4)  ;;  %v687_v5 = vld [vmem:[%s4217_s18 + $0x8] sm:$0xff] (!%p2664_p4)  ;;  %v688_v6 = vld [vmem:[%s4217_s18 + $0x10] sm:$0xff] (!%p2664_p4) }
  0x1d   : > { %s3655_s2 = scalar_lea.vmem %s4196_s13, %s2662_s16  ;;  %685 = sbr.rel (%p2664_p4) target bundleno = 36 (0x24), region = 88  ;;  %690 = vst [vmem:[#allocation2] sm:$0xff] (!%p2664_p4), %v686_v4  ;;  %691 = vst [vmem:[#allocation2 + $0x8] sm:$0xff] (!%p2664_p4), %v687_v5  ;;  %v689_v7 = vld [vmem:[%s4217_s18 + $0x18] sm:$0xf] (!%p2664_p4) }
  0x1e   : > { %692 = vst [vmem:[#allocation2 + $0x10] sm:$0xff] (!%p2664_p4), %v688_v6  ;;  %693 = vst [vmem:[#allocation2 + $0x18] sm:$0xf] (!%p2664_p4), %v689_v7 }
  0x24 PF: > { %v811_v8 = vld [vmem:[%s3616_s19 + $0x8] sm:$0xff]  ;;  %v813_v9 = vld [vmem:[%s3616_s19 + $0x18] sm:$0xff]  ;;  %v810_v10 = vld [vmem:[%s3616_s19] sm:$0xff]  ;;  %918 = vmatprep.mubr.f32.mxu1 %v3493_v2  ;;  %vm1426_vm1 = vcmp.ge.s32.totalorder %v3594_v1, 16  ;;  %vm1427_vm2 = vcmp.lt.s32.totalorder %v3594_v1, 24  ;;  %vm1671_vm3 = vcmp.ge.s32.totalorder %v3594_v1, 24  ;;  %s4218_s24 = scalar_lea.vmem %s4187_s4, %s3591_s23 }
  0x25   : > { %v3176_v11 = vpack.c.bf16 %v813_v9, %v811_v8  ;;  %v812_v12 = vld [vmem:[%s3616_s19 + $0x10] sm:$0xff]  ;;  %v815_v13 = vld [vmem:[%s3616_s19 + $0x28] sm:$0xff]  ;;  %v817_v14 = vld [vmem:[%s3616_s19 + $0x38] sm:$0xff]  ;;  %vm1084_vm6 = vcmp.ge.s32.totalorder %v3594_v1, 8  ;;  %vm1085_vm7 = vcmp.lt.s32.totalorder %v3594_v1, 16  ;;  %vm942_vm8 = vcmp.lt.s32.totalorder %v3594_v1, 8 }
  0x26   : > { %v3178_v15 = vpack.c.bf16 %v812_v12, %v810_v10  ;;  %v3180_v16 = vpack.c.bf16 %v817_v14, %v815_v13  ;;  %v814_v17 = vld [vmem:[%s3616_s19 + $0x20] sm:$0xff]  ;;  %v816_v18 = vld [vmem:[%s3616_s19 + $0x30] sm:$0xff]  ;;  %v819_v19 = vld [vmem:[%s3616_s19 + $0x48] sm:$0xff]  ;;  %vm1237_vm10 = vcmask 1043456   ;;  %s4219_s15 = sld [smem:[#allocation5_spill]]  ;;  %vm1035_vm11 = vcmask 162816  }
  0x27   : > { %3177 = vmatprep.subr.bf16.mxu1 %v3176_v11  ;;  %v821_v20 = vld [vmem:[%s3616_s19 + $0x58] sm:$0xff]  ;;  %v3182_v21 = vpack.c.bf16 %v816_v18, %v814_v17  ;;  %v818_v22 = vld [vmem:[%s3616_s19 + $0x40] sm:$0xff]  ;;  %v820_v24 = vld [vmem:[%s3616_s19 + $0x50] sm:$0xff]  ;;  %vm1045_vm12 = vcmask 158720   ;;  %p2693_p5 = scmp.ne.s32.totalorder %s3585_s22, 1 }
  0x28   : > { %3179 = vmatpush1.bf16.msra.mxu1 %v3178_v15  ;;  %v3184_v23 = vpack.c.bf16 %v821_v20, %v819_v19  ;;  %v702_v25 = vld [vmem:[%s3605_s30] sm:$0xff]  ;;  %v703_v26 = vld [vmem:[%s3605_s30 + $0x8] sm:$0xff]  ;;  %v825_v28 = vld [vmem:[%s3616_s19 + $0x78] sm:$0xff]  ;;  %v3186_v32 = vpack.c.bf16 %v820_v24, %v818_v22  ;;  %s4223_s20 = sld [smem:[#allocation11_spill]] (!%p2693_p5) }
  0x29   : > { %3181 = vmatprep.subr.bf16.mxu1 %v3180_v16  ;;  %v823_v27 = vld [vmem:[%s3616_s19 + $0x68] sm:$0xff]  ;;  %v3144_v29 = vpack.c.bf16 %v703_v26, %v702_v25  ;;  %v704_v30 = vld [vmem:[%s3605_s30 + $0x10] sm:$0xff]  ;;  %v705_v31 = vld [vmem:[%s3605_s30 + $0x18] sm:$0xff] }
  0x2a   : > { %v822_v33 = vld [vmem:[%s3616_s19 + $0x60] sm:$0xff]  ;;  %v3148_v34 = vpack.c.bf16 %v705_v31, %v704_v30  ;;  %v3188_v35 = vpack.c.bf16 %v825_v28, %v823_v27  ;;  %v824_v36 = vld [vmem:[%s3616_s19 + $0x70] sm:$0xff]  ;;  %v707_v38 = vld [vmem:[%s3605_s30 + $0x28] sm:$0xff]  ;;  %v3743_v27 = vshrl.u32 %v677_v0, 7 }
  0x2b   : > { %3145 = vmatprep.subr.bf16.mxu0 %v3144_v29  ;;  %v706_v37 = vld [vmem:[%s3605_s30 + $0x20] sm:$0xff]  ;;  %v827_v39 = vld [vmem:[%s3616_s19 + $0x88] sm:$0xff]  ;;  %v829_v40 = vld [vmem:[%s3616_s19 + $0x98] sm:$0xff]  ;;  %v3190_v44 = vpack.c.bf16 %v824_v36, %v822_v33 }
  0x2c   : > { %3183 = vmatpush1.bf16.msra.mxu1 %v3182_v21  ;;  %3147 = vmatpush3.bf16.msra.mxu0 %v3144_v29  ;;  %v3152_v41 = vpack.c.bf16 %v707_v38, %v706_v37  ;;  %v708_v42 = vld [vmem:[%s3605_s30 + $0x30] sm:$0xff]  ;;  %v709_v43 = vld [vmem:[%s3605_s30 + $0x38] sm:$0xff]  ;;  %v3192_v45 = vpack.c.bf16 %v829_v40, %v827_v39  ;;  %v826_v46 = vld [vmem:[%s3616_s19 + $0x80] sm:$0xff]  ;;  %v850_v28 = vsub.s32 1, %v3743_v27  ;;  %v846_v30 = vsub.s32 0, %v3743_v27 }
  0x2d   : > { %3185 = vmatprep.subr.bf16.mxu1 %v3184_v23  ;;  %3149 = vmatprep.subr.bf16.mxu0 %v3148_v34  ;;  %v828_v47 = vld [vmem:[%s3616_s19 + $0x90] sm:$0xff]  ;;  %v831_v48 = vld [vmem:[%s3616_s19 + $0xa8] sm:$0xff]  ;;  %v833_v49 = vld [vmem:[%s3616_s19 + $0xb8] sm:$0xff]  ;;  %v3156_v50 = vpack.c.bf16 %v709_v43, %v708_v42 }
  0x2e   : > { %v710_v51 = vld [vmem:[%s3605_s30 + $0x40] sm:$0xff]  ;;  %v711_v52 = vld [vmem:[%s3605_s30 + $0x48] sm:$0xff]  ;;  %v3194_v53 = vpack.c.bf16 %v828_v47, %v826_v46  ;;  %v3196_v55 = vpack.c.bf16 %v833_v49, %v831_v48  ;;  %v832_v57 = vld [vmem:[%s3616_s19 + $0xb0] sm:$0xff] }
  0x2f   : > { %v3703_v54 = vld [vmem:[#allocation2] sm:$0xff]  ;;  %v835_v58 = vld [vmem:[%s3616_s19 + $0xc8] sm:$0xff]  ;;  %v837_v59 = vld [vmem:[%s3616_s19 + $0xd8] sm:$0xff]  ;;  %v3160_v60 = vpack.c.bf16 %v711_v52, %v710_v51 }
  0x30   : > { %3187 = vmatpush1.bf16.msra.mxu1 %v3186_v32  ;;  %3151 = vmatpush3.bf16.msra.mxu0 %v3148_v34  ;;  %v830_v56 = vld [vmem:[%s3616_s19 + $0xa0] sm:$0xff]  ;;  %v712_v61 = vld [vmem:[%s3605_s30 + $0x50] sm:$0xff]  ;;  %v713_v62 = vld [vmem:[%s3605_s30 + $0x58] sm:$0xff]  ;;  %v3200_v4 = vpack.c.bf16 %v837_v59, %v835_v58 }
  0x31   : > { %3189 = vmatprep.subr.bf16.mxu1 %v3188_v35  ;;  %3153 = vmatprep.subr.bf16.mxu0 %v3152_v41  ;;  %v3198_v63 = vpack.c.bf16 %v832_v57, %v830_v56  ;;  %v834_v5 = vld [vmem:[%s3616_s19 + $0xc0] sm:$0xff]  ;;  %v836_v6 = vld [vmem:[%s3616_s19 + $0xd0] sm:$0xff]  ;;  %v839_v7 = vld [vmem:[%s3616_s19 + $0xe8] sm:$0xff]  ;;  %v3164_v9 = vpack.c.bf16 %v713_v62, %v712_v61 }
  0x32   : > { %2890 = vmatprep.mubr.f32.mxu0 %v3703_v54  ;;  %v841_v8 = vld [vmem:[%s3616_s19 + $0xf8] sm:$0xff]  ;;  %v714_v10 = vld [vmem:[%s3605_s30 + $0x60] sm:$0xff]  ;;  %v715_v11 = vld [vmem:[%s3605_s30 + $0x68] sm:$0xff]  ;;  %v3202_v12 = vpack.c.bf16 %v836_v6, %v834_v5 }
  0x33   : > { %v3204_v13 = vpack.c.bf16 %v841_v8, %v839_v7  ;;  %v838_v14 = vld [vmem:[%s3616_s19 + $0xe0] sm:$0xff]  ;;  %v840_v15 = vld [vmem:[%s3616_s19 + $0xf0] sm:$0xff]  ;;  %v3168_v16 = vpack.c.bf16 %v715_v11, %v714_v10  ;;  %v717_v18 = vld [vmem:[%s3605_s30 + $0x78] sm:$0xff] }
  0x34   : > { %3191 = vmatpush1.bf16.msra.mxu1 %v3190_v44  ;;  %3155 = vmatpush3.bf16.msra.mxu0 %v3152_v41  ;;  %v716_v17 = vld [vmem:[%s3605_s30 + $0x70] sm:$0xff]  ;;  %v3206_v19 = vpack.c.bf16 %v840_v15, %v838_v14  ;;  %v698_v21 = vld [vmem:[%s4184_s1] sm:$0xff]  ;;  %v699_v22 = vld [vmem:[%s4184_s1 + $0x8] sm:$0xff] }
  0x35   : > { %3193 = vmatprep.subr.bf16.mxu1 %v3192_v45  ;;  %3157 = vmatprep.subr.bf16.mxu0 %v3156_v50  ;;  %v3172_v20 = vpack.c.bf16 %v717_v18, %v716_v17  ;;  %v3729_v23 = vld [vmem:[#allocation2 + $0x8] sm:$0xff]  ;;  %v3731_v24 = vld [vmem:[#allocation2 + $0x10] sm:$0xff]  ;;  %v3739_v26 = vld [vmem:[#allocation2 + $0x18] sm:$0xf] }
  0x36   : > { %v700_v25 = vld [vmem:[%s4184_s1 + $0x10] sm:$0xf]  ;;  %v842_v29 = vld [vmem:[%s3622_s27] sm:$0x3]  ;;  %vm1428_vm4 = vmand %vm1426_vm1, %vm1427_vm2  ;;  %s4220_s27 = scalar_lea.vmem %s4191_s8, %s3591_s23 }
  0x37   : > { %v851_v31 = vrot.slane %v842_v29, %v850_v28  ;;  %vm1672_vm5 = vmand %vm1671_vm3, %vm679_vm0  ;;  %v847_v32 = vrot.slane %v842_v29, %v846_v30  ;;  %v3758_v34 = vsel %vm1428_vm4, 1.0, %v3493_v2  ;;  %v2665_v38 = vld [vmem:[%s4218_s24] ss:$0 sm:$0xff] }
  0x38   : > { %3195 = vmatpush1.bf16.msra.mxu1 %v3194_v53  ;;  %3159 = vmatpush3.bf16.msra.mxu0 %v3156_v50  ;;  %v3761_v35 = vsel %vm1672_vm5, 1.0, %v3493_v2  ;;  %vm1086_vm9 = vmand %vm1084_vm6, %vm1085_vm7  ;;  %v2666_v50 = vsel %vm942_vm8, 1.0, %v3493_v2 }
  0x39   : > { %3197 = vmatprep.subr.bf16.mxu1 %v3196_v55  ;;  %3161 = vmatprep.subr.bf16.mxu0 %v3160_v60  ;;  %v3775_v51 = vsel %vm1086_vm9, 1.0, %v3493_v2 }
  0x3c   : > { %3199 = vmatpush1.bf16.msra.mxu1 %v3198_v63  ;;  %3163 = vmatpush3.bf16.msra.mxu0 %v3160_v60 }
  0x3d   : > { %3201 = vmatprep.subr.bf16.mxu1 %v3200_v4  ;;  %3165 = vmatprep.subr.bf16.mxu0 %v3164_v9 }
  0x40   : > { %3203 = vmatpush1.bf16.msra.mxu1 %v3202_v12  ;;  %3167 = vmatpush3.bf16.msra.mxu0 %v3164_v9 }
  0x41   : > { %3205 = vmatprep.subr.bf16.mxu1 %v3204_v13  ;;  %3169 = vmatprep.subr.bf16.mxu0 %v3168_v16 }
  0x44   : > { %3207 = vmatpush1.bf16.msra.mxu1 %v3206_v19  ;;  %3171 = vmatpush3.bf16.msra.mxu0 %v3168_v16 }
  0x45   : > { %3173 = vmatprep.subr.bf16.mxu0 %v3172_v20 }
  0x47   : > { %919 = vmatmul.mubr.f32.vlgmr.msra.gmra.mrb[0].mxu1 %v698_v21 }
  0x48   : > { %924 = vmatprep.mubr.f32.mxu1 %v3493_v2  ;;  %3175 = vmatpush3.bf16.msra.mxu0 %v3172_v20 }
  0x4b   : > { %925 = vmatmul.mubr.f32.gmra.mrb[2].mxu1 %v699_v22  ;;  %2891 = vmatmul.mubr.f32.vlgmr.msra.gmra.mrb[0].mxu0 %v3729_v23 }
  0x4c   : > { %930 = vmatprep.mubr.f32.mxu1 %v3493_v2  ;;  %2893 = vmatprep.mubr.f32.mxu0 %v3731_v24 }
  0x4f   : > { %931 = vmatmul.mubr.f32.gmra.mrb[4].mxu1 %v700_v25  ;;  %2894 = vmatmul.mubr.f32.gmra.mrb[2].mxu0 %v3739_v26 }
 0x11a   : > { %v920_v0 = vpop.f32.mrb[0].mxu1 }
 0x11b   : > { %v922_v33 = vpop.f32.mrb[1].mxu1  ;;  %v921_v41 = vadd.f32 %v920_v0, %v847_v32 }
 0x11c   : > { %v923_v36 = vadd.f32 %v922_v33, %v851_v31 }
 0x11e   : > { %v926_v37 = vpop.f32.mrb[2].mxu1  ;;  %v1564_v39 = vmul.f32 %v3758_v34, %v923_v36  ;;  %v1808_v40 = vmul.f32 %v3761_v35, %v923_v36  ;;  %v2892_v44 = vpop.f32.mrb[0].mxu0  ;;  %v1222_v59 = vmul.f32 %v3775_v51, %v923_v36  ;;  %v1081_v62 = vmul.f32 %v2666_v50, %v923_v36 }
 0x11f   : > { %v927_v42 = vadd.f32 %v926_v37, %v847_v32  ;;  %v928_v43 = vpop.f32.mrb[3].mxu1  ;;  %v791_v45 = vpop.f32.mrb[1].mxu0  ;;  %v797_v2 = vadd.f32 %v2892_v44, %v2665_v38 }
 0x120   : > { %v929_v47 = vadd.f32 %v928_v43, %v851_v31  ;;  %v792_v48 = vadd.f32 %v2665_v38, %v791_v45 }
 0x121   : > { %v3208_v46 = vpack.c.bf16 %v927_v42, %v921_v41  ;;  %v947_v8 = vmul.f32 %v2666_v50, %v797_v2  ;;  %v1432_v12 = vmul.f32 %v3758_v34, %v797_v2  ;;  %v1090_v22 = vmul.f32 %v3775_v51, %v797_v2 }
 0x122   : > { %v932_v49 = vpop.f32.mrb[4].mxu1  ;;  %v2895_v55 = vpop.f32.mrb[2].mxu0  ;;  %v946_v56 = vmul.f32 %v2666_v50, %v792_v48  ;;  %v1431_v57 = vmul.f32 %v3758_v34, %v792_v48  ;;  %v1223_v60 = vmul.f32 %v3775_v51, %v929_v47  ;;  %v1082_v63 = vmul.f32 %v2666_v50, %v929_v47 }
 0x123   : > { %3209 = vmatprep.subr.bf16.mxu0 %v3208_v46  ;;  %3225 = vmatprep.subr.bf16.mxu1 %v3208_v46  ;;  %v933_v52 = vadd.f32 %v932_v49, %v847_v32  ;;  %v934_v53 = vpop.f32.mrb[5].mxu1  ;;  %v801_v1 = vpop.f32.mrb[3].mxu0  ;;  %v1565_v5 = vmul.f32 %v3758_v34, %v929_v47  ;;  %v1809_v7 = vmul.f32 %v3761_v35, %v929_v47 }
 0x124   : > { %3211 = vmatpush3.bf16.xpose.msra.mxu0 %v3208_v46  ;;  %3227 = vmatpush3.bf16.xpose.msra.mxu1 %v3208_v46  ;;  %v935_v58 = vadd.f32 %v934_v53, %v851_v31  ;;  %v3216_v61 = vpack.c.bf16 %v1223_v60, %v1222_v59  ;;  %v802_v9 = vadd.f32 %v2665_v38, %v801_v1  ;;  %v939_v53 = vld [vmem:[%s4219_s15 + $0x10] sm:$0xff]  ;;  %v940_v1 = vld [vmem:[%s4219_s15 + $0x18] sm:$0xf] }
 0x125   : > { %2900 = vmatprep.subr.mxu0 %v933_v52  ;;  %2948 = vmatprep.subr.mxu1 %v933_v52  ;;  %v3787_v10 = vpack.c.bf16 %v1082_v63, %v1081_v62  ;;  %v807_v13 = vadd.f32 %v2895_v55, %v2665_v38  ;;  %v3793_v14 = vpack.c.bf16 %v1565_v5, %v1564_v39 }
 0x126   : > { %2902 = vmatprep.mubr.f32.mxu0 %v946_v56  ;;  %2950 = vmatprep.mubr.f32.mxu1 %v1431_v57  ;;  %v3780_v4 = vmul.f32 %v2666_v50, %v935_v58  ;;  %v3784_v6 = vmul.f32 %v3758_v34, %v935_v58  ;;  %v3790_v11 = vmul.f32 %v3761_v35, %v935_v58 }
 0x127   : > { %v3795_v15 = vpack.c.bf16 %v1809_v7, %v1808_v40  ;;  %v948_v16 = vmul.f32 %v2666_v50, %v802_v9  ;;  %v1433_v17 = vmul.f32 %v3758_v34, %v802_v9  ;;  %v949_v18 = vmul.f32 %v2666_v50, %v807_v13 }
 0x128   : > { %v1434_v19 = vmul.f32 %v3758_v34, %v807_v13  ;;  %v1089_v20 = vmul.f32 %v3775_v51, %v792_v48  ;;  %v1675_v21 = vmul.f32 %v3761_v35, %v792_v48  ;;  %v1676_v25 = vmul.f32 %v3761_v35, %v797_v2  ;;  %v938_v48 = vld [vmem:[%s4219_s15 + $0x8] sm:$0xff] }
 0x129   : > { %v1091_v29 = vmul.f32 %v3775_v51, %v802_v9  ;;  %v1677_v31 = vmul.f32 %v3761_v35, %v802_v9  ;;  %v1224_v0 = vmul.f32 %v3775_v51, %v935_v58  ;;  %v1092_v32 = vmul.f32 %v3775_v51, %v807_v13 }
 0x12a   : > { %v1678_v33 = vmul.f32 %v3761_v35, %v807_v13  ;;  %v937_v35 = vld [vmem:[%s4219_s15] sm:$0xff] }
 0x12c   : > { %2901 = vmatpush3.xpose.msra.mxu0 %v933_v52  ;;  %2949 = vmatpush3.xpose.msra.mxu1 %v933_v52 }
 0x12d   : > { %3213 = vmatprep.subr.bf16.mxu0 %v3208_v46  ;;  %3233 = vmatprep.subr.bf16.mxu1 %v3208_v46 }
 0x12f   : > { %2903 = vmatmul.mubr.f32.vlgmr.msra.gmra.mrb[4].mxu0 %v947_v8  ;;  %2951 = vmatmul.mubr.f32.vlgmr.msra.gmra.mrb[6].mxu1 %v1432_v12 }
 0x130   : > { %3215 = vmatpush3.bf16.xpose.msra.mxu0 %v3208_v46  ;;  %3235 = vmatpush3.bf16.xpose.msra.mxu1 %v3208_v46 }
 0x131   : > { %2912 = vmatprep.subr.mxu0 %v933_v52  ;;  %2972 = vmatprep.subr.mxu1 %v933_v52 }
 0x132   : > { %2905 = vmatprep.mubr.f32.mxu0 %v948_v16  ;;  %2953 = vmatprep.mubr.f32.mxu1 %v1433_v17 }
 0x133   : > { %2906 = vmatmul.mubr.f32.gmra.mrb[6].mxu0 %v949_v18  ;;  %2954 = vmatmul.mubr.f32.gmra.mrb[8].mxu1 %v1434_v19 }
 0x134   : > { %2914 = vmatprep.mubr.f32.mxu0 %v1089_v20  ;;  %2974 = vmatprep.mubr.f32.mxu1 %v1675_v21 }
 0x138   : > { %2913 = vmatpush3.xpose.msra.mxu0 %v933_v52  ;;  %2973 = vmatpush3.xpose.msra.mxu1 %v933_v52 }
 0x139   : > { %3217 = vmatprep.subr.bf16.mxu0 %v3216_v61 }
 0x13b   : > { %2915 = vmatmul.mubr.f32.vlgmr.msra.gmra.mrb[8].mxu0 %v1090_v22  ;;  %2975 = vmatmul.mubr.f32.vlgmr.msra.gmra.mrb[10].mxu1 %v1676_v25 }
 0x13c   : > { %2917 = vmatprep.mubr.f32.mxu0 %v1091_v29  ;;  %3219 = vmatpush3.bf16.msra.mxu0 %v3216_v61 }
 0x13d   : > { %2977 = vmatprep.mubr.f32.mxu1 %v1677_v31  ;;  %2924 = vmatprep.subr.msk.mxu0 %vm1237_vm10, %v1224_v0 }
 0x13f   : > { %2918 = vmatmul.mubr.f32.gmra.mrb[10].mxu0 %v1092_v32  ;;  %2978 = vmatmul.mubr.f32.gmra.mrb[12].mxu1 %v1678_v33 }
 0x140   : > { %2925 = vmatpush3.msk.msra.mxu0 %vm1237_vm10, %v1224_v0 }
 0x141   : > { %3221 = vmatprep.subr.bf16.mxu0 %v3787_v10 }
 0x202   : > { %v2904_v34 = vpop.f32.mrb[4].mxu0  ;;  %v2952_v36 = vpop.f32.mrb[6].mxu1 }
 0x203   : > { %v1016_v37 = vpop.f32.mrb[5].mxu0  ;;  %v1501_v38 = vpop.f32.mrb[7].mxu1  ;;  %v1022_v61 = vadd.f32 %v2904_v34, %v938_v48  ;;  %v3837_v13 = vadd.f32 %v2952_v36, %v938_v48 }
 0x204   : > { %v1017_v58 = vadd.f32 %v1016_v37, %v937_v35  ;;  %v3831_v7 = vadd.f32 %v1501_v38, %v937_v35 }
 0x205   : > { %v1039_v9 = vsel %vm1035_vm11, %v1022_v61, -inf  ;;  %v1523_v21 = vsel %vm1035_vm11, %v3837_v13, -inf }
 0x206   : > { %v2907_v39 = vpop.f32.mrb[6].mxu0  ;;  %v2955_v40 = vpop.f32.mrb[8].mxu1  ;;  %v1036_v5 = vsel %vm1035_vm11, %v1017_v58, -inf  ;;  %v1520_v18 = vsel %vm1035_vm11, %v3831_v7, -inf }
 0x207   : > { %v1026_v41 = vpop.f32.mrb[7].mxu0  ;;  %v1511_v42 = vpop.f32.mrb[9].mxu1  ;;  %v3833_v8 = vadd.f32 %v2907_v39, %v940_v1  ;;  %v3845_v19 = vadd.f32 %v2955_v40, %v940_v1 }
 0x208   : > { %v1027_v62 = vadd.f32 %v1026_v41, %v939_v53  ;;  %v3839_v16 = vadd.f32 %v1511_v42, %v939_v53 }
 0x209   : > { %v1046_v17 = vsel %vm1045_vm12, %v3833_v8, -inf  ;;  %v1529_v31 = vsel %vm1045_vm12, %v3845_v19, -inf }
 0x20a   : > { %v1042_v12 = vsel %vm1035_vm11, %v1027_v62, -inf  ;;  %v1526_v22 = vsel %vm1035_vm11, %v3839_v16, -inf }
 0x20e   : > { %v2916_v43 = vpop.f32.mrb[8].mxu0  ;;  %v2976_v44 = vpop.f32.mrb[10].mxu1 }
 0x20f   : > { %v1159_v45 = vpop.f32.mrb[9].mxu0  ;;  %v1745_v46 = vpop.f32.mrb[11].mxu1  ;;  %v3817_v49 = vadd.f32 %v2916_v43, %v938_v48  ;;  %v3853_v25 = vadd.f32 %v2976_v44, %v938_v48 }
 0x210   : > { %v1160_v47 = vadd.f32 %v1159_v45, %v937_v35  ;;  %v3847_v20 = vadd.f32 %v1745_v46, %v937_v35 }
 0x211   : > { %v1181_v2 = vsel %vm1035_vm11, %v3817_v49, -inf  ;;  %v1767_v33 = vsel %vm1035_vm11, %v3853_v25, -inf }
 0x212   : > { %v2919_v50 = vpop.f32.mrb[10].mxu0  ;;  %v2979_v51 = vpop.f32.mrb[12].mxu1  ;;  %v1178_v52 = vsel %vm1035_vm11, %v1160_v47, -inf  ;;  %v1764_v0 = vsel %vm1035_vm11, %v3847_v20, -inf }
 0x213   : > { %v1169_v55 = vpop.f32.mrb[11].mxu0  ;;  %v1755_v56 = vpop.f32.mrb[13].mxu1  ;;  %1179 = vmax.xlane.f32.xlu0 %v1178_v52  ;;  %v1175_v59 = vadd.f32 %v2919_v50, %v940_v1  ;;  %v3861_v32 = vadd.f32 %v2979_v51, %v940_v1 }
 0x214   : > { %v1170_v57 = vadd.f32 %v1169_v55, %v939_v53  ;;  %v3855_v29 = vadd.f32 %v1755_v56, %v939_v53 }
 0x215   : > { %v1187_v63 = vsel %vm1045_vm12, %v1175_v59, -inf  ;;  %v1773_v36 = vsel %vm1045_vm12, %v3861_v32, -inf }
 0x216   : > { %v1184_v60 = vsel %vm1035_vm11, %v1170_v57, -inf  ;;  %v1770_v34 = vsel %vm1035_vm11, %v3855_v29, -inf }
 0x217   : > { %1185 = vmax.xlane.f32.xlu1 %v1184_v60  ;;  %1182 = vmax.xlane.f32.xlu0 %v1181_v2 }
 0x21b   : > { %1188 = vmax.xlane.f32.xlu1 %v1187_v63  ;;  %1037 = vmax.xlane.f32.xlu0 %v1036_v5 }
 0x21f   : > { %1040 = vmax.xlane.f32.xlu1 %v1039_v9  ;;  %1043 = vmax.xlane.f32.xlu0 %v1042_v12 }
 0x223   : > { %1047 = vmax.xlane.f32.xlu1 %v1046_v17  ;;  %1521 = vmax.xlane.f32.xlu0 %v1520_v18 }
 0x227   : > { %1524 = vmax.xlane.f32.xlu1 %v1523_v21  ;;  %1527 = vmax.xlane.f32.xlu0 %v1526_v22 }
 0x22b   : > { %1530 = vmax.xlane.f32.xlu1 %v1529_v31  ;;  %1765 = vmax.xlane.f32.xlu0 %v1764_v0 }
 0x22f   : > { %1768 = vmax.xlane.f32.xlu1 %v1767_v33  ;;  %1771 = vmax.xlane.f32.xlu0 %v1770_v34 }
 0x233   : > { %1774 = vmax.xlane.f32.xlu1 %v1773_v36 }
 0x2a0   : > { %v1180_v37 = vpop.xlane.xlu0 %1179 }
 0x2a1   : > { %v1190_v38 = vsub.f32 %v1160_v47, %v1180_v37 }
 0x2a3   : > { %v1194_v39 = vmul.f32 1.442695, %v1190_v38 }
 0x2a4   : > { %v1186_v40 = vpop.xlane.xlu1 %1185  ;;  %v1183_v41 = vpop.xlane.xlu0 %1182 }
 0x2a5   : > { %3405 = vpow2.f32 %v1194_v39  ;;  %v1192_v42 = vsub.f32 %v1170_v57, %v1186_v40  ;;  %v1191_v43 = vsub.f32 %v3817_v49, %v1183_v41 }
 0x2a7   : > { %v1198_v44 = vmul.f32 1.442695, %v1192_v42  ;;  %v1196_v35 = vmul.f32 1.442695, %v1191_v43 }
 0x2a8   : > { %v1189_v45 = vpop.xlane.xlu1 %1188  ;;  %v1038_v46 = vpop.xlane.xlu0 %1037 }
 0x2a9   : > { %3407 = vpow2.f32 %v1198_v44  ;;  %v1193_v48 = vsub.f32 %v1175_v59, %v1189_v45  ;;  %v1049_v50 = vsub.f32 %v1017_v58, %v1038_v46 }
 0x2aa   : > { %3409 = vpow2.f32 %v1196_v35 }
 0x2ab   : > { %v1200_v51 = vmul.f32 1.442695, %v1193_v48  ;;  %v1053_v52 = vmul.f32 1.442695, %v1049_v50 }
 0x2ac   : > { %v1041_v53 = vpop.xlane.xlu1 %1040  ;;  %v1044_v55 = vpop.xlane.xlu0 %1043 }
 0x2ad   : > { %3411 = vpow2.f32 %v1200_v51  ;;  %v1050_v47 = vsub.f32 %v1022_v61, %v1041_v53  ;;  %v1051_v56 = vsub.f32 %v1027_v62, %v1044_v55 }
 0x2ae   : > { %3413 = vpow2.f32 %v1053_v52 }
 0x2af   : > { %v3870_v1 = vpop.eup %3405  ;;  %v1055_v57 = vmul.f32 1.442695, %v1050_v47  ;;  %v1057_v49 = vmul.f32 1.442695, %v1051_v56 }
 0x2b0   : > { %v1048_v60 = vpop.xlane.xlu1 %1047  ;;  %v1522_v2 = vpop.xlane.xlu0 %1521  ;;  %v1202_v63 = vsel %vm1035_vm11, %v3870_v1, 0.0 }
 0x2b1   : > { %3415 = vpow2.f32 %v1055_v57  ;;  %v1052_v58 = vsub.f32 %v3833_v8, %v1048_v60  ;;  %v1532_v59 = vsub.f32 %v3831_v7, %v1522_v2  ;;  %1203 = vadd.xlane.f32.xlu0 %v1202_v63 }
 0x2b2   : > { %3417 = vpow2.f32 %v1057_v49 }
 0x2b3   : > { %v3876_v5 = vpop.eup %3407  ;;  %v1059_v61 = vmul.f32 1.442695, %v1052_v58  ;;  %v1536_v62 = vmul.f32 1.442695, %v1532_v59 }
 0x2b4   : > { %v3878_v9 = vpop.eup %3409  ;;  %v1525_v12 = vpop.xlane.xlu1 %1524  ;;  %v1208_v18 = vsel %vm1035_vm11, %v3876_v5, 0.0 }
 0x2b5   : > { %v1528_v17 = vpop.xlane.xlu0 %1527  ;;  %3419 = vpow2.f32 %v1059_v61  ;;  %v1533_v21 = vsub.f32 %v3837_v13, %v1525_v12  ;;  %v1205_v7 = vsel %vm1035_vm11, %v3878_v9, 0.0  ;;  %1209 = vadd.xlane.f32.xlu0 %v1208_v18  ;;  %v1915_v18 = vld [vmem:[%s3627_s3] sm:$0xff] }
 0x2b6   : > { %v1534_v8 = vsub.f32 %v3839_v16, %v1528_v17  ;;  %3421 = vpow2.f32 %v1536_v62  ;;  %1206 = vadd.xlane.f32.xlu1 %v1205_v7 }
 0x2b7   : > { %v3886_v22 = vpop.eup %3411  ;;  %v1538_v31 = vmul.f32 1.442695, %v1533_v21  ;;  %v1916_v21 = vld [vmem:[%s3627_s3 + $0x8] sm:$0xff] }
 0x2b8   : > { %v1540_v0 = vmul.f32 1.442695, %v1534_v8  ;;  %v3888_v33 = vpop.eup %3413  ;;  %v1531_v34 = vpop.xlane.xlu1 %1530  ;;  %v1211_v37 = vsel %vm1045_vm12, %v3886_v22, 0.0  ;;  %v1917_v8 = vld [vmem:[%s3627_s3 + $0x10] sm:$0xff]  ;;  %v3240_v7 = vpack.c.bf16 %v1916_v21, %v1915_v18 }
 0x2b9   : > { %v1766_v36 = vpop.xlane.xlu0 %1765  ;;  %3423 = vpow2.f32 %v1538_v31  ;;  %v1535_v13 = vsub.f32 %v3845_v19, %v1531_v34  ;;  %v1061_v38 = vsel %vm1035_vm11, %v3888_v33, 0.0  ;;  %v1918_v31 = vld [vmem:[%s3627_s3 + $0x18] sm:$0xff]  ;;  %v1919_v34 = vld [vmem:[%s3627_s3 + $0x20] sm:$0xff] }
 0x2ba   : > { %v1776_v16 = vsub.f32 %v3847_v20, %v1766_v36  ;;  %3425 = vpow2.f32 %v1540_v0  ;;  %1212 = vadd.xlane.f32.xlu1 %v1211_v37  ;;  %1062 = vadd.xlane.f32.xlu0 %v1061_v38  ;;  %v3244_v0 = vpack.c.bf16 %v1918_v31, %v1917_v8  ;;  %v1920_v36 = vld [vmem:[%s3627_s3 + $0x28] sm:$0xff] }
 0x2bb   : > { %v3896_v39 = vpop.eup %3415  ;;  %v1542_v40 = vmul.f32 1.442695, %v1535_v13  ;;  %3241 = vmatprep.subr.bf16.mxu1 %v3240_v7  ;;  %v3248_v37 = vpack.c.bf16 %v1920_v36, %v1919_v34  ;;  %v1921_v13 = vld [vmem:[%s3627_s3 + $0x30] sm:$0xff] }
 0x2bc   : > { %v1780_v41 = vmul.f32 1.442695, %v1776_v16  ;;  %v3898_v42 = vpop.eup %3417  ;;  %v1769_v43 = vpop.xlane.xlu1 %1768  ;;  %v1064_v35 = vsel %vm1035_vm11, %v3896_v39, 0.0  ;;  %3243 = vmatpush3.bf16.msra.mxu1 %v3240_v7  ;;  %v1922_v16 = vld [vmem:[%s3627_s3 + $0x38] sm:$0xff] }
 0x2bd   : > { %v1772_v44 = vpop.xlane.xlu0 %1771  ;;  %3427 = vpow2.f32 %v1542_v40  ;;  %v1777_v19 = vsub.f32 %v3853_v25, %v1769_v43  ;;  %v1067_v45 = vsel %vm1035_vm11, %v3898_v42, 0.0  ;;  %3245 = vmatprep.subr.bf16.mxu1 %v3244_v0  ;;  %v3252_v38 = vpack.c.bf16 %v1922_v16, %v1921_v13  ;;  %v1923_v40 = vld [vmem:[%s3627_s3 + $0x40] sm:$0xff] }
 0x2be   : > { %v1778_v20 = vsub.f32 %v3855_v29, %v1772_v44  ;;  %3429 = vpow2.f32 %v1780_v41  ;;  %1065 = vadd.xlane.f32.xlu1 %v1064_v35  ;;  %1068 = vadd.xlane.f32.xlu0 %v1067_v45  ;;  %v1924_v41 = vld [vmem:[%s3627_s3 + $0x48] sm:$0xff]  ;;  %v1925_v44 = vld [vmem:[%s3627_s3 + $0x50] sm:$0xff]  ;;  %v1926_v35 = vld [vmem:[%s3627_s3 + $0x58] sm:$0xff] }
 0x2bf   : > { %v3906_v46 = vpop.eup %3419  ;;  %v1782_v48 = vmul.f32 1.442695, %v1777_v19  ;;  %v3256_v43 = vpack.c.bf16 %v1924_v41, %v1923_v40  ;;  %v3260_v19 = vpack.c.bf16 %v1926_v35, %v1925_v44  ;;  %v1928_v45 = vld [vmem:[%s3627_s3 + $0x68] sm:$0xff] }
 0x2c0   : > { %v1784_v50 = vmul.f32 1.442695, %v1778_v20  ;;  %v3908_v51 = vpop.eup %3421  ;;  %v1775_v52 = vpop.xlane.xlu1 %1774  ;;  %v1070_v53 = vsel %vm1045_vm12, %v3906_v46, 0.0  ;;  %3247 = vmatpush3.bf16.msra.mxu1 %v3244_v0  ;;  %v1927_v20 = vld [vmem:[%s3627_s3 + $0x60] sm:$0xff] }
 0x2c1   : > { %3431 = vpow2.f32 %v1782_v48  ;;  %v1779_v25 = vsub.f32 %v3861_v32, %v1775_v52  ;;  %v1544_v29 = vsel %vm1035_vm11, %v3908_v51, 0.0  ;;  %3249 = vmatprep.subr.bf16.mxu1 %v3248_v37  ;;  %v3264_v48 = vpack.c.bf16 %v1928_v45, %v1927_v20  ;;  %v1930_v52 = vld [vmem:[%s3627_s3 + $0x78] sm:$0xff] }
 0x2c2   : > { %3433 = vpow2.f32 %v1784_v50  ;;  %1071 = vadd.xlane.f32.xlu1 %v1070_v53  ;;  %1545 = vadd.xlane.f32.xlu0 %v1544_v29  ;;  %v1929_v50 = vld [vmem:[%s3627_s3 + $0x70] sm:$0xff] }
 0x2c3   : > { %v3915_v55 = vpop.eup %3423  ;;  %v1786_v47 = vmul.f32 1.442695, %v1779_v25  ;;  %v3268_v53 = vpack.c.bf16 %v1930_v52, %v1929_v50 }
 0x2c4   : > { %v3917_v56 = vpop.eup %3425  ;;  %v1547_v57 = vsel %vm1035_vm11, %v3915_v55, 0.0  ;;  %3251 = vmatpush3.bf16.msra.mxu1 %v3248_v37 }
 0x2c5   : > { %3435 = vpow2.f32 %v1786_v47  ;;  %v1550_v49 = vsel %vm1035_vm11, %v3917_v56, 0.0  ;;  %3253 = vmatprep.subr.bf16.mxu1 %v3252_v38 }
 0x2c6   : > { %1548 = vadd.xlane.f32.xlu1 %v1547_v57  ;;  %1551 = vadd.xlane.f32.xlu0 %v1550_v49 }
 0x2c7   : > { %v3923_v32 = vpop.eup %3427 }
 0x2c8   : > { %v3925_v60 = vpop.eup %3429  ;;  %v1553_v2 = vsel %vm1045_vm12, %v3923_v32, 0.0  ;;  %3255 = vmatpush3.bf16.msra.mxu1 %v3252_v38 }
 0x2c9   : > { %v1788_v63 = vsel %vm1035_vm11, %v3925_v60, 0.0  ;;  %3257 = vmatprep.subr.bf16.mxu1 %v3256_v43 }
 0x2ca   : > { %1554 = vadd.xlane.f32.xlu1 %v1553_v2  ;;  %1789 = vadd.xlane.f32.xlu0 %v1788_v63 }
 0x2cb   : > { %v3931_v58 = vpop.eup %3431 }
 0x2cc   : > { %v3933_v59 = vpop.eup %3433  ;;  %v1791_v61 = vsel %vm1035_vm11, %v3931_v58, 0.0  ;;  %3259 = vmatpush3.bf16.msra.mxu1 %v3256_v43 }
 0x2cd   : > { %v1794_v62 = vsel %vm1035_vm11, %v3933_v59, 0.0  ;;  %3261 = vmatprep.subr.bf16.mxu1 %v3260_v19 }
 0x2ce   : > { %1792 = vadd.xlane.f32.xlu1 %v1791_v61  ;;  %1795 = vadd.xlane.f32.xlu0 %v1794_v62 }
 0x2cf   : > { %v3939_v12 = vpop.eup %3435 }
 0x2d0   : > { %v1797_v17 = vsel %vm1045_vm12, %v3939_v12, 0.0  ;;  %3263 = vmatpush3.bf16.msra.mxu1 %v3260_v19 }
 0x2d1   : > { %3265 = vmatprep.subr.bf16.mxu1 %v3264_v48 }
 0x2d2   : > { %1798 = vadd.xlane.f32.xlu1 %v1797_v17 }
 0x2d4   : > { %3267 = vmatpush3.bf16.msra.mxu1 %v3264_v48 }
 0x2d5   : > { %3269 = vmatprep.subr.bf16.mxu1 %v3268_v53 }
 0x2d8   : > { %3271 = vmatpush3.bf16.msra.mxu1 %v3268_v53 }
 0x33e   : > { %v1204_v25 = vpop.xlane.xlu0 %1203 }
 0x33f   : > { %3437 = vrcp.f32 %v1204_v25 }
 0x342   : > { %v1210_v29 = vpop.xlane.xlu0 %1209 }
 0x343   : > { %v1207_v47 = vpop.xlane.xlu1 %1206  ;;  %3439 = vrcp.f32 %v1210_v29 }
 0x344   : > { %3441 = vrcp.f32 %v1207_v47 }
 0x347   : > { %v1213_v57 = vpop.xlane.xlu1 %1212  ;;  %v1063_v49 = vpop.xlane.xlu0 %1062 }
 0x348   : > { %3443 = vrcp.f32 %v1213_v57 }
 0x349   : > { %v3438_v2 = vpop.eup %3437  ;;  %3445 = vrcp.f32 %v1063_v49 }
 0x34a   : > { %v1218_v63 = vmul.f32 %v3438_v2, %v3870_v1 }
 0x34b   : > { %v1066_v61 = vpop.xlane.xlu1 %1065  ;;  %v1069_v62 = vpop.xlane.xlu0 %1068 }
 0x34c   : > { %3447 = vrcp.f32 %v1066_v61  ;;  %2926 = vmatprep.mubr.msk.f32.mxu0 %vm1035_vm11, %v1218_v63 }
 0x34d   : > { %v3440_v17 = vpop.eup %3439  ;;  %3449 = vrcp.f32 %v1069_v62 }
 0x34e   : > { %v3442_v18 = vpop.eup %3441  ;;  %v1220_v21 = vmul.f32 %v3440_v17, %v3876_v5 }
 0x34f   : > { %v1219_v8 = vmul.f32 %v3442_v18, %v3878_v9  ;;  %v1072_v7 = vpop.xlane.xlu1 %1071  ;;  %v1546_v31 = vpop.xlane.xlu0 %1545 }
 0x350   : > { %3451 = vrcp.f32 %v1072_v7  ;;  %v2098_v7 = vld [vmem:[%s3636_s0 + $0x8] sm:$0xff] }
 0x351   : > { %3453 = vrcp.f32 %v1546_v31  ;;  %2927 = vmatmul.mubr.msk.f32.vlgmr.msra.gmra.mrb[12].mxu0 %vm1035_vm11, %v1219_v8  ;;  %v2097_v8 = vld [vmem:[%s3636_s0] sm:$0xff]  ;;  %v2099_v31 = vld [vmem:[%s3636_s0 + $0x10] sm:$0xff] }
 0x352   : > { %v3444_v0 = vpop.eup %3443  ;;  %3223 = vmatpush3.bf16.msra.mxu0 %v3787_v10  ;;  %2929 = vmatprep.mubr.msk.f32.mxu0 %vm1035_vm11, %v1220_v21 }
 0x353   : > { %v3446_v1 = vpop.eup %3445  ;;  %2936 = vmatprep.subr.msk.mxu0 %vm1237_vm10, %v3780_v4  ;;  %v1549_v34 = vpop.xlane.xlu1 %1548  ;;  %v1221_v5 = vmul.f32 %v3444_v0, %v3886_v22  ;;  %v3272_v0 = vpack.c.bf16 %v2098_v7, %v2097_v8  ;;  %v2219_v8 = vld [vmem:[%s3645_s5 + $0x50] sm:$0xff]  ;;  %v2220_v7 = vld [vmem:[%s3645_s5 + $0x58] sm:$0xff] }
 0x354   : > { %v1552_v36 = vpop.xlane.xlu0 %1551  ;;  %3455 = vrcp.f32 %v1549_v34  ;;  %v1077_v9 = vmul.f32 %v3446_v1, %v3888_v33  ;;  %v2100_v1 = vld [vmem:[%s3636_s0 + $0x18] sm:$0xff] }
 0x355   : > { %3457 = vrcp.f32 %v1552_v36  ;;  %2930 = vmatmul.mubr.msk.f32.gmra.mrb[14].mxu0 %vm1035_vm11, %v1221_v5  ;;  %v3276_v34 = vpack.c.bf16 %v2100_v1, %v2099_v31  ;;  %v2102_v36 = vld [vmem:[%s3636_s0 + $0x28] sm:$0xff]  ;;  %v3324_v31 = vpack.c.bf16 %v2220_v7, %v2219_v8 }
 0x356   : > { %v3448_v37 = vpop.eup %3447  ;;  %2937 = vmatpush3.msk.msra.mxu0 %vm1237_vm10, %v3780_v4  ;;  %2938 = vmatprep.mubr.msk.f32.mxu0 %vm1035_vm11, %v1077_v9  ;;  %v2222_v1 = vld [vmem:[%s3645_s5 + $0x68] sm:$0xff] }
 0x357   : > { %v3450_v10 = vpop.eup %3449  ;;  %v1078_v13 = vmul.f32 %v3448_v37, %v3896_v39  ;;  %3229 = vmatprep.subr.bf16.mxu0 %v3793_v14  ;;  %v1555_v16 = vpop.xlane.xlu1 %1554 }
 0x358   : > { %v1790_v38 = vpop.xlane.xlu0 %1789  ;;  %3459 = vrcp.f32 %v1555_v16  ;;  %v1079_v22 = vmul.f32 %v3450_v10, %v3898_v42 }
 0x359   : > { %3461 = vrcp.f32 %v1790_v38  ;;  %2939 = vmatmul.mubr.msk.f32.vlgmr.msra.gmra.mrb[12].mxu0 %vm1035_vm11, %v1078_v13 }
 0x35a   : > { %v3452_v33 = vpop.eup %3451  ;;  %3231 = vmatpush3.bf16.msra.mxu0 %v3793_v14  ;;  %2941 = vmatprep.mubr.msk.f32.mxu0 %vm1035_vm11, %v1079_v22 }
 0x35b   : > { %v3454_v4 = vpop.eup %3453  ;;  %2960 = vmatprep.subr.msk.mxu0 %vm1237_vm10, %v3784_v6  ;;  %v1793_v39 = vpop.xlane.xlu1 %1792  ;;  %v1080_v41 = vmul.f32 %v3452_v33, %v3906_v46 }
 0x35c   : > { %v1796_v40 = vpop.xlane.xlu0 %1795  ;;  %3463 = vrcp.f32 %v1793_v39  ;;  %v1560_v43 = vmul.f32 %v3454_v4, %v3908_v51 }
 0x35d   : > { %3465 = vrcp.f32 %v1796_v40  ;;  %2942 = vmatmul.mubr.msk.f32.gmra.mrb[14].mxu0 %vm1035_vm11, %v1080_v41 }
 0x35e   : > { %v3456_v42 = vpop.eup %3455  ;;  %2961 = vmatpush3.msk.msra.mxu0 %vm1237_vm10, %v3784_v6  ;;  %2962 = vmatprep.mubr.msk.f32.mxu0 %vm1035_vm11, %v1560_v43 }
 0x35f   : > { %v3458_v14 = vpop.eup %3457  ;;  %v1561_v44 = vmul.f32 %v3456_v42, %v3915_v55  ;;  %3237 = vmatprep.subr.bf16.mxu0 %v3795_v15  ;;  %v1799_v35 = vpop.xlane.xlu1 %1798 }
 0x360   : > { %3467 = vrcp.f32 %v1799_v35  ;;  %v1562_v46 = vmul.f32 %v3458_v14, %v3917_v56 }
 0x361   : > { %2963 = vmatmul.mubr.msk.f32.vlgmr.msra.gmra.mrb[12].mxu0 %vm1035_vm11, %v1561_v44 }
 0x362   : > { %v3460_v51 = vpop.eup %3459  ;;  %3239 = vmatpush3.bf16.msra.mxu0 %v3795_v15  ;;  %2965 = vmatprep.mubr.msk.f32.mxu0 %vm1035_vm11, %v1562_v46 }
 0x363   : > { %v3462_v19 = vpop.eup %3461  ;;  %2984 = vmatprep.subr.msk.mxu0 %vm1237_vm10, %v3790_v11  ;;  %v1563_v6 = vmul.f32 %v3460_v51, %v3923_v32 }
 0x364   : > { %v1804_v55 = vmul.f32 %v3462_v19, %v3925_v60 }
 0x365   : > { %2966 = vmatmul.mubr.msk.f32.gmra.mrb[14].mxu0 %vm1035_vm11, %v1563_v6  ;;  %v2103_v6 = vld [vmem:[%s3636_s0 + $0x30] sm:$0xff] }
 0x366   : > { %v3464_v20 = vpop.eup %3463  ;;  %2985 = vmatpush3.msk.msra.mxu0 %vm1237_vm10, %v3790_v11  ;;  %2986 = vmatprep.mubr.msk.f32.mxu0 %vm1035_vm11, %v1804_v55  ;;  %v2104_v55 = vld [vmem:[%s3636_s0 + $0x38] sm:$0xff] }
 0x367   : > { %v3466_v56 = vpop.eup %3465  ;;  %v1805_v15 = vmul.f32 %v3464_v20, %v3931_v58  ;;  %v2690_v58 = vld [vmem:[%s4220_s27] ss:$0 sm:$0xff]  ;;  %3273 = vmatprep.subr.bf16.mxu0 %v3272_v0  ;;  %v3284_v20 = vpack.c.bf16 %v2104_v55, %v2103_v6 }
 0x368   : > { %v1806_v45 = vmul.f32 %v3466_v56, %v3933_v59  ;;  %v2105_v56 = vld [vmem:[%s3636_s0 + $0x40] sm:$0xff] }
 0x369   : > { %2987 = vmatmul.mubr.msk.f32.vlgmr.msra.gmra.mrb[12].mxu0 %vm1035_vm11, %v1805_v15  ;;  %v2106_v15 = vld [vmem:[%s3636_s0 + $0x48] sm:$0xff] }
 0x36a   : > { %v3468_v48 = vpop.eup %3467  ;;  %2989 = vmatprep.mubr.msk.f32.mxu0 %vm1035_vm11, %v1806_v45  ;;  %3275 = vmatpush3.bf16.msra.mxu0 %v3272_v0  ;;  %v3288_v45 = vpack.c.bf16 %v2106_v15, %v2105_v56  ;;  %v2221_v0 = vld [vmem:[%s3645_s5 + $0x60] sm:$0xff] }
 0x36b   : > { %v1807_v32 = vmul.f32 %v3468_v48, %v3939_v12  ;;  %3277 = vmatprep.subr.bf16.mxu0 %v3276_v34  ;;  %v2107_v48 = vld [vmem:[%s3636_s0 + $0x50] sm:$0xff] }
 0x36d   : > { %2990 = vmatmul.mubr.msk.f32.gmra.mrb[14].mxu0 %vm1035_vm11, %v1807_v32  ;;  %v2108_v32 = vld [vmem:[%s3636_s0 + $0x58] sm:$0xff] }
 0x36e   : > { %3279 = vmatpush3.bf16.msra.mxu0 %v3276_v34  ;;  %v3328_v34 = vpack.c.bf16 %v2222_v1, %v2221_v0 }
 0x43c   : > { %v2988_v60 = vpop.f32.mrb[12].mxu0 }
 0x43d   : > { %v1892_v50 = vpop.f32.mrb[13].mxu0 }
 0x43e   : > { %3024 = vmatprep.mubr.f32.mxu1 %v1892_v50  ;;  %v2109_v50 = vld [vmem:[%s3636_s0 + $0x60] sm:$0xff] }
 0x43f   : > { %3025 = vmatmul.mubr.f32.vlgmr.msra.gmra.mrb[14].mxu1 %v2988_v60  ;;  %v3292_v60 = vpack.c.bf16 %v2108_v32, %v2107_v48 }
 0x440   : > { %v2991_v11 = vpop.f32.mrb[14].mxu0 }
 0x441   : > { %v1902_v52 = vpop.f32.mrb[15].mxu0 }
 0x442   : > { %3027 = vmatprep.mubr.f32.mxu1 %v1902_v52 }
 0x443   : > { %3028 = vmatmul.mubr.f32.gmra.mrb[16].mxu1 %v2991_v11  ;;  %v2110_v11 = vld [vmem:[%s3636_s0 + $0x68] sm:$0xff] }
 0x444   : > { %v3296_v52 = vpack.c.bf16 %v2110_v11, %v2109_v50 }
 0x512   : > { %v3026_v59 = vpop.f32.mrb[14].mxu1 }
 0x513   : > { %v2010_v53 = vadd.f32 %v3026_v59, %v2690_v58  ;;  %v2004_v25 = vpop.f32.mrb[15].mxu1  ;;  %v2112_v59 = vld [vmem:[%s3636_s0 + $0x78] sm:$0xff] }
 0x514   : > { %v2005_v29 = vadd.f32 %v2690_v58, %v2004_v25  ;;  %v2209_v25 = vld [vmem:[%s3645_s5] sm:$0xff] }
 0x515   : > { %v2024_v12 = vadd.f32 %v2010_v53, %v3729_v23 }
 0x516   : > { %v3029_v47 = vpop.f32.mrb[16].mxu1  ;;  %v2023_v57 = vadd.f32 %v2005_v29, %v3703_v54  ;;  %v2210_v29 = vld [vmem:[%s3645_s5 + $0x8] sm:$0xff] }
 0x517   : > { %v2020_v49 = vadd.f32 %v3029_v47, %v2690_v58  ;;  %v2014_v2 = vpop.f32.mrb[17].mxu1  ;;  %v2028_v63 = vmul.f32 %v3611_v3, %v2024_v12  ;;  %v2211_v12 = vld [vmem:[%s3645_s5 + $0x10] sm:$0xff]  ;;  %v3304_v47 = vpack.c.bf16 %v2210_v29, %v2209_v25 }
 0x518   : > { %v2015_v61 = vadd.f32 %v2690_v58, %v2014_v2  ;;  %v2027_v62 = vmul.f32 %v3611_v3, %v2023_v57  ;;  %v2111_v58 = vld [vmem:[%s3636_s0 + $0x70] sm:$0xff]  ;;  %v2212_v57 = vld [vmem:[%s3645_s5 + $0x18] sm:$0xff]  ;;  %v2213_v2 = vld [vmem:[%s3645_s5 + $0x20] sm:$0xff] }
 0x519   : > { %v2026_v17 = vadd.f32 %v2020_v49, %v3739_v26  ;;  %2033 = vadd.xlane.f32.xlu1 %v2028_v63  ;;  %v2101_v26 = vld [vmem:[%s3636_s0 + $0x20] sm:$0xff]  ;;  %v3300_v53 = vpack.c.bf16 %v2112_v59, %v2111_v58  ;;  %v3308_v49 = vpack.c.bf16 %v2212_v57, %v2211_v12  ;;  %3305 = vmatprep.subr.bf16.mxu1 %v3304_v47  ;;  %s4222_s0 = sld [smem:[#allocation10_spill]] (!%p2693_p5) }
 0x51a   : > { %2031 = vadd.xlane.f32.xlu0 %v2027_v62  ;;  %v2025_v23 = vadd.f32 %v2015_v61, %v3731_v24  ;;  %v3280_v24 = vpack.c.bf16 %v2102_v36, %v2101_v26  ;;  %3307 = vmatpush3.bf16.msra.mxu1 %v3304_v47 }
 0x51b   : > { %v2030_v54 = vmul.f32 %v3611_v3, %v2026_v17  ;;  %3309 = vmatprep.subr.bf16.mxu1 %v3308_v49  ;;  %v2216_v17 = vld [vmem:[%s3645_s5 + $0x38] sm:$0xff] }
 0x51c   : > { %v2029_v18 = vmul.f32 %v3611_v3, %v2025_v23  ;;  %3281 = vmatprep.subr.bf16.mxu0 %v3280_v24 }
 0x51d   : > { %v2037_v21 = vsel %vm1237_vm10, %v2030_v54, 0.0  ;;  %3283 = vmatpush3.bf16.msra.mxu0 %v3280_v24 }
 0x51e   : > { %2038 = vadd.xlane.f32.xlu1 %v2037_v21  ;;  %2035 = vadd.xlane.f32.xlu0 %v2029_v18 }
 0x51f   : > { %3285 = vmatprep.subr.bf16.mxu0 %v3284_v20  ;;  %3311 = vmatpush3.bf16.msra.mxu1 %v3308_v49 }
 0x521   : > { %3287 = vmatpush3.bf16.msra.mxu0 %v3284_v20 }
 0x522   : > { %3289 = vmatprep.subr.bf16.mxu0 %v3288_v45 }
 0x525   : > { %3291 = vmatpush3.bf16.msra.mxu0 %v3288_v45 }
 0x526   : > { %3293 = vmatprep.subr.bf16.mxu0 %v3292_v60 }
 0x529   : > { %3295 = vmatpush3.bf16.msra.mxu0 %v3292_v60  ;;  %v2224_v60 = vld [vmem:[%s3645_s5 + $0x78] sm:$0xff] }
 0x52a   : > { %3297 = vmatprep.subr.bf16.mxu0 %v3296_v52 }
 0x52d   : > { %3299 = vmatpush3.bf16.msra.mxu0 %v3296_v52 }
 0x52e   : > { %3301 = vmatprep.subr.bf16.mxu0 %v3300_v53 }
 0x531   : > { %3303 = vmatpush3.bf16.msra.mxu0 %v3300_v53 }
 0x5a6   : > { %v2034_v5 = vpop.xlane.xlu1 %2033 }
 0x5a7   : > { %v2041_v9 = vmul.f32 0.03125, %v2034_v5  ;;  %v2032_v37 = vpop.xlane.xlu0 %2031 }
 0x5a8   : > { %v2040_v10 = vmul.f32 0.03125, %v2032_v37 }
 0x5a9   : > { %v2045_v13 = vsub.f32 %v2028_v63, %v2041_v9  ;;  %v2214_v63 = vld [vmem:[%s3645_s5 + $0x28] sm:$0xff] }
 0x5aa   : > { %v2044_v16 = vsub.f32 %v2027_v62, %v2040_v10  ;;  %v3312_v61 = vpack.c.bf16 %v2214_v63, %v2213_v2  ;;  %v2215_v62 = vld [vmem:[%s3645_s5 + $0x30] sm:$0xff]  ;;  %v2692_v2 = vld [vmem:[%s672_s6] ss:$0 sm:$0xff] }
 0x5ab   : > { %v4029_v38 = vmul.f32 %v3611_v3, %v2045_v13  ;;  %v2039_v22 = vpop.xlane.xlu1 %2038  ;;  %v2036_v33 = vpop.xlane.xlu0 %2035  ;;  %v3316_v23 = vpack.c.bf16 %v2216_v17, %v2215_v62 }
 0x5ac   : > { %v4032_v4 = vmul.f32 %v3611_v3, %v2044_v16  ;;  %v2043_v39 = vmul.f32 0.03125, %v2039_v22  ;;  %v2042_v40 = vmul.f32 0.03125, %v2036_v33  ;;  %3313 = vmatprep.subr.bf16.mxu1 %v3312_v61 }
 0x5ad   : > { %v2053_v41 = vmul.f32 %v4029_v38, %v4029_v38  ;;  %3315 = vmatpush3.bf16.msra.mxu1 %v3312_v61 }
 0x5ae   : > { %v2047_v43 = vsub.f32 %v2030_v54, %v2043_v39  ;;  %v2046_v42 = vsub.f32 %v2029_v18, %v2042_v40  ;;  %v2052_v14 = vmul.f32 %v4032_v4, %v4032_v4  ;;  %v2217_v54 = vld [vmem:[%s3645_s5 + $0x40] sm:$0xff]  ;;  %v2218_v18 = vld [vmem:[%s3645_s5 + $0x48] sm:$0xff]  ;;  %3317 = vmatprep.subr.bf16.mxu1 %v3316_v23 }
 0x5af   : > { %2058 = vadd.xlane.f32.xlu1 %v2053_v41  ;;  %v3320_v21 = vpack.c.bf16 %v2218_v18, %v2217_v54  ;;  %v4074_v40 = vld [vmem:[%s3655_s2] sm:$0xf] }
 0x5b0   : > { %v4039_v44 = vmul.f32 %v3611_v3, %v2047_v43  ;;  %v4042_v35 = vmul.f32 %v3611_v3, %v2046_v42  ;;  %2056 = vadd.xlane.f32.xlu0 %v2052_v14  ;;  %v2084_v41 = vrot.slane %v4074_v40, %v846_v30 }
 0x5b1   : > { %3319 = vmatpush3.bf16.msra.mxu1 %v3316_v23 }
 0x5b2   : > { %v2054_v46 = vmul.f32 %v4042_v35, %v4042_v35  ;;  %v2055_v51 = vmul.f32 %v4039_v44, %v4039_v44  ;;  %3321 = vmatprep.subr.bf16.mxu1 %v3320_v21 }
 0x5b4   : > { %2060 = vadd.xlane.f32.xlu0 %v2054_v46  ;;  %v2062_v19 = vsel %vm1237_vm10, %v2055_v51, 0.0  ;;  %v2092_v46 = vrot.slane %v4074_v40, %v850_v28 }
 0x5b5   : > { %2063 = vadd.xlane.f32.xlu1 %v2062_v19  ;;  %3323 = vmatpush3.bf16.msra.mxu1 %v3320_v21 }
 0x5b6   : > { %3325 = vmatprep.subr.bf16.mxu1 %v3324_v31 }
 0x5b9   : > { %3327 = vmatpush3.bf16.msra.mxu1 %v3324_v31 }
 0x5ba   : > { %3329 = vmatprep.subr.bf16.mxu1 %v3328_v34 }
 0x5bd   : > { %3331 = vmatpush3.bf16.msra.mxu1 %v3328_v34 }
 0x63c   : > { %v2059_v26 = vpop.xlane.xlu1 %2058 }
 0x63d   : > { %v2066_v36 = vmul.f32 0.03125, %v2059_v26  ;;  %v2057_v24 = vpop.xlane.xlu0 %2056 }
 0x63e   : > { %v2065_v5 = vmul.f32 0.03125, %v2057_v24 }
 0x63f   : > { %v2070_v9 = vadd.f32 1e-05, %v2066_v36 }
 0x640   : > { %v2069_v37 = vadd.f32 1e-05, %v2065_v5 }
 0x641   : > { %3469 = vrsqrt.f32 %v2070_v9  ;;  %v2061_v10 = vpop.xlane.xlu0 %2060 }
 0x642   : > { %3471 = vrsqrt.f32 %v2069_v37  ;;  %v2067_v13 = vmul.f32 0.03125, %v2061_v10  ;;  %v2064_v16 = vpop.xlane.xlu1 %2063 }
 0x643   : > { %v2068_v22 = vmul.f32 0.03125, %v2064_v16 }
 0x644   : > { %v2071_v33 = vadd.f32 1e-05, %v2067_v13 }
 0x645   : > { %v2072_v39 = vadd.f32 1e-05, %v2068_v22 }
 0x646   : > { %3473 = vrsqrt.f32 %v2071_v33 }
 0x647   : > { %3475 = vrsqrt.f32 %v2072_v39 }
 0x64b   : > { %v3470_v43 = vpop.eup %3469 }
 0x64c   : > { %v3472_v42 = vpop.eup %3471  ;;  %v2078_v14 = vmul.f32 %v3470_v43, %v4029_v38 }
 0x64d   : > { %v2077_v51 = vmul.f32 %v3472_v42, %v4032_v4  ;;  %v2223_v4 = vld [vmem:[%s3645_s5 + $0x70] sm:$0xff] }
 0x64e   : > { %v2086_v19 = vmul.f32 %v2084_v41, %v2078_v14  ;;  %v3332_v50 = vpack.c.bf16 %v2224_v60, %v2223_v4 }
 0x64f   : > { %v2085_v6 = vmul.f32 %v2084_v41, %v2077_v51 }
 0x650   : > { %v3474_v55 = vpop.eup %3473  ;;  %v2094_v30 = vadd.f32 %v2092_v46, %v2086_v19  ;;  %3333 = vmatprep.subr.bf16.mxu1 %v3332_v50 }
 0x651   : > { %v3476_v20 = vpop.eup %3475  ;;  %v2093_v56 = vadd.f32 %v2092_v46, %v2085_v6  ;;  %v2079_v15 = vmul.f32 %v3474_v55, %v4042_v35  ;;  %3335 = vmatpush3.bf16.msra.mxu1 %v3332_v50  ;;  %v2691_v35 = vld [vmem:[%s664_s25] ss:$0 sm:$0xff]  ;;  %v2377_v50 = vsub.s32 2, %v3743_v27  ;;  %s4221_s25 = sld [smem:[#allocation9_spill]] (!%p2693_p5) }
 0x652   : > { %v2080_v45 = vmul.f32 %v3476_v20, %v4039_v44 }
 0x653   : > { %3062 = vmatprep.mubr.f32.mxu0 %v2093_v56  ;;  %v2087_v38 = vmul.f32 %v2084_v41, %v2079_v15 }
 0x654   : > { %3063 = vmatmul.mubr.f32.vlgmr.msra.gmra.mrb[16].mxu0 %v2094_v30  ;;  %v2088_v48 = vmul.f32 %v2084_v41, %v2080_v45 }
 0x655   : > { %v2095_v28 = vadd.f32 %v2092_v46, %v2087_v38 }
 0x656   : > { %v2096_v32 = vadd.f32 %v2092_v46, %v2088_v48 }
 0x657   : > { %3065 = vmatprep.mubr.f32.mxu0 %v2095_v28 }
 0x658   : > { %3066 = vmatmul.mubr.f32.gmra.mrb[18].mxu0 %v2096_v32 }
 0x727   : > { %v3064_v11 = vpop.f32.mrb[16].mxu0 }
 0x728   : > { %v2192_v44 = vadd.f32 %v3064_v11, %v2691_v35  ;;  %v2186_v52 = vpop.f32.mrb[17].mxu0 }
 0x729   : > { %v2187_v58 = vadd.f32 %v2691_v35, %v2186_v52  ;;  %v2378_v52 = vrot.slane %v4074_v40, %v2377_v50 }
 0x72a   : > { %v2206_v25 = vmax.f32 %v2192_v44, 0.0 }
 0x72b   : > { %v2205_v59 = vmax.f32 %v2187_v58, 0.0  ;;  %v3067_v53 = vpop.f32.mrb[18].mxu0 }
 0x72c   : > { %v2202_v29 = vadd.f32 %v3067_v53, %v2691_v35  ;;  %v2196_v12 = vpop.f32.mrb[19].mxu0 }
 0x72d   : > { %v2197_v47 = vadd.f32 %v2691_v35, %v2196_v12  ;;  %3100 = vmatprep.mubr.f32.mxu1 %v2205_v59  ;;  %v2385_v35 = vsub.s32 3, %v3743_v27 }
 0x72e   : > { %3101 = vmatmul.mubr.f32.vlgmr.msra.gmra.mrb[18].mxu1 %v2206_v25  ;;  %v2208_v49 = vmax.f32 %v2202_v29, 0.0 }
 0x72f   : > { %v2207_v57 = vmax.f32 %v2197_v47, 0.0  ;;  %v2386_v53 = vrot.slane %v4074_v40, %v2385_v35 }
 0x731   : > { %3103 = vmatprep.mubr.f32.mxu1 %v2207_v57 }
 0x732   : > { %3104 = vmatmul.mubr.f32.gmra.mrb[20].mxu1 %v2208_v49 }
 0x801   : > { %v3102_v63 = vpop.f32.mrb[18].mxu1 }
 0x802   : > { %v2298_v61 = vpop.f32.mrb[19].mxu1  ;;  %v2304_v21 = vadd.f32 %v3102_v63, %v2692_v2 }
 0x803   : > { %v2299_v62 = vadd.f32 %v2692_v2, %v2298_v61 }
 0x804   : > { %v2318_v26 = vadd.f32 %v2304_v21, %v2094_v30  ;;  %v2400_v21 = vld [vmem:[%s4221_s25 + $0x8] sm:$0xff] (!%p2693_p5) }
 0x805   : > { %v3105_v17 = vpop.f32.mrb[20].mxu1  ;;  %v2317_v23 = vadd.f32 %v2299_v62, %v2093_v56 }
 0x806   : > { %v2314_v54 = vadd.f32 %v3105_v17, %v2692_v2  ;;  %v2308_v18 = vpop.f32.mrb[21].mxu1  ;;  %v2322_v24 = vmul.f32 %v3611_v3, %v2318_v26 }
 0x807   : > { %v2309_v8 = vadd.f32 %v2692_v2, %v2308_v18  ;;  %v2321_v7 = vmul.f32 %v3611_v3, %v2317_v23  ;;  %v2399_v18 = vld [vmem:[%s4221_s25] sm:$0xff] (!%p2693_p5) }
 0x808   : > { %v2320_v31 = vadd.f32 %v2314_v54, %v2096_v32 }
 0x809   : > { %2325 = vadd.xlane.f32.xlu1 %v2321_v7  ;;  %v2319_v0 = vadd.f32 %v2309_v8, %v2095_v28  ;;  %v2401_v8 = vld [vmem:[%s4221_s25 + $0x10] sm:$0xff] (!%p2693_p5) }
 0x80a   : > { %v2324_v1 = vmul.f32 %v3611_v3, %v2320_v31  ;;  %v2402_v31 = vld [vmem:[%s4221_s25 + $0x18] sm:$0xff] (!%p2693_p5) }
 0x80b   : > { %v2323_v34 = vmul.f32 %v3611_v3, %v2319_v0  ;;  %v3340_v0 = vpack.c.bf16 (!%p2693_p5), %v2402_v31, %v2401_v8 }
 0x80c   : > { %v2331_v36 = vsel %vm1237_vm10, %v2324_v1, 0.0 }
 0x80d   : > { %2332 = vadd.xlane.f32.xlu0 %v2331_v36  ;;  %2329 = vadd.xlane.f32.xlu1 %v2323_v34  ;;  %v2405_v36 = vld [vmem:[%s4221_s25 + $0x30] sm:$0xff] (!%p2693_p5) }
 0x811   : > { %2327 = vadd.xlane.f32.xlu0 %v2322_v24 }
 0x896   : > { %v2326_v5 = vpop.xlane.xlu1 %2325 }
 0x897   : > { %v2334_v9 = vmul.f32 0.03125, %v2326_v5 }
 0x899   : > { %v2338_v37 = vsub.f32 %v2321_v7, %v2334_v9  ;;  %v3336_v7 = vpack.c.bf16 (!%p2693_p5), %v2400_v21, %v2399_v18  ;;  %v2407_v9 = vld [vmem:[%s4221_s25 + $0x40] sm:$0xff] (!%p2693_p5) }
 0x89a   : > { %v2333_v10 = vpop.xlane.xlu0 %2332  ;;  %v2330_v13 = vpop.xlane.xlu1 %2329 }
 0x89b   : > { %v2342_v16 = vmul.f32 %v3611_v3, %v2338_v37  ;;  %v2337_v22 = vmul.f32 0.03125, %v2333_v10  ;;  %v2336_v33 = vmul.f32 0.03125, %v2330_v13  ;;  %3337 = vmatprep.subr.bf16.mxu0 (!%p2693_p5), %v3336_v7  ;;  %3380 = vmatprep.subr.bf16.mxu1 (!%p2693_p5), %v3336_v7  ;;  %v2408_v37 = vld [vmem:[%s4221_s25 + $0x48] sm:$0xff] (!%p2693_p5)  ;;  %v2409_v13 = vld [vmem:[%s4221_s25 + $0x50] sm:$0xff] (!%p2693_p5) }
 0x89c   : > { %3339 = vmatpush3.bf16.msra.mxu0 (!%p2693_p5), %v3336_v7  ;;  %3388 = vmatpush3.bf16.msra.mxu1 (!%p2693_p5), %v3336_v7  ;;  %v3352_v10 = vpack.c.bf16 (!%p2693_p5), %v2408_v37, %v2407_v9 }
 0x89d   : > { %v2340_v39 = vsub.f32 %v2323_v34, %v2336_v33  ;;  %v2346_v41 = vmul.f32 %v2342_v16, %v2342_v16  ;;  %v2341_v43 = vsub.f32 %v2324_v1, %v2337_v22  ;;  %v2403_v1 = vld [vmem:[%s4221_s25 + $0x20] sm:$0xff] (!%p2693_p5)  ;;  %v2404_v34 = vld [vmem:[%s4221_s25 + $0x28] sm:$0xff] (!%p2693_p5)  ;;  %3341 = vmatprep.subr.bf16.mxu0 (!%p2693_p5), %v3340_v0  ;;  %3381 = vmatprep.subr.bf16.mxu1 (!%p2693_p5), %v3340_v0 }
 0x89e   : > { %v2328_v42 = vpop.xlane.xlu0 %2327  ;;  %v3344_v26 = vpack.c.bf16 (!%p2693_p5), %v2404_v34, %v2403_v1  ;;  %v2411_v33 = vld [vmem:[%s4221_s25 + $0x60] sm:$0xff] (!%p2693_p5) }
 0x89f   : > { %v2344_v14 = vmul.f32 %v3611_v3, %v2340_v39  ;;  %v2335_v46 = vmul.f32 0.03125, %v2328_v42  ;;  %2350 = vadd.xlane.f32.xlu0 %v2346_v41  ;;  %v2345_v6 = vmul.f32 %v3611_v3, %v2341_v43  ;;  %v2412_v39 = vld [vmem:[%s4221_s25 + $0x68] sm:$0xff] (!%p2693_p5)  ;;  %v2413_v43 = vld [vmem:[%s4221_s25 + $0x70] sm:$0xff] (!%p2693_p5)  ;;  %v2414_v42 = vld [vmem:[%s4221_s25 + $0x78] sm:$0xff] (!%p2693_p5) }
 0x8a0   : > { %3343 = vmatpush3.bf16.msra.mxu0 (!%p2693_p5), %v3340_v0  ;;  %3389 = vmatpush3.bf16.msra.mxu1 (!%p2693_p5), %v3340_v0  ;;  %v3360_v41 = vpack.c.bf16 (!%p2693_p5), %v2412_v39, %v2411_v33 }
 0x8a1   : > { %v2339_v51 = vsub.f32 %v2322_v24, %v2335_v46  ;;  %v2348_v19 = vmul.f32 %v2344_v14, %v2344_v14  ;;  %v2349_v56 = vmul.f32 %v2345_v6, %v2345_v6  ;;  %v2406_v24 = vld [vmem:[%s4221_s25 + $0x38] sm:$0xff] (!%p2693_p5)  ;;  %3345 = vmatprep.subr.bf16.mxu0 (!%p2693_p5), %v3344_v26  ;;  %3382 = vmatprep.subr.bf16.mxu1 (!%p2693_p5), %v3344_v26  ;;  %v2694_v46 = vld [vmem:[%s4222_s0] ss:$0 sm:$0xff] (!%p2693_p5) }
 0x8a2   : > { %v3348_v5 = vpack.c.bf16 (!%p2693_p5), %v2406_v24, %v2405_v36 }
 0x8a3   : > { %v2343_v55 = vmul.f32 %v3611_v3, %v2339_v51  ;;  %2354 = vadd.xlane.f32.xlu0 %v2348_v19  ;;  %v2356_v15 = vsel %vm1237_vm10, %v2349_v56, 0.0 }
 0x8a4   : > { %3347 = vmatpush3.bf16.msra.mxu0 (!%p2693_p5), %v3344_v26  ;;  %3390 = vmatpush3.bf16.msra.mxu1 (!%p2693_p5), %v3344_v26 }
 0x8a5   : > { %v2347_v20 = vmul.f32 %v2343_v55, %v2343_v55  ;;  %3349 = vmatprep.subr.bf16.mxu0 (!%p2693_p5), %v3348_v5  ;;  %3383 = vmatprep.subr.bf16.mxu1 (!%p2693_p5), %v3348_v5 }
 0x8a7   : > { %2352 = vadd.xlane.f32.xlu1 %v2347_v20 }
 0x8a8   : > { %3351 = vmatpush3.bf16.msra.mxu0 (!%p2693_p5), %v3348_v5  ;;  %3391 = vmatpush3.bf16.msra.mxu1 (!%p2693_p5), %v3348_v5 }
 0x8a9   : > { %3353 = vmatprep.subr.bf16.mxu0 (!%p2693_p5), %v3352_v10  ;;  %3384 = vmatprep.subr.bf16.mxu1 (!%p2693_p5), %v3352_v10 }
 0x8ab   : > { %2357 = vadd.xlane.f32.xlu1 %v2356_v15 }
 0x8ac   : > { %3355 = vmatpush3.bf16.msra.mxu0 (!%p2693_p5), %v3352_v10  ;;  %3392 = vmatpush3.bf16.msra.mxu1 (!%p2693_p5), %v3352_v10 }
 0x92c   : > { %v2351_v30 = vpop.xlane.xlu0 %2350 }
 0x92d   : > { %v2359_v45 = vmul.f32 0.03125, %v2351_v30 }
 0x92f   : > { %v2363_v38 = vadd.f32 1e-05, %v2359_v45 }
 0x930   : > { %v2355_v48 = vpop.xlane.xlu0 %2354 }
 0x931   : > { %3477 = vrsqrt.f32 %v2363_v38  ;;  %v2361_v28 = vmul.f32 0.03125, %v2355_v48 }
 0x933   : > { %v2365_v32 = vadd.f32 1e-05, %v2361_v28 }
 0x934   : > { %v2353_v4 = vpop.xlane.xlu1 %2352 }
 0x935   : > { %3479 = vrsqrt.f32 %v2365_v32  ;;  %v2360_v60 = vmul.f32 0.03125, %v2353_v4 }
 0x937   : > { %v2364_v3 = vadd.f32 1e-05, %v2360_v60 }
 0x938   : > { %v2358_v11 = vpop.xlane.xlu1 %2357 }
 0x939   : > { %3481 = vrsqrt.f32 %v2364_v3  ;;  %v2362_v44 = vmul.f32 0.03125, %v2358_v11 }
 0x93b   : > { %v3478_v58 = vpop.eup %3477  ;;  %v2366_v59 = vadd.f32 1e-05, %v2362_v44 }
 0x93c   : > { %v2371_v25 = vmul.f32 %v3478_v58, %v2342_v16  ;;  %v2410_v16 = vld [vmem:[%s4221_s25 + $0x58] sm:$0xff] (!%p2693_p5) }
 0x93d   : > { %3483 = vrsqrt.f32 %v2366_v59  ;;  %v3356_v22 = vpack.c.bf16 (!%p2693_p5), %v2410_v16, %v2409_v13 }
 0x93e   : > { %v2379_v29 = vmul.f32 %v2378_v52, %v2371_v25 }
 0x93f   : > { %v3480_v12 = vpop.eup %3479  ;;  %3357 = vmatprep.subr.bf16.mxu0 (!%p2693_p5), %v3356_v22  ;;  %3385 = vmatprep.subr.bf16.mxu1 (!%p2693_p5), %v3356_v22 }
 0x940   : > { %v2387_v47 = vadd.f32 %v2386_v53, %v2379_v29  ;;  %v2373_v57 = vmul.f32 %v3480_v12, %v2344_v14  ;;  %3359 = vmatpush3.bf16.msra.mxu0 (!%p2693_p5), %v3356_v22  ;;  %3393 = vmatpush3.bf16.msra.mxu1 (!%p2693_p5), %v3356_v22  ;;  %v3364_v14 = vpack.c.bf16 (!%p2693_p5), %v2414_v42, %v2413_v43 }
 0x941   : > { %3361 = vmatprep.subr.bf16.mxu0 (!%p2693_p5), %v3360_v41  ;;  %3386 = vmatprep.subr.bf16.mxu1 (!%p2693_p5), %v3360_v41 }
 0x942   : > { %2391 = vst [vmem:[#allocation2] sm:$0xff] %v2387_v47  ;;  %v2381_v49 = vmul.f32 %v2378_v52, %v2373_v57  ;;  %3138 = vmatprep.mubr.f32.mxu0 (!%p2693_p5), %v2387_v47 }
 0x943   : > { %v3482_v2 = vpop.eup %3481 }
 0x944   : > { %v2389_v63 = vadd.f32 %v2386_v53, %v2381_v49  ;;  %v2372_v27 = vmul.f32 %v3482_v2, %v2343_v55  ;;  %3363 = vmatpush3.bf16.msra.mxu0 (!%p2693_p5), %v3360_v41  ;;  %3394 = vmatpush3.bf16.msra.mxu1 (!%p2693_p5), %v3360_v41 }
 0x945   : > { %3365 = vmatprep.subr.bf16.mxu0 (!%p2693_p5), %v3364_v14  ;;  %3387 = vmatprep.subr.bf16.mxu1 (!%p2693_p5), %v3364_v14 }
 0x946   : > { %2393 = vst [vmem:[#allocation2 + $0x10] sm:$0xff] %v2389_v63  ;;  %v2380_v61 = vmul.f32 %v2378_v52, %v2372_v27  ;;  %3141 = vmatprep.mubr.f32.mxu1 (!%p2693_p5), %v2389_v63 }
 0x947   : > { %v3484_v62 = vpop.eup %3483 }
 0x948   : > { %v4112_v17 = vadd.f32 %v2386_v53, %v2380_v61  ;;  %v2374_v23 = vmul.f32 %v3484_v62, %v2345_v6  ;;  %2398 = sbr.rel (%p2693_p5) target bundleno = 2598 (0xa26), region = 92  ;;  %3367 = vmatpush3.bf16.msra.mxu0 (!%p2693_p5), %v3364_v14  ;;  %3395 = vmatpush3.bf16.msra.mxu1 (!%p2693_p5), %v3364_v14 }
 0x94a   : > { %2392 = vst [vmem:[#allocation2 + $0x8] sm:$0xff] %v4112_v17  ;;  %v2382_v40 = vmul.f32 %v2378_v52, %v2374_v23 }
 0x94b   : > { %3139 = vmatmul.mubr.f32.vlgmr.msra.gmra.mrb[0].mxu0 (!%p2693_p5), %v4112_v17 }
 0x94c   : > { %v2390_v54 = vadd.f32 %v2386_v53, %v2382_v40 }
 0x94e   : > { %2394 = vst [vmem:[#allocation2 + $0x18] sm:$0xf] %v2390_v54  ;;  %3142 = vmatmul.mubr.f32.vlgmr.msra.gmra.mrb[0].mxu1 (!%p2693_p5), %v2390_v54 }
 0xa1e   : > { %v3140_v51 = vpop.f32.mrb[0].mxu0 }
 0xa1f   : > { %v2494_v6 = vadd.f32 %v3140_v51, %v2694_v46  ;;  %v2488_v20 = vpop.f32.mrb[1].mxu0 }
 0xa20   : > { %v2489_v15 = vadd.f32 %v2694_v46, %v2488_v20 }
 0xa21   : > { %v3143_v19 = vpop.f32.mrb[0].mxu1  ;;  %2508 = vst [vmem:[%s4223_s20 + $0x8] sm:$0xff] %v2494_v6 }
 0xa22   : > { %v2504_v55 = vadd.f32 %v3143_v19, %v2694_v46  ;;  %v2498_v56 = vpop.f32.mrb[1].mxu1  ;;  %2507 = vst [vmem:[%s4223_s20] sm:$0xff] %v2489_v15 }
 0xa23   : > { %v2499_v30 = vadd.f32 %v2694_v46, %v2498_v56 }
 0xa24   : > { %2510 = vst [vmem:[%s4223_s20 + $0x18] sm:$0xf] %v2504_v55 }
 0xa25   : > { %2509 = vst [vmem:[%s4223_s20 + $0x10] sm:$0xff] %v2499_v30 }
 0xa26 PF: > { %s4224_s16 = sld [smem:[#allocation3_spill]] }
 0xa2c   : > { %s26_s21 = sadd.s32 1, %s4224_s16  }
 0xa2d   : > { %p23_p6 = scmp.ge.s32.totalorder %s26_s21, 4  }
 0xa2f   :  { %25 = sbr.rel (!%p23_p6) target bundleno = 9 (0x9), region = 148 }

// kernel: decoder_transformer_forward.3
= control target key start
LH: loop header
LB: loop body
LE: loop exit
PB: predicated region body
PF: predicated region fallthrough
CT: control target
= control target key end

     0   :  { %s11043_s0 = inlined_call_operand.vmem [shape: f32[54,128], index: 0, kind: input, shape index: {}]   ;;  %s11044_s1 = inlined_call_operand.vmem [shape: f32[20,128], index: 1, kind: input, shape index: {}]   ;;  %s11045_s2 = inlined_call_operand.vmem [shape: f32[54,54], index: 2, kind: input, shape index: {}]   ;;  %s11046_s3 = inlined_call_operand.vmem [shape: f32[54,20], index: 3, kind: input, shape index: {}]   ;;  %s11047_s4 = inlined_call_operand.vmem [shape: f32[2,128,384], index: 4, kind: input, shape index: {}]   ;;  %s11048_s5 = inlined_call_operand.vmem [shape: f32[2,1,384], index: 5, kind: input, shape index: {}]   ;;  %s11049_s6 = inlined_call_operand.hbm [shape: f32[2,128,128], index: 6, kind: input, shape index: {}]   ;;  %s11050_s7 = inlined_call_operand.vmem [shape: f32[2,1,128], index: 7, kind: input, shape index: {}]   ;;  %s11051_s8 = inlined_call_operand.hbm [shape: f32[2,128,128], index: 8, kind: input, shape index: {}]   ;;  %s11052_s9 = inlined_call_operand.vmem [shape: f32[2,1,128], index: 9, kind: input, shape index: {}]   ;;  %s11053_s10 = inlined_call_operand.vmem [shape: f32[2,128,256], index: 10, kind: input, shape index: {}]   ;;  %s11054_s11 = inlined_call_operand.vmem [shape: f32[2,1,256], index: 11, kind: input, shape index: {}]   ;;  %s11055_s12 = inlined_call_operand.hbm [shape: f32[2,128,128], index: 12, kind: input, shape index: {}]   ;;  %s11056_s13 = inlined_call_operand.vmem [shape: f32[2,1,128], index: 13, kind: input, shape index: {}]   ;;  %s11057_s14 = inlined_call_operand.hbm [shape: f32[2,128,128], index: 14, kind: input, shape index: {}]   ;;  %s11058_s15 = inlined_call_operand.vmem [shape: f32[2,1,128], index: 15, kind: input, shape index: {}]   ;;  %s11059_s16 = inlined_call_operand.hbm [shape: f32[2,128,128], index: 16, kind: input, shape index: {}]   ;;  %s11060_s17 = inlined_call_operand.vmem [shape: f32[2,1,128], index: 17, kind: input, shape index: {}]   ;;  %s11061_s18 = inlined_call_operand.vmem [shape: f32[2,6,128], index: 18, kind: input, shape index: {}]   ;;  %s11062_s19 = inlined_call_operand.hbm [shape: f32[128,128], index: 19, kind: input, shape index: {}]   ;;  %s11063_s20 = inlined_call_operand.vmem [shape: f32[1,128], index: 20, kind: input, shape index: {}]   ;;  %s11064_s21 = inlined_call_operand.vmem [shape: f32[54,128], index: 21, kind: output, shape index: {}]  }
   0x1   :  { %11107 = sst [smem:[#allocation29_spill]] %s11043_s0 }
   0x2   :  { %11108 = sst [smem:[#allocation30_spill]] %s11044_s1 }
   0x3   :  { %11109 = sst [smem:[#allocation31_spill]] %s11045_s2 }
   0x4   :  { %11110 = sst [smem:[#allocation32_spill]] %s11046_s3 }
   0x5   :  { %11111 = sst [smem:[#allocation33_spill]] %s11047_s4 }
   0x6   :  { %11112 = sst [smem:[#allocation34_spill]] %s11048_s5 }
   0x7   :  { %11113 = sst [smem:[#allocation35_spill]] %s11049_s6 }
   0x8   :  { %11114 = sst [smem:[#allocation36_spill]] %s11051_s8 }
   0x9   :  { %11115 = sst [smem:[#allocation37_spill]] %s11052_s9 }
   0xa   :  { %11116 = sst [smem:[#allocation38_spill]] %s11053_s10 }
   0xb   :  { %11117 = sst [smem:[#allocation39_spill]] %s11054_s11 }
   0xc   :  { %11118 = sst [smem:[#allocation40_spill]] %s11055_s12 }
   0xd   :  { %11119 = sst [smem:[#allocation41_spill]] %s11056_s13 }
   0xe   :  { %11120 = sst [smem:[#allocation42_spill]] %s11057_s14 }
   0xf   :  { %11121 = sst [smem:[#allocation43_spill]] %s11058_s15 }
  0x10   :  { %11122 = sst [smem:[#allocation44_spill]] %s11059_s16 }
  0x11   :  { %11123 = sst [smem:[#allocation45_spill]] %s11060_s17 }
  0x12   :  { %11124 = sst [smem:[#allocation46_spill]] %s11061_s18 }
  0x13   :  { %11125 = sst [smem:[#allocation47_spill]] %s11062_s19 }
  0x14   :  { %11126 = sst [smem:[#allocation48_spill]] %s11063_s20 }
  0x15   :  { %11127 = sst [smem:[#allocation49_spill]] %s11064_s21 }
  0x16   :  { %26 = vsyncpa [#allocation4], 0 }
  0x17   :  { %28 = vsyncpa [#allocation4 + $0x1], 0 }
  0x18   :  { %29 = vsyncpa [#allocation6], 0 }
  0x19   :  { %31 = vsyncpa [#allocation6 + $0x1], 0 }
  0x1a   :  { %32 = vsyncpa [#allocation9], 0 }
  0x1b   :  { %34 = vsyncpa [#allocation9 + $0x1], 0 }
  0x1c   :  { %35 = vsyncpa [#allocation12], 0  ;;  %s8280_s2 = smov 0   ;;  %s8282_s25 = smov 0  }
  0x1d   :  { %s8284_s26 = smov 0   ;;  %s8286_s27 = smov 0  }
  0x1e LB: > { %11128 = sst [smem:[#allocation17_spill]] %s8146_s25  ;;  %s8301_s3 = sadd.s32 1, %s8154_s27   ;;  %s8154_s27 = sphi %s8286_s27, %s11213_s27   ;;  %s8150_s26 = sphi %s8284_s26, %s11216_s26   ;;  %s8146_s25 = sphi %s8282_s25, %s11215_s25   ;;  %s8142_s2 = sphi %s8280_s2, %s11214_s2  }
  0x1f   : > { %11129 = sst [smem:[#allocation18_spill]] %s8150_s26  ;;  %s184_s28 = sadd.s32 1, %s8150_s26 }
  0x20   : > { %11130 = sst [smem:[#allocation19_spill]] %s8301_s3  ;;  %s181_s29 = ssub.s32 %s8154_s27, %s8301_s3 }
  0x21   : > { %p191_p0 = scmp.ne.s32.totalorder %s8150_s26, %s8146_s25  ;;  %p182_p1 = scmp.eq.s32.totalorder %s181_s29, 0 }
  0x22   : > { %p192_p2 = scmp.eq.s32.totalorder %s8154_s27, 0  ;;  %p7529_p4 = scmp.lt.s32.totalorder %s8154_s27, 2 }
  0x23   : > { %s8310_s0 = scalar_select %p182_p1, %s8150_s26, %s184_s28  }
  0x24   : > { %p193_p3 = por %p192_p2, %p191_p0  ;;  %s11069_s4 = sand.u32 1, %s8150_s26  }
  0x25   : > { %11131 = sst [smem:[#allocation20_spill]] %s8310_s0  ;;  %s8316_s30 = sshll.u32 %s11069_s4, 7 }
  0x26   : > { %s8319_s5 = sshll.u32 %s8154_s27, 11  ;;  %p8321_p5 = pnand %p7529_p4, %p193_p3 }
  0x27   : > { %s11073_s23 = sand.u32 1, %s8154_s27   ;;  %s11133_s8 = sld [smem:[#allocation36_spill]] }
  0x28   : > { %s11132_s22 = scalar_select %p8321_p5, 1, 0 }
  0x29   : > { %s670_s29 = scalar_lea.vmem [#allocation5], %s8316_s30  ;;  %s8337_s0 = scalar_lea.sflag [#allocation6], %s11073_s23 }
  0x2a   : > { %s677_s4 = sshll.u32 %s670_s29, 4  ;;  %p8343_p7 = pneg %p8321_p5  ;;  %s8333_s4 = int_to_ptr.vmem [resolvable:$true] %s677_s4 }
  0x2c   : > { %s11134_s21 = scalar_select %p8343_p7, 1, 0 }
  0x2d   : > { %s8330_s28 = scalar_lea.hbm %s11133_s8, %s8319_s5  ;;  %s7935_s29 = scalar_lea.hbm %s11133_s8, 4096 }
  0x2e   : > { %s7930_s3 = scalar_lea.hbm %s8330_s28, 2048  ;;  %p7936_p10 = scmp.lt.u32.totalorder %s8330_s28, %s11133_s8 }
  0x2f   : > { %p7931_p6 = scmp.ne.s32.totalorder %s8330_s28, %s7930_s3  ;;  %p7937_p11 = scmp.lt.u32.totalorder %s7935_s29, %s7930_s3 }
  0x30   : > { %p7939_p13 = scmp.lt.u32.totalorder %s7930_s3, %s8330_s28 }
  0x31   : > { %p7933_p8 = pnand %p8343_p7, %p7931_p6  ;;  %p7938_p12 = por %p7937_p11, %p7936_p10 }
  0x33   : > { %p7934_p9 = pneg %p7933_p8  ;;  %p7940_p0 = por %p7939_p13, %p7938_p12 }
  0x35   : > { %p7941_p1 = pnand %p7940_p0, %p7934_p9 }
  0x37   : > { %7944 = shalt.err (!%p7941_p1)
}
  0x38   : > { %s7945_s23 = scalar_lea.vmem %s8333_s4, 2048  ;;  %s8156_s1 = smov [#allocation5]  }
  0x39   : > { %p7946_p2 = scmp.ne.s32.totalorder %s8333_s4, %s7945_s23  ;;  %s7950_s24 = sshll.u32 %s8156_s1, 4  ;;  %s7951_s24 = int_to_ptr.vmem [resolvable:$false] %s7950_s24 }
  0x3a   : > { %s7952_s18 = scalar_lea.vmem %s7951_s24, 4096  ;;  %p7953_p6 = scmp.lt.s32.totalorder %s8333_s4, %s7951_s24 }
  0x3b   : > { %p7948_p3 = pnand %p7946_p2, %p8343_p7  ;;  %p7954_p8 = scmp.lt.s32.totalorder %s7952_s18, %s7945_s23 }
  0x3d   : > { %p7949_p4 = pneg %p7948_p3  ;;  %p7955_p10 = por %p7954_p8, %p7953_p6 }
  0x3f   : > { %p7956_p11 = pnand %p7955_p10, %p7949_p4 }
  0x41   : > { %7959 = shalt.err (!%p7956_p11)
}
  0x42   : > { %s11074_s20 = smov 128   ;;  %s11076_s3 = smov 8  }
  0x43   : > { %7518 = dma.hbm_to_vmem [thread:$0]  (!%p8321_p5), %s8330_s28, 2048, %s8333_s4, %s8337_s0, %s11074_s20, %s11074_s20, %s11076_s3  }
  0x44   : > { %s11135_s14 = sld [smem:[#allocation42_spill]]  ;;  %s739_s24 = scalar_lea.vmem [#allocation8], %s8316_s30 }
  0x45   : > { %s746_s18 = sshll.u32 %s739_s24, 4  ;;  %s11136_s8 = sand.u32 1, %s8154_s27   ;;  %s8377_s18 = int_to_ptr.vmem [resolvable:$true] %s746_s18 }
  0x46   : > { %s8381_s17 = scalar_lea.sflag [#allocation9], %s11136_s8 }
  0x4a   : > { %s8374_s1 = scalar_lea.hbm %s11135_s14, %s8319_s5  ;;  %s7965_s29 = scalar_lea.hbm %s11135_s14, 4096 }
  0x4b   : > { %s7960_s15 = scalar_lea.hbm %s8374_s1, 2048  ;;  %p7966_p0 = scmp.lt.u32.totalorder %s8374_s1, %s11135_s14 }
  0x4c   : > { %p7961_p9 = scmp.ne.s32.totalorder %s8374_s1, %s7960_s15  ;;  %p7967_p1 = scmp.lt.u32.totalorder %s7965_s29, %s7960_s15 }
  0x4d   : > { %p7969_p3 = scmp.lt.u32.totalorder %s7960_s15, %s8374_s1 }
  0x4e   : > { %p7963_p12 = pnand %p7961_p9, %p8343_p7  ;;  %p7968_p2 = por %p7967_p1, %p7966_p0 }
  0x50   : > { %p7964_p13 = pneg %p7963_p12  ;;  %p7970_p4 = por %p7969_p3, %p7968_p2 }
  0x52   : > { %p7971_p6 = pnand %p7970_p4, %p7964_p13 }
  0x54   : > { %7974 = shalt.err (!%p7971_p6)
}
  0x55   : > { %s7975_s8 = scalar_lea.vmem %s8377_s18, 2048  ;;  %s8159_s24 = smov [#allocation8]  }
  0x56   : > { %p7976_p8 = scmp.ne.s32.totalorder %s8377_s18, %s7975_s8  ;;  %s7980_s4 = sshll.u32 %s8159_s24, 4  ;;  %s7981_s4 = int_to_ptr.vmem [resolvable:$false] %s7980_s4 }
  0x57   : > { %s7982_s20 = scalar_lea.vmem %s7981_s4, 4096  ;;  %p7983_p9 = scmp.lt.s32.totalorder %s8377_s18, %s7981_s4 }
  0x58   : > { %p7978_p10 = pnand %p7976_p8, %p8343_p7  ;;  %p7984_p12 = scmp.lt.s32.totalorder %s7982_s20, %s7975_s8 }
  0x5a   : > { %p7979_p11 = pneg %p7978_p10  ;;  %p7985_p0 = por %p7984_p12, %p7983_p9 }
  0x5c   : > { %p7986_p1 = pnand %p7985_p0, %p7979_p11 }
  0x5e   : > { %7989 = shalt.err (!%p7986_p1)
}
  0x5f   : > { %s11137_s15 = smov 128   ;;  %s8409_s28 = sadd.s32 4294967295, %s8154_s27  }
  0x60   : > { %7524 = dma.hbm_to_vmem [thread:$0]  (!%p8321_p5), %s8374_s1, 2048, %s8377_s18, %s8381_s17, %s11137_s15, %s11137_s15, %s11076_s3  }
  0x61   : > { %p197_p13 = scmp.ne.s32.totalorder %s8146_s25, %s8142_s2  ;;  %p11078_p2 = scmp.eq.s32.totalorder %s8409_s28, 0 }
  0x62   : > { %p5699_p3 = scmp.ge.s32.totalorder %s8154_s27, 1  ;;  %p583_p4 = scmp.lt.s32.totalorder %s8154_s27, 3 }
  0x63   : > { %p8418_p6 = por %p11078_p2, %p197_p13  ;;  %s8160_s1 = smov [#allocation11]  }
  0x64   : > { %p8423_p10 = pnand %p5699_p3, %p583_p4  ;;  %s607_s18 = sshll.u32 %s8160_s1, 4  ;;  %s608_s18 = int_to_ptr.vmem [resolvable:$true] %s607_s18 }
  0x65   : > { %s11138_s29 = scalar_select %p8418_p6, 1, 0 }
  0x66   : > { %s11139_s23 = scalar_select %p8423_p10, 1, 0 }
  0x67   : > { %p7508_p11 = pneg %p8423_p10  ;;  %s11140_s6 = sld [smem:[#allocation35_spill]] }
  0x68   : > { %s643_s4 = scalar_lea.vmem [#allocation3], %s8316_s30  ;;  %s11142_s12 = sld [smem:[#allocation40_spill]] }
  0x69   : > { %p8437_p9 = pnand %p7508_p11, %p11078_p2  ;;  %s650_s20 = sshll.u32 %s643_s4, 4  ;;  %s8442_s20 = int_to_ptr.vmem [resolvable:$true] %s650_s20 }
  0x6a   : > { %s11143_s19 = sld [smem:[#allocation47_spill]] }
  0x6b   : > { %p7992_p0 = pneg %p8437_p9 }
  0x6d   : > { %s8433_s27 = scalar_lea.hbm %s11140_s6, %s8319_s5 }
  0x6e   : > { %s8448_s14 = scalar_lea.hbm %s11142_s12, %s8319_s5 }
  0x70   : > { %s7990_s2 = scalar_lea.hbm %s11143_s19, 2048 }
  0x71   : > { %p7991_p12 = scmp.ne.s32.totalorder %s11143_s19, %s7990_s2  ;;  %p7997_p3 = scmp.lt.u32.totalorder %s7990_s2, %s11143_s19 }
  0x73   : > { %p7993_p1 = pnand %p7992_p0, %p7991_p12 }
  0x75   : > { %p7994_p13 = pneg %p7993_p1 }
  0x77   : > { %p7999_p4 = pnand %p7997_p3, %p7994_p13 }
  0x79   : > { %8002 = shalt.err (!%p7999_p4)
}
  0x7a   : > { %s8003_s3 = scalar_lea.vmem %s608_s18, 2048  ;;  %p8011_p6 = scmp.lt.s32.totalorder %s608_s18, %s608_s18 }
  0x7b   : > { %p8004_p11 = scmp.ne.s32.totalorder %s608_s18, %s8003_s3  ;;  %p8012_p10 = scmp.lt.s32.totalorder %s8003_s3, %s8003_s3 }
  0x7d   : > { %p8006_p8 = pnand %p8004_p11, %p7992_p0  ;;  %p8013_p5 = por %p8012_p10, %p8011_p6 }
  0x7f   : > { %p8007_p2 = pneg %p8006_p8 }
  0x81   : > { %p8014_p7 = pnand %p8013_p5, %p8007_p2 }
  0x83   : > { %8017 = shalt.err (!%p8014_p7)
}
  0x84   : > { %s11144_s10 = smov 8   ;;  %s11145_s9 = sand.u32 1, %s8150_s26  }
  0x85   : > { %7511 = dma.hbm_to_vmem [thread:$0]  (!%p8437_p9), %s11143_s19, 2048, %s608_s18, [#allocation12], %s11137_s15, %s11137_s15, %s11144_s10  }
  0x86   : > { %s8471_s1 = scalar_lea.sflag [#allocation4], %s11145_s9  ;;  %s8018_s2 = scalar_lea.hbm %s8433_s27, 2048 }
  0x87   : > { %p8019_p5 = scmp.ne.s32.totalorder %s8433_s27, %s8018_s2  ;;  %p11146_p7 = scmp.ne.s32.totalorder %s11134_s21, 0 }
  0x88   : > { %s8023_s4 = scalar_lea.hbm %s11140_s6, 4096  ;;  %p8024_p8 = scmp.lt.u32.totalorder %s8433_s27, %s11140_s6 }
  0x89   : > { %p8021_p2 = pnand %p8019_p5, %p11146_p7  ;;  %p8025_p10 = scmp.lt.u32.totalorder %s8023_s4, %s8018_s2 }
  0x8a   : > { %p8027_p0 = scmp.lt.u32.totalorder %s8018_s2, %s8433_s27 }
  0x8b   : > { %p8022_p6 = pneg %p8021_p2  ;;  %p8026_p12 = por %p8025_p10, %p8024_p8 }
  0x8d   : > { %p8028_p9 = por %p8027_p0, %p8026_p12 }
  0x8f   : > { %p8029_p1 = pnand %p8028_p9, %p8022_p6 }
  0x91   : > { %8032 = shalt.err (!%p8029_p1)
}
  0x92   : > { %s8033_s18 = scalar_lea.vmem %s8442_s20, 2048  ;;  %s8161_s13 = smov [#allocation3]  }
  0x93   : > { %p8034_p13 = scmp.ne.s32.totalorder %s8442_s20, %s8033_s18  ;;  %s8038_s9 = sshll.u32 %s8161_s13, 4  ;;  %s8039_s9 = int_to_ptr.vmem [resolvable:$false] %s8038_s9 }
  0x94   : > { %s8040_s24 = scalar_lea.vmem %s8039_s9, 4096  ;;  %p8041_p11 = scmp.lt.s32.totalorder %s8442_s20, %s8039_s9 }
  0x95   : > { %p8036_p3 = pnand %p8034_p13, %p11146_p7  ;;  %p8042_p5 = scmp.lt.s32.totalorder %s8040_s24, %s8033_s18 }
  0x97   : > { %p8037_p4 = pneg %p8036_p3  ;;  %p8043_p2 = por %p8042_p5, %p8041_p11 }
  0x99   : > { %p8044_p8 = pnand %p8043_p2, %p8037_p4 }
  0x9b   : > { %8047 = shalt.err (!%p8044_p8)
}
  0x9c   : > { %p11147_p6 = scmp.ne.s32.totalorder %s11132_s22, 0  ;;  %s712_s2 = scalar_lea.vmem [#allocation7], %s8316_s30 }
  0x9d   : > { %s719_s8 = sshll.u32 %s712_s2, 4  ;;  %s11148_s16 = sld [smem:[#allocation44_spill]]  ;;  %s8499_s8 = int_to_ptr.vmem [resolvable:$true] %s719_s8 }
  0x9e   : > { %7515 = dma.hbm_to_vmem [thread:$0]  (!%p11147_p6), %s8433_s27, 2048, %s8442_s20, %s8471_s1, %s11137_s15, %s11137_s15, %s11144_s10  }
  0x9f   : > { %s8048_s18 = scalar_lea.hbm %s8448_s14, 2048  ;;  %s8053_s24 = scalar_lea.hbm %s11142_s12, 4096 }
  0xa0   : > { %p8049_p10 = scmp.ne.s32.totalorder %s8448_s14, %s8048_s18  ;;  %p8054_p9 = scmp.lt.u32.totalorder %s8448_s14, %s11142_s12 }
  0xa1   : > { %p8055_p1 = scmp.lt.u32.totalorder %s8053_s24, %s8048_s18  ;;  %p8057_p3 = scmp.lt.u32.totalorder %s8048_s18, %s8448_s14 }
  0xa2   : > { %p8051_p12 = pnand %p8049_p10, %p11146_p7 }
  0xa3   : > { %s8505_s11 = scalar_lea.hbm %s11148_s16, %s8319_s5  ;;  %p8056_p13 = por %p8055_p1, %p8054_p9 }
  0xa4   : > { %p8052_p0 = pneg %p8051_p12 }
  0xa5   : > { %p8058_p4 = por %p8057_p3, %p8056_p13 }
  0xa7   : > { %p8059_p11 = pnand %p8058_p4, %p8052_p0 }
  0xa9   : > { %8062 = shalt.err (!%p8059_p11)
}
  0xaa   : > { %s8063_s5 = scalar_lea.vmem %s8499_s8, 2048  ;;  %s8162_s20 = smov [#allocation7]  }
  0xab   : > { %p8064_p5 = scmp.ne.s32.totalorder %s8499_s8, %s8063_s5  ;;  %s8068_s1 = sshll.u32 %s8162_s20, 4  ;;  %s8069_s1 = int_to_ptr.vmem [resolvable:$false] %s8068_s1 }
  0xac   : > { %s8070_s6 = scalar_lea.vmem %s8069_s1, 4096  ;;  %p8071_p10 = scmp.lt.s32.totalorder %s8499_s8, %s8069_s1 }
  0xad   : > { %p8066_p2 = pnand %p8064_p5, %p11146_p7  ;;  %p8072_p12 = scmp.lt.s32.totalorder %s8070_s6, %s8063_s5 }
  0xaf   : > { %p8067_p8 = pneg %p8066_p2  ;;  %p8073_p9 = por %p8072_p12, %p8071_p10 }
  0xb1   : > { %p8074_p1 = pnand %p8073_p9, %p8067_p8 }
  0xb3   : > { %8077 = shalt.err (!%p8074_p1)
}
  0xb4   : > { %7521 = dma.hbm_to_vmem [thread:$0]  (!%p11147_p6), %s8448_s14, 2048, %s8499_s8, %s8337_s0, %s11137_s15, %s11137_s15, %s11144_s10  }
  0xb5   : > { %s766_s2 = scalar_lea.vmem [#allocation10], %s8316_s30  ;;  %s8078_s3 = scalar_lea.hbm %s8505_s11, 2048 }
  0xb6   : > { %s773_s4 = sshll.u32 %s766_s2, 4  ;;  %p8079_p0 = scmp.ne.s32.totalorder %s8505_s11, %s8078_s3  ;;  %s8533_s4 = int_to_ptr.vmem [resolvable:$true] %s773_s4 }
  0xb7   : > { %s8083_s9 = scalar_lea.hbm %s11148_s16, 4096  ;;  %p8084_p4 = scmp.lt.u32.totalorder %s8505_s11, %s11148_s16 }
  0xb8   : > { %p8081_p13 = pnand %p8079_p0, %p11146_p7  ;;  %p8085_p11 = scmp.lt.u32.totalorder %s8083_s9, %s8078_s3 }
  0xb9   : > { %p8087_p2 = scmp.lt.u32.totalorder %s8078_s3, %s8505_s11 }
  0xba   : > { %p8082_p3 = pneg %p8081_p13  ;;  %p8086_p5 = por %p8085_p11, %p8084_p4 }
  0xbc   : > { %p8088_p8 = por %p8087_p2, %p8086_p5 }
  0xbe   : > { %p8089_p10 = pnand %p8088_p8, %p8082_p3 }
  0xc0   : > { %8092 = shalt.err (!%p8089_p10)
}
  0xc1   : > { %s8093_s14 = scalar_lea.vmem %s8533_s4, 2048  ;;  %s8163_s0 = smov [#allocation10]  }
  0xc2   : > { %p8094_p12 = scmp.ne.s32.totalorder %s8533_s4, %s8093_s14  ;;  %s8098_s30 = sshll.u32 %s8163_s0, 4  ;;  %s8099_s30 = int_to_ptr.vmem [resolvable:$false] %s8098_s30 }
  0xc3   : > { %s8100_s8 = scalar_lea.vmem %s8099_s30, 4096  ;;  %p8101_p0 = scmp.lt.s32.totalorder %s8533_s4, %s8099_s30 }
  0xc4   : > { %p8096_p9 = pnand %p8094_p12, %p11146_p7  ;;  %p8102_p13 = scmp.lt.s32.totalorder %s8100_s8, %s8093_s14 }
  0xc6   : > { %p8097_p1 = pneg %p8096_p9  ;;  %p8103_p4 = por %p8102_p13, %p8101_p0 }
  0xc8   : > { %p8104_p11 = pnand %p8103_p4, %p8097_p1 }
  0xca   : > { %8107 = shalt.err (!%p8104_p11)
}
  0xcb   : > { %7527 = dma.hbm_to_vmem [thread:$0]  (!%p11147_p6), %s8505_s11, 2048, %s8533_s4, %s8381_s17, %s11137_s15, %s11137_s15, %s11144_s10  }
  0xcc   : > { %p11149_p7 = scmp.ne.s32.totalorder %s11139_s23, 0 }
  0xce   : > { %798 = sbr.rel (%p11149_p7) target bundleno = 4840 (0x12e8), region = 104 }
  0xd5   : > { %s800_s21 = sand.u32 1, %s8146_s25   ;;  %p11150_p3 = scmp.ne.s32.totalorder %s11138_s29, 0 }
  0xd6   : > { %s5718_s5 = sshll.u32 %s800_s21, 7  ;;  %s801_s20 = scalar_lea.sflag [#allocation4], %s800_s21 }
  0xd7   : > { %s8563_s1 = scalar_lea.vmem [#allocation3], %s5718_s5 }
  0xd8   : > { %8125 = dma.done.wait (%p11150_p3), %s801_s20, 2048  }
  0xd9   : > { %8127 = vsyncadd (%p11150_p3), %s801_s20, 4294965248  ;;  %s809_s22 = sand.u32 1, %s8409_s28   ;;  %s8570_s17 = scalar_lea.vmem [#allocation5], %s5718_s5 }
  0xda   : > { %s810_s6 = scalar_lea.sflag [#allocation6], %s809_s22 }
  0xdb   : > { %8129 = dma.done.wait (%p11150_p3), %s810_s6, 4096  }
  0xdc   : > { %8131 = vsyncadd (%p11150_p3), %s810_s6, 4294963200  ;;  %s8576_s15 = scalar_lea.vmem [#allocation7], %s5718_s5  ;;  %s828_s23 = scalar_lea.sflag [#allocation9], %s809_s22 }
  0xdd   : > { %s8578_s10 = scalar_lea.vmem [#allocation8], %s5718_s5 }
  0xde   : > { %11151 = sst [smem:[#allocation21_spill]] %s8578_s10 }
  0xdf   : > { %8133 = dma.done.wait (%p11150_p3), %s828_s23, 4096  }
  0xe0   : > { %8135 = vsyncadd (%p11150_p3), %s828_s23, 4294963200  ;;  %s8584_s11 = scalar_lea.vmem [#allocation10], %s5718_s5  ;;  %p11153_p6 = scmp.eq.s32.totalorder %s8409_s28, 0 }
  0xe1   : > { %11152 = sst [smem:[#allocation22_spill]] %s8584_s11 }
  0xe2   : > { %8137 = dma.done.wait (%p11153_p6), [#allocation12], 2048   ;;  %p11154_p5 = pmov %p11153_p6 }
  0xe3   : > { %p955_p2 = scmp.lt.s32.totalorder %s8409_s28, 1  ;;  %v992_v0 = vlaneseq  ;;  %v11090_v2 = vmov 0.0   ;;  %s11157_s8 = sld [smem:[#allocation33_spill]] }
  0xe4   : > { %8139 = vsyncadd (%p11154_p5), [#allocation12], 4294965248  ;;  %s11158_s6 = sld [smem:[#allocation34_spill]]  ;;  %s11159_s9 = sld [smem:[#allocation38_spill]] }
  0xe5   : > { %s8592_s2 = scalar_select %p955_p2, %s8409_s28, 1  ;;  %v8595_v1 = vand.u32 127, %v992_v0 }
  0xe6   : > { %s11160_s12 = sld [smem:[#allocation41_spill]]  ;;  %s11162_s20 = sld [smem:[#allocation43_spill]] }
  0xe7   : > { %s7492_s29 = smul.u32 384, %s8592_s2  ;;  %vm994_vm0 = vcmp.lt.s32.totalorder %v8595_v1, 32  ;;  %s5827_s5 = sshll.u32 %s8592_s2, 8 }
  0xe8   : > { %s7493_s13 = smul.u32 3, %s8592_s2  ;;  %v8611_v3 = vsel %vm994_vm0, 1.0, %v11090_v2  ;;  %s5727_s27 = sshll.u32 %s8592_s2, 1 }
  0xe9   : > { %11156 = vst [vmem:[#allocation23_spill] sm:$0xff] %v8611_v3  ;;  %s8616_s21 = scalar_lea.vmem %s11157_s8, %s7492_s29  ;;  %s11161_s29 = sld [smem:[#allocation39_spill]] }
  0xea   : > { %s8622_s23 = scalar_lea.vmem %s11158_s6, %s7493_s13  ;;  %s8627_s24 = scalar_lea.vmem %s11159_s9, %s5827_s5 }
  0xeb   : > { %s11163_s25 = sld [smem:[#allocation45_spill]]  ;;  %s5728_s5 = sshll.u32 %s8592_s2, 3 }
  0xec   : > { %s981_s16 = scalar_lea.vmem %s11160_s12, %s8592_s2  ;;  %s984_s13 = scalar_lea.vmem %s11162_s20, %s8592_s2 }
  0xed   : > { %s11164_s11 = sld [smem:[#allocation46_spill]]  ;;  %p11165_p8 = scmp.ne.s32.totalorder %s8409_s28, 0 }
  0xee   : > { %s11166_s18 = sld [smem:[#allocation29_spill]] (!%p11165_p8) }
  0xef   : > { %s8637_s30 = scalar_lea.vmem %s11161_s29, %s5727_s27  ;;  %1000 = sbr.rel (%p11165_p8) target bundleno = 249 (0xf9), region = 132 }
  0xf1   : > { %s987_s4 = scalar_lea.vmem %s11163_s25, %s8592_s2 }
  0xf3   : > { %s8651_s10 = scalar_lea.vmem %s11164_s11, %s5728_s5 }
  0xf4   : > { %v1001_v4 = vld [vmem:[%s11166_s18] sm:$0xff] (!%p11165_p8)  ;;  %v1002_v5 = vld [vmem:[%s11166_s18 + $0x8] sm:$0xff] (!%p11165_p8)  ;;  %v1003_v6 = vld [vmem:[%s11166_s18 + $0x10] sm:$0xff] (!%p11165_p8) }
  0xf5   : > { %1008 = vst [vmem:[#allocation2] sm:$0xff] (!%p11165_p8), %v1001_v4  ;;  %1009 = vst [vmem:[#allocation2 + $0x8] sm:$0xff] (!%p11165_p8), %v1002_v5  ;;  %v1004_v7 = vld [vmem:[%s11166_s18 + $0x18] sm:$0xff] (!%p11165_p8)  ;;  %v1005_v8 = vld [vmem:[%s11166_s18 + $0x20] sm:$0xff] (!%p11165_p8) }
  0xf6   : > { %1010 = vst [vmem:[#allocation2 + $0x10] sm:$0xff] %v1003_v6  ;;  %v1006_v9 = vld [vmem:[%s11166_s18 + $0x28] sm:$0xff]  ;;  %1011 = vst [vmem:[#allocation2 + $0x18] sm:$0xff] %v1004_v7  ;;  %v1007_v10 = vld [vmem:[%s11166_s18 + $0x30] sm:$0x3f] }
  0xf7   : > { %1012 = vst [vmem:[#allocation2 + $0x20] sm:$0xff] %v1005_v8  ;;  %1013 = vst [vmem:[#allocation2 + $0x28] sm:$0xff] %v1006_v9 }
  0xf8   : > { %1014 = vst [vmem:[#allocation2 + $0x30] sm:$0x3f] %v1007_v10 }
  0xf9 PF: > { %v1027_v11 = vld [vmem:[%s8616_s21 + $0x8] sm:$0xff]  ;;  %v1030_v12 = vld [vmem:[%s8616_s21 + $0x20] sm:$0xff]  ;;  %1155 = vmatprep.mubr.f32.mxu0 %v11090_v2  ;;  %v1029_v15 = vld [vmem:[%s8616_s21 + $0x18] sm:$0xff]  ;;  %v11092_v18 = vmov 0.0|0.0   ;;  %vm8166_vm1 = vmmov 0   ;;  %vm1503_vm2 = vcmp.ge.s32.totalorder %v8595_v1, 8  ;;  %s11183_s6 = scalar_lea.vmem %s11050_s7, %s8592_s2 }
  0xfa   : > { %v1026_v13 = vld [vmem:[%s8616_s21] sm:$0xff]  ;;  %v7048_v14 = vpack.c.bf16 %v1030_v12, %v1027_v11  ;;  %v1033_v16 = vld [vmem:[%s8616_s21 + $0x38] sm:$0xff]  ;;  %v1036_v17 = vld [vmem:[%s8616_s21 + $0x50] sm:$0xff]  ;;  %7080 = vmatprep.subr.bf16.mxu1 %v11092_v18  ;;  %6213 = vmatprep.mubr.msk.f32.mxu1 %vm8166_vm1, %v11090_v2  ;;  %vm1504_vm3 = vcmp.lt.s32.totalorder %v8595_v1, 16  ;;  %vm1306_vm4 = vcmp.lt.s32.totalorder %v8595_v1, 8  ;;  %vm1948_vm6 = vcmp.ge.s32.totalorder %v8595_v1, 16 }
  0xfb   : > { %v7050_v19 = vpack.c.bf16 %v1029_v15, %v1026_v13  ;;  %v7052_v20 = vpack.c.bf16 %v1036_v17, %v1033_v16  ;;  %v1032_v21 = vld [vmem:[%s8616_s21 + $0x30] sm:$0xff]  ;;  %v1035_v22 = vld [vmem:[%s8616_s21 + $0x48] sm:$0xff]  ;;  %v1042_v24 = vld [vmem:[%s8616_s21 + $0x80] sm:$0xff]  ;;  %vm1949_vm7 = vcmp.lt.s32.totalorder %v8595_v1, 24  ;;  %vm2275_vm9 = vcmp.ge.s32.totalorder %v8595_v1, 24  ;;  %s11171_s3 = sld [smem:[#allocation31_spill]] }
  0xfc   : > { %v1039_v23 = vld [vmem:[%s8616_s21 + $0x68] sm:$0xff]  ;;  %7049 = vmatprep.subr.bf16.mxu0 %v7048_v14  ;;  %v7054_v25 = vpack.c.bf16 %v1035_v22, %v1032_v21  ;;  %v1038_v27 = vld [vmem:[%s8616_s21 + $0x60] sm:$0xff]  ;;  %v1041_v28 = vld [vmem:[%s8616_s21 + $0x78] sm:$0xff]  ;;  %vm1720_vm11 = vcmask 1045504   ;;  %vm1417_vm12 = vcmask 441344   ;;  %vm1436_vm13 = vcmask 439296  }
  0xfd   : > { %7051 = vmatpush1.bf16.msra.mxu0 %v7050_v19  ;;  %v7056_v26 = vpack.c.bf16 %v1042_v24, %v1039_v23  ;;  %v1045_v29 = vld [vmem:[%s8616_s21 + $0x98] sm:$0xff]  ;;  %v1048_v30 = vld [vmem:[%s8616_s21 + $0xb0] sm:$0xff]  ;;  %v7058_v31 = vpack.c.bf16 %v1041_v28, %v1038_v27  ;;  %v1047_v34 = vld [vmem:[%s8616_s21 + $0xa8] sm:$0xff]  ;;  %s11193_s14 = sld [smem:[#allocation37_spill]]  ;;  %vm3500_vm14 = vcmask 1043456   ;;  %s11195_s25 = sld [smem:[#allocation32_spill]] }
  0xfe   : > { %7053 = vmatprep.subr.bf16.mxu0 %v7052_v20  ;;  %v7060_v32 = vpack.c.bf16 %v1048_v30, %v1045_v29  ;;  %v1044_v33 = vld [vmem:[%s8616_s21 + $0x90] sm:$0xff]  ;;  %v1051_v35 = vld [vmem:[%s8616_s21 + $0xc8] sm:$0xff]  ;;  %v1054_v36 = vld [vmem:[%s8616_s21 + $0xe0] sm:$0xff]  ;;  %vm3210_vm15 = vcmask 162816   ;;  %p5818_p10 = scmp.ne.s32.totalorder %s8409_s28, 1 }
  0xff   : > { %v7062_v37 = vpack.c.bf16 %v1047_v34, %v1044_v33  ;;  %v1050_v38 = vld [vmem:[%s8616_s21 + $0xc0] sm:$0xff]  ;;  %v1053_v39 = vld [vmem:[%s8616_s21 + $0xd8] sm:$0xff]  ;;  %v7064_v40 = vpack.c.bf16 %v1054_v36, %v1051_v35  ;;  %v1028_v41 = vld [vmem:[%s8616_s21 + $0x10] sm:$0xff]  ;;  %s11212_s20 = sld [smem:[#allocation49_spill]] (!%p5818_p10) }
 0x100   : > { %v1031_v42 = vld [vmem:[%s8616_s21 + $0x28] sm:$0xff]  ;;  %v1034_v43 = vld [vmem:[%s8616_s21 + $0x40] sm:$0xff]  ;;  %v1057_v44 = vld [vmem:[%s8616_s21 + $0xf8] sm:$0xff]  ;;  %v7066_v48 = vpack.c.bf16 %v1053_v39, %v1050_v38 }
 0x101   : > { %7055 = vmatpush1.bf16.msra.mxu0 %v7054_v25  ;;  %v1060_v45 = vld [vmem:[%s8616_s21 + $0x110] sm:$0xff]  ;;  %v7081_v46 = vpack.c.bf16 %v1031_v42, %v1028_v41  ;;  %v1037_v47 = vld [vmem:[%s8616_s21 + $0x58] sm:$0xff]  ;;  %v1059_v52 = vld [vmem:[%s8616_s21 + $0x108] sm:$0xff] }
 0x102   : > { %7057 = vmatprep.subr.bf16.mxu0 %v7056_v26  ;;  %v1056_v49 = vld [vmem:[%s8616_s21 + $0xf0] sm:$0xff]  ;;  %v7084_v50 = vpack.c.bf16 %v1037_v47, %v1034_v43  ;;  %v7068_v51 = vpack.c.bf16 %v1060_v45, %v1057_v44  ;;  %v1043_v54 = vld [vmem:[%s8616_s21 + $0x88] sm:$0xff]  ;;  %v1066_v56 = vld [vmem:[%s8616_s21 + $0x140] sm:$0xff] }
 0x103   : > { %7082 = vmatpush3.bf16.msra.mxu1 %v7081_v46  ;;  %v1040_v53 = vld [vmem:[%s8616_s21 + $0x70] sm:$0xff]  ;;  %v1063_v55 = vld [vmem:[%s8616_s21 + $0x128] sm:$0xff]  ;;  %v7070_v57 = vpack.c.bf16 %v1059_v52, %v1056_v49  ;;  %v1062_v58 = vld [vmem:[%s8616_s21 + $0x120] sm:$0xff]  ;;  %s11194_s26 = scalar_lea.vmem %s11193_s14, %s8592_s2  ;;  %s11196_s11 = smov %s11195_s25 }
 0x104   : > { %7083 = vmatprep.subr.bf16.mxu1 %v11092_v18  ;;  %v7087_v59 = vpack.c.bf16 %v1043_v54, %v1040_v53  ;;  %v7072_v60 = vpack.c.bf16 %v1066_v56, %v1063_v55  ;;  %v1065_v61 = vld [vmem:[%s8616_s21 + $0x138] sm:$0xff]  ;;  %v1046_v62 = vld [vmem:[%s8616_s21 + $0xa0] sm:$0xff]  ;;  %v1072_v5 = vld [vmem:[%s8616_s21 + $0x170] sm:$0xff] }
 0x105   : > { %7059 = vmatpush1.bf16.msra.mxu0 %v7058_v31  ;;  %v1049_v63 = vld [vmem:[%s8616_s21 + $0xb8] sm:$0xff]  ;;  %v7074_v6 = vpack.c.bf16 %v1065_v61, %v1062_v58  ;;  %v1068_v7 = vld [vmem:[%s8616_s21 + $0x150] sm:$0xff]  ;;  %v1071_v10 = vld [vmem:[%s8616_s21 + $0x168] sm:$0xff] }
 0x106   : > { %7061 = vmatprep.subr.bf16.mxu0 %v7060_v32  ;;  %v1069_v4 = vld [vmem:[%s8616_s21 + $0x158] sm:$0xff]  ;;  %v7090_v8 = vpack.c.bf16 %v1049_v63, %v1046_v62  ;;  %v1052_v11 = vld [vmem:[%s8616_s21 + $0xd0] sm:$0xff]  ;;  %v1055_v12 = vld [vmem:[%s8616_s21 + $0xe8] sm:$0xff]  ;;  %v7078_v13 = vpack.c.bf16 %v1071_v10, %v1068_v7  ;;  %v8760_v32 = vshrl.u32 %v992_v0, 7  ;;  %v8801_v62 = vsel %vm1306_vm4, 1.0, %v11090_v2 }
 0x107   : > { %7085 = vmatpush3.bf16.msra.mxu1 %v7084_v50  ;;  %v7076_v9 = vpack.c.bf16 %v1072_v5, %v1069_v4  ;;  %v7093_v14 = vpack.c.bf16 %v1055_v12, %v1052_v11  ;;  %v1058_v15 = vld [vmem:[%s8616_s21 + $0x100] sm:$0xff]  ;;  %v1061_v16 = vld [vmem:[%s8616_s21 + $0x118] sm:$0xff]  ;;  %v1064_v20 = vld [vmem:[%s8616_s21 + $0x130] sm:$0xff] }
 0x108   : > { %7086 = vmatprep.subr.bf16.mxu1 %v11092_v18  ;;  %v1015_v17 = vld [vmem:[#allocation2] sm:$0xff]  ;;  %v7096_v19 = vpack.c.bf16 %v1061_v16, %v1058_v15  ;;  %v1067_v21 = vld [vmem:[%s8616_s21 + $0x148] sm:$0xff]  ;;  %v1017_v24 = vld [vmem:[#allocation2 + $0x10] sm:$0xff]  ;;  %11167 = vst [vmem:[#allocation24_spill] sm:$0xff] %v8760_v32  ;;  %v8763_v33 = vsub.s32 1, %v8760_v32  ;;  %v8783_v55 = vsub.s32 0, %v8760_v32 }
 0x109   : > { %7063 = vmatpush1.bf16.msra.mxu0 %v7062_v37  ;;  %v1016_v22 = vld [vmem:[#allocation2 + $0x8] sm:$0xff]  ;;  %v7099_v23 = vpack.c.bf16 %v1067_v21, %v1064_v20  ;;  %v1018_v25 = vld [vmem:[#allocation2 + $0x18] sm:$0xff]  ;;  %v1019_v26 = vld [vmem:[#allocation2 + $0x20] sm:$0xff] }
 0x10a   : > { %7065 = vmatprep.subr.bf16.mxu0 %v7064_v40  ;;  %v1020_v27 = vld [vmem:[#allocation2 + $0x28] sm:$0xff]  ;;  %v1021_v28 = vld [vmem:[#allocation2 + $0x30] sm:$0x3f]  ;;  %v1070_v29 = vld [vmem:[%s8616_s21 + $0x160] sm:$0xff]  ;;  %11168 = vst [vmem:[#allocation25_spill] sm:$0xff] %v8763_v33 }
 0x10b   : > { %7088 = vmatpush3.bf16.msra.mxu1 %v7087_v59  ;;  %v1073_v30 = vld [vmem:[%s8616_s21 + $0x178] sm:$0xff]  ;;  %v8766_v34 = vld [vmem:[%s8622_s23] sm:$0x7]  ;;  %11169 = vst [vmem:[#allocation26_spill] sm:$0xff] %v8783_v55  ;;  %vm1505_vm5 = vmand %vm1503_vm2, %vm1504_vm3  ;;  %s11185_s21 = sld [smem:[#allocation30_spill]] }
 0x10c   : > { %7089 = vmatprep.subr.bf16.mxu1 %v11092_v18  ;;  %v7102_v31 = vpack.c.bf16 %v1073_v30, %v1070_v29  ;;  %v1083_v37 = vrot.slane %v8766_v34, %v8763_v33  ;;  %v1079_v59 = vrot.slane %v8766_v34, %v8783_v55  ;;  %v8804_v63 = vsel %vm1505_vm5, 1.0, %v11090_v2  ;;  %vm1950_vm8 = vmand %vm1948_vm6, %vm1949_vm7 }
 0x10d   : > { %7067 = vmatpush1.bf16.msra.mxu0 %v7066_v48  ;;  %11170 = vst [vmem:[#allocation27_spill] sm:$0xff] %v8804_v63  ;;  %vm2276_vm10 = vmand %vm2275_vm9, %vm994_vm0  ;;  %vm3229_vm0 = vcmask 160768  }
 0x10e   : > { %7069 = vmatprep.subr.bf16.mxu0 %v7068_v51 }
 0x10f   : > { %7091 = vmatpush3.bf16.msra.mxu1 %v7090_v8 }
 0x110   : > { %7092 = vmatprep.subr.bf16.mxu1 %v11092_v18 }
 0x111   : > { %7071 = vmatpush1.bf16.msra.mxu0 %v7070_v57 }
 0x112   : > { %7073 = vmatprep.subr.bf16.mxu0 %v7072_v60 }
 0x113   : > { %7094 = vmatpush3.bf16.msra.mxu1 %v7093_v14 }
 0x114   : > { %7095 = vmatprep.subr.bf16.mxu1 %v11092_v18 }
 0x115   : > { %7075 = vmatpush1.bf16.msra.mxu0 %v7074_v6 }
 0x116   : > { %7077 = vmatprep.subr.bf16.mxu0 %v7076_v9 }
 0x117   : > { %7097 = vmatpush3.bf16.msra.mxu1 %v7096_v19 }
 0x118   : > { %7098 = vmatprep.subr.bf16.mxu1 %v11092_v18 }
 0x119   : > { %7079 = vmatpush1.bf16.msra.mxu0 %v7078_v13 }
 0x11a   : > { %7104 = vmatprep.subr.bf16.mxu0 %v11092_v18 }
 0x11b   : > { %7100 = vmatpush3.bf16.msra.mxu1 %v7099_v23 }
 0x11c   : > { %1156 = vmatmul.mubr.f32.vlgmr.msra.gmra.mrb[0].mxu0 %v1015_v17  ;;  %7101 = vmatprep.subr.bf16.mxu1 %v11092_v18 }
 0x11d   : > { %1161 = vmatprep.mubr.f32.mxu0 %v11090_v2 }
 0x11f   : > { %7103 = vmatpush3.bf16.msra.mxu1 %v7102_v31  ;;  %v11089_v31 = vsub.s32 2, %v8760_v32 }
 0x120   : > { %1162 = vmatmul.mubr.f32.gmra.mrb[2].mxu0 %v1016_v22  ;;  %7113 = vmatprep.subr.bf16.mxu1 %v11092_v18 }
 0x121   : > { %1167 = vmatprep.mubr.f32.mxu0 %v11090_v2 }
 0x122   : > { %6214 = vmatmul.mubr.f32.vlgmr.msra.gmra.mrb[0].mxu1 %v1015_v17 }
 0x123   : > { %6216 = vmatprep.mubr.msk.f32.mxu1 %vm8166_vm1, %v11090_v2 }
 0x124   : > { %1168 = vmatmul.mubr.f32.gmra.mrb[4].mxu0 %v1017_v24 }
 0x125   : > { %1173 = vmatprep.mubr.f32.mxu0 %v11090_v2 }
 0x126   : > { %6217 = vmatmul.mubr.f32.gmra.mrb[2].mxu1 %v1016_v22 }
 0x127   : > { %6219 = vmatprep.mubr.msk.f32.mxu1 %vm8166_vm1, %v11090_v2 }
 0x128   : > { %1174 = vmatmul.mubr.f32.gmra.mrb[6].mxu0 %v1018_v25 }
 0x129   : > { %1179 = vmatprep.mubr.f32.mxu0 %v11090_v2 }
 0x12a   : > { %6220 = vmatmul.mubr.f32.gmra.mrb[4].mxu1 %v1017_v24 }
 0x12b   : > { %6222 = vmatprep.mubr.msk.f32.mxu1 %vm8166_vm1, %v11090_v2 }
 0x12c   : > { %1180 = vmatmul.mubr.f32.gmra.mrb[8].mxu0 %v1019_v26 }
 0x12d   : > { %1185 = vmatprep.mubr.f32.mxu0 %v11090_v2 }
 0x12e   : > { %6223 = vmatmul.mubr.f32.gmra.mrb[6].mxu1 %v1018_v25  ;;  %v8883_v25 = vsel %vm1950_vm8, 1.0, %v11090_v2 }
 0x12f   : > { %6225 = vmatprep.mubr.msk.f32.mxu1 %vm8166_vm1, %v11090_v2 }
 0x130   : > { %1186 = vmatmul.mubr.f32.gmra.mrb[10].mxu0 %v1020_v27 }
 0x131   : > { %1191 = vmatprep.mubr.f32.mxu0 %v11090_v2 }
 0x132   : > { %6226 = vmatmul.mubr.f32.gmra.mrb[8].mxu1 %v1019_v26 }
 0x133   : > { %6228 = vmatprep.mubr.msk.f32.mxu1 %vm8166_vm1, %v11090_v2 }
 0x134   : > { %1192 = vmatmul.mubr.f32.gmra.mrb[12].mxu0 %v1021_v28 }
 0x135   : > { %6248 = vmatprep.mubr.msk.f32.mxu0 %vm8166_vm1, %v11090_v2 }
 0x136   : > { %6229 = vmatmul.mubr.f32.gmra.mrb[10].mxu1 %v1020_v27 }
 0x137   : > { %6231 = vmatprep.mubr.msk.f32.mxu1 %vm8166_vm1, %v11090_v2 }
 0x13a   : > { %6232 = vmatmul.mubr.f32.gmra.mrb[12].mxu1 %v1021_v28 }
 0x13b   : > { %6283 = vmatprep.mubr.msk.f32.mxu1 %vm8166_vm1, %v11090_v2 }
 0x1ef   : > { %v1157_v35 = vpop.f32.mrb[0].mxu0 }
 0x1f0   : > { %v1159_v36 = vpop.f32.mrb[1].mxu0  ;;  %v8798_v61 = vadd.f32 %v1157_v35, %v1079_v59 }
 0x1f1   : > { %v1160_v40 = vadd.f32 %v1159_v36, %v1083_v37  ;;  %v8928_v36 = vrot.slane %v8766_v34, %v11089_v31 }
 0x1f2   : > { %v1310_v4 = vmul.f32 %v8801_v62, %v8798_v61  ;;  %v1508_v5 = vmul.f32 %v8804_v63, %v8798_v61  ;;  %v1953_v26 = vmul.f32 %v8883_v25, %v8798_v61 }
 0x1f3   : > { %v1163_v38 = vpop.f32.mrb[2].mxu0 }
 0x1f4   : > { %v1165_v39 = vpop.f32.mrb[3].mxu0  ;;  %v8812_v6 = vadd.f32 %v1163_v38, %v1079_v59  ;;  %v8933_v38 = vsel %vm2276_vm10, 1.0, %v11090_v2 }
 0x1f5   : > { %v1166_v41 = vadd.f32 %v1165_v39, %v1083_v37  ;;  %v1264_v39 = vpop.f32.mrb[0].mxu1  ;;  %v2279_v34 = vmul.f32 %v8933_v38, %v8798_v61 }
 0x1f6   : > { %v1311_v8 = vmul.f32 %v8801_v62, %v8812_v6  ;;  %v1509_v9 = vmul.f32 %v8804_v63, %v8812_v6  ;;  %v1954_v27 = vmul.f32 %v8883_v25, %v8812_v6  ;;  %v1265_v1 = vadd.f32 %v1264_v39, %v8928_v36 }
 0x1f7   : > { %v8770_v42 = vpack.c.bf16 %v1166_v41, %v1160_v40  ;;  %v1169_v43 = vpop.f32.mrb[4].mxu0  ;;  %v6215_v40 = vpop.f32.mrb[1].mxu1 }
 0x1f8   : > { %v1171_v44 = vpop.f32.mrb[5].mxu0  ;;  %v8819_v7 = vadd.f32 %v1169_v43, %v1079_v59  ;;  %v1692_v43 = vmul.f32 %v8804_v63, %v1265_v1 }
 0x1f9   : > { %7106 = vmatpush3.bf16.xpose.msra.mxu0 %v8770_v42  ;;  %7115 = vmatpush3.bf16.xpose.msra.mxu1 %v8770_v42  ;;  %v1172_v46 = vadd.f32 %v1171_v44, %v1083_v37  ;;  %v1269_v41 = vpop.f32.mrb[2].mxu1  ;;  %v8949_v44 = vmul.f32 %v8883_v25, %v1265_v1 }
 0x1fa   : > { %7107 = vmatprep.subr.bf16.mxu0 %v11092_v18  ;;  %7116 = vmatprep.subr.bf16.mxu1 %v11092_v18  ;;  %v1312_v11 = vmul.f32 %v8801_v62, %v8819_v7  ;;  %v1510_v12 = vmul.f32 %v8804_v63, %v8819_v7  ;;  %v1955_v28 = vmul.f32 %v8883_v25, %v8819_v7 }
 0x1fb   : > { %v1175_v0 = vpop.f32.mrb[6].mxu0 }
 0x1fc   : > { %v1177_v45 = vpop.f32.mrb[7].mxu0  ;;  %v8832_v10 = vadd.f32 %v1175_v0, %v1079_v59  ;;  %v1270_v0 = vadd.f32 %v1269_v41, %v8928_v36 }
 0x1fd   : > { %v1178_v47 = vadd.f32 %v1177_v45, %v1083_v37  ;;  %v6218_v45 = vpop.f32.mrb[3].mxu1 }
 0x1fe   : > { %v1313_v14 = vmul.f32 %v8801_v62, %v8832_v10  ;;  %v1511_v15 = vmul.f32 %v8804_v63, %v8832_v10  ;;  %v1956_v29 = vmul.f32 %v8883_v25, %v8832_v10 }
 0x1ff   : > { %v8776_v48 = vpack.c.bf16 %v1178_v47, %v1172_v46  ;;  %v1181_v49 = vpop.f32.mrb[8].mxu0  ;;  %v2280_v46 = vmul.f32 %v8933_v38, %v8812_v6  ;;  %v8955_v47 = vmul.f32 %v8933_v38, %v1265_v1 }
 0x200   : > { %v1183_v50 = vpop.f32.mrb[9].mxu0  ;;  %v8841_v13 = vadd.f32 %v1181_v49, %v1079_v59  ;;  %v1693_v49 = vmul.f32 %v8804_v63, %v1270_v0 }
 0x201   : > { %7109 = vmatpush3.bf16.xpose.msra.mxu0 %v8776_v48  ;;  %7118 = vmatpush3.bf16.xpose.msra.mxu1 %v8776_v48  ;;  %v1184_v53 = vadd.f32 %v1183_v50, %v1083_v37  ;;  %v8962_v50 = vmul.f32 %v8883_v25, %v1270_v0 }
 0x202   : > { %7110 = vmatprep.subr.bf16.mxu0 %v11092_v18  ;;  %7119 = vmatprep.subr.bf16.mxu1 %v11092_v18  ;;  %v1314_v17 = vmul.f32 %v8801_v62, %v8841_v13  ;;  %v1512_v19 = vmul.f32 %v8804_v63, %v8841_v13  ;;  %v1957_v30 = vmul.f32 %v8883_v25, %v8841_v13 }
 0x203   : > { %v1187_v51 = vpop.f32.mrb[10].mxu0 }
 0x204   : > { %v1189_v52 = vpop.f32.mrb[11].mxu0  ;;  %v8854_v16 = vadd.f32 %v1187_v51, %v1079_v59  ;;  %v8965_v51 = vmul.f32 %v8933_v38, %v1270_v0 }
 0x205   : > { %v1190_v54 = vadd.f32 %v1189_v52, %v1083_v37  ;;  %v1274_v52 = vpop.f32.mrb[4].mxu1 }
 0x206   : > { %v1315_v21 = vmul.f32 %v8801_v62, %v8854_v16  ;;  %v1513_v22 = vmul.f32 %v8804_v63, %v8854_v16  ;;  %v1958_v35 = vmul.f32 %v8883_v25, %v8854_v16  ;;  %v2284_v39 = vmul.f32 %v8933_v38, %v8854_v16 }
 0x207   : > { %v8785_v56 = vpack.c.bf16 %v1190_v54, %v1184_v53  ;;  %v1193_v57 = vpop.f32.mrb[12].mxu0  ;;  %v7123_v53 = vpack.c.bf16 %v1693_v49, %v1692_v43  ;;  %v1275_v54 = vadd.f32 %v1274_v52, %v8928_v36 }
 0x208   : > { %v1195_v58 = vpop.f32.mrb[13].mxu0  ;;  %v8865_v20 = vadd.f32 %v1193_v57, %v1079_v59  ;;  %v2281_v59 = vmul.f32 %v8933_v38, %v8819_v7 }
 0x209   : > { %7112 = vmatpush3.bf16.xpose.msra.mxu0 %v8785_v56  ;;  %7121 = vmatpush3.bf16.xpose.msra.mxu1 %v8785_v56  ;;  %v8796_v60 = vadd.f32 %v1195_v58, %v1083_v37  ;;  %v8986_v6 = vmul.f32 %v8883_v25, %v1275_v54 }
 0x20a   : > { %6246 = vmatprep.subr.mxu0 %v11090_v2  ;;  %6281 = vmatprep.subr.mxu1 %v11090_v2  ;;  %v1316_v23 = vmul.f32 %v8801_v62, %v8865_v20  ;;  %v1514_v24 = vmul.f32 %v8804_v63, %v8865_v20  ;;  %v1959_v37 = vmul.f32 %v8883_v25, %v8865_v20 }
 0x211   : > { %6247 = vmatpush3.xpose.msra.mxu0 %v8796_v60  ;;  %6282 = vmatpush3.xpose.msra.mxu1 %v8796_v60 }
 0x212   : > { %7140 = vmatprep.subr.bf16.mxu1 %v11092_v18  ;;  %7122 = vmatprep.subr.bf16.mxu0 %v11092_v18 }
 0x214   : > { %6249 = vmatmul.mubr.f32.vlgmr.msra.gmra.mrb[14].mxu0 %v1310_v4  ;;  %6284 = vmatmul.mubr.f32.vlgmr.msra.gmra.mrb[14].mxu1 %v1508_v5  ;;  %v8982_v4 = vmul.f32 %v8801_v62, %v1275_v54  ;;  %v1694_v5 = vmul.f32 %v8804_v63, %v1275_v54 }
 0x215   : > { %7142 = vmatpush3.bf16.xpose.msra.mxu1 %v8770_v42  ;;  %6251 = vmatprep.mubr.msk.f32.mxu0 %vm8166_vm1, %v11090_v2 }
 0x216   : > { %6286 = vmatprep.mubr.msk.f32.mxu1 %vm8166_vm1, %v11090_v2  ;;  %7143 = vmatprep.subr.bf16.mxu1 %v11092_v18 }
 0x217   : > { %7124 = vmatpush3.bf16.msra.mxu0 %v7123_v53  ;;  %v2285_v53 = vmul.f32 %v8933_v38, %v8865_v20  ;;  %v9064_v20 = vld [vmem:[%s11171_s3] sm:$0xff] }
 0x218   : > { %6252 = vmatmul.mubr.f32.gmra.mrb[16].mxu0 %v1311_v8  ;;  %6287 = vmatmul.mubr.f32.gmra.mrb[16].mxu1 %v1509_v9  ;;  %v2282_v9 = vmul.f32 %v8933_v38, %v8832_v10 }
 0x219   : > { %6254 = vmatprep.mubr.msk.f32.mxu0 %vm8166_vm1, %v11090_v2  ;;  %6289 = vmatprep.mubr.msk.f32.mxu1 %vm8166_vm1, %v11090_v2 }
 0x21a   : > { %7125 = vmatprep.subr.bf16.mxu0 %v11092_v18 }
 0x21c   : > { %6255 = vmatmul.mubr.f32.gmra.mrb[18].mxu0 %v1312_v11  ;;  %6290 = vmatmul.mubr.f32.gmra.mrb[18].mxu1 %v1510_v12  ;;  %v8992_v11 = vmul.f32 %v8933_v38, %v1275_v54 }
 0x21d   : > { %7145 = vmatpush3.bf16.xpose.msra.mxu1 %v8776_v48  ;;  %6257 = vmatprep.mubr.msk.f32.mxu0 %vm8166_vm1, %v11090_v2 }
 0x21e   : > { %6292 = vmatprep.mubr.msk.f32.mxu1 %vm8166_vm1, %v11090_v2  ;;  %7146 = vmatprep.subr.bf16.mxu1 %v11092_v18 }
 0x220   : > { %6258 = vmatmul.mubr.f32.gmra.mrb[20].mxu0 %v1313_v14  ;;  %6293 = vmatmul.mubr.f32.gmra.mrb[20].mxu1 %v1511_v15 }
 0x221   : > { %6260 = vmatprep.mubr.msk.f32.mxu0 %vm8166_vm1, %v11090_v2  ;;  %6295 = vmatprep.mubr.msk.f32.mxu1 %vm8166_vm1, %v11090_v2 }
 0x224   : > { %6261 = vmatmul.mubr.f32.gmra.mrb[22].mxu0 %v1314_v17  ;;  %6296 = vmatmul.mubr.f32.gmra.mrb[22].mxu1 %v1512_v19 }
 0x225   : > { %7148 = vmatpush3.bf16.xpose.msra.mxu1 %v8785_v56  ;;  %6263 = vmatprep.mubr.msk.f32.mxu0 %vm8166_vm1, %v11090_v2 }
 0x226   : > { %6298 = vmatprep.mubr.msk.f32.mxu1 %vm8166_vm1, %v11090_v2  ;;  %6386 = vmatprep.subr.mxu1 %v11090_v2 }
 0x228   : > { %6264 = vmatmul.mubr.f32.gmra.mrb[24].mxu0 %v1315_v21  ;;  %6299 = vmatmul.mubr.f32.gmra.mrb[24].mxu1 %v1513_v22 }
 0x229   : > { %6266 = vmatprep.mubr.msk.f32.mxu0 %vm8166_vm1, %v11090_v2  ;;  %6301 = vmatprep.mubr.msk.f32.mxu1 %vm8166_vm1, %v11090_v2 }
 0x22c   : > { %6267 = vmatmul.mubr.f32.gmra.mrb[26].mxu0 %v1316_v23  ;;  %6302 = vmatmul.mubr.f32.gmra.mrb[26].mxu1 %v1514_v24 }
 0x22d   : > { %6387 = vmatpush3.xpose.msra.mxu1 %v8796_v60  ;;  %6388 = vmatprep.mubr.msk.f32.mxu1 %vm8166_vm1, %v11090_v2 }
 0x22e   : > { %7158 = vmatprep.subr.bf16.mxu1 %v11092_v18  ;;  %6318 = vmatprep.mubr.msk.f32.mxu0 %vm8166_vm1, %v11090_v2 }
 0x230   : > { %6389 = vmatmul.mubr.f32.vlgmr.msra.gmra.mrb[28].mxu1 %v1953_v26  ;;  %v2283_v26 = vmul.f32 %v8933_v38, %v8841_v13 }
 0x231   : > { %7160 = vmatpush3.bf16.xpose.msra.mxu1 %v8770_v42  ;;  %6391 = vmatprep.mubr.msk.f32.mxu1 %vm8166_vm1, %v11090_v2  ;;  %v8945_v42 = vmul.f32 %v8801_v62, %v1265_v1 }
 0x232   : > { %7161 = vmatprep.subr.bf16.mxu1 %v11092_v18 }
 0x234   : > { %6392 = vmatmul.mubr.f32.gmra.mrb[30].mxu1 %v1954_v27 }
 0x235   : > { %6394 = vmatprep.mubr.msk.f32.mxu1 %vm8166_vm1, %v11090_v2 }
 0x238   : > { %6395 = vmatmul.mubr.f32.gmra.mrb[32].mxu1 %v1955_v28 }
 0x239   : > { %7163 = vmatpush3.bf16.xpose.msra.mxu1 %v8776_v48  ;;  %6397 = vmatprep.mubr.msk.f32.mxu1 %vm8166_vm1, %v11090_v2  ;;  %v8958_v48 = vmul.f32 %v8801_v62, %v1270_v0 }
 0x23a   : > { %7164 = vmatprep.subr.bf16.mxu1 %v11092_v18 }
 0x23c   : > { %6398 = vmatmul.mubr.f32.gmra.mrb[34].mxu1 %v1956_v29 }
 0x23d   : > { %6400 = vmatprep.mubr.msk.f32.mxu1 %vm8166_vm1, %v11090_v2 }
 0x240   : > { %6401 = vmatmul.mubr.f32.gmra.mrb[36].mxu1 %v1957_v30 }
 0x241   : > { %7166 = vmatpush3.bf16.xpose.msra.mxu1 %v8785_v56  ;;  %6403 = vmatprep.mubr.msk.f32.mxu1 %vm8166_vm1, %v11090_v2  ;;  %v6221_v56 = vpop.f32.mrb[5].mxu1 }
 0x242   : > { %6456 = vmatprep.subr.mxu1 %v11090_v2  ;;  %v1279_v61 = vpop.f32.mrb[6].mxu1 }
 0x243   : > { %v1280_v7 = vadd.f32 %v1279_v61, %v8928_v36  ;;  %v6224_v8 = vpop.f32.mrb[7].mxu1 }
 0x244   : > { %6404 = vmatmul.mubr.f32.gmra.mrb[38].mxu1 %v1958_v35  ;;  %v1284_v19 = vpop.f32.mrb[8].mxu1  ;;  %v9072_v8 = vld [vmem:[%s11171_s3 + $0x8] sm:$0xff] }
 0x245   : > { %6406 = vmatprep.mubr.msk.f32.mxu1 %vm8166_vm1, %v11090_v2  ;;  %v8995_v12 = vmul.f32 %v8801_v62, %v1280_v7  ;;  %v1695_v14 = vmul.f32 %v8804_v63, %v1280_v7  ;;  %v8999_v15 = vmul.f32 %v8883_v25, %v1280_v7  ;;  %v9002_v17 = vmul.f32 %v8933_v38, %v1280_v7  ;;  %v6227_v21 = vpop.f32.mrb[9].mxu1 }
 0x246   : > { %v1285_v10 = vadd.f32 %v1284_v19, %v8928_v36  ;;  %v1289_v28 = vpop.f32.mrb[10].mxu1 }
 0x247   : > { %v7126_v22 = vpack.c.bf16 %v1695_v14, %v1694_v5  ;;  %v1290_v13 = vadd.f32 %v1289_v28, %v8928_v36 }
 0x248   : > { %6407 = vmatmul.mubr.f32.gmra.mrb[40].mxu1 %v1959_v37  ;;  %v9019_v29 = vmul.f32 %v8801_v62, %v1285_v10  ;;  %v1696_v30 = vmul.f32 %v8804_v63, %v1285_v10  ;;  %v9023_v35 = vmul.f32 %v8883_v25, %v1285_v10  ;;  %v6230_v37 = vpop.f32.mrb[11].mxu1  ;;  %v9029_v1 = vmul.f32 %v8933_v38, %v1285_v10 }
 0x249   : > { %6457 = vmatpush3.xpose.msra.mxu1 %v8796_v60  ;;  %6458 = vmatprep.mubr.msk.f32.mxu1 %vm8166_vm1, %v11090_v2  ;;  %v9032_v40 = vmul.f32 %v8801_v62, %v1290_v13  ;;  %v9036_v41 = vmul.f32 %v8883_v25, %v1290_v13  ;;  %v9039_v43 = vmul.f32 %v8933_v38, %v1290_v13  ;;  %v1294_v0 = vpop.f32.mrb[12].mxu1 }
 0x24a   : > { %7176 = vmatprep.subr.bf16.mxu1 %v11092_v18  ;;  %7127 = vmatpush3.bf16.msra.mxu0 %v7126_v22  ;;  %v9044_v16 = vadd.f32 %v1294_v0, %v8928_v36  ;;  %v6233_v45 = vpop.f32.mrb[13].mxu1  ;;  %v9092_v0 = vld [vmem:[%s11171_s3 + $0x18] sm:$0xff] }
 0x24b   : > { %7128 = vmatprep.subr.bf16.mxu0 %v11092_v18 }
 0x24c   : > { %6459 = vmatmul.mubr.f32.vlgmr.msra.gmra.mrb[42].mxu1 %v2279_v34  ;;  %v1697_v34 = vmul.f32 %v8804_v63, %v1290_v13  ;;  %v1698_v36 = vmul.f32 %v8804_v63, %v9044_v16 }
 0x24d   : > { %6461 = vmatprep.mubr.msk.f32.mxu1 %vm8166_vm1, %v11090_v2 }
 0x250   : > { %6462 = vmatmul.mubr.f32.gmra.mrb[44].mxu1 %v2280_v46  ;;  %v7129_v46 = vpack.c.bf16 %v1697_v34, %v1696_v30 }
 0x251   : > { %6464 = vmatprep.mubr.msk.f32.mxu1 %vm8166_vm1, %v11090_v2 }
 0x252   : > { %7130 = vmatpush3.bf16.msra.mxu0 %v7129_v46 }
 0x253   : > { %6316 = vmatprep.subr.mxu0 %v11090_v2 }
 0x254   : > { %6465 = vmatmul.mubr.f32.gmra.mrb[46].mxu1 %v2281_v59 }
 0x255   : > { %6467 = vmatprep.mubr.msk.f32.mxu1 %vm8166_vm1, %v11090_v2 }
 0x256   : > { %6317 = vmatpush3.msk.msra.mxu0 %vm1720_vm11, %v1698_v36 }
 0x257   : > { %7131 = vmatprep.subr.bf16.mxu0 %v11092_v18 }
 0x258   : > { %6468 = vmatmul.mubr.f32.gmra.mrb[48].mxu1 %v2282_v9 }
 0x259   : > { %6470 = vmatprep.mubr.msk.f32.mxu1 %vm8166_vm1, %v11090_v2 }
 0x25c   : > { %6471 = vmatmul.mubr.f32.gmra.mrb[50].mxu1 %v2283_v26  ;;  %v9082_v26 = vld [vmem:[%s11171_s3 + $0x10] sm:$0xff] }
 0x25d   : > { %6473 = vmatprep.mubr.msk.f32.mxu1 %vm8166_vm1, %v11090_v2 }
 0x260   : > { %6474 = vmatmul.mubr.f32.gmra.mrb[52].mxu1 %v2284_v39 }
 0x261   : > { %6476 = vmatprep.mubr.msk.f32.mxu1 %vm8166_vm1, %v11090_v2 }
 0x264   : > { %6477 = vmatmul.mubr.f32.gmra.mrb[54].mxu1 %v2285_v53 }
 0x265   : > { %6546 = vmatprep.mubr.msk.f32.mxu1 %vm8166_vm1, %v11090_v2 }
 0x2e7   : > { %v1383_v56 = vpop.f32.mrb[14].mxu0  ;;  %v1581_v59 = vpop.f32.mrb[14].mxu1 }
 0x2e8   : > { %v9067_v61 = vadd.f32 %v1581_v59, %v9064_v20  ;;  %v6250_v5 = vpop.f32.mrb[15].mxu0  ;;  %v6285_v7 = vpop.f32.mrb[15].mxu1 }
 0x2e9   : > { %v9102_v7 = vld [vmem:[%s11171_s3 + $0x20] sm:$0xff] }
 0x2ea   : > { %v1615_v9 = vsel %vm1417_vm12, %v9067_v61, -inf }
 0x2eb   : > { %1616 = vmax.xlane.f32.xlu0 %v1615_v9  ;;  %v1388_v14 = vpop.f32.mrb[16].mxu0  ;;  %v1586_v19 = vpop.f32.mrb[16].mxu1 }
 0x2ec   : > { %v9077_v10 = vadd.f32 %v1586_v19, %v9072_v8  ;;  %v6253_v21 = vpop.f32.mrb[17].mxu0  ;;  %v6288_v22 = vpop.f32.mrb[17].mxu1  ;;  %v9133_v54 = vadd.f32 %v1388_v14, %v9072_v8 }
 0x2ee   : > { %v1618_v28 = vsel %vm1417_vm12, %v9077_v10, -inf  ;;  %v1421_v14 = vsel %vm1417_vm12, %v9133_v54, -inf }
 0x2ef   : > { %1619 = vmax.xlane.f32.xlu0 %v1618_v28  ;;  %v1393_v30 = vpop.f32.mrb[18].mxu0  ;;  %v1591_v13 = vpop.f32.mrb[18].mxu1 }
 0x2f0   : > { %v9087_v37 = vadd.f32 %v1591_v13, %v9082_v26  ;;  %v6256_v39 = vpop.f32.mrb[19].mxu0  ;;  %v6291_v34 = vpop.f32.mrb[19].mxu1  ;;  %v9136_v27 = vadd.f32 %v1393_v30, %v9082_v26 }
 0x2f1   : > { %v9112_v39 = vld [vmem:[%s11171_s3 + $0x28] sm:$0xff] }
 0x2f2   : > { %v1621_v45 = vsel %vm1417_vm12, %v9087_v37, -inf  ;;  %v1424_v30 = vsel %vm1417_vm12, %v9136_v27, -inf }
 0x2f3   : > { %1622 = vmax.xlane.f32.xlu1 %v1621_v45  ;;  %v1398_v46 = vpop.f32.mrb[20].mxu0  ;;  %v1596_v53 = vpop.f32.mrb[20].mxu1 }
 0x2f4   : > { %v9097_v36 = vadd.f32 %v1596_v53, %v9092_v0  ;;  %v6259_v59 = vpop.f32.mrb[21].mxu0  ;;  %v6294_v5 = vpop.f32.mrb[21].mxu1 }
 0x2f6   : > { %v1624_v9 = vsel %vm1417_vm12, %v9097_v36, -inf }
 0x2f7   : > { %1625 = vmax.xlane.f32.xlu1 %v1624_v9  ;;  %v1403_v19 = vpop.f32.mrb[22].mxu0  ;;  %v1601_v21 = vpop.f32.mrb[22].mxu1 }
 0x2f8   : > { %v9107_v22 = vadd.f32 %v1601_v21, %v9102_v7  ;;  %v6262_v28 = vpop.f32.mrb[23].mxu0  ;;  %v6297_v13 = vpop.f32.mrb[23].mxu1  ;;  %v9122_v21 = vld [vmem:[%s11171_s3 + $0x30] sm:$0x3f] }
 0x2f9   : > { %v9125_v28 = vadd.f32 %v1383_v56, %v9064_v20 }
 0x2fa   : > { %v1627_v34 = vsel %vm1417_vm12, %v9107_v22, -inf }
 0x2fb   : > { %1628 = vmax.xlane.f32.xlu0 %v1627_v34  ;;  %v1408_v45 = vpop.f32.mrb[24].mxu0  ;;  %v1606_v53 = vpop.f32.mrb[24].mxu1 }
 0x2fc   : > { %v9117_v59 = vadd.f32 %v1606_v53, %v9112_v39  ;;  %v6265_v5 = vpop.f32.mrb[25].mxu0  ;;  %v6300_v9 = vpop.f32.mrb[25].mxu1 }
 0x2fe   : > { %v1630_v13 = vsel %vm1417_vm12, %v9117_v59, -inf }
 0x2ff   : > { %1631 = vmax.xlane.f32.xlu1 %v1630_v13  ;;  %v1413_v34 = vpop.f32.mrb[26].mxu0  ;;  %v1611_v31 = vpop.f32.mrb[26].mxu1  ;;  %v1418_v13 = vsel %vm1417_vm12, %v9125_v28, -inf }
 0x300   : > { %v9130_v53 = vadd.f32 %v1611_v31, %v9122_v21  ;;  %v6268_v5 = vpop.f32.mrb[27].mxu0  ;;  %v6303_v9 = vpop.f32.mrb[27].mxu1  ;;  %v9143_v31 = vadd.f32 %v1398_v46, %v9092_v0 }
 0x301   : > { %v9146_v5 = vadd.f32 %v1403_v19, %v9102_v7 }
 0x302   : > { %v1633_v56 = vsel %vm1436_vm13, %v9130_v53, -inf  ;;  %v1427_v46 = vsel %vm1417_vm12, %v9143_v31, -inf }
 0x303   : > { %1634 = vmax.xlane.f32.xlu0 %v1633_v56  ;;  %v2026_v60 = vpop.f32.mrb[28].mxu1  ;;  %1419 = vmax.xlane.f32.xlu1 %v1418_v13  ;;  %v9153_v56 = vadd.f32 %v1408_v45, %v9112_v39  ;;  %v1430_v19 = vsel %vm1417_vm12, %v9146_v5, -inf }
 0x304   : > { %v6390_v52 = vpop.f32.mrb[29].mxu1 }
 0x305   : > { %v9156_v52 = vadd.f32 %v1413_v34, %v9122_v21  ;;  %v1433_v45 = vsel %vm1417_vm12, %v9153_v56, -inf }
 0x307   : > { %v2031_v9 = vpop.f32.mrb[30].mxu1  ;;  %1422 = vmax.xlane.f32.xlu0 %v1421_v14  ;;  %1425 = vmax.xlane.f32.xlu1 %v1424_v30  ;;  %v9163_v14 = vadd.f32 %v2026_v60, %v9064_v20  ;;  %v1437_v34 = vsel %vm1436_vm13, %v9156_v52, -inf }
 0x308   : > { %v6393_v24 = vpop.f32.mrb[31].mxu1 }
 0x309   : > { %v9166_v24 = vadd.f32 %v2031_v9, %v9072_v8  ;;  %v2060_v60 = vsel %vm1417_vm12, %v9163_v14, -inf }
 0x30b   : > { %v2036_v13 = vpop.f32.mrb[32].mxu1  ;;  %1428 = vmax.xlane.f32.xlu0 %v1427_v46  ;;  %1431 = vmax.xlane.f32.xlu1 %v1430_v19  ;;  %v2063_v9 = vsel %vm1417_vm12, %v9166_v24, -inf }
 0x30c   : > { %v6396_v58 = vpop.f32.mrb[33].mxu1  ;;  %v9173_v46 = vadd.f32 %v2036_v13, %v9082_v26 }
 0x30f   : > { %v2041_v30 = vpop.f32.mrb[34].mxu1  ;;  %1434 = vmax.xlane.f32.xlu0 %v1433_v45  ;;  %1438 = vmax.xlane.f32.xlu1 %v1437_v34 }
 0x310   : > { %v6399_v49 = vpop.f32.mrb[35].mxu1  ;;  %v9176_v58 = vadd.f32 %v2041_v30, %v9092_v0 }
 0x311   : > { %v2066_v49 = vsel %vm1417_vm12, %v9173_v46, -inf }
 0x312   : > { %v2069_v13 = vsel %vm1417_vm12, %v9176_v58, -inf }
 0x313   : > { %v2046_v19 = vpop.f32.mrb[36].mxu1  ;;  %2061 = vmax.xlane.f32.xlu0 %v2060_v60  ;;  %2064 = vmax.xlane.f32.xlu1 %v2063_v9 }
 0x314   : > { %v6402_v23 = vpop.f32.mrb[37].mxu1  ;;  %v9183_v45 = vadd.f32 %v2046_v19, %v9102_v7 }
 0x316   : > { %v2072_v60 = vsel %vm1417_vm12, %v9183_v45, -inf }
 0x317   : > { %v2051_v34 = vpop.f32.mrb[38].mxu1  ;;  %2067 = vmax.xlane.f32.xlu0 %v2066_v49  ;;  %2070 = vmax.xlane.f32.xlu1 %v2069_v13 }
 0x318   : > { %v9190_v30 = vadd.f32 %v2051_v34, %v9112_v39  ;;  %v6405_v2 = vpop.f32.mrb[39].mxu1 }
 0x31a   : > { %v2075_v23 = vsel %vm1417_vm12, %v9190_v30, -inf }
 0x31b   : > { %v2056_v9 = vpop.f32.mrb[40].mxu1  ;;  %2073 = vmax.xlane.f32.xlu0 %v2072_v60  ;;  %2076 = vmax.xlane.f32.xlu1 %v2075_v23 }
 0x31c   : > { %v9197_v19 = vadd.f32 %v2056_v9, %v9122_v21  ;;  %v6408_v57 = vpop.f32.mrb[41].mxu1 }
 0x31e   : > { %v2078_v49 = vsel %vm1436_vm13, %v9197_v19, -inf }
 0x31f   : > { %v2352_v13 = vpop.f32.mrb[42].mxu1  ;;  %2079 = vmax.xlane.f32.xlu0 %v2078_v49 }
 0x320   : > { %v9202_v2 = vadd.f32 %v2352_v13, %v9064_v20  ;;  %v6460_v34 = vpop.f32.mrb[43].mxu1 }
 0x322   : > { %v2386_v18 = vsel %vm1417_vm12, %v9202_v2, -inf }
 0x323   : > { %v2357_v32 = vpop.f32.mrb[44].mxu1  ;;  %2387 = vmax.xlane.f32.xlu1 %v2386_v18 }
 0x324   : > { %v9207_v60 = vadd.f32 %v2357_v32, %v9072_v8  ;;  %v6463_v23 = vpop.f32.mrb[45].mxu1 }
 0x326   : > { %v2389_v57 = vsel %vm1417_vm12, %v9207_v60, -inf }
 0x327   : > { %v2362_v9 = vpop.f32.mrb[46].mxu1  ;;  %2390 = vmax.xlane.f32.xlu1 %v2389_v57 }
 0x328   : > { %v9212_v49 = vadd.f32 %v2362_v9, %v9082_v26  ;;  %v6466_v20 = vpop.f32.mrb[47].mxu1 }
 0x32a   : > { %v2392_v13 = vsel %vm1417_vm12, %v9212_v49, -inf }
 0x32b   : > { %v2367_v34 = vpop.f32.mrb[48].mxu1  ;;  %2393 = vmax.xlane.f32.xlu1 %v2392_v13 }
 0x32c   : > { %v9217_v18 = vadd.f32 %v2367_v34, %v9092_v0  ;;  %v6469_v32 = vpop.f32.mrb[49].mxu1 }
 0x32e   : > { %v2395_v8 = vsel %vm1417_vm12, %v9217_v18, -inf }
 0x32f   : > { %v2372_v23 = vpop.f32.mrb[50].mxu1  ;;  %2396 = vmax.xlane.f32.xlu1 %v2395_v8 }
 0x330   : > { %v9222_v57 = vadd.f32 %v2372_v23, %v9102_v7  ;;  %v6472_v26 = vpop.f32.mrb[51].mxu1 }
 0x332   : > { %v2398_v9 = vsel %vm1417_vm12, %v9222_v57, -inf }
 0x333   : > { %v2377_v20 = vpop.f32.mrb[52].mxu1  ;;  %2399 = vmax.xlane.f32.xlu1 %v2398_v9 }
 0x334   : > { %v9227_v13 = vadd.f32 %v2377_v20, %v9112_v39  ;;  %v6475_v0 = vpop.f32.mrb[53].mxu1 }
 0x336   : > { %v2401_v34 = vsel %vm1417_vm12, %v9227_v13, -inf }
 0x337   : > { %v2382_v32 = vpop.f32.mrb[54].mxu1  ;;  %2402 = vmax.xlane.f32.xlu1 %v2401_v34 }
 0x338   : > { %v9232_v8 = vadd.f32 %v2382_v32, %v9122_v21  ;;  %v6478_v7 = vpop.f32.mrb[55].mxu1 }
 0x33a   : > { %v2404_v23 = vsel %vm1436_vm13, %v9232_v8, -inf }
 0x33b   : > { %2405 = vmax.xlane.f32.xlu1 %v2404_v23 }
 0x378   : > { %v1617_v26 = vpop.xlane.xlu0 %1616 }
 0x379   : > { %v1636_v9 = vsub.f32 %v9067_v61, %v1617_v26 }
 0x37b   : > { %v1643_v63 = vmul.f32 1.442695, %v1636_v9 }
 0x37c   : > { %v1620_v39 = vpop.xlane.xlu0 %1619 }
 0x37d   : > { %7572 = vpow2.f32 %v1643_v63  ;;  %v1637_v20 = vsub.f32 %v9077_v10, %v1620_v39 }
 0x37f   : > { %v1645_v0 = vmul.f32 1.442695, %v1637_v20 }
 0x380   : > { %v1623_v33 = vpop.xlane.xlu1 %1622 }
 0x381   : > { %7574 = vpow2.f32 %v1645_v0  ;;  %v1638_v34 = vsub.f32 %v9087_v37, %v1623_v33 }
 0x383   : > { %v1647_v21 = vmul.f32 1.442695, %v1638_v34 }
 0x384   : > { %v1626_v32 = vpop.xlane.xlu1 %1625 }
 0x385   : > { %7576 = vpow2.f32 %v1647_v21  ;;  %v1639_v7 = vsub.f32 %v9097_v36, %v1626_v32 }
 0x387   : > { %v9240_v55 = vpop.eup %7572  ;;  %v1649_v23 = vmul.f32 1.442695, %v1639_v7 }
 0x388   : > { %v1629_v3 = vpop.xlane.xlu0 %1628  ;;  %v1657_v61 = vsel %vm1417_vm12, %v9240_v55, 0.0 }
 0x389   : > { %7578 = vpow2.f32 %v1649_v23  ;;  %v1640_v63 = vsub.f32 %v9107_v22, %v1629_v3  ;;  %1658 = vadd.xlane.f32.xlu0 %v1657_v61 }
 0x38b   : > { %v9245_v10 = vpop.eup %7574  ;;  %v1651_v26 = vmul.f32 1.442695, %v1640_v63 }
 0x38c   : > { %v1632_v33 = vpop.xlane.xlu1 %1631  ;;  %v1660_v37 = vsel %vm1417_vm12, %v9245_v10, 0.0 }
 0x38d   : > { %7580 = vpow2.f32 %v1651_v26  ;;  %v1641_v36 = vsub.f32 %v9117_v59, %v1632_v33  ;;  %1661 = vadd.xlane.f32.xlu0 %v1660_v37 }
 0x38f   : > { %v9250_v9 = vpop.eup %7576  ;;  %v1653_v39 = vmul.f32 1.442695, %v1641_v36 }
 0x390   : > { %v1635_v20 = vpop.xlane.xlu0 %1634  ;;  %v1420_v0 = vpop.xlane.xlu1 %1419  ;;  %v1663_v3 = vsel %vm1417_vm12, %v9250_v9, 0.0 }
 0x391   : > { %7582 = vpow2.f32 %v1653_v39  ;;  %v1642_v22 = vsub.f32 %v9130_v53, %v1635_v20  ;;  %v1440_v34 = vsub.f32 %v9125_v28, %v1420_v0  ;;  %1664 = vadd.xlane.f32.xlu0 %v1663_v3 }
 0x393   : > { %v9256_v21 = vpop.eup %7578  ;;  %v1655_v32 = vmul.f32 1.442695, %v1642_v22  ;;  %v1447_v7 = vmul.f32 1.442695, %v1440_v34 }
 0x394   : > { %v1423_v59 = vpop.xlane.xlu0 %1422  ;;  %v1426_v23 = vpop.xlane.xlu1 %1425  ;;  %v1666_v61 = vsel %vm1417_vm12, %v9256_v21, 0.0 }
 0x395   : > { %7584 = vpow2.f32 %v1655_v32  ;;  %v1441_v63 = vsub.f32 %v9133_v54, %v1423_v59  ;;  %v1442_v26 = vsub.f32 %v9136_v27, %v1426_v23  ;;  %1667 = vadd.xlane.f32.xlu0 %v1666_v61 }
 0x396   : > { %7586 = vpow2.f32 %v1447_v7 }
 0x397   : > { %v9262_v53 = vpop.eup %7580  ;;  %v1449_v28 = vmul.f32 1.442695, %v1441_v63  ;;  %v1451_v33 = vmul.f32 1.442695, %v1442_v26 }
 0x398   : > { %v1429_v37 = vpop.xlane.xlu0 %1428  ;;  %v1432_v36 = vpop.xlane.xlu1 %1431  ;;  %v1669_v39 = vsel %vm1417_vm12, %v9262_v53, 0.0 }
 0x399   : > { %7588 = vpow2.f32 %v1449_v28  ;;  %v1443_v20 = vsub.f32 %v9143_v31, %v1429_v37  ;;  %v1444_v0 = vsub.f32 %v9146_v5, %v1432_v36  ;;  %1670 = vadd.xlane.f32.xlu0 %v1669_v39 }
 0x39a   : > { %7590 = vpow2.f32 %v1451_v33 }
 0x39b   : > { %v9268_v54 = vpop.eup %7582  ;;  %v1453_v27 = vmul.f32 1.442695, %v1443_v20  ;;  %v1455_v3 = vmul.f32 1.442695, %v1444_v0 }
 0x39c   : > { %v1435_v22 = vpop.xlane.xlu0 %1434  ;;  %v1439_v34 = vpop.xlane.xlu1 %1438  ;;  %v1672_v32 = vsel %vm1417_vm12, %v9268_v54, 0.0 }
 0x39d   : > { %7592 = vpow2.f32 %v1453_v27  ;;  %v1445_v7 = vsub.f32 %v9153_v56, %v1435_v22  ;;  %v1446_v59 = vsub.f32 %v9156_v52, %v1439_v34  ;;  %1673 = vadd.xlane.f32.xlu0 %v1672_v32 }
 0x39e   : > { %7594 = vpow2.f32 %v1455_v3 }
 0x39f   : > { %v9274_v31 = vpop.eup %7584  ;;  %v1457_v5 = vmul.f32 1.442695, %v1445_v7  ;;  %v1459_v23 = vmul.f32 1.442695, %v1446_v59 }
 0x3a0   : > { %v9276_v61 = vpop.eup %7586  ;;  %v2062_v63 = vpop.xlane.xlu0 %2061  ;;  %v1675_v28 = vsel %vm1436_vm13, %v9274_v31, 0.0 }
 0x3a1   : > { %v2065_v26 = vpop.xlane.xlu1 %2064  ;;  %7596 = vpow2.f32 %v1457_v5  ;;  %v2081_v33 = vsub.f32 %v9163_v14, %v2062_v63  ;;  %1676 = vadd.xlane.f32.xlu0 %v1675_v28  ;;  %v1461_v52 = vsel %vm1417_vm12, %v9276_v61, 0.0 }
 0x3a2   : > { %v2082_v56 = vsub.f32 %v9166_v24, %v2065_v26  ;;  %7598 = vpow2.f32 %v1459_v23  ;;  %1462 = vadd.xlane.f32.xlu1 %v1461_v52 }
 0x3a3   : > { %v9284_v37 = vpop.eup %7588  ;;  %v2088_v36 = vmul.f32 1.442695, %v2081_v33 }
 0x3a4   : > { %v2090_v39 = vmul.f32 1.442695, %v2082_v56  ;;  %v9286_v20 = vpop.eup %7590  ;;  %v2068_v0 = vpop.xlane.xlu0 %2067  ;;  %v1464_v3 = vsel %vm1417_vm12, %v9284_v37, 0.0 }
 0x3a5   : > { %v2071_v27 = vpop.xlane.xlu1 %2070  ;;  %7600 = vpow2.f32 %v2088_v36  ;;  %v2083_v14 = vsub.f32 %v9173_v46, %v2068_v0  ;;  %1465 = vadd.xlane.f32.xlu0 %v1464_v3  ;;  %v1467_v22 = vsel %vm1417_vm12, %v9286_v20, 0.0 }
 0x3a6   : > { %v2084_v24 = vsub.f32 %v9176_v58, %v2071_v27  ;;  %7602 = vpow2.f32 %v2090_v39  ;;  %1468 = vadd.xlane.f32.xlu1 %v1467_v22 }
 0x3a7   : > { %v9294_v34 = vpop.eup %7592  ;;  %v2092_v32 = vmul.f32 1.442695, %v2083_v14 }
 0x3a8   : > { %v2094_v7 = vmul.f32 1.442695, %v2084_v24  ;;  %v9296_v59 = vpop.eup %7594  ;;  %v2074_v5 = vpop.xlane.xlu0 %2073  ;;  %v1470_v63 = vsel %vm1417_vm12, %v9294_v34, 0.0 }
 0x3a9   : > { %v2077_v23 = vpop.xlane.xlu1 %2076  ;;  %7604 = vpow2.f32 %v2092_v32  ;;  %v2085_v46 = vsub.f32 %v9183_v45, %v2074_v5  ;;  %1471 = vadd.xlane.f32.xlu0 %v1470_v63  ;;  %v1473_v26 = vsel %vm1417_vm12, %v9296_v59, 0.0 }
 0x3aa   : > { %v2086_v58 = vsub.f32 %v9190_v30, %v2077_v23  ;;  %7606 = vpow2.f32 %v2094_v7  ;;  %1474 = vadd.xlane.f32.xlu1 %v1473_v26 }
 0x3ab   : > { %v9304_v28 = vpop.eup %7596  ;;  %v2096_v33 = vmul.f32 1.442695, %v2085_v46 }
 0x3ac   : > { %v2098_v56 = vmul.f32 1.442695, %v2086_v58  ;;  %v9306_v52 = vpop.eup %7598  ;;  %v2080_v36 = vpop.xlane.xlu0 %2079  ;;  %v1476_v39 = vsel %vm1417_vm12, %v9304_v28, 0.0 }
 0x3ad   : > { %7608 = vpow2.f32 %v2096_v33  ;;  %v2087_v45 = vsub.f32 %v9197_v19, %v2080_v36  ;;  %1477 = vadd.xlane.f32.xlu0 %v1476_v39  ;;  %v1479_v30 = vsel %vm1436_vm13, %v9306_v52, 0.0 }
 0x3ae   : > { %7610 = vpow2.f32 %v2098_v56  ;;  %1480 = vadd.xlane.f32.xlu1 %v1479_v30 }
 0x3af   : > { %v9313_v0 = vpop.eup %7600  ;;  %v2100_v27 = vmul.f32 1.442695, %v2087_v45 }
 0x3b0   : > { %v9315_v3 = vpop.eup %7602  ;;  %v2388_v14 = vpop.xlane.xlu1 %2387  ;;  %v2102_v24 = vsel %vm1417_vm12, %v9313_v0, 0.0 }
 0x3b1   : > { %7612 = vpow2.f32 %v2100_v27  ;;  %v2407_v22 = vsub.f32 %v9202_v2, %v2388_v14  ;;  %2103 = vadd.xlane.f32.xlu0 %v2102_v24  ;;  %v2105_v19 = vsel %vm1417_vm12, %v9315_v3, 0.0 }
 0x3b2   : > { %2106 = vadd.xlane.f32.xlu1 %v2105_v19 }
 0x3b3   : > { %v9322_v32 = vpop.eup %7604  ;;  %v2414_v7 = vmul.f32 1.442695, %v2407_v22 }
 0x3b4   : > { %v9324_v5 = vpop.eup %7606  ;;  %v2391_v23 = vpop.xlane.xlu1 %2390  ;;  %v2108_v63 = vsel %vm1417_vm12, %v9322_v32, 0.0 }
 0x3b5   : > { %7614 = vpow2.f32 %v2414_v7  ;;  %v2408_v46 = vsub.f32 %v9207_v60, %v2391_v23  ;;  %2109 = vadd.xlane.f32.xlu0 %v2108_v63  ;;  %v2111_v2 = vsel %vm1417_vm12, %v9324_v5, 0.0 }
 0x3b6   : > { %2112 = vadd.xlane.f32.xlu1 %v2111_v2 }
 0x3b7   : > { %v9331_v58 = vpop.eup %7608  ;;  %v2416_v26 = vmul.f32 1.442695, %v2408_v46 }
 0x3b8   : > { %v9333_v33 = vpop.eup %7610  ;;  %v2394_v56 = vpop.xlane.xlu1 %2393  ;;  %v2114_v36 = vsel %vm1417_vm12, %v9331_v58, 0.0 }
 0x3b9   : > { %7616 = vpow2.f32 %v2416_v26  ;;  %v2409_v39 = vsub.f32 %v9212_v49, %v2394_v56  ;;  %2115 = vadd.xlane.f32.xlu0 %v2114_v36  ;;  %v2117_v60 = vsel %vm1417_vm12, %v9333_v33, 0.0 }
 0x3ba   : > { %2118 = vadd.xlane.f32.xlu1 %v2117_v60 }
 0x3bb   : > { %v9340_v45 = vpop.eup %7612  ;;  %v2418_v30 = vmul.f32 1.442695, %v2409_v39 }
 0x3bc   : > { %v2397_v27 = vpop.xlane.xlu1 %2396  ;;  %v2120_v14 = vsel %vm1436_vm13, %v9340_v45, 0.0 }
 0x3bd   : > { %7618 = vpow2.f32 %v2418_v30  ;;  %v2410_v24 = vsub.f32 %v9217_v18, %v2397_v27  ;;  %2121 = vadd.xlane.f32.xlu0 %v2120_v14 }
 0x3bf   : > { %v9345_v22 = vpop.eup %7614  ;;  %v2420_v19 = vmul.f32 1.442695, %v2410_v24 }
 0x3c0   : > { %v2400_v49 = vpop.xlane.xlu1 %2399  ;;  %v2428_v7 = vsel %vm1417_vm12, %v9345_v22, 0.0 }
 0x3c1   : > { %7620 = vpow2.f32 %v2420_v19  ;;  %v2411_v23 = vsub.f32 %v9222_v57, %v2400_v49  ;;  %2429 = vadd.xlane.f32.xlu1 %v2428_v7 }
 0x3c3   : > { %v9350_v63 = vpop.eup %7616  ;;  %v2422_v46 = vmul.f32 1.442695, %v2411_v23  ;;  %v2601_v23 = vld [vmem:[%s8563_s1] sm:$0xff] }
 0x3c4   : > { %v2403_v2 = vpop.xlane.xlu1 %2402  ;;  %v2431_v26 = vsel %vm1417_vm12, %v9350_v63, 0.0 }
 0x3c5   : > { %7622 = vpow2.f32 %v2422_v46  ;;  %v2412_v18 = vsub.f32 %v9227_v13, %v2403_v2  ;;  %2432 = vadd.xlane.f32.xlu0 %v2431_v26  ;;  %v2602_v46 = vld [vmem:[%s8563_s1 + $0x8] sm:$0xff]  ;;  %v2603_v2 = vld [vmem:[%s8563_s1 + $0x10] sm:$0xff] }
 0x3c6   : > { %v7177_v26 = vpack.c.bf16 %v2602_v46, %v2601_v23  ;;  %v2609_v46 = vld [vmem:[%s8563_s1 + $0x40] sm:$0xff] }
 0x3c7   : > { %v9355_v56 = vpop.eup %7618  ;;  %v2424_v36 = vmul.f32 1.442695, %v2412_v18  ;;  %v2604_v18 = vld [vmem:[%s8563_s1 + $0x18] sm:$0xff] }
 0x3c8   : > { %v2406_v39 = vpop.xlane.xlu1 %2405  ;;  %v2434_v60 = vsel %vm1417_vm12, %v9355_v56, 0.0  ;;  %7178 = vmatpush3.bf16.msra.mxu1 %v7177_v26 }
 0x3c9   : > { %7624 = vpow2.f32 %v2424_v36  ;;  %v2413_v57 = vsub.f32 %v9232_v8, %v2406_v39  ;;  %2435 = vadd.xlane.f32.xlu1 %v2434_v60  ;;  %v7180_v36 = vpack.c.bf16 %v2604_v18, %v2603_v2  ;;  %v11172_v39 = vmov 0.0|0.0   ;;  %v2605_v60 = vld [vmem:[%s8563_s1 + $0x20] sm:$0xff]  ;;  %v2610_v2 = vld [vmem:[%s8563_s1 + $0x48] sm:$0xff] }
 0x3ca   : > { %7179 = vmatprep.subr.bf16.mxu1 %v11172_v39  ;;  %v7189_v18 = vpack.c.bf16 %v2610_v2, %v2609_v46  ;;  %v11173_v46 = vpack.c.bf16 %v8958_v48, %v8945_v42  ;;  %v11174_v2 = vmov 0.0   ;;  %v11175_v42 = vpack.c.bf16 %v8995_v12, %v8982_v4 }
 0x3cb   : > { %v9360_v30 = vpop.eup %7620  ;;  %v2426_v27 = vmul.f32 1.442695, %v2413_v57  ;;  %v2606_v57 = vld [vmem:[%s8563_s1 + $0x28] sm:$0xff]  ;;  %v11176_v4 = vpack.c.bf16 %v9032_v40, %v9019_v29 }
 0x3cc   : > { %v2437_v13 = vsel %vm1417_vm12, %v9360_v30, 0.0  ;;  %7181 = vmatpush3.bf16.msra.mxu1 %v7180_v36  ;;  %v2611_v36 = vld [vmem:[%s8563_s1 + $0x50] sm:$0xff] }
 0x3cd   : > { %7626 = vpow2.f32 %v2426_v27  ;;  %2438 = vadd.xlane.f32.xlu0 %v2437_v13  ;;  %v7183_v13 = vpack.c.bf16 %v2606_v57, %v2605_v60  ;;  %7182 = vmatprep.subr.bf16.mxu1 %v11172_v39  ;;  %v2612_v60 = vld [vmem:[%s8563_s1 + $0x58] sm:$0xff] }
 0x3cf   : > { %v9364_v14 = vpop.eup %7622 }
 0x3d0   : > { %v2440_v24 = vsel %vm1417_vm12, %v9364_v14, 0.0  ;;  %7184 = vmatpush3.bf16.msra.mxu1 %v7183_v13  ;;  %v7192_v13 = vpack.c.bf16 %v2612_v60, %v2611_v36  ;;  %v2615_v36 = vld [vmem:[%s8563_s1 + $0x70] sm:$0xff]  ;;  %v2616_v60 = vld [vmem:[%s8563_s1 + $0x78] sm:$0xff] }
 0x3d1   : > { %2441 = vadd.xlane.f32.xlu1 %v2440_v24  ;;  %v2607_v24 = vld [vmem:[%s8563_s1 + $0x30] sm:$0xff]  ;;  %7185 = vmatprep.subr.bf16.mxu1 %v11172_v39 }
 0x3d3   : > { %v9368_v8 = vpop.eup %7624 }
 0x3d4   : > { %v2443_v19 = vsel %vm1417_vm12, %v9368_v8, 0.0 }
 0x3d5   : > { %2444 = vadd.xlane.f32.xlu0 %v2443_v19  ;;  %v2608_v19 = vld [vmem:[%s8563_s1 + $0x38] sm:$0xff] }
 0x3d6   : > { %v7186_v23 = vpack.c.bf16 %v2608_v19, %v2607_v24  ;;  %v2613_v24 = vld [vmem:[%s8563_s1 + $0x60] sm:$0xff]  ;;  %v2614_v19 = vld [vmem:[%s8563_s1 + $0x68] sm:$0xff] }
 0x3d7   : > { %v9372_v49 = vpop.eup %7626 }
 0x3d8   : > { %v2446_v7 = vsel %vm1436_vm13, %v9372_v49, 0.0  ;;  %7187 = vmatpush3.bf16.msra.mxu1 %v7186_v23 }
 0x3d9   : > { %2447 = vadd.xlane.f32.xlu1 %v2446_v7  ;;  %7188 = vmatprep.subr.bf16.mxu1 %v11172_v39 }
 0x3dc   : > { %7190 = vmatpush3.bf16.msra.mxu1 %v7189_v18  ;;  %v7195_v18 = vpack.c.bf16 %v2614_v19, %v2613_v24 }
 0x3dd   : > { %7191 = vmatprep.subr.bf16.mxu1 %v11172_v39 }
 0x3e0   : > { %7193 = vmatpush3.bf16.msra.mxu1 %v7192_v13  ;;  %v1502_v13 = vmul.f32 %v8801_v62, %v9044_v16 }
 0x3e1   : > { %7194 = vmatprep.subr.bf16.mxu1 %v11172_v39 }
 0x3e4   : > { %7196 = vmatpush3.bf16.msra.mxu1 %v7195_v18 }
 0x3e5   : > { %7197 = vmatprep.subr.bf16.mxu1 %v11172_v39 }
 0x416   : > { %v1659_v27 = vpop.xlane.xlu0 %1658 }
 0x417   : > { %7628 = vrcp.f32 %v1659_v27 }
 0x41a   : > { %v1662_v7 = vpop.xlane.xlu0 %1661 }
 0x41b   : > { %7630 = vrcp.f32 %v1662_v7 }
 0x41e   : > { %v1665_v26 = vpop.xlane.xlu0 %1664 }
 0x41f   : > { %7632 = vrcp.f32 %v1665_v26 }
 0x421   : > { %v7629_v57 = vpop.eup %7628 }
 0x422   : > { %v1685_v27 = vmul.f32 %v7629_v57, %v9240_v55  ;;  %v1668_v7 = vpop.xlane.xlu0 %1667 }
 0x423   : > { %7634 = vrcp.f32 %v1668_v7 }
 0x424   : > { %6319 = vmatmul.mubr.msk.f32.vlgmr.msra.gmra.mrb[28].mxu0 %vm1417_vm12, %v1685_v27  ;;  %v7198_v27 = vpack.c.bf16 %v2616_v60, %v2615_v36 }
 0x425   : > { %v7631_v23 = vpop.eup %7630  ;;  %7133 = vmatpush3.bf16.msra.mxu0 %v11173_v46  ;;  %6321 = vmatprep.mubr.msk.f32.mxu0 %vm8166_vm1, %v11174_v2 }
 0x426   : > { %v1671_v55 = vpop.xlane.xlu0 %1670  ;;  %7134 = vmatprep.subr.bf16.mxu0 %v11172_v39  ;;  %v1686_v26 = vmul.f32 %v7631_v23, %v9245_v10  ;;  %7199 = vmatpush3.bf16.msra.mxu1 %v7198_v27 }
 0x427   : > { %7636 = vrcp.f32 %v1671_v55  ;;  %7200 = vmatprep.subr.bf16.mxu1 %v11172_v39 }
 0x428   : > { %6322 = vmatmul.mubr.msk.f32.gmra.mrb[30].mxu0 %vm1417_vm12, %v1686_v26 }
 0x429   : > { %v7633_v57 = vpop.eup %7632  ;;  %7136 = vmatpush3.bf16.msra.mxu0 %v11175_v42  ;;  %6324 = vmatprep.mubr.msk.f32.mxu0 %vm8166_vm1, %v11174_v2 }
 0x42a   : > { %v1674_v48 = vpop.xlane.xlu0 %1673  ;;  %7137 = vmatprep.subr.bf16.mxu0 %v11172_v39  ;;  %v1687_v10 = vmul.f32 %v7633_v57, %v9250_v9  ;;  %v11177_v57 = vpack.c.bf16 %v8962_v50, %v8949_v44 }
 0x42b   : > { %7638 = vrcp.f32 %v1674_v48 }
 0x42c   : > { %6325 = vmatmul.mubr.msk.f32.gmra.mrb[32].mxu0 %vm1417_vm12, %v1687_v10 }
 0x42d   : > { %v7635_v7 = vpop.eup %7634  ;;  %7139 = vmatpush3.bf16.msra.mxu0 %v11176_v4  ;;  %6327 = vmatprep.mubr.msk.f32.mxu0 %vm8166_vm1, %v11174_v2 }
 0x42e   : > { %v1677_v12 = vpop.xlane.xlu0 %1676  ;;  %6351 = vmatprep.subr.mxu0 %v11174_v2  ;;  %v1688_v9 = vmul.f32 %v7635_v7, %v9256_v21 }
 0x42f   : > { %7640 = vrcp.f32 %v1677_v12  ;;  %v1463_v24 = vpop.xlane.xlu1 %1462 }
 0x430   : > { %6328 = vmatmul.mubr.msk.f32.gmra.mrb[34].mxu0 %vm1417_vm12, %v1688_v9  ;;  %7642 = vrcp.f32 %v1463_v24 }
 0x431   : > { %v7637_v29 = vpop.eup %7636  ;;  %6352 = vmatpush3.msk.msra.mxu0 %vm1720_vm11, %v1502_v13  ;;  %6330 = vmatprep.mubr.msk.f32.mxu0 %vm8166_vm1, %v11174_v2 }
 0x432   : > { %v1466_v40 = vpop.xlane.xlu0 %1465  ;;  %v1689_v21 = vmul.f32 %v7637_v29, %v9262_v53  ;;  %7149 = vmatprep.subr.bf16.mxu0 %v11172_v39 }
 0x433   : > { %7644 = vrcp.f32 %v1466_v40  ;;  %v1469_v23 = vpop.xlane.xlu1 %1468  ;;  %v11180_v40 = vpack.c.bf16 %v8965_v51, %v8955_v47 }
 0x434   : > { %6331 = vmatmul.mubr.msk.f32.gmra.mrb[36].mxu0 %vm1417_vm12, %v1689_v21  ;;  %7646 = vrcp.f32 %v1469_v23 }
 0x435   : > { %v7639_v19 = vpop.eup %7638  ;;  %6333 = vmatprep.mubr.msk.f32.mxu0 %vm8166_vm1, %v11174_v2 }
 0x436   : > { %v1690_v46 = vmul.f32 %v7639_v19, %v9268_v54  ;;  %v1472_v53 = vpop.xlane.xlu0 %1471 }
 0x437   : > { %7648 = vrcp.f32 %v1472_v53  ;;  %v1475_v54 = vpop.xlane.xlu1 %1474 }
 0x438   : > { %6334 = vmatmul.mubr.msk.f32.gmra.mrb[38].mxu0 %vm1417_vm12, %v1690_v46  ;;  %7650 = vrcp.f32 %v1475_v54 }
 0x439   : > { %v7641_v55 = vpop.eup %7640  ;;  %6336 = vmatprep.mubr.msk.f32.mxu0 %vm8166_vm1, %v11174_v2 }
 0x43a   : > { %v1691_v26 = vmul.f32 %v7641_v55, %v9274_v31  ;;  %v7643_v18 = vpop.eup %7642  ;;  %v1478_v31 = vpop.xlane.xlu0 %1477 }
 0x43b   : > { %v1489_v36 = vmul.f32 %v7643_v18, %v9276_v61  ;;  %7652 = vrcp.f32 %v1478_v31  ;;  %v11178_v61 = vpack.c.bf16 %v8999_v15, %v8986_v6  ;;  %v1481_v44 = vpop.xlane.xlu1 %1480 }
 0x43c   : > { %6337 = vmatmul.mubr.msk.f32.gmra.mrb[40].mxu0 %vm1417_vm12, %v1691_v26  ;;  %7654 = vrcp.f32 %v1481_v44 }
 0x43d   : > { %6353 = vmatprep.mubr.msk.f32.mxu0 %vm8166_vm1, %v11174_v2  ;;  %v7645_v60 = vpop.eup %7644 }
 0x43e   : > { %v1490_v42 = vmul.f32 %v7645_v60, %v9284_v37  ;;  %v7647_v48 = vpop.eup %7646  ;;  %v11179_v37 = vpack.c.bf16 %v9036_v41, %v9023_v35  ;;  %v2104_v6 = vpop.xlane.xlu0 %2103 }
 0x43f   : > { %v1491_v50 = vmul.f32 %v7647_v48, %v9286_v20  ;;  %v2143_v20 = vmul.f32 %v8883_v25, %v9044_v16  ;;  %7656 = vrcp.f32 %v2104_v6  ;;  %v2107_v35 = vpop.xlane.xlu1 %2106 }
 0x440   : > { %6354 = vmatmul.mubr.msk.f32.vlgmr.msra.gmra.mrb[28].mxu0 %vm1417_vm12, %v1489_v36  ;;  %7658 = vrcp.f32 %v2107_v35 }
 0x441   : > { %7151 = vmatpush3.bf16.msra.mxu0 %v11177_v57  ;;  %6356 = vmatprep.mubr.msk.f32.mxu0 %vm8166_vm1, %v11174_v2  ;;  %v7649_v10 = vpop.eup %7648 }
 0x442   : > { %7152 = vmatprep.subr.bf16.mxu0 %v11172_v39  ;;  %v1492_v15 = vmul.f32 %v7649_v10, %v9294_v34  ;;  %v7651_v27 = vpop.eup %7650  ;;  %v2110_v34 = vpop.xlane.xlu0 %2109 }
 0x443   : > { %v1493_v41 = vmul.f32 %v7651_v27, %v9296_v59  ;;  %7660 = vrcp.f32 %v2110_v34  ;;  %v2113_v59 = vpop.xlane.xlu1 %2112 }
 0x444   : > { %6357 = vmatmul.mubr.msk.f32.gmra.mrb[30].mxu0 %vm1417_vm12, %v1490_v42  ;;  %7662 = vrcp.f32 %v2113_v59 }
 0x445   : > { %7154 = vmatpush3.bf16.msra.mxu0 %v11178_v61  ;;  %6359 = vmatprep.mubr.msk.f32.mxu0 %vm8166_vm1, %v11174_v2  ;;  %v7653_v7 = vpop.eup %7652 }
 0x446   : > { %7155 = vmatprep.subr.bf16.mxu0 %v11172_v39  ;;  %v1494_v4 = vmul.f32 %v7653_v7, %v9304_v28  ;;  %v7655_v12 = vpop.eup %7654  ;;  %v2116_v28 = vpop.xlane.xlu0 %2115 }
 0x447   : > { %v1495_v9 = vmul.f32 %v7655_v12, %v9306_v52  ;;  %7664 = vrcp.f32 %v2116_v28  ;;  %v2119_v52 = vpop.xlane.xlu1 %2118  ;;  %v5767_v12 = vld [vmem:[%s11183_s6] ss:$0 sm:$0xff] }
 0x448   : > { %6360 = vmatmul.mubr.msk.f32.gmra.mrb[32].mxu0 %vm1417_vm12, %v1491_v50  ;;  %7666 = vrcp.f32 %v2119_v52 }
 0x449   : > { %7157 = vmatpush3.bf16.msra.mxu0 %v11179_v37  ;;  %6362 = vmatprep.mubr.msk.f32.mxu0 %vm8166_vm1, %v11174_v2  ;;  %v7657_v13 = vpop.eup %7656 }
 0x44a   : > { %6421 = vmatprep.subr.mxu0 %v11174_v2  ;;  %v2130_v24 = vmul.f32 %v7657_v13, %v9313_v0  ;;  %v7659_v29 = vpop.eup %7658  ;;  %v11181_v0 = vpack.c.bf16 %v9002_v17, %v8992_v11  ;;  %v2122_v47 = vpop.xlane.xlu0 %2121 }
 0x44b   : > { %v2131_v21 = vmul.f32 %v7659_v29, %v9315_v3  ;;  %7668 = vrcp.f32 %v2122_v47  ;;  %v11182_v3 = vpack.c.bf16 %v9039_v43, %v9029_v1 }
 0x44c   : > { %6363 = vmatmul.mubr.msk.f32.gmra.mrb[34].mxu0 %vm1417_vm12, %v1492_v15 }
 0x44d   : > { %6422 = vmatpush3.msk.msra.mxu0 %vm1720_vm11, %v2143_v20  ;;  %6365 = vmatprep.mubr.msk.f32.mxu0 %vm8166_vm1, %v11174_v2  ;;  %v7661_v19 = vpop.eup %7660 }
 0x44e   : > { %7167 = vmatprep.subr.bf16.mxu0 %v11172_v39  ;;  %v2132_v51 = vmul.f32 %v7661_v19, %v9322_v32  ;;  %v7663_v23 = vpop.eup %7662  ;;  %v2430_v11 = vpop.xlane.xlu1 %2429  ;;  %v2469_v32 = vmul.f32 %v8933_v38, %v9044_v16 }
 0x44f   : > { %v2133_v17 = vmul.f32 %v7663_v23, %v9324_v5  ;;  %7670 = vrcp.f32 %v2430_v11 }
 0x450   : > { %6366 = vmatmul.mubr.msk.f32.gmra.mrb[36].mxu0 %vm1417_vm12, %v1493_v41 }
 0x451   : > { %6368 = vmatprep.mubr.msk.f32.mxu0 %vm8166_vm1, %v11174_v2  ;;  %v7665_v46 = vpop.eup %7664 }
 0x452   : > { %v2433_v1 = vpop.xlane.xlu0 %2432  ;;  %v2134_v43 = vmul.f32 %v7665_v46, %v9331_v58  ;;  %v7667_v55 = vpop.eup %7666 }
 0x453   : > { %7672 = vrcp.f32 %v2433_v1  ;;  %v2135_v16 = vmul.f32 %v7667_v55, %v9333_v33 }
 0x454   : > { %6369 = vmatmul.mubr.msk.f32.gmra.mrb[38].mxu0 %vm1417_vm12, %v1494_v4 }
 0x455   : > { %6371 = vmatprep.mubr.msk.f32.mxu0 %vm8166_vm1, %v11174_v2  ;;  %v7669_v53 = vpop.eup %7668 }
 0x456   : > { %v2436_v5 = vpop.xlane.xlu1 %2435  ;;  %v2136_v58 = vmul.f32 %v7669_v53, %v9340_v45 }
 0x457   : > { %7674 = vrcp.f32 %v2436_v5  ;;  %v7925_v5 = vld [vmem:[#allocation2 + $0x18] sm:$0xff] }
 0x458   : > { %6372 = vmatmul.mubr.msk.f32.gmra.mrb[40].mxu0 %vm1417_vm12, %v1495_v9 }
 0x459   : > { %6423 = vmatprep.mubr.msk.f32.mxu0 %vm8166_vm1, %v11174_v2  ;;  %v7671_v18 = vpop.eup %7670 }
 0x45a   : > { %v2439_v26 = vpop.xlane.xlu0 %2438  ;;  %v2456_v36 = vmul.f32 %v7671_v18, %v9345_v22 }
 0x45b   : > { %7676 = vrcp.f32 %v2439_v26 }
 0x45c   : > { %6424 = vmatmul.mubr.msk.f32.vlgmr.msra.gmra.mrb[28].mxu0 %vm1417_vm12, %v2130_v24  ;;  %v7922_v24 = vld [vmem:[#allocation2] sm:$0xff] }
 0x45d   : > { %7169 = vmatpush3.bf16.msra.mxu0 %v11180_v40  ;;  %6426 = vmatprep.mubr.msk.f32.mxu0 %vm8166_vm1, %v11174_v2  ;;  %v7673_v54 = vpop.eup %7672 }
 0x45e   : > { %7170 = vmatprep.subr.bf16.mxu0 %v11172_v39  ;;  %v2442_v33 = vpop.xlane.xlu1 %2441  ;;  %v2457_v45 = vmul.f32 %v7673_v54, %v9350_v63 }
 0x45f   : > { %7678 = vrcp.f32 %v2442_v33 }
 0x460   : > { %6427 = vmatmul.mubr.msk.f32.gmra.mrb[30].mxu0 %vm1417_vm12, %v2131_v21  ;;  %v11184_v21 = vld [vmem:[#allocation23_spill] sm:$0xff] }
 0x461   : > { %7172 = vmatpush3.bf16.msra.mxu0 %v11181_v0  ;;  %6429 = vmatprep.mubr.msk.f32.mxu0 %vm8166_vm1, %v11174_v2  ;;  %v7675_v57 = vpop.eup %7674  ;;  %v7923_v0 = vld [vmem:[#allocation2 + $0x8] sm:$0xff] }
 0x462   : > { %7173 = vmatprep.subr.bf16.mxu0 %v11172_v39  ;;  %v2445_v60 = vpop.xlane.xlu0 %2444  ;;  %v2458_v22 = vmul.f32 %v7675_v57, %v9355_v56 }
 0x463   : > { %7680 = vrcp.f32 %v2445_v60 }
 0x464   : > { %6430 = vmatmul.mubr.msk.f32.gmra.mrb[32].mxu0 %vm1417_vm12, %v2132_v51 }
 0x465   : > { %7175 = vmatpush3.bf16.msra.mxu0 %v11182_v3  ;;  %6432 = vmatprep.mubr.msk.f32.mxu0 %vm8166_vm1, %v11174_v2  ;;  %v7677_v42 = vpop.eup %7676 }
 0x466   : > { %6491 = vmatprep.subr.mxu0 %v11174_v2  ;;  %v2448_v31 = vpop.xlane.xlu1 %2447  ;;  %v2459_v48 = vmul.f32 %v7677_v42, %v9360_v30 }
 0x467   : > { %7682 = vrcp.f32 %v2448_v31  ;;  %v7927_v31 = vld [vmem:[#allocation2 + $0x28] sm:$0xff] }
 0x468   : > { %6433 = vmatmul.mubr.msk.f32.gmra.mrb[34].mxu0 %vm1417_vm12, %v2133_v17  ;;  %v7924_v17 = vld [vmem:[#allocation2 + $0x10] sm:$0xff] }
 0x469   : > { %6492 = vmatpush3.msk.msra.mxu0 %vm1720_vm11, %v2469_v32  ;;  %6435 = vmatprep.mubr.msk.f32.mxu0 %vm8166_vm1, %v11174_v2  ;;  %v7679_v63 = vpop.eup %7678 }
 0x46a   : > { %v2460_v61 = vmul.f32 %v7679_v63, %v9364_v14 }
 0x46c   : > { %6436 = vmatmul.mubr.msk.f32.gmra.mrb[36].mxu0 %vm1417_vm12, %v2134_v43 }
 0x46d   : > { %6438 = vmatprep.mubr.msk.f32.mxu0 %vm8166_vm1, %v11174_v2  ;;  %v7681_v44 = vpop.eup %7680 }
 0x46e   : > { %v2461_v56 = vmul.f32 %v7681_v44, %v9368_v8  ;;  %v7928_v44 = vld [vmem:[#allocation2 + $0x30] sm:$0x3f] }
 0x470   : > { %6439 = vmatmul.mubr.msk.f32.gmra.mrb[38].mxu0 %vm1417_vm12, %v2135_v16 }
 0x471   : > { %6441 = vmatprep.mubr.msk.f32.mxu0 %vm8166_vm1, %v11174_v2  ;;  %v7683_v50 = vpop.eup %7682 }
 0x472   : > { %v2462_v30 = vmul.f32 %v7683_v50, %v9372_v49 }
 0x474   : > { %6442 = vmatmul.mubr.msk.f32.gmra.mrb[40].mxu0 %vm1417_vm12, %v2136_v58 }
 0x475   : > { %6493 = vmatprep.mubr.msk.f32.mxu0 %vm8166_vm1, %v11174_v2 }
 0x478   : > { %6494 = vmatmul.mubr.msk.f32.vlgmr.msra.gmra.mrb[28].mxu0 %vm1417_vm12, %v2456_v36  ;;  %v7926_v36 = vld [vmem:[#allocation2 + $0x20] sm:$0xff] }
 0x479   : > { %6496 = vmatprep.mubr.msk.f32.mxu0 %vm8166_vm1, %v11174_v2 }
 0x47c   : > { %6497 = vmatmul.mubr.msk.f32.gmra.mrb[30].mxu0 %vm1417_vm12, %v2457_v45 }
 0x47d   : > { %6499 = vmatprep.mubr.msk.f32.mxu0 %vm8166_vm1, %v11174_v2 }
 0x480   : > { %6500 = vmatmul.mubr.msk.f32.gmra.mrb[32].mxu0 %vm1417_vm12, %v2458_v22 }
 0x481   : > { %6502 = vmatprep.mubr.msk.f32.mxu0 %vm8166_vm1, %v11174_v2 }
 0x484   : > { %6503 = vmatmul.mubr.msk.f32.gmra.mrb[34].mxu0 %vm1417_vm12, %v2459_v48 }
 0x485   : > { %6505 = vmatprep.mubr.msk.f32.mxu0 %vm8166_vm1, %v11174_v2 }
 0x488   : > { %6506 = vmatmul.mubr.msk.f32.gmra.mrb[36].mxu0 %vm1417_vm12, %v2460_v61 }
 0x489   : > { %6508 = vmatprep.mubr.msk.f32.mxu0 %vm8166_vm1, %v11174_v2 }
 0x48c   : > { %6509 = vmatmul.mubr.msk.f32.gmra.mrb[38].mxu0 %vm1417_vm12, %v2461_v56 }
 0x48d   : > { %6511 = vmatprep.mubr.msk.f32.mxu0 %vm8166_vm1, %v11174_v2 }
 0x490   : > { %6512 = vmatmul.mubr.msk.f32.gmra.mrb[40].mxu0 %vm1417_vm12, %v2462_v30 }
 0x491   : > { %3077 = vmatprep.mubr.f32.mxu0 %v11174_v2 }
 0x54b   : > { %v2560_v14 = vpop.f32.mrb[28].mxu0 }
 0x54c   : > { %v6495_v10 = vpop.f32.mrb[29].mxu0  ;;  %6547 = vmatmul.mubr.f32.vlgmr.msra.gmra.mrb[56].mxu1 %v2560_v14  ;;  %v2970_v14 = vld [vmem:[%s8627_s24 + $0x8] sm:$0xff] }
 0x54d   : > { %6549 = vmatprep.mubr.msk.f32.mxu1 %vm8166_vm1, %v11174_v2  ;;  %v2972_v10 = vld [vmem:[%s8627_s24 + $0x18] sm:$0xff] }
 0x54f   : > { %v2565_v37 = vpop.f32.mrb[30].mxu0 }
 0x550   : > { %v6498_v8 = vpop.f32.mrb[31].mxu0  ;;  %6550 = vmatmul.mubr.f32.gmra.mrb[58].mxu1 %v2565_v37  ;;  %v2969_v37 = vld [vmem:[%s8627_s24] sm:$0xff] }
 0x551   : > { %6552 = vmatprep.mubr.msk.f32.mxu1 %vm8166_vm1, %v11174_v2  ;;  %v7224_v8 = vpack.c.bf16 %v2972_v10, %v2970_v14 }
 0x553   : > { %v2570_v6 = vpop.f32.mrb[32].mxu0  ;;  %7225 = vmatprep.subr.bf16.mxu0 %v7224_v8 }
 0x554   : > { %v6501_v15 = vpop.f32.mrb[33].mxu0  ;;  %6553 = vmatmul.mubr.f32.gmra.mrb[60].mxu1 %v2570_v6  ;;  %v2971_v6 = vld [vmem:[%s8627_s24 + $0x10] sm:$0xff] }
 0x555   : > { %6555 = vmatprep.mubr.msk.f32.mxu1 %vm8166_vm1, %v11174_v2  ;;  %v2974_v15 = vld [vmem:[%s8627_s24 + $0x28] sm:$0xff] }
 0x557   : > { %v2575_v49 = vpop.f32.mrb[34].mxu0 }
 0x558   : > { %v6504_v27 = vpop.f32.mrb[35].mxu0  ;;  %6556 = vmatmul.mubr.f32.gmra.mrb[62].mxu1 %v2575_v49  ;;  %v2976_v49 = vld [vmem:[%s8627_s24 + $0x38] sm:$0xff] }
 0x559   : > { %6558 = vmatprep.mubr.msk.f32.mxu1 %vm8166_vm1, %v11174_v2  ;;  %v7226_v27 = vpack.c.bf16 %v2971_v6, %v2969_v37 }
 0x55b   : > { %v2580_v20 = vpop.f32.mrb[36].mxu0  ;;  %7227 = vmatpush1.bf16.msra.mxu0 %v7226_v27 }
 0x55c   : > { %v6507_v35 = vpop.f32.mrb[37].mxu0  ;;  %6559 = vmatmul.mubr.f32.gmra.mrb[64].mxu1 %v2580_v20  ;;  %v7228_v20 = vpack.c.bf16 %v2976_v49, %v2974_v15 }
 0x55d   : > { %6561 = vmatprep.mubr.msk.f32.mxu1 %vm8166_vm1, %v11174_v2  ;;  %v2973_v35 = vld [vmem:[%s8627_s24 + $0x20] sm:$0xff] }
 0x55e   : > { %7229 = vmatprep.subr.bf16.mxu0 %v7228_v20 }
 0x55f   : > { %v2585_v41 = vpop.f32.mrb[38].mxu0 }
 0x560   : > { %v6510_v7 = vpop.f32.mrb[39].mxu0  ;;  %6562 = vmatmul.mubr.f32.gmra.mrb[66].mxu1 %v2585_v41  ;;  %v2975_v41 = vld [vmem:[%s8627_s24 + $0x30] sm:$0xff] }
 0x561   : > { %6564 = vmatprep.mubr.msk.f32.mxu1 %vm8166_vm1, %v11174_v2  ;;  %v2978_v7 = vld [vmem:[%s8627_s24 + $0x48] sm:$0xff] }
 0x563   : > { %v2590_v34 = vpop.f32.mrb[40].mxu0 }
 0x564   : > { %v6513_v4 = vpop.f32.mrb[41].mxu0  ;;  %6565 = vmatmul.mubr.f32.gmra.mrb[68].mxu1 %v2590_v34  ;;  %v2980_v34 = vld [vmem:[%s8627_s24 + $0x58] sm:$0xff] }
 0x565   : > { %6599 = vmatprep.mubr.msk.f32.mxu1 %vm8166_vm1, %v11174_v2  ;;  %v7230_v4 = vpack.c.bf16 %v2975_v41, %v2973_v35 }
 0x567   : > { %7231 = vmatpush1.bf16.msra.mxu0 %v7230_v4 }
 0x61f   : > { %v2690_v59 = vpop.f32.mrb[56].mxu1 }
 0x620   : > { %v2691_v9 = vadd.f32 %v5767_v12, %v2690_v59  ;;  %v6548_v13 = vpop.f32.mrb[57].mxu1  ;;  %v2977_v59 = vld [vmem:[%s8627_s24 + $0x40] sm:$0xff] }
 0x621   : > { %v2982_v13 = vld [vmem:[%s8627_s24 + $0x68] sm:$0xff] }
 0x622   : > { %v2724_v28 = vadd.f32 %v7922_v24, %v2691_v9  ;;  %v2979_v9 = vld [vmem:[%s8627_s24 + $0x50] sm:$0xff]  ;;  %v2984_v24 = vld [vmem:[%s8627_s24 + $0x78] sm:$0xff] }
 0x623   : > { %v2695_v29 = vpop.f32.mrb[58].mxu1 }
 0x624   : > { %v2696_v40 = vadd.f32 %v5767_v12, %v2695_v29  ;;  %v6551_v52 = vpop.f32.mrb[59].mxu1  ;;  %v9578_v19 = vmul.f32 %v11184_v21, %v2724_v28  ;;  %v2846_v28 = vld [vmem:[%s8570_s17] sm:$0xff]  ;;  %v2847_v29 = vld [vmem:[%s8570_s17 + $0x8] sm:$0xff] }
 0x625   : > { %v7201_v52 = vpack.c.bf16 %v2847_v29, %v2846_v28 }
 0x626   : > { %2738 = vadd.xlane.f32.xlu0 %v9578_v19  ;;  %v2725_v47 = vadd.f32 %v7923_v0, %v2696_v40  ;;  %v7234_v40 = vpack.c.bf16 %v2979_v9, %v2977_v59  ;;  %v2848_v0 = vld [vmem:[%s8570_s17 + $0x10] sm:$0xff] }
 0x627   : > { %v2700_v51 = vpop.f32.mrb[60].mxu1  ;;  %7202 = vmatpush3.bf16.msra.mxu1 %v7201_v52 }
 0x628   : > { %v2701_v23 = vadd.f32 %v5767_v12, %v2700_v51  ;;  %v6554_v3 = vpop.f32.mrb[61].mxu1  ;;  %v9582_v11 = vmul.f32 %v11184_v21, %v2725_v47  ;;  %v7236_v47 = vpack.c.bf16 %v2984_v24, %v2982_v13  ;;  %v2981_v51 = vld [vmem:[%s8627_s24 + $0x60] sm:$0xff]  ;;  %7203 = vmatprep.subr.bf16.mxu1 %v11172_v39 }
 0x629   : > { %v2849_v3 = vld [vmem:[%s8570_s17 + $0x18] sm:$0xff] }
 0x62a   : > { %2740 = vadd.xlane.f32.xlu1 %v9582_v11  ;;  %v2726_v46 = vadd.f32 %v7924_v17, %v2701_v23  ;;  %v2983_v23 = vld [vmem:[%s8627_s24 + $0x70] sm:$0xff]  ;;  %v2986_v17 = vld [vmem:[%s8627_s24 + $0x88] sm:$0xff] }
 0x62b   : > { %v2705_v32 = vpop.f32.mrb[62].mxu1 }
 0x62c   : > { %v2706_v1 = vadd.f32 %v5767_v12, %v2705_v32  ;;  %v6557_v43 = vpop.f32.mrb[63].mxu1  ;;  %v9586_v55 = vmul.f32 %v11184_v21, %v2726_v46  ;;  %v2988_v46 = vld [vmem:[%s8627_s24 + $0x98] sm:$0xff]  ;;  %v7204_v32 = vpack.c.bf16 %v2849_v3, %v2848_v0 }
 0x62d   : > { %v2851_v43 = vld [vmem:[%s8570_s17 + $0x28] sm:$0xff] }
 0x62e   : > { %2742 = vadd.xlane.f32.xlu0 %v9586_v55  ;;  %v2727_v16 = vadd.f32 %v7925_v5, %v2706_v1  ;;  %v2850_v1 = vld [vmem:[%s8570_s17 + $0x20] sm:$0xff]  ;;  %v7238_v5 = vpack.c.bf16 %v2983_v23, %v2981_v51  ;;  %7205 = vmatpush3.bf16.msra.mxu1 %v7204_v32  ;;  %v2997_v51 = vld [vmem:[%s8627_s24 + $0xe0] sm:$0xff]  ;;  %v2999_v23 = vld [vmem:[%s8627_s24 + $0xf0] sm:$0xff] }
 0x62f   : > { %v2710_v53 = vpop.f32.mrb[64].mxu1  ;;  %7206 = vmatprep.subr.bf16.mxu1 %v11172_v39  ;;  %v7254_v3 = vpack.c.bf16 %v2999_v23, %v2997_v51  ;;  %v2853_v32 = vld [vmem:[%s8570_s17 + $0x38] sm:$0xff] }
 0x630   : > { %v2711_v26 = vadd.f32 %v5767_v12, %v2710_v53  ;;  %v6560_v58 = vpop.f32.mrb[65].mxu1  ;;  %v9590_v18 = vmul.f32 %v11184_v21, %v2727_v16  ;;  %v7240_v16 = vpack.c.bf16 %v2988_v46, %v2986_v17  ;;  %v2985_v53 = vld [vmem:[%s8627_s24 + $0x80] sm:$0xff]  ;;  %v2852_v46 = vld [vmem:[%s8570_s17 + $0x30] sm:$0xff] }
 0x631   : > { %v2990_v58 = vld [vmem:[%s8627_s24 + $0xa8] sm:$0xff] }
 0x632   : > { %2744 = vadd.xlane.f32.xlu1 %v9590_v18  ;;  %v2728_v33 = vadd.f32 %v7926_v36, %v2711_v26  ;;  %v2987_v26 = vld [vmem:[%s8627_s24 + $0x90] sm:$0xff]  ;;  %v2992_v36 = vld [vmem:[%s8627_s24 + $0xb8] sm:$0xff] }
 0x633   : > { %v2715_v54 = vpop.f32.mrb[66].mxu1 }
 0x634   : > { %v2716_v60 = vadd.f32 %v5767_v12, %v2715_v54  ;;  %v6563_v45 = vpop.f32.mrb[67].mxu1  ;;  %v9594_v57 = vmul.f32 %v11184_v21, %v2728_v33  ;;  %v7207_v33 = vpack.c.bf16 %v2851_v43, %v2850_v1  ;;  %v7242_v54 = vpack.c.bf16 %v2987_v26, %v2985_v53  ;;  %v2854_v26 = vld [vmem:[%s8570_s17 + $0x40] sm:$0xff] }
 0x635   : > { %v2989_v45 = vld [vmem:[%s8627_s24 + $0xa0] sm:$0xff]  ;;  %v7210_v1 = vpack.c.bf16 %v2853_v32, %v2852_v46 }
 0x636   : > { %2746 = vadd.xlane.f32.xlu0 %v9594_v57  ;;  %v2729_v22 = vadd.f32 %v7927_v31, %v2716_v60  ;;  %v7244_v60 = vpack.c.bf16 %v2992_v36, %v2990_v58  ;;  %v2991_v31 = vld [vmem:[%s8627_s24 + $0xb0] sm:$0xff]  ;;  %7208 = vmatpush3.bf16.msra.mxu1 %v7207_v33  ;;  %v2855_v58 = vld [vmem:[%s8570_s17 + $0x48] sm:$0xff] }
 0x637   : > { %v2720_v42 = vpop.f32.mrb[68].mxu1  ;;  %7209 = vmatprep.subr.bf16.mxu1 %v11172_v39  ;;  %v7213_v33 = vpack.c.bf16 %v2855_v58, %v2854_v26 }
 0x638   : > { %v2721_v48 = vadd.f32 %v5767_v12, %v2720_v42  ;;  %v6566_v63 = vpop.f32.mrb[69].mxu1  ;;  %v9598_v61 = vmul.f32 %v11184_v21, %v2729_v22  ;;  %v7232_v12 = vpack.c.bf16 %v2980_v34, %v2978_v7  ;;  %v2994_v22 = vld [vmem:[%s8627_s24 + $0xc8] sm:$0xff]  ;;  %v2996_v42 = vld [vmem:[%s8627_s24 + $0xd8] sm:$0xff] }
 0x639   : > { %v7248_v63 = vpack.c.bf16 %v2996_v42, %v2994_v22 }
 0x63a   : > { %v2730_v56 = vadd.f32 %v7928_v44, %v2721_v48  ;;  %2748 = vadd.xlane.f32.xlu1 %v9598_v61  ;;  %7233 = vmatprep.subr.bf16.mxu0 %v7232_v12  ;;  %v7246_v48 = vpack.c.bf16 %v2991_v31, %v2989_v45  ;;  %v2993_v44 = vld [vmem:[%s8627_s24 + $0xc0] sm:$0xff]  ;;  %v2857_v45 = vld [vmem:[%s8570_s17 + $0x58] sm:$0xff] }
 0x63b   : > { %7235 = vmatpush1.bf16.msra.mxu0 %v7234_v40  ;;  %v2998_v40 = vld [vmem:[%s8627_s24 + $0xe8] sm:$0xff]  ;;  %7211 = vmatpush3.bf16.msra.mxu1 %v7210_v1 }
 0x63c   : > { %v9602_v50 = vmul.f32 %v11184_v21, %v2730_v56  ;;  %7237 = vmatprep.subr.bf16.mxu0 %v7236_v47  ;;  %v2995_v56 = vld [vmem:[%s8627_s24 + $0xd0] sm:$0xff]  ;;  %7212 = vmatprep.subr.bf16.mxu1 %v11172_v39 }
 0x63e   : > { %v2750_v30 = vsel %vm1720_vm11, %v9602_v50, 0.0 }
 0x63f   : > { %2751 = vadd.xlane.f32.xlu0 %v2750_v30  ;;  %7239 = vmatpush1.bf16.msra.mxu0 %v7238_v5  ;;  %v7250_v30 = vpack.c.bf16 %v2995_v56, %v2993_v44  ;;  %v2860_v56 = vld [vmem:[%s8570_s17 + $0x70] sm:$0xff] }
 0x640   : > { %7241 = vmatprep.subr.bf16.mxu0 %v7240_v16  ;;  %7214 = vmatpush3.bf16.msra.mxu1 %v7213_v33 }
 0x641   : > { %7215 = vmatprep.subr.bf16.mxu1 %v11172_v39 }
 0x643   : > { %7243 = vmatpush1.bf16.msra.mxu0 %v7242_v54 }
 0x644   : > { %7245 = vmatprep.subr.bf16.mxu0 %v7244_v60  ;;  %v1023_v60 = vld [vmem:[%s11185_s21 + $0x8] sm:$0xff] }
 0x647   : > { %7247 = vmatpush1.bf16.msra.mxu0 %v7246_v48  ;;  %v2858_v48 = vld [vmem:[%s8570_s17 + $0x60] sm:$0xff] }
 0x648   : > { %7249 = vmatprep.subr.bf16.mxu0 %v7248_v63  ;;  %v2859_v63 = vld [vmem:[%s8570_s17 + $0x68] sm:$0xff] }
 0x649   : > { %v7219_v44 = vpack.c.bf16 %v2859_v63, %v2858_v48 }
 0x64b   : > { %7251 = vmatpush1.bf16.msra.mxu0 %v7250_v30  ;;  %v2861_v30 = vld [vmem:[%s8570_s17 + $0x78] sm:$0xff] }
 0x6b3   : > { %v2739_v14 = vpop.xlane.xlu0 %2738 }
 0x6b4   : > { %v2753_v10 = vmul.f32 0.03125, %v2739_v14  ;;  %v7222_v14 = vpack.c.bf16 %v2861_v30, %v2860_v56  ;;  %v3001_v30 = vld [vmem:[%s8637_s30] sm:$0x3] }
 0x6b6   : > { %v2760_v37 = vsub.f32 %v9578_v19, %v2753_v10  ;;  %v1024_v10 = vld [vmem:[%s11185_s21 + $0x10] sm:$0xf] }
 0x6b7   : > { %v2741_v8 = vpop.xlane.xlu1 %2740 }
 0x6b8   : > { %v2754_v6 = vmul.f32 0.03125, %v2741_v8  ;;  %v9645_v15 = vmul.f32 %v11184_v21, %v2760_v37 }
 0x6ba   : > { %v2761_v49 = vsub.f32 %v9582_v11, %v2754_v6  ;;  %v2774_v27 = vmul.f32 %v9645_v15, %v9645_v15 }
 0x6bb   : > { %v2743_v20 = vpop.xlane.xlu0 %2742 }
 0x6bc   : > { %v2755_v35 = vmul.f32 0.03125, %v2743_v20  ;;  %2781 = vadd.xlane.f32.xlu1 %v2774_v27  ;;  %v9651_v41 = vmul.f32 %v11184_v21, %v2761_v49 }
 0x6be   : > { %v2762_v7 = vsub.f32 %v9586_v55, %v2755_v35  ;;  %v2775_v19 = vmul.f32 %v9651_v41, %v9651_v41 }
 0x6bf   : > { %v2745_v34 = vpop.xlane.xlu1 %2744 }
 0x6c0   : > { %v2756_v4 = vmul.f32 0.03125, %v2745_v34  ;;  %2783 = vadd.xlane.f32.xlu0 %v2775_v19  ;;  %v9657_v11 = vmul.f32 %v11184_v21, %v2762_v7  ;;  %v1025_v19 = vld [vmem:[%s8651_s10] sm:$0x3f] }
 0x6c2   : > { %v2763_v12 = vsub.f32 %v9590_v18, %v2756_v4  ;;  %v2776_v59 = vmul.f32 %v9657_v11, %v9657_v11  ;;  %v3000_v18 = vld [vmem:[%s8627_s24 + $0xf8] sm:$0xff] }
 0x6c3   : > { %v2747_v9 = vpop.xlane.xlu0 %2746  ;;  %v7252_v47 = vpack.c.bf16 %v3000_v18, %v2998_v40 }
 0x6c4   : > { %v2757_v13 = vmul.f32 0.03125, %v2747_v9  ;;  %2785 = vadd.xlane.f32.xlu1 %v2776_v59  ;;  %v9663_v55 = vmul.f32 %v11184_v21, %v2763_v12  ;;  %v11186_v59 = vld [vmem:[#allocation26_spill] sm:$0xff] }
 0x6c5   : > { %7253 = vmatprep.subr.bf16.mxu0 %v7252_v47  ;;  %v9721_v9 = vrot.slane %v1025_v19, %v11186_v59 }
 0x6c6   : > { %v2764_v24 = vsub.f32 %v9594_v57, %v2757_v13  ;;  %v2777_v28 = vmul.f32 %v9663_v55, %v9663_v55  ;;  %7255 = vmatpush1.bf16.msra.mxu0 %v7254_v3 }
 0x6c7   : > { %v2749_v29 = vpop.xlane.xlu1 %2748  ;;  %7259 = vmatprep.subr.bf16.mxu0 %v11172_v39 }
 0x6c8   : > { %v2758_v52 = vmul.f32 0.03125, %v2749_v29  ;;  %2787 = vadd.xlane.f32.xlu0 %v2777_v28  ;;  %v9671_v0 = vmul.f32 %v11184_v21, %v2764_v24  ;;  %v11187_v28 = vld [vmem:[#allocation25_spill] sm:$0xff] }
 0x6c9   : > { %v9724_v29 = vrot.slane %v1025_v19, %v11187_v28 }
 0x6ca   : > { %v2765_v17 = vsub.f32 %v9598_v61, %v2758_v52  ;;  %v2778_v57 = vmul.f32 %v9671_v0, %v9671_v0  ;;  %v1022_v61 = vld [vmem:[%s11185_s21] sm:$0xff] }
 0x6cb   : > { %3078 = vmatmul.mubr.f32.vlgmr.msra.gmra.mrb[42].mxu0 %v1022_v61 }
 0x6cc   : > { %2789 = vadd.xlane.f32.xlu1 %v2778_v57  ;;  %v2752_v43 = vpop.xlane.xlu0 %2751  ;;  %v9681_v5 = vmul.f32 %v11184_v21, %v2765_v17  ;;  %3083 = vmatprep.mubr.f32.mxu0 %v11174_v2 }
 0x6cd   : > { %v2759_v16 = vmul.f32 0.03125, %v2752_v43 }
 0x6ce   : > { %v2779_v53 = vmul.f32 %v9681_v5, %v9681_v5 }
 0x6cf   : > { %v2766_v36 = vsub.f32 %v9602_v50, %v2759_v16  ;;  %3084 = vmatmul.mubr.f32.gmra.mrb[44].mxu0 %v1023_v60  ;;  %v2856_v50 = vld [vmem:[%s8570_s17 + $0x50] sm:$0xff] }
 0x6d0   : > { %2791 = vadd.xlane.f32.xlu0 %v2779_v53  ;;  %v7216_v22 = vpack.c.bf16 %v2857_v45, %v2856_v50  ;;  %3089 = vmatprep.mubr.f32.mxu0 %v11174_v2 }
 0x6d1   : > { %v9695_v54 = vmul.f32 %v11184_v21, %v2766_v36 }
 0x6d2   : > { %7217 = vmatpush3.bf16.msra.mxu1 %v7216_v22 }
 0x6d3   : > { %v2780_v31 = vmul.f32 %v9695_v54, %v9695_v54  ;;  %7218 = vmatprep.subr.bf16.mxu1 %v11172_v39  ;;  %3090 = vmatmul.mubr.f32.gmra.mrb[46].mxu0 %v1024_v10 }
 0x6d4   : > { %6653 = vmatprep.mubr.msk.f32.mxu0 %vm8166_vm1, %v11174_v2 }
 0x6d5   : > { %v2793_v42 = vsel %vm1720_vm11, %v2780_v31, 0.0 }
 0x6d6   : > { %2794 = vadd.xlane.f32.xlu1 %v2793_v42  ;;  %7220 = vmatpush3.bf16.msra.mxu1 %v7219_v44 }
 0x6d7   : > { %7221 = vmatprep.subr.bf16.mxu1 %v11172_v39 }
 0x6da   : > { %7223 = vmatpush3.bf16.msra.mxu1 %v7222_v14  ;;  %v3010_v14 = vrot.slane %v3001_v30, %v11187_v28 }
 0x6db   : > { %7256 = vmatprep.subr.bf16.mxu1 %v11172_v39 }
 0x749   : > { %v2782_v37 = vpop.xlane.xlu1 %2781 }
 0x74a   : > { %v2796_v8 = vmul.f32 0.03125, %v2782_v37 }
 0x74c   : > { %v2803_v6 = vadd.f32 1e-05, %v2796_v8 }
 0x74d   : > { %v2784_v49 = vpop.xlane.xlu0 %2783 }
 0x74e   : > { %7684 = vrsqrt.f32 %v2803_v6  ;;  %v2797_v27 = vmul.f32 0.03125, %v2784_v49 }
 0x750   : > { %v2804_v20 = vadd.f32 1e-05, %v2797_v27 }
 0x751   : > { %v2786_v35 = vpop.xlane.xlu1 %2785 }
 0x752   : > { %7686 = vrsqrt.f32 %v2804_v20  ;;  %v2798_v7 = vmul.f32 0.03125, %v2786_v35 }
 0x754   : > { %v2805_v34 = vadd.f32 1e-05, %v2798_v7  ;;  %v11192_v7 = vld [vmem:[#allocation27_spill] sm:$0xff] }
 0x755   : > { %v2788_v4 = vpop.xlane.xlu0 %2787 }
 0x756   : > { %7688 = vrsqrt.f32 %v2805_v34  ;;  %v2799_v12 = vmul.f32 0.03125, %v2788_v4 }
 0x758   : > { %v7685_v13 = vpop.eup %7684  ;;  %v2806_v24 = vadd.f32 1e-05, %v2799_v12 }
 0x759   : > { %v2817_v40 = vmul.f32 %v7685_v13, %v9645_v15  ;;  %v2790_v18 = vpop.xlane.xlu1 %2789 }
 0x75a   : > { %7690 = vrsqrt.f32 %v2806_v24  ;;  %v2800_v52 = vmul.f32 0.03125, %v2790_v18 }
 0x75b   : > { %v2828_v47 = vmul.f32 %v9721_v9, %v2817_v40 }
 0x75c   : > { %v7687_v51 = vpop.eup %7686  ;;  %v2807_v23 = vadd.f32 1e-05, %v2800_v52 }
 0x75d   : > { %v2818_v3 = vmul.f32 %v7687_v51, %v9651_v41  ;;  %v2792_v17 = vpop.xlane.xlu0 %2791  ;;  %v9730_v57 = vadd.f32 %v9724_v29, %v2828_v47 }
 0x75e   : > { %7692 = vrsqrt.f32 %v2807_v23  ;;  %v2801_v46 = vmul.f32 0.03125, %v2792_v17 }
 0x75f   : > { %6600 = vmatmul.mubr.f32.vlgmr.msra.gmra.mrb[70].mxu1 %v9730_v57  ;;  %v2829_v32 = vmul.f32 %v9721_v9, %v2818_v3 }
 0x760   : > { %v7689_v15 = vpop.eup %7688  ;;  %v2808_v1 = vadd.f32 1e-05, %v2801_v46  ;;  %6602 = vmatprep.mubr.msk.f32.mxu1 %vm8166_vm1, %v11174_v2 }
 0x761   : > { %v2819_v43 = vmul.f32 %v7689_v15, %v9657_v11  ;;  %v9738_v16 = vadd.f32 %v9724_v29, %v2829_v32  ;;  %v9830_v32 = vld [vmem:[%s11194_s26] ss:$0 sm:$0xff] }
 0x762   : > { %7694 = vrsqrt.f32 %v2808_v1 }
 0x763   : > { %11188 = vst [vmem:[#allocation23_spill] sm:$0xff] %v9738_v16  ;;  %v2795_v41 = vpop.xlane.xlu1 %2794  ;;  %6603 = vmatmul.mubr.f32.gmra.mrb[72].mxu1 %v9738_v16  ;;  %v2830_v61 = vmul.f32 %v9721_v9, %v2819_v43 }
 0x764   : > { %v7691_v53 = vpop.eup %7690  ;;  %v2802_v26 = vmul.f32 0.03125, %v2795_v41  ;;  %6605 = vmatprep.mubr.msk.f32.mxu1 %vm8166_vm1, %v11174_v2 }
 0x765   : > { %v2820_v58 = vmul.f32 %v7691_v53, %v9663_v55  ;;  %v9746_v36 = vadd.f32 %v9724_v29, %v2830_v61 }
 0x766   : > { %v2809_v11 = vadd.f32 1e-05, %v2802_v26 }
 0x767   : > { %11189 = vst [vmem:[#allocation26_spill] sm:$0xff] %v9746_v36  ;;  %6606 = vmatmul.mubr.f32.gmra.mrb[74].mxu1 %v9746_v36  ;;  %v2831_v33 = vmul.f32 %v9721_v9, %v2820_v58 }
 0x768   : > { %v7693_v60 = vpop.eup %7692  ;;  %7696 = vrsqrt.f32 %v2809_v11  ;;  %6608 = vmatprep.mubr.msk.f32.mxu1 %vm8166_vm1, %v11174_v2 }
 0x769   : > { %v2821_v50 = vmul.f32 %v7693_v60, %v9671_v0  ;;  %v9754_v45 = vadd.f32 %v9724_v29, %v2831_v33 }
 0x76b   : > { %11190 = vst [vmem:[#allocation25_spill] sm:$0xff] %v9754_v45  ;;  %6609 = vmatmul.mubr.f32.gmra.mrb[76].mxu1 %v9754_v45  ;;  %v2832_v55 = vmul.f32 %v9721_v9, %v2821_v50 }
 0x76c   : > { %v7695_v31 = vpop.eup %7694  ;;  %6611 = vmatprep.mubr.msk.f32.mxu1 %vm8166_vm1, %v11174_v2 }
 0x76d   : > { %v2822_v22 = vmul.f32 %v7695_v31, %v9681_v5  ;;  %v9762_v42 = vadd.f32 %v9724_v29, %v2832_v55 }
 0x76f   : > { %11191 = vst [vmem:[#allocation28_spill] sm:$0xff] %v9762_v42  ;;  %6612 = vmatmul.mubr.f32.gmra.mrb[78].mxu1 %v9762_v42  ;;  %v2833_v0 = vmul.f32 %v9721_v9, %v2822_v22 }
 0x770   : > { %6614 = vmatprep.mubr.msk.f32.mxu1 %vm8166_vm1, %v11174_v2 }
 0x771   : > { %v9769_v48 = vadd.f32 %v9724_v29, %v2833_v0 }
 0x772   : > { %v7697_v63 = vpop.eup %7696 }
 0x773   : > { %v2823_v44 = vmul.f32 %v7697_v63, %v9695_v54  ;;  %6615 = vmatmul.mubr.f32.gmra.mrb[80].mxu1 %v9769_v48  ;;  %v3006_v54 = vrot.slane %v3001_v30, %v11186_v59 }
 0x774   : > { %6617 = vmatprep.mubr.msk.f32.mxu1 %vm8166_vm1, %v11174_v2 }
 0x775   : > { %v2834_v5 = vmul.f32 %v9721_v9, %v2823_v44 }
 0x777   : > { %v9777_v56 = vadd.f32 %v9724_v29, %v2834_v5 }
 0x779   : > { %6618 = vmatmul.mubr.f32.gmra.mrb[82].mxu1 %v9777_v56 }
 0x77a   : > { %6626 = vmatprep.mubr.msk.f32.mxu1 %vm8166_vm1, %v11174_v2 }
 0x79e   : > { %v3079_v10 = vpop.f32.mrb[42].mxu0 }
 0x79f   : > { %v3081_v37 = vpop.f32.mrb[43].mxu0  ;;  %v3080_v6 = vadd.f32 %v3079_v10, %v3006_v54 }
 0x7a0   : > { %v3082_v8 = vadd.f32 %v3081_v37, %v3010_v14 }
 0x7a2   : > { %v3085_v49 = vpop.f32.mrb[44].mxu0  ;;  %v9786_v35 = vmul.f32 %v8801_v62, %v3082_v8  ;;  %v3476_v19 = vmul.f32 %v11192_v7, %v3082_v8  ;;  %v9790_v34 = vmul.f32 %v8883_v25, %v3082_v8  ;;  %v9793_v12 = vmul.f32 %v8933_v38, %v3082_v8 }
 0x7a3   : > { %v3086_v27 = vadd.f32 %v3085_v49, %v3006_v54  ;;  %v3087_v20 = vpop.f32.mrb[45].mxu0 }
 0x7a4   : > { %v3088_v4 = vadd.f32 %v3087_v20, %v3010_v14 }
 0x7a5   : > { %v9795_v59 = vpack.c.bf16 %v3086_v27, %v3080_v6 }
 0x7a6   : > { %v9798_v13 = vmul.f32 %v8801_v62, %v3088_v4  ;;  %v3477_v24 = vmul.f32 %v11192_v7, %v3088_v4  ;;  %v9802_v28 = vmul.f32 %v8883_v25, %v3088_v4  ;;  %v9805_v40 = vmul.f32 %v8933_v38, %v3088_v4  ;;  %v3091_v23 = vpop.f32.mrb[46].mxu0 }
 0x7a7   : > { %7258 = vmatpush3.bf16.xpose.msra.mxu1 %v9795_v59  ;;  %7261 = vmatpush3.bf16.xpose.msra.mxu0 %v9795_v59  ;;  %v9817_v3 = vadd.f32 %v3091_v23, %v3006_v54  ;;  %v3093_v17 = vpop.f32.mrb[47].mxu0 }
 0x7a8   : > { %6624 = vmatprep.subr.mxu1 %v11174_v2  ;;  %6651 = vmatprep.subr.mxu0 %v11174_v2  ;;  %v7263_v18 = vpack.c.bf16 %v3477_v24, %v3476_v19  ;;  %v9821_v46 = vadd.f32 %v3093_v17, %v3010_v14 }
 0x7aa   : > { %v3478_v60 = vmul.f32 %v11192_v7, %v9821_v46 }
 0x7af   : > { %6625 = vmatpush3.xpose.msra.mxu1 %v9817_v3  ;;  %6652 = vmatpush3.xpose.msra.mxu0 %v9817_v3 }
 0x7b0   : > { %7262 = vmatprep.subr.bf16.mxu1 %v11172_v39  ;;  %7268 = vmatprep.subr.bf16.mxu0 %v11172_v39 }
 0x832   : > { %v2935_v15 = vpop.f32.mrb[70].mxu1 }
 0x833   : > { %v9833_v1 = vadd.f32 %v9830_v32, %v2935_v15  ;;  %v6601_v43 = vpop.f32.mrb[71].mxu1 }
 0x835   : > { %v3103_v41 = vmul.f32 %v8801_v62, %v9833_v1  ;;  %v3292_v61 = vmul.f32 %v11192_v7, %v9833_v1  ;;  %v3728_v43 = vmul.f32 %v8883_v25, %v9833_v1 }
 0x836   : > { %v2940_v53 = vpop.f32.mrb[72].mxu1 }
 0x837   : > { %v9840_v26 = vadd.f32 %v9830_v32, %v2940_v53  ;;  %v6604_v58 = vpop.f32.mrb[73].mxu1  ;;  %6627 = vmatmul.mubr.f32.vlgmr.msra.gmra.mrb[84].mxu1 %v3103_v41  ;;  %6654 = vmatmul.mubr.f32.vlgmr.msra.gmra.mrb[48].mxu0 %v3292_v61  ;;  %v4046_v53 = vmul.f32 %v8933_v38, %v9833_v1 }
 0x838   : > { %7264 = vmatpush3.bf16.msra.mxu1 %v7263_v18  ;;  %7270 = vmatpush3.bf16.xpose.msra.mxu0 %v9795_v59 }
 0x839   : > { %6629 = vmatprep.mubr.msk.f32.mxu1 %vm8166_vm1, %v11174_v2  ;;  %6656 = vmatprep.mubr.msk.f32.mxu0 %vm8166_vm1, %v11174_v2  ;;  %v3104_v11 = vmul.f32 %v8801_v62, %v9840_v26  ;;  %v3293_v33 = vmul.f32 %v11192_v7, %v9840_v26  ;;  %v4047_v58 = vmul.f32 %v8933_v38, %v9840_v26 }
 0x83a   : > { %v2945_v50 = vpop.f32.mrb[74].mxu1  ;;  %6678 = vmatprep.subr.mxu1 %v11174_v2  ;;  %6732 = vmatprep.subr.mxu0 %v11174_v2 }
 0x83b   : > { %v9856_v55 = vadd.f32 %v9830_v32, %v2945_v50  ;;  %v6607_v31 = vpop.f32.mrb[75].mxu1  ;;  %6630 = vmatmul.mubr.f32.gmra.mrb[86].mxu1 %v3104_v11  ;;  %6657 = vmatmul.mubr.f32.gmra.mrb[50].mxu0 %v3293_v33  ;;  %v9969_v50 = vld [vmem:[%s11195_s25] sm:$0xff] }
 0x83c   : > { %6679 = vmatpush3.msk.msra.mxu1 %vm3500_vm14, %v3478_v60  ;;  %6632 = vmatprep.mubr.msk.f32.mxu1 %vm8166_vm1, %v11174_v2 }
 0x83d   : > { %6659 = vmatprep.mubr.msk.f32.mxu0 %vm8166_vm1, %v11174_v2  ;;  %v3105_v22 = vmul.f32 %v8801_v62, %v9856_v55  ;;  %v3294_v0 = vmul.f32 %v11192_v7, %v9856_v55  ;;  %7265 = vmatprep.subr.bf16.mxu1 %v11172_v39  ;;  %v4048_v11 = vmul.f32 %v8933_v38, %v9856_v55 }
 0x83e   : > { %v2950_v63 = vpop.f32.mrb[76].mxu1 }
 0x83f   : > { %v9869_v44 = vadd.f32 %v9830_v32, %v2950_v63  ;;  %v6610_v5 = vpop.f32.mrb[77].mxu1  ;;  %6633 = vmatmul.mubr.f32.gmra.mrb[88].mxu1 %v3105_v22  ;;  %6660 = vmatmul.mubr.f32.gmra.mrb[52].mxu0 %v3294_v0 }
 0x840   : > { %6733 = vmatpush3.xpose.msra.mxu0 %v9817_v3  ;;  %6635 = vmatprep.mubr.msk.f32.mxu1 %vm8166_vm1, %v11174_v2 }
 0x841   : > { %6662 = vmatprep.mubr.msk.f32.mxu0 %vm8166_vm1, %v11174_v2  ;;  %v3106_v30 = vmul.f32 %v8801_v62, %v9869_v44  ;;  %v3295_v14 = vmul.f32 %v11192_v7, %v9869_v44  ;;  %7274 = vmatprep.subr.bf16.mxu0 %v11172_v39  ;;  %v4049_v1 = vmul.f32 %v8933_v38, %v9869_v44 }
 0x842   : > { %v2955_v54 = vpop.f32.mrb[78].mxu1 }
 0x843   : > { %v9882_v10 = vadd.f32 %v9830_v32, %v2955_v54  ;;  %v6613_v37 = vpop.f32.mrb[79].mxu1  ;;  %6636 = vmatmul.mubr.f32.gmra.mrb[90].mxu1 %v3106_v30  ;;  %6663 = vmatmul.mubr.f32.gmra.mrb[54].mxu0 %v3295_v14 }
 0x844   : > { %6638 = vmatprep.mubr.msk.f32.mxu1 %vm8166_vm1, %v11174_v2  ;;  %6665 = vmatprep.mubr.msk.f32.mxu0 %vm8166_vm1, %v11174_v2 }
 0x845   : > { %v3107_v8 = vmul.f32 %v8801_v62, %v9882_v10  ;;  %v3296_v6 = vmul.f32 %v11192_v7, %v9882_v10  ;;  %v3732_v41 = vmul.f32 %v8883_v25, %v9882_v10 }
 0x846   : > { %v2960_v49 = vpop.f32.mrb[80].mxu1 }
 0x847   : > { %v2961_v27 = vadd.f32 %v9830_v32, %v2960_v49  ;;  %v6616_v20 = vpop.f32.mrb[81].mxu1  ;;  %6639 = vmatmul.mubr.f32.gmra.mrb[92].mxu1 %v3107_v8  ;;  %6666 = vmatmul.mubr.f32.gmra.mrb[56].mxu0 %v3296_v6  ;;  %v9987_v8 = vld [vmem:[%s11196_s11 + $0x10] sm:$0xff] }
 0x848   : > { %6641 = vmatprep.mubr.msk.f32.mxu1 %vm8166_vm1, %v11174_v2  ;;  %6668 = vmatprep.mubr.msk.f32.mxu0 %vm8166_vm1, %v11174_v2 }
 0x849   : > { %v3108_v19 = vmul.f32 %v8801_v62, %v2961_v27  ;;  %v3297_v4 = vmul.f32 %v11192_v7, %v2961_v27  ;;  %v4051_v33 = vmul.f32 %v8933_v38, %v2961_v27 }
 0x84b   : > { %6642 = vmatmul.mubr.f32.gmra.mrb[94].mxu1 %v3108_v19  ;;  %6669 = vmatmul.mubr.f32.gmra.mrb[58].mxu0 %v3297_v4 }
 0x84c   : > { %v2965_v24 = vpop.f32.mrb[82].mxu1  ;;  %6644 = vmatprep.mubr.msk.f32.mxu1 %vm8166_vm1, %v11174_v2  ;;  %6671 = vmatprep.mubr.msk.f32.mxu0 %vm8166_vm1, %v11174_v2 }
 0x84d   : > { %v2966_v18 = vadd.f32 %v9830_v32, %v2965_v24  ;;  %v6619_v23 = vpop.f32.mrb[83].mxu1  ;;  %v3730_v32 = vmul.f32 %v8883_v25, %v9856_v55  ;;  %v9997_v24 = vld [vmem:[%s11196_s11 + $0x18] sm:$0xff] }
 0x84f   : > { %v3109_v17 = vmul.f32 %v8801_v62, %v2966_v18  ;;  %v3298_v15 = vmul.f32 %v11192_v7, %v2966_v18  ;;  %v3729_v7 = vmul.f32 %v8883_v25, %v9840_v26  ;;  %v3734_v61 = vmul.f32 %v8883_v25, %v2966_v18 }
 0x850   : > { %v4050_v26 = vmul.f32 %v8933_v38, %v9882_v10  ;;  %v4052_v60 = vmul.f32 %v8933_v38, %v2966_v18 }
 0x851   : > { %6645 = vmatmul.mubr.f32.gmra.mrb[96].mxu1 %v3109_v17  ;;  %6672 = vmatmul.mubr.f32.gmra.mrb[60].mxu0 %v3298_v15 }
 0x852   : > { %6734 = vmatprep.mubr.msk.f32.mxu0 %vm8166_vm1, %v11174_v2  ;;  %6680 = vmatprep.mubr.msk.f32.mxu1 %vm8166_vm1, %v11174_v2 }
 0x855   : > { %6735 = vmatmul.mubr.f32.vlgmr.msra.gmra.mrb[62].mxu0 %v3728_v43 }
 0x856   : > { %7276 = vmatpush3.bf16.xpose.msra.mxu0 %v9795_v59  ;;  %6737 = vmatprep.mubr.msk.f32.mxu0 %vm8166_vm1, %v11174_v2  ;;  %v3731_v59 = vmul.f32 %v8883_v25, %v9869_v44  ;;  %v9977_v44 = vld [vmem:[%s11196_s11 + $0x8] sm:$0xff] }
 0x857   : > { %6786 = vmatprep.subr.mxu0 %v11174_v2 }
 0x859   : > { %6738 = vmatmul.mubr.f32.gmra.mrb[64].mxu0 %v3729_v7 }
 0x85a   : > { %6740 = vmatprep.mubr.msk.f32.mxu0 %vm8166_vm1, %v11174_v2 }
 0x85d   : > { %6741 = vmatmul.mubr.f32.gmra.mrb[66].mxu0 %v3730_v32  ;;  %v10007_v32 = vld [vmem:[%s11196_s11 + $0x20] sm:$0xff] }
 0x85e   : > { %6787 = vmatpush3.xpose.msra.mxu0 %v9817_v3  ;;  %6743 = vmatprep.mubr.msk.f32.mxu0 %vm8166_vm1, %v11174_v2  ;;  %v3733_v3 = vmul.f32 %v8883_v25, %v2961_v27 }
 0x85f   : > { %7280 = vmatprep.subr.bf16.mxu0 %v11172_v39 }
 0x861   : > { %6744 = vmatmul.mubr.f32.gmra.mrb[68].mxu0 %v3731_v59 }
 0x862   : > { %6746 = vmatprep.mubr.msk.f32.mxu0 %vm8166_vm1, %v11174_v2 }
 0x865   : > { %6747 = vmatmul.mubr.f32.gmra.mrb[70].mxu0 %v3732_v41 }
 0x866   : > { %6749 = vmatprep.mubr.msk.f32.mxu0 %vm8166_vm1, %v11174_v2 }
 0x869   : > { %6750 = vmatmul.mubr.f32.gmra.mrb[72].mxu0 %v3733_v3 }
 0x86a   : > { %6752 = vmatprep.mubr.msk.f32.mxu0 %vm8166_vm1, %v11174_v2 }
 0x86d   : > { %6753 = vmatmul.mubr.f32.gmra.mrb[74].mxu0 %v3734_v61 }
 0x86e   : > { %6788 = vmatprep.mubr.msk.f32.mxu0 %vm8166_vm1, %v11174_v2 }
 0x871   : > { %6789 = vmatmul.mubr.f32.vlgmr.msra.gmra.mrb[76].mxu0 %v4046_v53 }
 0x872   : > { %6791 = vmatprep.mubr.msk.f32.mxu0 %vm8166_vm1, %v11174_v2 }
 0x875   : > { %6792 = vmatmul.mubr.f32.gmra.mrb[78].mxu0 %v4047_v58 }
 0x876   : > { %6794 = vmatprep.mubr.msk.f32.mxu0 %vm8166_vm1, %v11174_v2 }
 0x879   : > { %6795 = vmatmul.mubr.f32.gmra.mrb[80].mxu0 %v4048_v11  ;;  %v10017_v11 = vld [vmem:[%s11196_s11 + $0x28] sm:$0xff] }
 0x87a   : > { %6797 = vmatprep.mubr.msk.f32.mxu0 %vm8166_vm1, %v11174_v2 }
 0x87d   : > { %6798 = vmatmul.mubr.f32.gmra.mrb[82].mxu0 %v4049_v1 }
 0x87e   : > { %6800 = vmatprep.mubr.msk.f32.mxu0 %vm8166_vm1, %v11174_v2 }
 0x881   : > { %6801 = vmatmul.mubr.f32.gmra.mrb[84].mxu0 %v4050_v26 }
 0x882   : > { %6803 = vmatprep.mubr.msk.f32.mxu0 %vm8166_vm1, %v11174_v2 }
 0x885   : > { %6804 = vmatmul.mubr.f32.gmra.mrb[86].mxu0 %v4051_v33 }
 0x886   : > { %6806 = vmatprep.mubr.msk.f32.mxu0 %vm8166_vm1, %v11174_v2 }
 0x889   : > { %6807 = vmatmul.mubr.f32.gmra.mrb[88].mxu0 %v4052_v60 }
 0x88a   : > { %6868 = vmatprep.mubr.msk.f32.mxu0 %vm8166_vm1, %v11174_v2 }
 0x90a   : > { %v3176_v55 = vpop.f32.mrb[84].mxu1  ;;  %v3365_v31 = vpop.f32.mrb[48].mxu0 }
 0x90b   : > { %v9972_v22 = vadd.f32 %v3365_v31, %v9969_v50  ;;  %v6628_v0 = vpop.f32.mrb[85].mxu1  ;;  %v6655_v63 = vpop.f32.mrb[49].mxu0 }
 0x90c   : > { %v10025_v63 = vadd.f32 %v3176_v55, %v9969_v50 }
 0x90d   : > { %v3399_v5 = vsel %vm3210_vm15, %v9972_v22, -inf }
 0x90e   : > { %3400 = vmax.xlane.f32.xlu0 %v3399_v5  ;;  %v3181_v30 = vpop.f32.mrb[86].mxu1  ;;  %v3370_v14 = vpop.f32.mrb[50].mxu0 }
 0x90f   : > { %v9982_v54 = vadd.f32 %v3370_v14, %v9977_v44  ;;  %v6631_v10 = vpop.f32.mrb[87].mxu1  ;;  %v6658_v37 = vpop.f32.mrb[51].mxu0  ;;  %v10032_v14 = vld [vmem:[%s11196_s11 + $0x30] sm:$0x3f] }
 0x911   : > { %v3402_v6 = vsel %vm3210_vm15, %v9982_v54, -inf }
 0x912   : > { %3403 = vmax.xlane.f32.xlu1 %v3402_v6  ;;  %v3186_v49 = vpop.f32.mrb[88].mxu1  ;;  %v3375_v27 = vpop.f32.mrb[52].mxu0 }
 0x913   : > { %v9992_v20 = vadd.f32 %v3375_v27, %v9987_v8  ;;  %v6634_v19 = vpop.f32.mrb[89].mxu1  ;;  %v6661_v4 = vpop.f32.mrb[53].mxu0  ;;  %v10035_v6 = vadd.f32 %v3186_v49, %v9987_v8 }
 0x914   : > { %v3211_v4 = vsel %vm3210_vm15, %v10025_v63, -inf }
 0x915   : > { %v3405_v18 = vsel %vm3210_vm15, %v9992_v20, -inf }
 0x916   : > { %3406 = vmax.xlane.f32.xlu0 %v3405_v18  ;;  %v3191_v23 = vpop.f32.mrb[90].mxu1  ;;  %v3380_v17 = vpop.f32.mrb[54].mxu0  ;;  %v10043_v18 = vadd.f32 %v3181_v30, %v9977_v44 }
 0x917   : > { %v10002_v15 = vadd.f32 %v3380_v17, %v9997_v24  ;;  %v6637_v43 = vpop.f32.mrb[91].mxu1  ;;  %v6664_v7 = vpop.f32.mrb[55].mxu0 }
 0x918   : > { %v3214_v30 = vsel %vm3210_vm15, %v10043_v18, -inf }
 0x919   : > { %v3408_v59 = vsel %vm3210_vm15, %v10002_v15, -inf }
 0x91a   : > { %3409 = vmax.xlane.f32.xlu1 %v3408_v59  ;;  %v3196_v41 = vpop.f32.mrb[92].mxu1  ;;  %v3385_v3 = vpop.f32.mrb[56].mxu0  ;;  %v3217_v59 = vsel %vm3210_vm15, %v10035_v6, -inf }
 0x91b   : > { %v10012_v61 = vadd.f32 %v3385_v3, %v10007_v32  ;;  %v6640_v53 = vpop.f32.mrb[93].mxu1  ;;  %v6667_v58 = vpop.f32.mrb[57].mxu0  ;;  %v10048_v49 = vadd.f32 %v3196_v41, %v10007_v32  ;;  %v10053_v3 = vadd.f32 %v3191_v23, %v9997_v24 }
 0x91d   : > { %v3411_v1 = vsel %vm3210_vm15, %v10012_v61, -inf  ;;  %v3223_v41 = vsel %vm3210_vm15, %v10048_v49, -inf  ;;  %v3220_v23 = vsel %vm3210_vm15, %v10053_v3, -inf }
 0x91e   : > { %3412 = vmax.xlane.f32.xlu0 %v3411_v1  ;;  %v3201_v26 = vpop.f32.mrb[94].mxu1  ;;  %v3390_v33 = vpop.f32.mrb[58].mxu0 }
 0x91f   : > { %v10022_v60 = vadd.f32 %v3390_v33, %v10017_v11  ;;  %v6643_v31 = vpop.f32.mrb[95].mxu1  ;;  %v6670_v0 = vpop.f32.mrb[59].mxu0  ;;  %v10063_v33 = vadd.f32 %v3201_v26, %v10017_v11 }
 0x921   : > { %v3414_v5 = vsel %vm3210_vm15, %v10022_v60, -inf  ;;  %v3226_v26 = vsel %vm3210_vm15, %v10063_v33, -inf }
 0x922   : > { %3415 = vmax.xlane.f32.xlu1 %v3414_v5 }
 0x924   : > { %v3206_v10 = vpop.f32.mrb[96].mxu1  ;;  %v3395_v37 = vpop.f32.mrb[60].mxu0 }
 0x925   : > { %v10038_v27 = vadd.f32 %v3395_v37, %v10032_v14  ;;  %v6646_v55 = vpop.f32.mrb[97].mxu1  ;;  %v6673_v19 = vpop.f32.mrb[61].mxu0  ;;  %v10058_v58 = vadd.f32 %v3206_v10, %v10032_v14 }
 0x926   : > { %3212 = vmax.xlane.f32.xlu1 %v3211_v4 }
 0x927   : > { %v3417_v17 = vsel %vm3229_vm0, %v10038_v27, -inf  ;;  %v3230_v10 = vsel %vm3229_vm0, %v10058_v58, -inf }
 0x928   : > { %3418 = vmax.xlane.f32.xlu0 %v3417_v17  ;;  %v3801_v43 = vpop.f32.mrb[62].mxu0 }
 0x929   : > { %v6736_v7 = vpop.f32.mrb[63].mxu0  ;;  %v10073_v37 = vadd.f32 %v3801_v43, %v9969_v50 }
 0x92a   : > { %3218 = vmax.xlane.f32.xlu1 %v3217_v59 }
 0x92b   : > { %v3835_v43 = vsel %vm3210_vm15, %v10073_v37, -inf }
 0x92c   : > { %v3806_v53 = vpop.f32.mrb[64].mxu0  ;;  %3215 = vmax.xlane.f32.xlu0 %v3214_v30 }
 0x92d   : > { %v6739_v1 = vpop.f32.mrb[65].mxu0  ;;  %v10068_v0 = vadd.f32 %v3806_v53, %v9977_v44 }
 0x92e   : > { %3224 = vmax.xlane.f32.xlu1 %v3223_v41 }
 0x92f   : > { %v3838_v17 = vsel %vm3210_vm15, %v10068_v0, -inf }
 0x930   : > { %v3811_v31 = vpop.f32.mrb[66].mxu0  ;;  %3221 = vmax.xlane.f32.xlu0 %v3220_v23 }
 0x931   : > { %v6742_v5 = vpop.f32.mrb[67].mxu0  ;;  %v10083_v7 = vadd.f32 %v3811_v31, %v9987_v8 }
 0x932   : > { %3231 = vmax.xlane.f32.xlu1 %v3230_v10 }
 0x933   : > { %v3841_v41 = vsel %vm3210_vm15, %v10083_v7, -inf }
 0x934   : > { %v3816_v55 = vpop.f32.mrb[68].mxu0  ;;  %3227 = vmax.xlane.f32.xlu0 %v3226_v26 }
 0x935   : > { %v10078_v19 = vadd.f32 %v3816_v55, %v9997_v24  ;;  %v6745_v4 = vpop.f32.mrb[69].mxu0 }
 0x936   : > { %3839 = vmax.xlane.f32.xlu1 %v3838_v17 }
 0x937   : > { %v3844_v53 = vsel %vm3210_vm15, %v10078_v19, -inf }
 0x938   : > { %v3821_v59 = vpop.f32.mrb[70].mxu0  ;;  %3836 = vmax.xlane.f32.xlu0 %v3835_v43 }
 0x939   : > { %v6748_v30 = vpop.f32.mrb[71].mxu0  ;;  %v10090_v1 = vadd.f32 %v3821_v59, %v10007_v32 }
 0x93a   : > { %3845 = vmax.xlane.f32.xlu1 %v3844_v53 }
 0x93b   : > { %v3847_v10 = vsel %vm3210_vm15, %v10090_v1, -inf }
 0x93c   : > { %v3826_v23 = vpop.f32.mrb[72].mxu0  ;;  %3842 = vmax.xlane.f32.xlu0 %v3841_v41 }
 0x93d   : > { %v10095_v31 = vadd.f32 %v3826_v23, %v10017_v11  ;;  %v6751_v5 = vpop.f32.mrb[73].mxu0 }
 0x93f   : > { %v3850_v26 = vsel %vm3210_vm15, %v10095_v31, -inf }
 0x940   : > { %v3831_v55 = vpop.f32.mrb[74].mxu0  ;;  %3848 = vmax.xlane.f32.xlu0 %v3847_v10  ;;  %3851 = vmax.xlane.f32.xlu1 %v3850_v26 }
 0x941   : > { %v10102_v4 = vadd.f32 %v3831_v55, %v10032_v14  ;;  %v6754_v17 = vpop.f32.mrb[75].mxu0 }
 0x943   : > { %v3853_v43 = vsel %vm3229_vm0, %v10102_v4, -inf }
 0x944   : > { %v4119_v59 = vpop.f32.mrb[76].mxu0  ;;  %3854 = vmax.xlane.f32.xlu0 %v3853_v43 }
 0x945   : > { %v10107_v30 = vadd.f32 %v4119_v59, %v9969_v50  ;;  %v6790_v53 = vpop.f32.mrb[77].mxu0 }
 0x947   : > { %v4153_v41 = vsel %vm3210_vm15, %v10107_v30, -inf }
 0x948   : > { %v4124_v23 = vpop.f32.mrb[78].mxu0  ;;  %4154 = vmax.xlane.f32.xlu1 %v4153_v41 }
 0x949   : > { %v10112_v5 = vadd.f32 %v4124_v23, %v9977_v44  ;;  %v6793_v10 = vpop.f32.mrb[79].mxu0 }
 0x94b   : > { %v4156_v26 = vsel %vm3210_vm15, %v10112_v5, -inf }
 0x94c   : > { %v4129_v55 = vpop.f32.mrb[80].mxu0  ;;  %4157 = vmax.xlane.f32.xlu1 %v4156_v26 }
 0x94d   : > { %v10117_v17 = vadd.f32 %v4129_v55, %v9987_v8  ;;  %v6796_v50 = vpop.f32.mrb[81].mxu0 }
 0x94f   : > { %v4159_v43 = vsel %vm3210_vm15, %v10117_v17, -inf }
 0x950   : > { %v4134_v59 = vpop.f32.mrb[82].mxu0  ;;  %4160 = vmax.xlane.f32.xlu1 %v4159_v43 }
 0x951   : > { %v10122_v53 = vadd.f32 %v4134_v59, %v9997_v24  ;;  %v6799_v44 = vpop.f32.mrb[83].mxu0 }
 0x953   : > { %v4162_v41 = vsel %vm3210_vm15, %v10122_v53, -inf }
 0x954   : > { %v4139_v23 = vpop.f32.mrb[84].mxu0  ;;  %4163 = vmax.xlane.f32.xlu1 %v4162_v41 }
 0x955   : > { %v10127_v10 = vadd.f32 %v4139_v23, %v10007_v32  ;;  %v6802_v8 = vpop.f32.mrb[85].mxu0 }
 0x957   : > { %v4165_v26 = vsel %vm3210_vm15, %v10127_v10, -inf }
 0x958   : > { %v4144_v55 = vpop.f32.mrb[86].mxu0  ;;  %4166 = vmax.xlane.f32.xlu1 %v4165_v26 }
 0x959   : > { %v10132_v50 = vadd.f32 %v4144_v55, %v10017_v11  ;;  %v6805_v24 = vpop.f32.mrb[87].mxu0 }
 0x95b   : > { %v4168_v43 = vsel %vm3210_vm15, %v10132_v50, -inf }
 0x95c   : > { %v4149_v59 = vpop.f32.mrb[88].mxu0  ;;  %4169 = vmax.xlane.f32.xlu1 %v4168_v43 }
 0x95d   : > { %v10137_v44 = vadd.f32 %v4149_v59, %v10032_v14  ;;  %v6808_v32 = vpop.f32.mrb[89].mxu0 }
 0x95f   : > { %v4171_v41 = vsel %vm3229_vm0, %v10137_v44, -inf }
 0x960   : > { %4172 = vmax.xlane.f32.xlu1 %v4171_v41 }
 0x99b   : > { %v3401_v23 = vpop.xlane.xlu0 %3400 }
 0x99c   : > { %v3420_v8 = vsub.f32 %v9972_v22, %v3401_v23 }
 0x99e   : > { %v3427_v26 = vmul.f32 1.442695, %v3420_v8 }
 0x99f   : > { %v3404_v11 = vpop.xlane.xlu1 %3403 }
 0x9a0   : > { %7698 = vpow2.f32 %v3427_v26  ;;  %v3421_v55 = vsub.f32 %v9982_v54, %v3404_v11 }
 0x9a2   : > { %v3429_v24 = vmul.f32 1.442695, %v3421_v55 }
 0x9a3   : > { %v3407_v51 = vpop.xlane.xlu0 %3406 }
 0x9a4   : > { %7700 = vpow2.f32 %v3429_v24  ;;  %v3422_v43 = vsub.f32 %v9992_v20, %v3407_v51 }
 0x9a6   : > { %v3431_v14 = vmul.f32 1.442695, %v3422_v43 }
 0x9a7   : > { %v3410_v59 = vpop.xlane.xlu1 %3409 }
 0x9a8   : > { %7702 = vpow2.f32 %v3431_v14  ;;  %v3423_v32 = vsub.f32 %v10002_v15, %v3410_v59 }
 0x9aa   : > { %v10145_v47 = vpop.eup %7698  ;;  %v3433_v41 = vmul.f32 1.442695, %v3423_v32 }
 0x9ab   : > { %v3413_v52 = vpop.xlane.xlu0 %3412  ;;  %v3441_v22 = vsel %vm3210_vm15, %v10145_v47, 0.0 }
 0x9ac   : > { %7704 = vpow2.f32 %v3433_v41  ;;  %v3424_v54 = vsub.f32 %v10012_v61, %v3413_v52  ;;  %3442 = vadd.xlane.f32.xlu0 %v3441_v22 }
 0x9ae   : > { %v10150_v23 = vpop.eup %7700  ;;  %v3435_v8 = vmul.f32 1.442695, %v3424_v54 }
 0x9af   : > { %v3416_v51 = vpop.xlane.xlu1 %3415  ;;  %v3444_v20 = vsel %vm3210_vm15, %v10150_v23, 0.0 }
 0x9b0   : > { %7706 = vpow2.f32 %v3435_v8  ;;  %v3425_v15 = vsub.f32 %v10022_v60, %v3416_v51  ;;  %3445 = vadd.xlane.f32.xlu0 %v3444_v20 }
 0x9b2   : > { %v10155_v26 = vpop.eup %7702  ;;  %v3437_v11 = vmul.f32 1.442695, %v3425_v15 }
 0x9b3   : > { %v3213_v55 = vpop.xlane.xlu1 %3212  ;;  %v3447_v24 = vsel %vm3210_vm15, %v10155_v26, 0.0 }
 0x9b4   : > { %7708 = vpow2.f32 %v3437_v11  ;;  %v3233_v52 = vsub.f32 %v10025_v63, %v3213_v55  ;;  %3448 = vadd.xlane.f32.xlu0 %v3447_v24 }
 0x9b5   : > { %v3419_v61 = vpop.xlane.xlu0 %3418 }
 0x9b6   : > { %v10160_v43 = vpop.eup %7704  ;;  %v3240_v14 = vmul.f32 1.442695, %v3233_v52  ;;  %v3426_v59 = vsub.f32 %v10038_v27, %v3419_v61 }
 0x9b7   : > { %v3219_v32 = vpop.xlane.xlu1 %3218  ;;  %v3450_v60 = vsel %vm3210_vm15, %v10160_v43, 0.0 }
 0x9b8   : > { %7710 = vpow2.f32 %v3240_v14  ;;  %v3439_v41 = vmul.f32 1.442695, %v3426_v59  ;;  %v3235_v22 = vsub.f32 %v10035_v6, %v3219_v32  ;;  %3451 = vadd.xlane.f32.xlu0 %v3450_v60 }
 0x9b9   : > { %v3216_v54 = vpop.xlane.xlu0 %3215 }
 0x9ba   : > { %v10166_v8 = vpop.eup %7706  ;;  %7712 = vpow2.f32 %v3439_v41  ;;  %v3244_v63 = vmul.f32 1.442695, %v3235_v22  ;;  %v3234_v51 = vsub.f32 %v10043_v18, %v3216_v54 }
 0x9bb   : > { %v3225_v20 = vpop.xlane.xlu1 %3224  ;;  %v3453_v27 = vsel %vm3210_vm15, %v10166_v8, 0.0 }
 0x9bc   : > { %7714 = vpow2.f32 %v3244_v63  ;;  %v3242_v15 = vmul.f32 1.442695, %v3234_v51  ;;  %v3237_v11 = vsub.f32 %v10048_v49, %v3225_v20  ;;  %3454 = vadd.xlane.f32.xlu0 %v3453_v27 }
 0x9bd   : > { %v3222_v55 = vpop.xlane.xlu0 %3221 }
 0x9be   : > { %v10172_v24 = vpop.eup %7708  ;;  %7716 = vpow2.f32 %v3242_v15  ;;  %v3248_v6 = vmul.f32 1.442695, %v3237_v11  ;;  %v3236_v52 = vsub.f32 %v10053_v3, %v3222_v55 }
 0x9bf   : > { %v3232_v61 = vpop.xlane.xlu1 %3231  ;;  %v3456_v18 = vsel %vm3210_vm15, %v10172_v24, 0.0 }
 0x9c0   : > { %7718 = vpow2.f32 %v3248_v6  ;;  %v3246_v14 = vmul.f32 1.442695, %v3236_v52  ;;  %v3239_v59 = vsub.f32 %v10058_v58, %v3232_v61  ;;  %3457 = vadd.xlane.f32.xlu0 %v3456_v18 }
 0x9c1   : > { %v3228_v32 = vpop.xlane.xlu0 %3227 }
 0x9c2   : > { %v10178_v60 = vpop.eup %7710  ;;  %7720 = vpow2.f32 %v3246_v14  ;;  %v3252_v49 = vmul.f32 1.442695, %v3239_v59  ;;  %v3238_v41 = vsub.f32 %v10063_v33, %v3228_v32 }
 0x9c3   : > { %v3840_v22 = vpop.xlane.xlu1 %3839  ;;  %v3254_v3 = vsel %vm3210_vm15, %v10178_v60, 0.0 }
 0x9c4   : > { %v10183_v54 = vpop.eup %7712  ;;  %7722 = vpow2.f32 %v3252_v49  ;;  %v3250_v63 = vmul.f32 1.442695, %v3238_v41  ;;  %v3857_v51 = vsub.f32 %v10068_v0, %v3840_v22  ;;  %3255 = vadd.xlane.f32.xlu1 %v3254_v3 }
 0x9c5   : > { %v3837_v58 = vpop.xlane.xlu0 %3836  ;;  %v3459_v20 = vsel %vm3229_vm0, %v10183_v54, 0.0 }
 0x9c6   : > { %v10188_v27 = vpop.eup %7714  ;;  %7724 = vpow2.f32 %v3250_v63  ;;  %v3865_v15 = vmul.f32 1.442695, %v3857_v51  ;;  %v3856_v33 = vsub.f32 %v10073_v37, %v3837_v58  ;;  %3460 = vadd.xlane.f32.xlu0 %v3459_v20 }
 0x9c7   : > { %v3846_v11 = vpop.xlane.xlu1 %3845  ;;  %v3260_v55 = vsel %vm3210_vm15, %v10188_v27, 0.0 }
 0x9c8   : > { %v10193_v6 = vpop.eup %7716  ;;  %7726 = vpow2.f32 %v3865_v15  ;;  %v3863_v0 = vmul.f32 1.442695, %v3856_v33  ;;  %v3859_v52 = vsub.f32 %v10078_v19, %v3846_v11  ;;  %3261 = vadd.xlane.f32.xlu1 %v3260_v55 }
 0x9c9   : > { %v3843_v61 = vpop.xlane.xlu0 %3842  ;;  %v3257_v18 = vsel %vm3210_vm15, %v10193_v6, 0.0 }
 0x9ca   : > { %v10198_v14 = vpop.eup %7718  ;;  %7728 = vpow2.f32 %v3863_v0  ;;  %v3869_v37 = vmul.f32 1.442695, %v3859_v52  ;;  %v3858_v59 = vsub.f32 %v10083_v7, %v3843_v61  ;;  %3258 = vadd.xlane.f32.xlu0 %v3257_v18 }
 0x9cb   : > { %v3266_v32 = vsel %vm3210_vm15, %v10198_v14, 0.0 }
 0x9cc   : > { %v10203_v49 = vpop.eup %7720  ;;  %7730 = vpow2.f32 %v3869_v37  ;;  %v3867_v41 = vmul.f32 1.442695, %v3858_v59  ;;  %3267 = vadd.xlane.f32.xlu1 %v3266_v32  ;;  %v5809_v59 = vmul.f32 -1.442695, %v9730_v57 }
 0x9cd   : > { %v3849_v19 = vpop.xlane.xlu0 %3848  ;;  %v3852_v22 = vpop.xlane.xlu1 %3851  ;;  %v3263_v3 = vsel %vm3210_vm15, %v10203_v49, 0.0 }
 0x9ce   : > { %v10207_v63 = vpop.eup %7722  ;;  %7732 = vpow2.f32 %v3867_v41  ;;  %v3860_v51 = vsub.f32 %v10090_v1, %v3849_v19  ;;  %v3861_v7 = vsub.f32 %v10095_v31, %v3852_v22  ;;  %3264 = vadd.xlane.f32.xlu0 %v3263_v3 }
 0x9cf   : > { %v3272_v58 = vsel %vm3229_vm0, %v10207_v63, 0.0 }
 0x9d0   : > { %v10213_v20 = vpop.eup %7724  ;;  %v3871_v15 = vmul.f32 1.442695, %v3860_v51  ;;  %v3873_v33 = vmul.f32 1.442695, %v3861_v7  ;;  %3273 = vadd.xlane.f32.xlu1 %v3272_v58  ;;  %v5810_v7 = vmul.f32 -1.442695, %v9738_v16 }
 0x9d1   : > { %v3855_v11 = vpop.xlane.xlu0 %3854  ;;  %v3269_v55 = vsel %vm3210_vm15, %v10213_v20, 0.0 }
 0x9d2   : > { %v10217_v0 = vpop.eup %7726  ;;  %7734 = vpow2.f32 %v3871_v15  ;;  %v3862_v1 = vsub.f32 %v10102_v4, %v3855_v11  ;;  %3270 = vadd.xlane.f32.xlu0 %v3269_v55 }
 0x9d3   : > { %7736 = vpow2.f32 %v3873_v33  ;;  %v3880_v31 = vsel %vm3210_vm15, %v10217_v0, 0.0 }
 0x9d4   : > { %v10222_v52 = vpop.eup %7728  ;;  %v3875_v61 = vmul.f32 1.442695, %v3862_v1  ;;  %3881 = vadd.xlane.f32.xlu1 %v3880_v31  ;;  %v5811_v1 = vmul.f32 -1.442695, %v9746_v36 }
 0x9d5   : > { %v4155_v18 = vpop.xlane.xlu1 %4154  ;;  %v3877_v37 = vsel %vm3210_vm15, %v10222_v52, 0.0 }
 0x9d6   : > { %v10227_v32 = vpop.eup %7730  ;;  %7738 = vpow2.f32 %v3875_v61  ;;  %v4174_v4 = vsub.f32 %v10107_v30, %v4155_v18  ;;  %3878 = vadd.xlane.f32.xlu0 %v3877_v37 }
 0x9d7   : > { %v3886_v41 = vsel %vm3210_vm15, %v10227_v32, 0.0  ;;  %7740 = vpow2.f32 %v5809_v59 }
 0x9d8   : > { %v10232_v19 = vpop.eup %7732  ;;  %v4181_v22 = vmul.f32 1.442695, %v4174_v4  ;;  %3887 = vadd.xlane.f32.xlu1 %v3886_v41  ;;  %v5812_v4 = vmul.f32 -1.442695, %v9754_v45 }
 0x9d9   : > { %v4158_v3 = vpop.xlane.xlu1 %4157  ;;  %v3883_v51 = vsel %vm3210_vm15, %v10232_v19, 0.0 }
 0x9da   : > { %7742 = vpow2.f32 %v4181_v22  ;;  %v4175_v58 = vsub.f32 %v10112_v5, %v4158_v3  ;;  %3884 = vadd.xlane.f32.xlu0 %v3883_v51 }
 0x9db   : > { %7744 = vpow2.f32 %v5810_v7 }
 0x9dc   : > { %v10238_v30 = vpop.eup %7734  ;;  %v4183_v15 = vmul.f32 1.442695, %v4175_v58  ;;  %v5813_v58 = vmul.f32 -1.442695, %v9762_v42 }
 0x9dd   : > { %v10240_v33 = vpop.eup %7736  ;;  %v4161_v11 = vpop.xlane.xlu1 %4160  ;;  %v3889_v55 = vsel %vm3210_vm15, %v10238_v30, 0.0 }
 0x9de   : > { %7746 = vpow2.f32 %v4183_v15  ;;  %v4176_v31 = vsub.f32 %v10117_v17, %v4161_v11  ;;  %3890 = vadd.xlane.f32.xlu0 %v3889_v55  ;;  %v3892_v5 = vsel %vm3210_vm15, %v10240_v33, 0.0 }
 0x9df   : > { %3893 = vadd.xlane.f32.xlu1 %v3892_v5  ;;  %7748 = vpow2.f32 %v5811_v1 }
 0x9e0   : > { %v10248_v61 = vpop.eup %7738  ;;  %v4185_v18 = vmul.f32 1.442695, %v4176_v31 }
 0x9e1   : > { %v4164_v37 = vpop.xlane.xlu1 %4163  ;;  %v3895_v59 = vsel %vm3229_vm0, %v10248_v61, 0.0  ;;  %v7741_v17 = vpop.eup %7740 }
 0x9e2   : > { %7750 = vpow2.f32 %v4185_v18  ;;  %v4177_v41 = vsub.f32 %v10122_v53, %v4164_v37  ;;  %3896 = vadd.xlane.f32.xlu0 %v3895_v59  ;;  %v4671_v55 = vadd.f32 1.0, %v7741_v17 }
 0x9e3   : > { %7752 = vpow2.f32 %v5812_v4 }
 0x9e4   : > { %v10254_v22 = vpop.eup %7742  ;;  %v4187_v3 = vmul.f32 1.442695, %v4177_v41 }
 0x9e5   : > { %v4167_v51 = vpop.xlane.xlu1 %4166  ;;  %v4195_v7 = vsel %vm3210_vm15, %v10254_v22, 0.0  ;;  %v7745_v11 = vpop.eup %7744 }
 0x9e6   : > { %7754 = vpow2.f32 %v4187_v3  ;;  %v4178_v15 = vsub.f32 %v10127_v10, %v4167_v51  ;;  %4196 = vadd.xlane.f32.xlu1 %v4195_v7  ;;  %v4672_v59 = vadd.f32 1.0, %v7745_v11 }
 0x9e7   : > { %7756 = vpow2.f32 %v5813_v58 }
 0x9e8   : > { %v10260_v1 = vpop.eup %7746  ;;  %v4189_v53 = vmul.f32 1.442695, %v4178_v15 }
 0x9e9   : > { %v4170_v31 = vpop.xlane.xlu1 %4169  ;;  %v4198_v5 = vsel %vm3210_vm15, %v10260_v1, 0.0  ;;  %v7749_v37 = vpop.eup %7748 }
 0x9ea   : > { %7758 = vpow2.f32 %v4189_v53  ;;  %v4179_v18 = vsub.f32 %v10132_v50, %v4170_v31  ;;  %4199 = vadd.xlane.f32.xlu0 %v4198_v5  ;;  %v4673_v7 = vadd.f32 1.0, %v7749_v37 }
 0x9eb   : > { %7760 = vrcp.f32 %v4671_v55 }
 0x9ec   : > { %v10265_v4 = vpop.eup %7750  ;;  %v4191_v10 = vmul.f32 1.442695, %v4179_v18 }
 0x9ed   : > { %v4173_v41 = vpop.xlane.xlu1 %4172  ;;  %v4201_v17 = vsel %vm3210_vm15, %v10265_v4, 0.0  ;;  %v7753_v51 = vpop.eup %7752 }
 0x9ee   : > { %7762 = vpow2.f32 %v4191_v10  ;;  %v4180_v3 = vsub.f32 %v10137_v44, %v4173_v41  ;;  %4202 = vadd.xlane.f32.xlu1 %v4201_v17  ;;  %v4674_v55 = vadd.f32 1.0, %v7753_v51 }
 0x9ef   : > { %7764 = vrcp.f32 %v4672_v59 }
 0x9f0   : > { %v10270_v58 = vpop.eup %7754  ;;  %v4193_v50 = vmul.f32 1.442695, %v4180_v3 }
 0x9f1   : > { %v4204_v15 = vsel %vm3210_vm15, %v10270_v58, 0.0  ;;  %v7757_v11 = vpop.eup %7756 }
 0x9f2   : > { %7766 = vpow2.f32 %v4193_v50  ;;  %4205 = vadd.xlane.f32.xlu0 %v4204_v15  ;;  %v4675_v5 = vadd.f32 1.0, %v7757_v11 }
 0x9f3   : > { %7768 = vrcp.f32 %v4673_v7 }
 0x9f4   : > { %v10274_v53 = vpop.eup %7758  ;;  %7770 = vrcp.f32 %v4674_v55 }
 0x9f5   : > { %v7761_v31 = vpop.eup %7760  ;;  %v4207_v44 = vsel %vm3210_vm15, %v10274_v53, 0.0  ;;  %7772 = vrcp.f32 %v4675_v5 }
 0x9f6   : > { %4208 = vadd.xlane.f32.xlu1 %v4207_v44  ;;  %v4692_v37 = vmul.f32 %v7761_v31, %v9730_v57 }
 0x9f8   : > { %v10278_v18 = vpop.eup %7762  ;;  %v4699_v17 = vadd.f32 %v4692_v37, %v9730_v57 }
 0x9f9   : > { %v7765_v59 = vpop.eup %7764  ;;  %v4210_v10 = vsel %vm3210_vm15, %v10278_v18, 0.0 }
 0x9fa   : > { %4211 = vadd.xlane.f32.xlu0 %v4210_v10  ;;  %v4693_v3 = vmul.f32 %v7765_v59, %v9738_v16  ;;  %v10290_v50 = vmul.f32 %v11184_v21, %v4699_v17 }
 0x9fc   : > { %v10283_v41 = vpop.eup %7766  ;;  %v4700_v15 = vadd.f32 %v4693_v3, %v9738_v16  ;;  %v4371_v16 = vld [vmem:[%s8576_s15 + $0x38] sm:$0xff] }
 0x9fd   : > { %v7769_v51 = vpop.eup %7768  ;;  %v4213_v7 = vsel %vm3229_vm0, %v10283_v41, 0.0 }
 0x9fe   : > { %4214 = vadd.xlane.f32.xlu1 %v4213_v7  ;;  %v4694_v11 = vmul.f32 %v7769_v51, %v9746_v36  ;;  %v7771_v55 = vpop.eup %7770  ;;  %v10296_v31 = vmul.f32 %v11184_v21, %v4700_v15  ;;  %v4364_v15 = vld [vmem:[%s8576_s15] sm:$0xff] }
 0x9ff   : > { %v4695_v5 = vmul.f32 %v7771_v55, %v9754_v45  ;;  %v7773_v37 = vpop.eup %7772  ;;  %v4366_v55 = vld [vmem:[%s8576_s15 + $0x10] sm:$0xff] }
 0xa00   : > { %v4701_v44 = vadd.f32 %v4694_v11, %v9746_v36  ;;  %v4696_v17 = vmul.f32 %v7773_v37, %v9762_v42  ;;  %v4365_v11 = vld [vmem:[%s8576_s15 + $0x8] sm:$0xff]  ;;  %v4370_v36 = vld [vmem:[%s8576_s15 + $0x30] sm:$0xff] }
 0xa01   : > { %v4702_v10 = vadd.f32 %v4695_v5, %v9754_v45  ;;  %v4367_v5 = vld [vmem:[%s8576_s15 + $0x18] sm:$0xff] }
 0xa02   : > { %4713 = vadd.xlane.f32.xlu1 %v10290_v50  ;;  %v10302_v59 = vmul.f32 %v11184_v21, %v4701_v44  ;;  %v4703_v51 = vadd.f32 %v4696_v17, %v9762_v42  ;;  %v7281_v44 = vpack.c.bf16 %v4365_v11, %v4364_v15  ;;  %v7284_v37 = vpack.c.bf16 %v4367_v5, %v4366_v55  ;;  %v4368_v17 = vld [vmem:[%s8576_s15 + $0x20] sm:$0xff]  ;;  %v4369_v42 = vld [vmem:[%s8576_s15 + $0x28] sm:$0xff] }
 0xa03   : > { %v10308_v3 = vmul.f32 %v11184_v21, %v4702_v10  ;;  %v7290_v15 = vpack.c.bf16 %v4371_v16, %v4370_v36  ;;  %v4372_v55 = vld [vmem:[%s8576_s15 + $0x40] sm:$0xff]  ;;  %v11197_v36 = vpack.c.bf16 %v9798_v13, %v9786_v35  ;;  %v4377_v13 = vld [vmem:[%s8576_s15 + $0x68] sm:$0xff] }
 0xa04   : > { %v10313_v7 = vmul.f32 %v11184_v21, %v4703_v51  ;;  %7282 = vmatpush3.bf16.msra.mxu0 %v7281_v44  ;;  %v7287_v51 = vpack.c.bf16 %v4369_v42, %v4368_v17  ;;  %v4373_v44 = vld [vmem:[%s8576_s15 + $0x48] sm:$0xff]  ;;  %v4375_v17 = vld [vmem:[%s8576_s15 + $0x58] sm:$0xff]  ;;  %v4376_v35 = vld [vmem:[%s8576_s15 + $0x60] sm:$0xff] }
 0xa05   : > { %7283 = vmatprep.subr.bf16.mxu0 %v11172_v39 }
 0xa06   : > { %4715 = vadd.xlane.f32.xlu1 %v10296_v31 }
 0xa08   : > { %7285 = vmatpush3.bf16.msra.mxu0 %v7284_v37 }
 0xa09   : > { %7286 = vmatprep.subr.bf16.mxu0 %v11172_v39 }
 0xa0a   : > { %4717 = vadd.xlane.f32.xlu1 %v10302_v59 }
 0xa0c   : > { %7288 = vmatpush3.bf16.msra.mxu0 %v7287_v51 }
 0xa0d   : > { %7289 = vmatprep.subr.bf16.mxu0 %v11172_v39 }
 0xa0e   : > { %4719 = vadd.xlane.f32.xlu1 %v10308_v3 }
 0xa10   : > { %7291 = vmatpush3.bf16.msra.mxu0 %v7290_v15 }
 0xa11   : > { %7292 = vmatprep.subr.bf16.mxu0 %v11172_v39 }
 0xa12   : > { %4721 = vadd.xlane.f32.xlu1 %v10313_v7 }
 0xa39   : > { %v3443_v10 = vpop.xlane.xlu0 %3442 }
 0xa3a   : > { %7774 = vrcp.f32 %v3443_v10  ;;  %v7293_v10 = vpack.c.bf16 %v4373_v44, %v4372_v55 }
 0xa3c   : > { %7294 = vmatpush3.bf16.msra.mxu0 %v7293_v10 }
 0xa3d   : > { %v3446_v45 = vpop.xlane.xlu0 %3445  ;;  %7295 = vmatprep.subr.bf16.mxu0 %v11172_v39 }
 0xa3e   : > { %7776 = vrcp.f32 %v3446_v45  ;;  %v4374_v45 = vld [vmem:[%s8576_s15 + $0x50] sm:$0xff] }
 0xa3f   : > { %v7296_v15 = vpack.c.bf16 %v4375_v17, %v4374_v45 }
 0xa41   : > { %v3449_v11 = vpop.xlane.xlu0 %3448  ;;  %7297 = vmatpush3.bf16.msra.mxu0 %v7296_v15 }
 0xa42   : > { %7778 = vrcp.f32 %v3449_v11  ;;  %v3291_v11 = vmul.f32 %v8801_v62, %v9821_v46  ;;  %v7299_v62 = vpack.c.bf16 %v4377_v13, %v4376_v35  ;;  %7298 = vmatprep.subr.bf16.mxu0 %v11172_v39 }
 0xa44   : > { %v7775_v5 = vpop.eup %7774 }
 0xa45   : > { %v3469_v42 = vmul.f32 %v7775_v5, %v10145_v47  ;;  %v3452_v37 = vpop.xlane.xlu0 %3451  ;;  %v4378_v5 = vld [vmem:[%s8576_s15 + $0x70] sm:$0xff]  ;;  %7300 = vmatpush3.bf16.msra.mxu0 %v7299_v62 }
 0xa46   : > { %7780 = vrcp.f32 %v3452_v37  ;;  %7301 = vmatprep.subr.bf16.mxu0 %v11172_v39 }
 0xa47   : > { %6681 = vmatmul.mubr.msk.f32.vlgmr.msra.gmra.mrb[98].mxu1 %vm3210_vm15, %v3469_v42  ;;  %v4379_v42 = vld [vmem:[%s8576_s15 + $0x78] sm:$0xff] }
 0xa48   : > { %v7777_v16 = vpop.eup %7776  ;;  %7267 = vmatpush3.bf16.msra.mxu1 %v11197_v36  ;;  %6683 = vmatprep.mubr.msk.f32.mxu1 %vm8166_vm1, %v11174_v2  ;;  %v7302_v45 = vpack.c.bf16 %v4379_v42, %v4378_v5 }
 0xa49   : > { %v3455_v47 = vpop.xlane.xlu0 %3454  ;;  %6705 = vmatprep.subr.mxu1 %v11174_v2  ;;  %v3470_v51 = vmul.f32 %v7777_v16, %v10150_v23 }
 0xa4a   : > { %7782 = vrcp.f32 %v3455_v47  ;;  %7303 = vmatpush3.bf16.msra.mxu0 %v7302_v45 }
 0xa4b   : > { %6684 = vmatmul.mubr.msk.f32.gmra.mrb[100].mxu1 %vm3210_vm15, %v3470_v51  ;;  %7304 = vmatprep.subr.bf16.mxu0 %v11172_v39 }
 0xa4c   : > { %v7779_v55 = vpop.eup %7778  ;;  %6706 = vmatpush3.msk.msra.mxu1 %vm3500_vm14, %v3291_v11  ;;  %6686 = vmatprep.mubr.msk.f32.mxu1 %vm8166_vm1, %v11174_v2 }
 0xa4d   : > { %v3458_v23 = vpop.xlane.xlu0 %3457  ;;  %v3471_v44 = vmul.f32 %v7779_v55, %v10155_v26  ;;  %7271 = vmatprep.subr.bf16.mxu1 %v11172_v39 }
 0xa4e   : > { %7784 = vrcp.f32 %v3458_v23 }
 0xa4f   : > { %6687 = vmatmul.mubr.msk.f32.gmra.mrb[102].mxu1 %vm3210_vm15, %v3471_v44  ;;  %v11198_v44 = vpack.c.bf16 %v9802_v28, %v9790_v34 }
 0xa50   : > { %v7781_v37 = vpop.eup %7780  ;;  %6689 = vmatprep.mubr.msk.f32.mxu1 %vm8166_vm1, %v11174_v2 }
 0xa51   : > { %v3472_v10 = vmul.f32 %v7781_v37, %v10160_v43  ;;  %v3256_v26 = vpop.xlane.xlu1 %3255 }
 0xa53   : > { %6690 = vmatmul.mubr.msk.f32.gmra.mrb[104].mxu1 %vm3210_vm15, %v3472_v10  ;;  %v3461_v17 = vpop.xlane.xlu0 %3460 }
 0xa54   : > { %v7783_v16 = vpop.eup %7782  ;;  %7786 = vrcp.f32 %v3461_v17  ;;  %6692 = vmatprep.mubr.msk.f32.mxu1 %vm8166_vm1, %v11174_v2 }
 0xa55   : > { %v3473_v36 = vmul.f32 %v7783_v16, %v10166_v8  ;;  %7788 = vrcp.f32 %v3256_v26  ;;  %v3262_v15 = vpop.xlane.xlu1 %3261 }
 0xa57   : > { %6693 = vmatmul.mubr.msk.f32.gmra.mrb[106].mxu1 %vm3210_vm15, %v3473_v36  ;;  %v3259_v43 = vpop.xlane.xlu0 %3258 }
 0xa58   : > { %v7785_v47 = vpop.eup %7784  ;;  %6695 = vmatprep.mubr.msk.f32.mxu1 %vm8166_vm1, %v11174_v2  ;;  %7790 = vrcp.f32 %v3259_v43 }
 0xa59   : > { %v3474_v51 = vmul.f32 %v7785_v47, %v10172_v24  ;;  %7792 = vrcp.f32 %v3262_v15  ;;  %v3268_v55 = vpop.xlane.xlu1 %3267 }
 0xa5b   : > { %6696 = vmatmul.mubr.msk.f32.gmra.mrb[108].mxu1 %vm3210_vm15, %v3474_v51  ;;  %v3265_v11 = vpop.xlane.xlu0 %3264  ;;  %v11199_v51 = vpack.c.bf16 %v9805_v40, %v9793_v12 }
 0xa5c   : > { %6698 = vmatprep.mubr.msk.f32.mxu1 %vm8166_vm1, %v11174_v2  ;;  %7794 = vrcp.f32 %v3265_v11 }
 0xa5d   : > { %7796 = vrcp.f32 %v3268_v55  ;;  %v3274_v34 = vpop.xlane.xlu1 %3273 }
 0xa5e   : > { %v7787_v8 = vpop.eup %7786 }
 0xa5f   : > { %v3475_v35 = vmul.f32 %v7787_v8, %v10183_v54  ;;  %v7789_v13 = vpop.eup %7788  ;;  %v3271_v54 = vpop.xlane.xlu0 %3270 }
 0xa60   : > { %v3282_v24 = vmul.f32 %v7789_v13, %v10178_v60  ;;  %v3914_v60 = vmul.f32 %v8883_v25, %v9821_v46  ;;  %7798 = vrcp.f32 %v3271_v54 }
 0xa61   : > { %6699 = vmatmul.mubr.msk.f32.gmra.mrb[110].mxu1 %vm3210_vm15, %v3475_v35  ;;  %7800 = vrcp.f32 %v3274_v34 }
 0xa62   : > { %6707 = vmatprep.mubr.msk.f32.mxu1 %vm8166_vm1, %v11174_v2  ;;  %v7791_v23 = vpop.eup %7790 }
 0xa63   : > { %v3283_v62 = vmul.f32 %v7791_v23, %v10193_v6  ;;  %v7793_v5 = vpop.eup %7792  ;;  %v3879_v25 = vpop.xlane.xlu0 %3878 }
 0xa64   : > { %v3284_v28 = vmul.f32 %v7793_v5, %v10188_v27  ;;  %7802 = vrcp.f32 %v3879_v25  ;;  %v3882_v27 = vpop.xlane.xlu1 %3881 }
 0xa65   : > { %6708 = vmatmul.mubr.msk.f32.vlgmr.msra.gmra.mrb[98].mxu1 %vm3210_vm15, %v3282_v24  ;;  %7804 = vrcp.f32 %v3882_v27 }
 0xa66   : > { %7273 = vmatpush3.bf16.msra.mxu1 %v11198_v44  ;;  %6710 = vmatprep.mubr.msk.f32.mxu1 %vm8166_vm1, %v11174_v2  ;;  %v7795_v42 = vpop.eup %7794 }
 0xa67   : > { %6759 = vmatprep.subr.mxu1 %v11174_v2  ;;  %v3285_v6 = vmul.f32 %v7795_v42, %v10203_v49  ;;  %v7797_v37 = vpop.eup %7796  ;;  %v3885_v26 = vpop.xlane.xlu0 %3884 }
 0xa68   : > { %v3286_v10 = vmul.f32 %v7797_v37, %v10198_v14  ;;  %7806 = vrcp.f32 %v3885_v26  ;;  %v3888_v16 = vpop.xlane.xlu1 %3887 }
 0xa69   : > { %6711 = vmatmul.mubr.msk.f32.gmra.mrb[100].mxu1 %vm3210_vm15, %v3283_v62  ;;  %7808 = vrcp.f32 %v3888_v16 }
 0xa6a   : > { %6760 = vmatpush3.msk.msra.mxu1 %vm3500_vm14, %v3914_v60  ;;  %6713 = vmatprep.mubr.msk.f32.mxu1 %vm8166_vm1, %v11174_v2  ;;  %v7799_v45 = vpop.eup %7798 }
 0xa6b   : > { %7277 = vmatprep.subr.bf16.mxu1 %v11172_v39  ;;  %v3287_v49 = vmul.f32 %v7799_v45, %v10213_v20  ;;  %v7801_v17 = vpop.eup %7800  ;;  %v3891_v20 = vpop.xlane.xlu0 %3890 }
 0xa6c   : > { %v3288_v14 = vmul.f32 %v7801_v17, %v10207_v63  ;;  %7810 = vrcp.f32 %v3891_v20  ;;  %v3894_v63 = vpop.xlane.xlu1 %3893 }
 0xa6d   : > { %6714 = vmatmul.mubr.msk.f32.gmra.mrb[102].mxu1 %vm3210_vm15, %v3284_v28  ;;  %7812 = vrcp.f32 %v3894_v63 }
 0xa6e   : > { %6716 = vmatprep.mubr.msk.f32.mxu1 %vm8166_vm1, %v11174_v2  ;;  %v7803_v36 = vpop.eup %7802 }
 0xa6f   : > { %v3905_v43 = vmul.f32 %v7803_v36, %v10222_v52  ;;  %v7805_v47 = vpop.eup %7804  ;;  %v4232_v52 = vmul.f32 %v8933_v38, %v9821_v46  ;;  %v3897_v12 = vpop.xlane.xlu0 %3896 }
 0xa70   : > { %v3906_v15 = vmul.f32 %v7805_v47, %v10217_v0  ;;  %7814 = vrcp.f32 %v3897_v12  ;;  %v5801_v47 = vld [vmem:[%s981_s16] ss:$0 sm:$0xff]  ;;  %s11207_s16 = sld [smem:[#allocation21_spill]] }
 0xa71   : > { %6717 = vmatmul.mubr.msk.f32.gmra.mrb[104].mxu1 %vm3210_vm15, %v3285_v6 }
 0xa72   : > { %6719 = vmatprep.mubr.msk.f32.mxu1 %vm8166_vm1, %v11174_v2  ;;  %v7807_v8 = vpop.eup %7806 }
 0xa73   : > { %v3907_v40 = vmul.f32 %v7807_v8, %v10232_v19  ;;  %v7809_v11 = vpop.eup %7808  ;;  %v4197_v38 = vpop.xlane.xlu1 %4196 }
 0xa74   : > { %v3908_v46 = vmul.f32 %v7809_v11, %v10227_v32  ;;  %7816 = vrcp.f32 %v4197_v38 }
 0xa75   : > { %6720 = vmatmul.mubr.msk.f32.gmra.mrb[106].mxu1 %vm3210_vm15, %v3286_v10 }
 0xa76   : > { %6722 = vmatprep.mubr.msk.f32.mxu1 %vm8166_vm1, %v11174_v2  ;;  %v7811_v0 = vpop.eup %7810 }
 0xa77   : > { %v4200_v19 = vpop.xlane.xlu0 %4199  ;;  %v3909_v35 = vmul.f32 %v7811_v0, %v10238_v30  ;;  %v7813_v13 = vpop.eup %7812 }
 0xa78   : > { %7818 = vrcp.f32 %v4200_v19  ;;  %v3910_v32 = vmul.f32 %v7813_v13, %v10240_v33 }
 0xa79   : > { %6723 = vmatmul.mubr.msk.f32.gmra.mrb[108].mxu1 %vm3210_vm15, %v3287_v49 }
 0xa7a   : > { %6725 = vmatprep.mubr.msk.f32.mxu1 %vm8166_vm1, %v11174_v2  ;;  %v7815_v55 = vpop.eup %7814 }
 0xa7b   : > { %v4203_v24 = vpop.xlane.xlu1 %4202  ;;  %v3911_v30 = vmul.f32 %v7815_v55, %v10248_v61 }
 0xa7c   : > { %7820 = vrcp.f32 %v4203_v24 }
 0xa7d   : > { %6726 = vmatmul.mubr.msk.f32.gmra.mrb[110].mxu1 %vm3210_vm15, %v3288_v14 }
 0xa7e   : > { %6761 = vmatprep.mubr.msk.f32.mxu1 %vm8166_vm1, %v11174_v2  ;;  %v7817_v44 = vpop.eup %7816 }
 0xa7f   : > { %v4206_v23 = vpop.xlane.xlu0 %4205  ;;  %v4223_v54 = vmul.f32 %v7817_v44, %v10254_v22 }
 0xa80   : > { %7822 = vrcp.f32 %v4206_v23  ;;  %v5814_v23 = vmul.f32 -1.442695, %v9769_v48 }
 0xa81   : > { %6762 = vmatmul.mubr.msk.f32.vlgmr.msra.gmra.mrb[98].mxu1 %vm3210_vm15, %v3905_v43 }
 0xa82   : > { %7279 = vmatpush3.bf16.msra.mxu1 %v11199_v51  ;;  %6764 = vmatprep.mubr.msk.f32.mxu1 %vm8166_vm1, %v11174_v2  ;;  %v7819_v62 = vpop.eup %7818 }
 0xa83   : > { %6813 = vmatprep.subr.mxu1 %v11174_v2  ;;  %v4209_v33 = vpop.xlane.xlu1 %4208  ;;  %v4224_v61 = vmul.f32 %v7819_v62, %v10260_v1 }
 0xa84   : > { %7824 = vrcp.f32 %v4209_v33 }
 0xa85   : > { %6765 = vmatmul.mubr.msk.f32.gmra.mrb[100].mxu1 %vm3210_vm15, %v3906_v15 }
 0xa86   : > { %6814 = vmatpush3.msk.msra.mxu1 %vm3500_vm14, %v4232_v52  ;;  %6767 = vmatprep.mubr.msk.f32.mxu1 %vm8166_vm1, %v11174_v2  ;;  %v7821_v60 = vpop.eup %7820 }
 0xa87   : > { %7376 = vmatprep.subr.bf16.mxu1 %v11172_v39  ;;  %v4212_v5 = vpop.xlane.xlu0 %4211  ;;  %v4225_v22 = vmul.f32 %v7821_v60, %v10265_v4 }
 0xa88   : > { %7826 = vrcp.f32 %v4212_v5 }
 0xa89   : > { %6768 = vmatmul.mubr.msk.f32.gmra.mrb[102].mxu1 %vm3210_vm15, %v3907_v40 }
 0xa8a   : > { %6770 = vmatprep.mubr.msk.f32.mxu1 %vm8166_vm1, %v11174_v2  ;;  %v7823_v28 = vpop.eup %7822 }
 0xa8b   : > { %v4215_v34 = vpop.xlane.xlu1 %4214  ;;  %v4226_v42 = vmul.f32 %v7823_v28, %v10270_v58 }
 0xa8c   : > { %7828 = vrcp.f32 %v4215_v34 }
 0xa8d   : > { %6771 = vmatmul.mubr.msk.f32.gmra.mrb[104].mxu1 %vm3210_vm15, %v3908_v46 }
 0xa8e   : > { %6773 = vmatprep.mubr.msk.f32.mxu1 %vm8166_vm1, %v11174_v2  ;;  %v7825_v1 = vpop.eup %7824 }
 0xa8f   : > { %v4227_v25 = vmul.f32 %v7825_v1, %v10274_v53 }
 0xa91   : > { %6774 = vmatmul.mubr.msk.f32.gmra.mrb[106].mxu1 %vm3210_vm15, %v3909_v35 }
 0xa92   : > { %6776 = vmatprep.mubr.msk.f32.mxu1 %vm8166_vm1, %v11174_v2  ;;  %v7827_v6 = vpop.eup %7826 }
 0xa93   : > { %v4228_v4 = vmul.f32 %v7827_v6, %v10278_v18 }
 0xa95   : > { %6777 = vmatmul.mubr.msk.f32.gmra.mrb[108].mxu1 %vm3210_vm15, %v3910_v32 }
 0xa96   : > { %6779 = vmatprep.mubr.msk.f32.mxu1 %vm8166_vm1, %v11174_v2  ;;  %v7829_v37 = vpop.eup %7828 }
 0xa97   : > { %v4229_v58 = vmul.f32 %v7829_v37, %v10283_v41 }
 0xa99   : > { %6780 = vmatmul.mubr.msk.f32.gmra.mrb[110].mxu1 %vm3210_vm15, %v3911_v30 }
 0xa9a   : > { %6815 = vmatprep.mubr.msk.f32.mxu1 %vm8166_vm1, %v11174_v2 }
 0xa9d   : > { %6816 = vmatmul.mubr.msk.f32.vlgmr.msra.gmra.mrb[98].mxu1 %vm3210_vm15, %v4223_v54  ;;  %v5815_v54 = vmul.f32 -1.442695, %v9777_v56 }
 0xa9e   : > { %6818 = vmatprep.mubr.msk.f32.mxu1 %vm8166_vm1, %v11174_v2 }
 0xaa1   : > { %6819 = vmatmul.mubr.msk.f32.gmra.mrb[100].mxu1 %vm3210_vm15, %v4224_v61 }
 0xaa2   : > { %6821 = vmatprep.mubr.msk.f32.mxu1 %vm8166_vm1, %v11174_v2 }
 0xaa5   : > { %6822 = vmatmul.mubr.msk.f32.gmra.mrb[102].mxu1 %vm3210_vm15, %v4225_v22 }
 0xaa6   : > { %6824 = vmatprep.mubr.msk.f32.mxu1 %vm8166_vm1, %v11174_v2 }
 0xaa9   : > { %6825 = vmatmul.mubr.msk.f32.gmra.mrb[104].mxu1 %vm3210_vm15, %v4226_v42 }
 0xaaa   : > { %6827 = vmatprep.mubr.msk.f32.mxu1 %vm8166_vm1, %v11174_v2 }
 0xaad   : > { %6828 = vmatmul.mubr.msk.f32.gmra.mrb[106].mxu1 %vm3210_vm15, %v4227_v25 }
 0xaae   : > { %6830 = vmatprep.mubr.msk.f32.mxu1 %vm8166_vm1, %v11174_v2 }
 0xab1   : > { %6831 = vmatmul.mubr.msk.f32.gmra.mrb[108].mxu1 %vm3210_vm15, %v4228_v4 }
 0xab2   : > { %6833 = vmatprep.mubr.msk.f32.mxu1 %vm8166_vm1, %v11174_v2 }
 0xab5   : > { %6834 = vmatmul.mubr.msk.f32.gmra.mrb[110].mxu1 %vm3210_vm15, %v4229_v58 }
 0xab6   : > { %6977 = vmatprep.mubr.msk.f32.mxu1 %vm8166_vm1, %v11174_v2 }
 0xb70   : > { %v4323_v53 = vpop.f32.mrb[98].mxu1 }
 0xb71   : > { %v6817_v27 = vpop.f32.mrb[99].mxu1  ;;  %6869 = vmatmul.mubr.f32.vlgmr.msra.gmra.mrb[90].mxu0 %v4323_v53 }
 0xb72   : > { %6871 = vmatprep.mubr.msk.f32.mxu0 %vm8166_vm1, %v11174_v2 }
 0xb74   : > { %v4328_v18 = vpop.f32.mrb[100].mxu1 }
 0xb75   : > { %v6820_v10 = vpop.f32.mrb[101].mxu1  ;;  %6872 = vmatmul.mubr.f32.gmra.mrb[92].mxu0 %v4328_v18 }
 0xb76   : > { %6874 = vmatprep.mubr.msk.f32.mxu0 %vm8166_vm1, %v11174_v2 }
 0xb78   : > { %v4333_v45 = vpop.f32.mrb[102].mxu1 }
 0xb79   : > { %v6823_v26 = vpop.f32.mrb[103].mxu1  ;;  %6875 = vmatmul.mubr.f32.gmra.mrb[94].mxu0 %v4333_v45 }
 0xb7a   : > { %6877 = vmatprep.mubr.msk.f32.mxu0 %vm8166_vm1, %v11174_v2 }
 0xb7c   : > { %v4338_v41 = vpop.f32.mrb[104].mxu1 }
 0xb7d   : > { %v6826_v49 = vpop.f32.mrb[105].mxu1  ;;  %6878 = vmatmul.mubr.f32.gmra.mrb[96].mxu0 %v4338_v41 }
 0xb7e   : > { %6880 = vmatprep.mubr.msk.f32.mxu0 %vm8166_vm1, %v11174_v2 }
 0xb80   : > { %v4343_v17 = vpop.f32.mrb[106].mxu1 }
 0xb81   : > { %v6829_v16 = vpop.f32.mrb[107].mxu1  ;;  %6881 = vmatmul.mubr.f32.gmra.mrb[98].mxu0 %v4343_v17 }
 0xb82   : > { %6883 = vmatprep.mubr.msk.f32.mxu0 %vm8166_vm1, %v11174_v2 }
 0xb84   : > { %v4348_v14 = vpop.f32.mrb[108].mxu1 }
 0xb85   : > { %v6832_v36 = vpop.f32.mrb[109].mxu1  ;;  %6884 = vmatmul.mubr.f32.gmra.mrb[100].mxu0 %v4348_v14 }
 0xb86   : > { %6886 = vmatprep.mubr.msk.f32.mxu0 %vm8166_vm1, %v11174_v2 }
 0xb88   : > { %v4353_v43 = vpop.f32.mrb[110].mxu1 }
 0xb89   : > { %v6835_v20 = vpop.f32.mrb[111].mxu1  ;;  %6887 = vmatmul.mubr.f32.gmra.mrb[102].mxu0 %v4353_v43 }
 0xb8a   : > { %6921 = vmatprep.mubr.msk.f32.mxu0 %vm8166_vm1, %v11174_v2 }
 0xc44   : > { %v4453_v51 = vpop.f32.mrb[90].mxu0 }
 0xc45   : > { %v4454_v63 = vadd.f32 %v5801_v47, %v4453_v51  ;;  %v6870_v15 = vpop.f32.mrb[91].mxu0 }
 0xc47   : > { %v5802_v8 = vmul.f32 -1.442695, %v4454_v63 }
 0xc48   : > { %v4458_v52 = vpop.f32.mrb[92].mxu0 }
 0xc49   : > { %7830 = vpow2.f32 %v5802_v8  ;;  %v4459_v12 = vadd.f32 %v5801_v47, %v4458_v52  ;;  %v6873_v40 = vpop.f32.mrb[93].mxu0 }
 0xc4b   : > { %v5803_v11 = vmul.f32 -1.442695, %v4459_v12 }
 0xc4c   : > { %v4463_v38 = vpop.f32.mrb[94].mxu0 }
 0xc4d   : > { %7832 = vpow2.f32 %v5803_v11  ;;  %v10495_v46 = vadd.f32 %v5801_v47, %v4463_v38  ;;  %v6876_v0 = vpop.f32.mrb[95].mxu0 }
 0xc4f   : > { %v5804_v19 = vmul.f32 -1.442695, %v10495_v46 }
 0xc50   : > { %v4468_v35 = vpop.f32.mrb[96].mxu0 }
 0xc51   : > { %7834 = vpow2.f32 %v5804_v19  ;;  %v10498_v13 = vadd.f32 %v5801_v47, %v4468_v35  ;;  %v6879_v24 = vpop.f32.mrb[97].mxu0  ;;  %v4714_v35 = vpop.xlane.xlu1 %4713 }
 0xc53   : > { %v7831_v32 = vpop.eup %7830  ;;  %v5805_v55 = vmul.f32 -1.442695, %v10498_v13 }
 0xc54   : > { %v4508_v30 = vadd.f32 1.0, %v7831_v32  ;;  %v4473_v44 = vpop.f32.mrb[98].mxu0 }
 0xc55   : > { %7836 = vpow2.f32 %v5805_v55  ;;  %v10503_v33 = vadd.f32 %v5801_v47, %v4473_v44  ;;  %v6882_v62 = vpop.f32.mrb[99].mxu0 }
 0xc56   : > { %7838 = vrcp.f32 %v4508_v30  ;;  %v4716_v62 = vpop.xlane.xlu1 %4715 }
 0xc57   : > { %v7833_v5 = vpop.eup %7832  ;;  %v5806_v61 = vmul.f32 -1.442695, %v10503_v33  ;;  %7840 = vpow2.f32 %v5814_v23 }
 0xc58   : > { %v4509_v60 = vadd.f32 1.0, %v7833_v5  ;;  %v4478_v34 = vpop.f32.mrb[100].mxu0  ;;  %7842 = vpow2.f32 %v5815_v54 }
 0xc59   : > { %7844 = vpow2.f32 %v5806_v61  ;;  %v10506_v22 = vadd.f32 %v5801_v47, %v4478_v34  ;;  %v6885_v28 = vpop.f32.mrb[101].mxu0 }
 0xc5a   : > { %7846 = vrcp.f32 %v4509_v60 }
 0xc5b   : > { %v7835_v42 = vpop.eup %7834  ;;  %v5807_v1 = vmul.f32 -1.442695, %v10506_v22 }
 0xc5c   : > { %v4510_v25 = vadd.f32 1.0, %v7835_v42  ;;  %v4483_v6 = vpop.f32.mrb[102].mxu0 }
 0xc5d   : > { %7848 = vpow2.f32 %v5807_v1  ;;  %v10509_v4 = vadd.f32 %v5801_v47, %v4483_v6  ;;  %v6888_v37 = vpop.f32.mrb[103].mxu0  ;;  %v4718_v6 = vpop.xlane.xlu1 %4717 }
 0xc5e   : > { %7850 = vrcp.f32 %v4510_v25  ;;  %v4728_v25 = vmul.f32 0.03125, %v4714_v35 }
 0xc5f   : > { %v7837_v58 = vpop.eup %7836  ;;  %v5808_v53 = vmul.f32 -1.442695, %v10509_v4 }
 0xc60   : > { %v7839_v27 = vpop.eup %7838  ;;  %v4511_v18 = vadd.f32 1.0, %v7837_v58 }
 0xc61   : > { %v7841_v10 = vpop.eup %7840  ;;  %v4529_v45 = vmul.f32 %v7839_v27, %v4454_v63  ;;  %7852 = vpow2.f32 %v5808_v53  ;;  %v4735_v27 = vsub.f32 %v10290_v50, %v4728_v25 }
 0xc62   : > { %v7843_v26 = vpop.eup %7842  ;;  %7854 = vrcp.f32 %v4511_v18  ;;  %v4676_v14 = vadd.f32 1.0, %v7841_v10  ;;  %v4729_v18 = vmul.f32 0.03125, %v4716_v62 }
 0xc63   : > { %v7845_v41 = vpop.eup %7844  ;;  %v4536_v49 = vadd.f32 %v4529_v45, %v4454_v63  ;;  %v4677_v20 = vadd.f32 1.0, %v7843_v26  ;;  %v10564_v26 = vmul.f32 %v11184_v21, %v4735_v27 }
 0xc64   : > { %v7847_v17 = vpop.eup %7846  ;;  %v4512_v16 = vadd.f32 1.0, %v7845_v41  ;;  %v4736_v41 = vsub.f32 %v10296_v31, %v4729_v18 }
 0xc65   : > { %v4530_v36 = vmul.f32 %v7847_v17, %v4459_v12  ;;  %v10513_v43 = vmul.f32 %v11184_v21, %v4536_v49  ;;  %v4730_v49 = vmul.f32 0.03125, %v4718_v6 }
 0xc66   : > { %7856 = vrcp.f32 %v4512_v16  ;;  %v10570_v17 = vmul.f32 %v11184_v21, %v4736_v41 }
 0xc67   : > { %v7849_v47 = vpop.eup %7848  ;;  %4550 = vadd.xlane.f32.xlu0 %v10513_v43  ;;  %v4537_v51 = vadd.f32 %v4530_v36, %v4459_v12  ;;  %7858 = vrcp.f32 %v4676_v14  ;;  %v4737_v16 = vsub.f32 %v10302_v59, %v4730_v49  ;;  %v4749_v36 = vmul.f32 %v10564_v26, %v10564_v26 }
 0xc68   : > { %v7851_v15 = vpop.eup %7850  ;;  %v4513_v8 = vadd.f32 1.0, %v7849_v47  ;;  %7860 = vrcp.f32 %v4677_v20 }
 0xc69   : > { %v4531_v52 = vmul.f32 %v7851_v15, %v10495_v46  ;;  %v10518_v63 = vmul.f32 %v11184_v21, %v4537_v51  ;;  %v10576_v47 = vmul.f32 %v11184_v21, %v4737_v16  ;;  %v4750_v15 = vmul.f32 %v10570_v17, %v10570_v17 }
 0xc6a   : > { %7862 = vrcp.f32 %v4513_v8 }
 0xc6b   : > { %v7853_v40 = vpop.eup %7852  ;;  %4552 = vadd.xlane.f32.xlu0 %v10518_v63  ;;  %v4538_v11 = vadd.f32 %v4531_v52, %v10495_v46  ;;  %v4751_v52 = vmul.f32 %v10576_v47, %v10576_v47 }
 0xc6c   : > { %v7855_v38 = vpop.eup %7854  ;;  %v4514_v0 = vadd.f32 1.0, %v7853_v40 }
 0xc6d   : > { %v4532_v19 = vmul.f32 %v7855_v38, %v10498_v13  ;;  %v10524_v12 = vmul.f32 %v11184_v21, %v4538_v11 }
 0xc6e   : > { %7864 = vrcp.f32 %v4514_v0 }
 0xc6f   : > { %4554 = vadd.xlane.f32.xlu0 %v10524_v12  ;;  %v4539_v24 = vadd.f32 %v4532_v19, %v10498_v13 }
 0xc70   : > { %v7857_v32 = vpop.eup %7856 }
 0xc71   : > { %v4533_v55 = vmul.f32 %v7857_v32, %v10503_v33  ;;  %v10530_v23 = vmul.f32 %v11184_v21, %v4539_v24  ;;  %v7859_v46 = vpop.eup %7858 }
 0xc72   : > { %v7861_v30 = vpop.eup %7860  ;;  %v4697_v13 = vmul.f32 %v7859_v46, %v9769_v48 }
 0xc73   : > { %4556 = vadd.xlane.f32.xlu0 %v10530_v23  ;;  %v4540_v44 = vadd.f32 %v4533_v55, %v10503_v33  ;;  %v4698_v34 = vmul.f32 %v7861_v30, %v9777_v56 }
 0xc74   : > { %v7863_v54 = vpop.eup %7862  ;;  %v4704_v1 = vadd.f32 %v4697_v13, %v9769_v48 }
 0xc75   : > { %v4534_v5 = vmul.f32 %v7863_v54, %v10506_v22  ;;  %v10536_v61 = vmul.f32 %v11184_v21, %v4540_v44  ;;  %v4705_v58 = vadd.f32 %v4698_v34, %v9777_v56 }
 0xc77   : > { %4558 = vadd.xlane.f32.xlu0 %v10536_v61  ;;  %v4541_v60 = vadd.f32 %v4534_v5, %v10506_v22  ;;  %v10551_v22 = vmul.f32 %v11184_v21, %v4704_v1  ;;  %v10561_v45 = vmul.f32 %v11184_v21, %v4705_v58 }
 0xc78   : > { %v7865_v28 = vpop.eup %7864 }
 0xc79   : > { %v4535_v42 = vmul.f32 %v7865_v28, %v10509_v4  ;;  %v10544_v33 = vmul.f32 %v11184_v21, %v4541_v60  ;;  %v4725_v50 = vsel %vm1720_vm11, %v10561_v45, 0.0 }
 0xc7b   : > { %4560 = vadd.xlane.f32.xlu0 %v10544_v33  ;;  %v4542_v37 = vadd.f32 %v4535_v42, %v10509_v4  ;;  %v4720_v4 = vpop.xlane.xlu1 %4719 }
 0xc7c   : > { %v4731_v14 = vmul.f32 0.03125, %v4720_v4 }
 0xc7d   : > { %v10554_v53 = vmul.f32 %v11184_v21, %v4542_v37 }
 0xc7e   : > { %v4738_v31 = vsub.f32 %v10308_v3, %v4731_v14 }
 0xc7f   : > { %4723 = vadd.xlane.f32.xlu0 %v10551_v22  ;;  %v4562_v10 = vsel %vm1720_vm11, %v10554_v53, 0.0  ;;  %v4722_v20 = vpop.xlane.xlu1 %4721 }
 0xc80   : > { %4563 = vadd.xlane.f32.xlu1 %v4562_v10  ;;  %v4732_v51 = vmul.f32 0.03125, %v4722_v20  ;;  %v10582_v8 = vmul.f32 %v11184_v21, %v4738_v31 }
 0xc82   : > { %v4739_v59 = vsub.f32 %v10313_v7, %v4732_v51  ;;  %v4752_v3 = vmul.f32 %v10582_v8, %v10582_v8 }
 0xc84   : > { %4726 = vadd.xlane.f32.xlu1 %v4725_v50  ;;  %v10588_v40 = vmul.f32 %v11184_v21, %v4739_v59 }
 0xc86   : > { %v4753_v11 = vmul.f32 %v10588_v40, %v10588_v40 }
 0xc88   : > { %4756 = vadd.xlane.f32.xlu1 %v4749_v36 }
 0xc8c   : > { %4758 = vadd.xlane.f32.xlu1 %v4750_v15 }
 0xc90   : > { %4760 = vadd.xlane.f32.xlu1 %v4751_v52 }
 0xc94   : > { %4762 = vadd.xlane.f32.xlu1 %v4752_v3 }
 0xc98   : > { %4764 = vadd.xlane.f32.xlu1 %v4753_v11 }
 0xcf4   : > { %v4551_v38 = vpop.xlane.xlu0 %4550 }
 0xcf5   : > { %v4565_v0 = vmul.f32 0.03125, %v4551_v38 }
 0xcf7   : > { %v4572_v19 = vsub.f32 %v10513_v43, %v4565_v0 }
 0xcf8   : > { %v4553_v7 = vpop.xlane.xlu0 %4552 }
 0xcf9   : > { %v10596_v35 = vmul.f32 %v11184_v21, %v4572_v19  ;;  %v4566_v24 = vmul.f32 0.03125, %v4553_v7 }
 0xcfb   : > { %v4573_v32 = vsub.f32 %v10518_v63, %v4566_v24  ;;  %v4586_v55 = vmul.f32 %v10596_v35, %v10596_v35 }
 0xcfc   : > { %v4555_v46 = vpop.xlane.xlu0 %4554 }
 0xcfd   : > { %v10602_v30 = vmul.f32 %v11184_v21, %v4573_v32  ;;  %v4567_v44 = vmul.f32 0.03125, %v4555_v46  ;;  %4593 = vadd.xlane.f32.xlu0 %v4586_v55 }
 0xcff   : > { %v4574_v54 = vsub.f32 %v10524_v12, %v4567_v44  ;;  %v4587_v43 = vmul.f32 %v10602_v30, %v10602_v30 }
 0xd00   : > { %v4557_v62 = vpop.xlane.xlu0 %4556 }
 0xd01   : > { %v10608_v5 = vmul.f32 %v11184_v21, %v4574_v54  ;;  %v4568_v13 = vmul.f32 0.03125, %v4557_v62  ;;  %4595 = vadd.xlane.f32.xlu0 %v4587_v43 }
 0xd03   : > { %v4575_v63 = vsub.f32 %v10530_v23, %v4568_v13  ;;  %v4588_v60 = vmul.f32 %v10608_v5, %v10608_v5 }
 0xd04   : > { %v4559_v34 = vpop.xlane.xlu0 %4558 }
 0xd05   : > { %v10614_v28 = vmul.f32 %v11184_v21, %v4575_v63  ;;  %v4569_v42 = vmul.f32 0.03125, %v4559_v34  ;;  %4597 = vadd.xlane.f32.xlu0 %v4588_v60 }
 0xd07   : > { %v4576_v12 = vsub.f32 %v10536_v61, %v4569_v42  ;;  %v4589_v1 = vmul.f32 %v10614_v28, %v10614_v28 }
 0xd08   : > { %v4561_v25 = vpop.xlane.xlu0 %4560 }
 0xd09   : > { %v10620_v6 = vmul.f32 %v11184_v21, %v4576_v12  ;;  %v4570_v37 = vmul.f32 0.03125, %v4561_v25  ;;  %4599 = vadd.xlane.f32.xlu0 %v4589_v1 }
 0xd0b   : > { %v4577_v23 = vsub.f32 %v10544_v33, %v4570_v37  ;;  %v4590_v58 = vmul.f32 %v10620_v6, %v10620_v6 }
 0xd0c   : > { %v4724_v27 = vpop.xlane.xlu0 %4723 }
 0xd0d   : > { %v10626_v18 = vmul.f32 %v11184_v21, %v4577_v23  ;;  %v4733_v10 = vmul.f32 0.03125, %v4724_v27  ;;  %4601 = vadd.xlane.f32.xlu0 %v4590_v58  ;;  %v4564_v61 = vpop.xlane.xlu1 %4563 }
 0xd0e   : > { %v4571_v4 = vmul.f32 0.03125, %v4564_v61 }
 0xd0f   : > { %v4740_v41 = vsub.f32 %v10551_v22, %v4733_v10  ;;  %v4591_v49 = vmul.f32 %v10626_v18, %v10626_v18  ;;  %v11201_v10 = vld [vmem:[#allocation24_spill] sm:$0xff] }
 0xd10   : > { %v4578_v50 = vsub.f32 %v10554_v53, %v4571_v4  ;;  %v4812_v61 = vsub.s32 3, %v11201_v10  ;;  %v10652_v4 = vld [vmem:[%s8651_s10] sm:$0x3f]  ;;  %s11208_s10 = sld [smem:[#allocation22_spill]] }
 0xd11   : > { %v10633_v33 = vmul.f32 %v11184_v21, %v4740_v41  ;;  %4603 = vadd.xlane.f32.xlu0 %v4591_v49  ;;  %v4727_v16 = vpop.xlane.xlu1 %4726  ;;  %v11202_v41 = vsub.s32 2, %v11201_v10 }
 0xd12   : > { %v10636_v14 = vmul.f32 %v11184_v21, %v4578_v50  ;;  %v4734_v36 = vmul.f32 0.03125, %v4727_v16 }
 0xd13   : > { %v4754_v20 = vmul.f32 %v10633_v33, %v10633_v33  ;;  %v10657_v49 = vrot.slane %v10652_v4, %v11202_v41 }
 0xd14   : > { %v4741_v31 = vsub.f32 %v10561_v45, %v4734_v36  ;;  %v4592_v22 = vmul.f32 %v10636_v14, %v10636_v14 }
 0xd15   : > { %4766 = vadd.xlane.f32.xlu0 %v4754_v20  ;;  %v4757_v52 = vpop.xlane.xlu1 %4756 }
 0xd16   : > { %v10644_v53 = vmul.f32 %v11184_v21, %v4741_v31  ;;  %v4605_v51 = vsel %vm1720_vm11, %v4592_v22, 0.0  ;;  %v4771_v11 = vmul.f32 0.03125, %v4757_v52 }
 0xd17   : > { %4606 = vadd.xlane.f32.xlu1 %v4605_v51 }
 0xd18   : > { %v4755_v15 = vmul.f32 %v10644_v53, %v10644_v53  ;;  %v4778_v0 = vadd.f32 1e-05, %v4771_v11 }
 0xd19   : > { %v4759_v3 = vpop.xlane.xlu1 %4758 }
 0xd1a   : > { %v4768_v59 = vsel %vm1720_vm11, %v4755_v15, 0.0  ;;  %v4772_v38 = vmul.f32 0.03125, %v4759_v3  ;;  %7866 = vrsqrt.f32 %v4778_v0  ;;  %v10662_v15 = vrot.slane %v10652_v4, %v4812_v61 }
 0xd1b   : > { %4769 = vadd.xlane.f32.xlu1 %v4768_v59 }
 0xd1c   : > { %v4779_v7 = vadd.f32 1e-05, %v4772_v38 }
 0xd1d   : > { %v4761_v45 = vpop.xlane.xlu1 %4760 }
 0xd1e   : > { %v4773_v24 = vmul.f32 0.03125, %v4761_v45  ;;  %7868 = vrsqrt.f32 %v4779_v7 }
 0xd20   : > { %v4780_v44 = vadd.f32 1e-05, %v4773_v24 }
 0xd21   : > { %v4763_v19 = vpop.xlane.xlu1 %4762 }
 0xd22   : > { %v4774_v54 = vmul.f32 0.03125, %v4763_v19 }
 0xd24   : > { %v4781_v60 = vadd.f32 1e-05, %v4774_v54  ;;  %v7867_v1 = vpop.eup %7866 }
 0xd25   : > { %v4765_v62 = vpop.xlane.xlu1 %4764  ;;  %v4792_v50 = vmul.f32 %v7867_v1, %v10564_v26 }
 0xd26   : > { %v4775_v34 = vmul.f32 0.03125, %v4765_v62 }
 0xd27   : > { %v4803_v52 = vmul.f32 %v10657_v49, %v4792_v50 }
 0xd28   : > { %v4782_v37 = vadd.f32 1e-05, %v4775_v34  ;;  %v7869_v27 = vpop.eup %7868 }
 0xd29   : > { %v4793_v3 = vmul.f32 %v7869_v27, %v10570_v17  ;;  %v4814_v24 = vadd.f32 %v10662_v15, %v4803_v52 }
 0xd2b   : > { %v4804_v17 = vmul.f32 %v10657_v49, %v4793_v3 }
 0xd8a   : > { %v4594_v32 = vpop.xlane.xlu0 %4593 }
 0xd8b   : > { %v4608_v55 = vmul.f32 0.03125, %v4594_v32 }
 0xd8d   : > { %v4615_v46 = vadd.f32 1e-05, %v4608_v55 }
 0xd8e   : > { %v4596_v43 = vpop.xlane.xlu0 %4595 }
 0xd8f   : > { %7870 = vrsqrt.f32 %v4615_v46  ;;  %v4609_v13 = vmul.f32 0.03125, %v4596_v43 }
 0xd90   : > { %7872 = vrsqrt.f32 %v4780_v44 }
 0xd91   : > { %v4616_v63 = vadd.f32 1e-05, %v4609_v13 }
 0xd92   : > { %v4598_v42 = vpop.xlane.xlu0 %4597 }
 0xd93   : > { %7874 = vrsqrt.f32 %v4616_v63  ;;  %v4610_v12 = vmul.f32 0.03125, %v4598_v42  ;;  %v4815_v42 = vadd.f32 %v10662_v15, %v4804_v17 }
 0xd94   : > { %7876 = vrsqrt.f32 %v4781_v60 }
 0xd95   : > { %v4617_v25 = vadd.f32 1e-05, %v4610_v12  ;;  %v11203_v12 = vld [vmem:[#allocation23_spill] sm:$0xff] }
 0xd96   : > { %v4600_v23 = vpop.xlane.xlu0 %4599 }
 0xd97   : > { %7878 = vrsqrt.f32 %v4617_v25  ;;  %v4611_v58 = vmul.f32 0.03125, %v4600_v23 }
 0xd98   : > { %7880 = vrsqrt.f32 %v4782_v37 }
 0xd99   : > { %v7871_v16 = vpop.eup %7870  ;;  %v4618_v36 = vadd.f32 1e-05, %v4611_v58 }
 0xd9a   : > { %v4602_v20 = vpop.xlane.xlu0 %4601  ;;  %v4629_v31 = vmul.f32 %v7871_v16, %v10596_v35  ;;  %v7873_v51 = vpop.eup %7872 }
 0xd9b   : > { %7882 = vrsqrt.f32 %v4618_v36  ;;  %v4612_v22 = vmul.f32 0.03125, %v4602_v20  ;;  %v4794_v19 = vmul.f32 %v7873_v51, %v10576_v47  ;;  %v11204_v20 = vld [vmem:[#allocation26_spill] sm:$0xff] }
 0xd9c   : > { %v4636_v59 = vmul.f32 %v4629_v31, %v9721_v9 }
 0xd9d   : > { %v7875_v11 = vpop.eup %7874  ;;  %v4619_v26 = vadd.f32 1e-05, %v4612_v22  ;;  %v4805_v47 = vmul.f32 %v10657_v49, %v4794_v19 }
 0xd9e   : > { %v4604_v45 = vpop.xlane.xlu0 %4603  ;;  %v4643_v38 = vadd.f32 %v4636_v59, %v9724_v29  ;;  %v4630_v0 = vmul.f32 %v7875_v11, %v10602_v30  ;;  %v7877_v7 = vpop.eup %7876 }
 0xd9f   : > { %7884 = vrsqrt.f32 %v4619_v26  ;;  %v4613_v35 = vmul.f32 0.03125, %v4604_v45  ;;  %v4795_v63 = vmul.f32 %v7877_v7, %v10582_v8  ;;  %v4816_v41 = vadd.f32 %v10662_v15, %v4805_v47 }
 0xda0   : > { %v4821_v32 = vadd.f32 %v4643_v38, %v9730_v57  ;;  %v4637_v55 = vmul.f32 %v4630_v0, %v9721_v9  ;;  %v11205_v0 = vld [vmem:[#allocation25_spill] sm:$0xff] }
 0xda1   : > { %v7879_v46 = vpop.eup %7878  ;;  %v4620_v44 = vadd.f32 1e-05, %v4613_v35  ;;  %v4806_v50 = vmul.f32 %v10657_v49, %v4795_v63 }
 0xda2   : > { %v4767_v54 = vpop.xlane.xlu0 %4766  ;;  %v4828_v43 = vadd.f32 %v4821_v32, %v4814_v24  ;;  %v4644_v62 = vadd.f32 %v4637_v55, %v9724_v29  ;;  %v4631_v30 = vmul.f32 %v7879_v46, %v10608_v5  ;;  %v7881_v60 = vpop.eup %7880  ;;  %v11206_v46 = vld [vmem:[#allocation28_spill] sm:$0xff] }
 0xda3   : > { %7886 = vrsqrt.f32 %v4620_v44  ;;  %v4776_v13 = vmul.f32 0.03125, %v4767_v54  ;;  %v4796_v51 = vmul.f32 %v7881_v60, %v10588_v40  ;;  %v4817_v45 = vadd.f32 %v10662_v15, %v4806_v50 }
 0xda4   : > { %v4607_v57 = vpop.xlane.xlu1 %4606  ;;  %v10679_v34 = vmul.f32 %v11184_v21, %v4828_v43  ;;  %v4822_v1 = vadd.f32 %v4644_v62, %v11203_v12  ;;  %v4638_v25 = vmul.f32 %v4631_v30, %v9721_v9 }
 0xda5   : > { %v7883_v37 = vpop.eup %7882  ;;  %v4783_v23 = vadd.f32 1e-05, %v4776_v13  ;;  %v4614_v5 = vmul.f32 0.03125, %v4607_v57  ;;  %v4807_v19 = vmul.f32 %v10657_v49, %v4796_v51 }
 0xda6   : > { %4842 = vadd.xlane.f32.xlu0 %v10679_v34  ;;  %v4829_v58 = vadd.f32 %v4822_v1, %v4815_v42  ;;  %v4645_v27 = vadd.f32 %v4638_v25, %v9724_v29  ;;  %v4632_v8 = vmul.f32 %v7883_v37, %v10614_v28 }
 0xda7   : > { %7888 = vrsqrt.f32 %v4783_v23  ;;  %v4621_v61 = vadd.f32 1e-05, %v4614_v5  ;;  %v4818_v17 = vadd.f32 %v10662_v15, %v4807_v19 }
 0xda8   : > { %v4770_v16 = vpop.xlane.xlu1 %4769  ;;  %v10690_v36 = vmul.f32 %v11184_v21, %v4829_v58  ;;  %v4823_v31 = vadd.f32 %v4645_v27, %v11204_v20  ;;  %v4639_v22 = vmul.f32 %v4632_v8, %v9721_v9  ;;  %v4943_v27 = vld [vmem:[%s11207_s16 + $0x8] sm:$0xff]  ;;  %v4944_v8 = vld [vmem:[%s11207_s16 + $0x10] sm:$0xff] }
 0xda9   : > { %v7885_v59 = vpop.eup %7884  ;;  %7890 = vrsqrt.f32 %v4621_v61  ;;  %v4777_v52 = vmul.f32 0.03125, %v4770_v16  ;;  %v4946_v16 = vld [vmem:[%s11207_s16 + $0x20] sm:$0xff]  ;;  %v4947_v20 = vld [vmem:[%s11207_s16 + $0x28] sm:$0xff] }
 0xdaa   : > { %4844 = vadd.xlane.f32.xlu1 %v10690_v36  ;;  %v4830_v28 = vadd.f32 %v4823_v31, %v4816_v41  ;;  %v4646_v3 = vadd.f32 %v4639_v22, %v9724_v29  ;;  %v4633_v11 = vmul.f32 %v7885_v59, %v10620_v6  ;;  %v4945_v41 = vld [vmem:[%s11207_s16 + $0x18] sm:$0xff] }
 0xdab   : > { %v4784_v26 = vadd.f32 1e-05, %v4777_v52  ;;  %v7308_v50 = vpack.c.bf16 %v4945_v41, %v4944_v8  ;;  %v5073_v41 = vld [vmem:[%s11208_s10 + $0x8] sm:$0xff] }
 0xdac   : > { %v10700_v38 = vmul.f32 %v11184_v21, %v4830_v28  ;;  %v4824_v35 = vadd.f32 %v4646_v3, %v11205_v0  ;;  %v4640_v40 = vmul.f32 %v4633_v11, %v9721_v9 }
 0xdad   : > { %v7887_v7 = vpop.eup %7886  ;;  %7892 = vrsqrt.f32 %v4784_v26 }
 0xdae   : > { %4846 = vadd.xlane.f32.xlu0 %v10700_v38  ;;  %v4831_v24 = vadd.f32 %v4824_v35, %v4817_v45  ;;  %v4647_v32 = vadd.f32 %v4640_v40, %v9724_v29  ;;  %v4634_v6 = vmul.f32 %v7887_v7, %v10626_v18 }
 0xdb0   : > { %v10709_v55 = vmul.f32 %v11184_v21, %v4831_v24  ;;  %v4825_v44 = vadd.f32 %v4647_v32, %v11206_v46  ;;  %v4641_v54 = vmul.f32 %v4634_v6, %v9721_v9 }
 0xdb1   : > { %v7889_v43 = vpop.eup %7888 }
 0xdb2   : > { %4848 = vadd.xlane.f32.xlu1 %v10709_v55  ;;  %v4832_v62 = vadd.f32 %v4825_v44, %v4818_v17  ;;  %v4648_v30 = vadd.f32 %v4641_v54, %v9724_v29  ;;  %v4797_v13 = vmul.f32 %v7889_v43, %v10633_v33 }
 0xdb3   : > { %v7891_v47 = vpop.eup %7890 }
 0xdb4   : > { %v4839_v18 = vmul.f32 %v11184_v21, %v4832_v62  ;;  %v4808_v63 = vmul.f32 %v10657_v49, %v4797_v13  ;;  %v4635_v60 = vmul.f32 %v7891_v47, %v10636_v14  ;;  %v4826_v42 = vadd.f32 %v4648_v30, %v9769_v48  ;;  %v4948_v62 = vld [vmem:[%s11207_s16 + $0x30] sm:$0xff]  ;;  %v4949_v30 = vld [vmem:[%s11207_s16 + $0x38] sm:$0xff] }
 0xdb5   : > { %v7314_v13 = vpack.c.bf16 %v4949_v30, %v4948_v62 }
 0xdb6   : > { %4850 = vadd.xlane.f32.xlu0 %v4839_v18  ;;  %v4819_v57 = vadd.f32 %v10662_v15, %v4808_v63  ;;  %v4642_v12 = vmul.f32 %v4635_v60, %v9721_v9  ;;  %v4950_v63 = vld [vmem:[%s11207_s16 + $0x40] sm:$0xff]  ;;  %v4951_v60 = vld [vmem:[%s11207_s16 + $0x48] sm:$0xff] }
 0xdb7   : > { %v7893_v1 = vpop.eup %7892 }
 0xdb8   : > { %v4833_v25 = vadd.f32 %v4826_v42, %v4819_v57  ;;  %v4649_v33 = vadd.f32 %v4642_v12, %v9724_v29  ;;  %v4798_v37 = vmul.f32 %v7893_v1, %v10644_v53  ;;  %v4942_v53 = vld [vmem:[%s11207_s16] sm:$0xff]  ;;  %v7317_v57 = vpack.c.bf16 %v4951_v60, %v4950_v63 }
 0xdb9   : > { %v7305_v61 = vpack.c.bf16 %v4943_v27, %v4942_v53  ;;  %v4957_v27 = vld [vmem:[%s11207_s16 + $0x78] sm:$0xff] }
 0xdba   : > { %v4840_v23 = vmul.f32 %v11184_v21, %v4833_v25  ;;  %v4809_v14 = vmul.f32 %v10657_v49, %v4798_v37  ;;  %v4827_v5 = vadd.f32 %v4649_v33, %v9777_v56  ;;  %v7311_v56 = vpack.c.bf16 %v4947_v20, %v4946_v16  ;;  %v4952_v25 = vld [vmem:[%s11207_s16 + $0x50] sm:$0xff]  ;;  %v4953_v33 = vld [vmem:[%s11207_s16 + $0x58] sm:$0xff] }
 0xdbb   : > { %7306 = vmatpush3.bf16.msra.mxu0 %v7305_v61  ;;  %v5072_v61 = vld [vmem:[%s11208_s10] sm:$0xff]  ;;  %v5074_v16 = vld [vmem:[%s11208_s10 + $0x10] sm:$0xff]  ;;  %v5075_v20 = vld [vmem:[%s11208_s10 + $0x18] sm:$0xff] }
 0xdbc   : > { %4852 = vadd.xlane.f32.xlu1 %v4840_v23  ;;  %v4820_v48 = vadd.f32 %v10662_v15, %v4809_v14  ;;  %7307 = vmatprep.subr.bf16.mxu0 %v11172_v39 }
 0xdbe   : > { %v4834_v9 = vadd.f32 %v4827_v5, %v4820_v48  ;;  %v4954_v48 = vld [vmem:[%s11207_s16 + $0x60] sm:$0xff]  ;;  %v4955_v5 = vld [vmem:[%s11207_s16 + $0x68] sm:$0xff] }
 0xdbf   : > { %7309 = vmatpush3.bf16.msra.mxu0 %v7308_v50  ;;  %v10801_v50 = vpack.c.bf16 %v5073_v41, %v5072_v61 }
 0xdc0   : > { %v10730_v58 = vmul.f32 %v11184_v21, %v4834_v9  ;;  %7310 = vmatprep.subr.bf16.mxu0 %v11172_v39 }
 0xdc1   : > { %7384 = vmatpush3.bf16.msra.mxu1 %v10801_v50 }
 0xdc2   : > { %v4854_v29 = vsel %vm1720_vm11, %v10730_v58, 0.0  ;;  %7377 = vmatprep.subr.bf16.mxu1 %v11172_v39 }
 0xdc3   : > { %4855 = vadd.xlane.f32.xlu0 %v4854_v29  ;;  %7312 = vmatpush3.bf16.msra.mxu0 %v7311_v56  ;;  %v7323_v29 = vpack.c.bf16 %v4955_v5, %v4954_v48  ;;  %v10807_v56 = vpack.c.bf16 %v5075_v20, %v5074_v16 }
 0xdc4   : > { %7313 = vmatprep.subr.bf16.mxu0 %v11172_v39 }
 0xdc5   : > { %7385 = vmatpush3.bf16.msra.mxu1 %v10807_v56 }
 0xdc6   : > { %7378 = vmatprep.subr.bf16.mxu1 %v11172_v39 }
 0xdc7   : > { %7315 = vmatpush3.bf16.msra.mxu0 %v7314_v13 }
 0xdc8   : > { %7316 = vmatprep.subr.bf16.mxu0 %v11172_v39 }
 0xdcb   : > { %7318 = vmatpush3.bf16.msra.mxu0 %v7317_v57 }
 0xdcc   : > { %7319 = vmatprep.subr.bf16.mxu0 %v11172_v39 }
 0xe33   : > { %v4843_v31 = vpop.xlane.xlu0 %4842 }
 0xe34   : > { %v4857_v22 = vmul.f32 0.03125, %v4843_v31  ;;  %v5076_v31 = vld [vmem:[%s11208_s10 + $0x20] sm:$0xff] }
 0xe36   : > { %v4864_v51 = vsub.f32 %v10679_v34, %v4857_v22  ;;  %v5077_v22 = vld [vmem:[%s11208_s10 + $0x28] sm:$0xff] }
 0xe37   : > { %v4845_v59 = vpop.xlane.xlu1 %4844 }
 0xe38   : > { %v10745_v52 = vmul.f32 %v11184_v21, %v4864_v51  ;;  %v4858_v28 = vmul.f32 0.03125, %v4845_v59  ;;  %v10813_v51 = vpack.c.bf16 %v5077_v22, %v5076_v31  ;;  %v5078_v59 = vld [vmem:[%s11208_s10 + $0x30] sm:$0xff] }
 0xe3a   : > { %v4865_v3 = vsub.f32 %v10690_v36, %v4858_v28  ;;  %v4878_v11 = vmul.f32 %v10745_v52, %v10745_v52  ;;  %v5079_v28 = vld [vmem:[%s11208_s10 + $0x38] sm:$0xff]  ;;  %7386 = vmatpush3.bf16.msra.mxu1 %v10813_v51 }
 0xe3b   : > { %v4847_v26 = vpop.xlane.xlu0 %4846  ;;  %7379 = vmatprep.subr.bf16.mxu1 %v11172_v39 }
 0xe3c   : > { %v10751_v45 = vmul.f32 %v11184_v21, %v4865_v3  ;;  %v4859_v0 = vmul.f32 0.03125, %v4847_v26  ;;  %4885 = vadd.xlane.f32.xlu1 %v4878_v11  ;;  %v10819_v3 = vpack.c.bf16 %v5079_v28, %v5078_v59  ;;  %v5080_v11 = vld [vmem:[%s11208_s10 + $0x40] sm:$0xff]  ;;  %v5081_v26 = vld [vmem:[%s11208_s10 + $0x48] sm:$0xff] }
 0xe3e   : > { %v4866_v35 = vsub.f32 %v10700_v38, %v4859_v0  ;;  %v4879_v34 = vmul.f32 %v10751_v45, %v10751_v45  ;;  %7387 = vmatpush3.bf16.msra.mxu1 %v10819_v3  ;;  %v10825_v0 = vpack.c.bf16 %v5081_v26, %v5080_v11 }
 0xe3f   : > { %v4849_v40 = vpop.xlane.xlu1 %4848  ;;  %7380 = vmatprep.subr.bf16.mxu1 %v11172_v39 }
 0xe40   : > { %v10757_v19 = vmul.f32 %v11184_v21, %v4866_v35  ;;  %v4860_v36 = vmul.f32 0.03125, %v4849_v40  ;;  %4887 = vadd.xlane.f32.xlu0 %v4879_v34  ;;  %v5082_v35 = vld [vmem:[%s11208_s10 + $0x50] sm:$0xff]  ;;  %v5083_v34 = vld [vmem:[%s11208_s10 + $0x58] sm:$0xff] }
 0xe41   : > { %v10831_v40 = vpack.c.bf16 %v5083_v34, %v5082_v35  ;;  %v5087_v35 = vld [vmem:[%s11208_s10 + $0x78] sm:$0xff] }
 0xe42   : > { %v4867_v7 = vsub.f32 %v10709_v55, %v4860_v36  ;;  %v4880_v24 = vmul.f32 %v10757_v19, %v10757_v19  ;;  %7388 = vmatpush3.bf16.msra.mxu1 %v10825_v0  ;;  %v5084_v36 = vld [vmem:[%s11208_s10 + $0x60] sm:$0xff] }
 0xe43   : > { %v4851_v32 = vpop.xlane.xlu0 %4850  ;;  %7381 = vmatprep.subr.bf16.mxu1 %v11172_v39 }
 0xe44   : > { %v10763_v6 = vmul.f32 %v11184_v21, %v4867_v7  ;;  %v4861_v38 = vmul.f32 0.03125, %v4851_v32  ;;  %4889 = vadd.xlane.f32.xlu1 %v4880_v24  ;;  %v5085_v7 = vld [vmem:[%s11208_s10 + $0x68] sm:$0xff] }
 0xe45   : > { %v10837_v24 = vpack.c.bf16 %v5085_v7, %v5084_v36 }
 0xe46   : > { %v4868_v17 = vsub.f32 %v4839_v18, %v4861_v38  ;;  %v4881_v46 = vmul.f32 %v10763_v6, %v10763_v6  ;;  %7389 = vmatpush3.bf16.msra.mxu1 %v10831_v40 }
 0xe47   : > { %7382 = vmatprep.subr.bf16.mxu1 %v11172_v39 }
 0xe48   : > { %v10768_v44 = vmul.f32 %v11184_v21, %v4868_v17  ;;  %4891 = vadd.xlane.f32.xlu0 %v4881_v46 }
 0xe49   : > { %v4853_v55 = vpop.xlane.xlu1 %4852 }
 0xe4a   : > { %v4862_v54 = vmul.f32 0.03125, %v4853_v55  ;;  %v4882_v43 = vmul.f32 %v10768_v44, %v10768_v44  ;;  %7390 = vmatpush3.bf16.msra.mxu1 %v10837_v24 }
 0xe4b   : > { %7383 = vmatprep.subr.bf16.mxu1 %v11172_v39 }
 0xe4c   : > { %v4869_v47 = vsub.f32 %v4840_v23, %v4862_v54  ;;  %4893 = vadd.xlane.f32.xlu1 %v4882_v43  ;;  %v7320_v23 = vpack.c.bf16 %v4953_v33, %v4952_v25 }
 0xe4e   : > { %v10775_v18 = vmul.f32 %v11184_v21, %v4869_v47  ;;  %7321 = vmatpush3.bf16.msra.mxu0 %v7320_v23 }
 0xe4f   : > { %7322 = vmatprep.subr.bf16.mxu0 %v11172_v39 }
 0xe50   : > { %v4856_v42 = vpop.xlane.xlu0 %4855  ;;  %v4883_v12 = vmul.f32 %v10775_v18, %v10775_v18 }
 0xe51   : > { %v4863_v1 = vmul.f32 0.03125, %v4856_v42 }
 0xe52   : > { %4895 = vadd.xlane.f32.xlu0 %v4883_v12  ;;  %7324 = vmatpush3.bf16.msra.mxu0 %v7323_v29 }
 0xe53   : > { %v4870_v37 = vsub.f32 %v10730_v58, %v4863_v1  ;;  %7325 = vmatprep.subr.bf16.mxu0 %v11172_v39  ;;  %v4956_v58 = vld [vmem:[%s11207_s16 + $0x70] sm:$0xff] }
 0xe54   : > { %v7326_v8 = vpack.c.bf16 %v4957_v27, %v4956_v58 }
 0xe55   : > { %v10787_v14 = vmul.f32 %v11184_v21, %v4870_v37 }
 0xe56   : > { %7327 = vmatpush3.bf16.msra.mxu0 %v7326_v8 }
 0xe57   : > { %v4884_v9 = vmul.f32 %v10787_v14, %v10787_v14  ;;  %7328 = vmatprep.subr.bf16.mxu0 %v11172_v39 }
 0xe59   : > { %v4897_v53 = vsel %vm1720_vm11, %v4884_v9, 0.0 }
 0xe5a   : > { %4898 = vadd.xlane.f32.xlu1 %v4897_v53 }
 0xec9   : > { %v4886_v32 = vpop.xlane.xlu1 %4885 }
 0xeca   : > { %v4900_v38 = vmul.f32 0.03125, %v4886_v32 }
 0xecc   : > { %v4907_v17 = vadd.f32 1e-05, %v4900_v38 }
 0xecd   : > { %v4888_v46 = vpop.xlane.xlu0 %4887 }
 0xece   : > { %7894 = vrsqrt.f32 %v4907_v17  ;;  %v4901_v55 = vmul.f32 0.03125, %v4888_v46 }
 0xed0   : > { %v4908_v54 = vadd.f32 1e-05, %v4901_v55 }
 0xed1   : > { %v4890_v43 = vpop.xlane.xlu1 %4889 }
 0xed2   : > { %7896 = vrsqrt.f32 %v4908_v54  ;;  %v4902_v62 = vmul.f32 0.03125, %v4890_v43 }
 0xed4   : > { %v4909_v30 = vadd.f32 1e-05, %v4902_v62 }
 0xed5   : > { %v4892_v13 = vpop.xlane.xlu0 %4891 }
 0xed6   : > { %7898 = vrsqrt.f32 %v4909_v30  ;;  %v4903_v47 = vmul.f32 0.03125, %v4892_v13 }
 0xed8   : > { %v7895_v63 = vpop.eup %7894  ;;  %v4910_v60 = vadd.f32 1e-05, %v4903_v47 }
 0xed9   : > { %v4921_v57 = vmul.f32 %v7895_v63, %v10745_v52  ;;  %v4894_v42 = vpop.xlane.xlu1 %4893 }
 0xeda   : > { %7900 = vrsqrt.f32 %v4910_v60  ;;  %v4904_v12 = vmul.f32 0.03125, %v4894_v42 }
 0xedb   : > { %v4928_v1 = vmul.f32 %v4921_v57, %v10657_v49 }
 0xedc   : > { %v7897_v25 = vpop.eup %7896  ;;  %v4911_v33 = vadd.f32 1e-05, %v4904_v12 }
 0xedd   : > { %v10844_v37 = vadd.f32 %v4928_v1, %v10662_v15  ;;  %v4922_v23 = vmul.f32 %v7897_v25, %v10751_v45 }
 0xede   : > { %7902 = vrsqrt.f32 %v4911_v33 }
 0xedf   : > { %v4896_v48 = vpop.xlane.xlu0 %4895  ;;  %6922 = vmatmul.mubr.f32.vlgmr.msra.gmra.mrb[104].mxu0 %v10844_v37  ;;  %v4929_v5 = vmul.f32 %v4922_v23, %v10657_v49 }
 0xee0   : > { %v7899_v9 = vpop.eup %7898  ;;  %v4905_v52 = vmul.f32 0.03125, %v4896_v48  ;;  %6924 = vmatprep.mubr.msk.f32.mxu0 %vm8166_vm1, %v11174_v2  ;;  %7330 = vmatpush3.bf16.msra.mxu0 %v10801_v50 }
 0xee1   : > { %v10853_v29 = vadd.f32 %v4929_v5, %v10662_v15  ;;  %v4923_v53 = vmul.f32 %v7899_v9, %v10757_v19  ;;  %7331 = vmatprep.subr.bf16.mxu0 %v11172_v39  ;;  %v5817_v5 = vld [vmem:[%s987_s4] ss:$0 sm:$0xff]  ;;  %s11211_s4 = sld [smem:[#allocation48_spill]] (!%p5818_p10) }
 0xee2   : > { %v4912_v45 = vadd.f32 1e-05, %v4905_v52 }
 0xee3   : > { %6925 = vmatmul.mubr.f32.gmra.mrb[106].mxu0 %v10853_v29  ;;  %v4930_v58 = vmul.f32 %v4923_v53, %v10657_v49 }
 0xee4   : > { %v7901_v27 = vpop.eup %7900  ;;  %7904 = vrsqrt.f32 %v4912_v45  ;;  %6927 = vmatprep.mubr.msk.f32.mxu0 %vm8166_vm1, %v11174_v2  ;;  %7333 = vmatpush3.bf16.msra.mxu0 %v10807_v56 }
 0xee5   : > { %v10863_v8 = vadd.f32 %v4930_v58, %v10662_v15  ;;  %v4924_v61 = vmul.f32 %v7901_v27, %v10763_v6  ;;  %7334 = vmatprep.subr.bf16.mxu0 %v11172_v39 }
 0xee7   : > { %6928 = vmatmul.mubr.f32.gmra.mrb[108].mxu0 %v10863_v8  ;;  %v4899_v19 = vpop.xlane.xlu1 %4898  ;;  %v4931_v41 = vmul.f32 %v4924_v61, %v10657_v49 }
 0xee8   : > { %v7903_v50 = vpop.eup %7902  ;;  %v4906_v16 = vmul.f32 0.03125, %v4899_v19  ;;  %6930 = vmatprep.mubr.msk.f32.mxu0 %vm8166_vm1, %v11174_v2  ;;  %7336 = vmatpush3.bf16.msra.mxu0 %v10813_v51 }
 0xee9   : > { %v10873_v20 = vadd.f32 %v4931_v41, %v10662_v15  ;;  %v4925_v56 = vmul.f32 %v7903_v50, %v10768_v44  ;;  %7337 = vmatprep.subr.bf16.mxu0 %v11172_v39 }
 0xeea   : > { %v4913_v6 = vadd.f32 1e-05, %v4906_v16 }
 0xeeb   : > { %6931 = vmatmul.mubr.f32.gmra.mrb[110].mxu0 %v10873_v20  ;;  %v4932_v31 = vmul.f32 %v4925_v56, %v10657_v49 }
 0xeec   : > { %7906 = vrsqrt.f32 %v4913_v6  ;;  %6933 = vmatprep.mubr.msk.f32.mxu0 %vm8166_vm1, %v11174_v2  ;;  %7339 = vmatpush3.bf16.msra.mxu0 %v10819_v3 }
 0xeed   : > { %v10883_v22 = vadd.f32 %v4932_v31, %v10662_v15  ;;  %7340 = vmatprep.subr.bf16.mxu0 %v11172_v39 }
 0xeee   : > { %v7905_v51 = vpop.eup %7904 }
 0xeef   : > { %6934 = vmatmul.mubr.f32.gmra.mrb[112].mxu0 %v10883_v22  ;;  %v4926_v44 = vmul.f32 %v7905_v51, %v10775_v18 }
 0xef0   : > { %6936 = vmatprep.mubr.msk.f32.mxu0 %vm8166_vm1, %v11174_v2  ;;  %7342 = vmatpush3.bf16.msra.mxu0 %v10825_v0  ;;  %v5086_v0 = vld [vmem:[%s11208_s10 + $0x70] sm:$0xff] }
 0xef1   : > { %v4933_v59 = vmul.f32 %v4926_v44, %v10657_v49  ;;  %7343 = vmatprep.subr.bf16.mxu0 %v11172_v39  ;;  %v7350_v34 = vpack.c.bf16 %v5087_v35, %v5086_v0 }
 0xef3   : > { %v10894_v28 = vadd.f32 %v4933_v59, %v10662_v15  ;;  %7391 = vmatpush3.bf16.msra.mxu1 %v7350_v34 }
 0xef4   : > { %7345 = vmatpush3.bf16.msra.mxu0 %v10831_v40 }
 0xef5   : > { %6937 = vmatmul.mubr.f32.gmra.mrb[114].mxu0 %v10894_v28  ;;  %7346 = vmatprep.subr.bf16.mxu0 %v11172_v39 }
 0xef6   : > { %v7907_v18 = vpop.eup %7906  ;;  %6939 = vmatprep.mubr.msk.f32.mxu0 %vm8166_vm1, %v11174_v2 }
 0xef7   : > { %v4927_v3 = vmul.f32 %v7907_v18, %v10787_v14 }
 0xef8   : > { %7348 = vmatpush3.bf16.msra.mxu0 %v10837_v24 }
 0xef9   : > { %v4934_v11 = vmul.f32 %v4927_v3, %v10657_v49  ;;  %7349 = vmatprep.subr.bf16.mxu0 %v11172_v39  ;;  %v5816_v49 = vld [vmem:[%s984_s13] ss:$0 sm:$0xff] }
 0xefb   : > { %v10906_v26 = vadd.f32 %v4934_v11, %v10662_v15 }
 0xefc   : > { %7351 = vmatpush3.bf16.msra.mxu0 %v7350_v34 }
 0xefd   : > { %6940 = vmatmul.mubr.f32.gmra.mrb[116].mxu0 %v10906_v26 }
 0xefe   : > { %6974 = vmatprep.mubr.msk.f32.mxu0 %vm8166_vm1, %v11174_v2 }
 0xfb2   : > { %v5031_v14 = vpop.f32.mrb[104].mxu0 }
 0xfb3   : > { %v5032_v39 = vadd.f32 %v5816_v49, %v5031_v14  ;;  %v6923_v40 = vpop.f32.mrb[105].mxu0 }
 0xfb5   : > { %v5065_v15 = vmax.f32 %v5032_v39, 0.0 }
 0xfb6   : > { %v5036_v36 = vpop.f32.mrb[106].mxu0 }
 0xfb7   : > { %v5037_v7 = vadd.f32 %v5816_v49, %v5036_v36  ;;  %v6926_v24 = vpop.f32.mrb[107].mxu0  ;;  %6975 = vmatmul.mubr.f32.vlgmr.msra.gmra.mrb[118].mxu0 %v5065_v15 }
 0xfb9   : > { %v5066_v32 = vmax.f32 %v5037_v7, 0.0 }
 0xfba   : > { %v5041_v38 = vpop.f32.mrb[108].mxu0 }
 0xfbb   : > { %v5042_v17 = vadd.f32 %v5816_v49, %v5041_v38  ;;  %v6929_v46 = vpop.f32.mrb[109].mxu0  ;;  %6978 = vmatmul.mubr.f32.vlgmr.msra.gmra.mrb[112].mxu1 %v5066_v32 }
 0xfbc   : > { %6980 = vmatprep.mubr.msk.f32.mxu1 %vm8166_vm1, %v11174_v2 }
 0xfbd   : > { %v5067_v55 = vmax.f32 %v5042_v17, 0.0 }
 0xfbe   : > { %v5046_v54 = vpop.f32.mrb[110].mxu0 }
 0xfbf   : > { %v5047_v43 = vadd.f32 %v5816_v49, %v5046_v54  ;;  %v6932_v62 = vpop.f32.mrb[111].mxu0  ;;  %6981 = vmatmul.mubr.f32.gmra.mrb[114].mxu1 %v5067_v55 }
 0xfc0   : > { %6983 = vmatprep.mubr.msk.f32.mxu1 %vm8166_vm1, %v11174_v2 }
 0xfc1   : > { %v5068_v30 = vmax.f32 %v5047_v43, 0.0 }
 0xfc2   : > { %v5051_v13 = vpop.f32.mrb[112].mxu0 }
 0xfc3   : > { %v5052_v47 = vadd.f32 %v5816_v49, %v5051_v13  ;;  %v6935_v63 = vpop.f32.mrb[113].mxu0  ;;  %6984 = vmatmul.mubr.f32.gmra.mrb[116].mxu1 %v5068_v30 }
 0xfc4   : > { %6986 = vmatprep.mubr.msk.f32.mxu1 %vm8166_vm1, %v11174_v2 }
 0xfc5   : > { %v5069_v60 = vmax.f32 %v5052_v47, 0.0 }
 0xfc7   : > { %6987 = vmatmul.mubr.f32.gmra.mrb[118].mxu1 %v5069_v60 }
 0xfc8   : > { %v5056_v57 = vpop.f32.mrb[114].mxu0  ;;  %6989 = vmatprep.mubr.msk.f32.mxu1 %vm8166_vm1, %v11174_v2 }
 0xfc9   : > { %v5057_v42 = vadd.f32 %v5816_v49, %v5056_v57  ;;  %v6938_v12 = vpop.f32.mrb[115].mxu0 }
 0xfcb   : > { %v5070_v1 = vmax.f32 %v5057_v42, 0.0 }
 0xfcd   : > { %6990 = vmatmul.mubr.f32.gmra.mrb[120].mxu1 %v5070_v1 }
 0xfce   : > { %6992 = vmatprep.mubr.msk.f32.mxu1 %vm8166_vm1, %v11174_v2  ;;  %vm8168_vm1 = vmmov (!%p5818_p10), 0  }
 0xfd0   : > { %v5061_v25 = vpop.f32.mrb[116].mxu0 }
 0xfd1   : > { %v5062_v33 = vadd.f32 %v5816_v49, %v5061_v25  ;;  %v6941_v23 = vpop.f32.mrb[117].mxu0 }
 0xfd3   : > { %v5071_v48 = vmax.f32 %v5062_v33, 0.0 }
 0xfd5   : > { %6993 = vmatmul.mubr.f32.gmra.mrb[122].mxu1 %v5071_v48 }
0x108a   : > { %v5161_v9 = vpop.f32.mrb[118].mxu0 }
0x108b   : > { %v5162_v52 = vadd.f32 %v5817_v5, %v5161_v9  ;;  %v6976_v53 = vpop.f32.mrb[119].mxu0 }
0x108d   : > { %v5195_v45 = vadd.f32 %v5162_v52, %v10844_v37 }
0x108e   : > { %v5166_v58 = vpop.f32.mrb[112].mxu1 }
0x108f   : > { %v5202_v27 = vmul.f32 %v11184_v21, %v5195_v45  ;;  %v5167_v61 = vadd.f32 %v5817_v5, %v5166_v58  ;;  %v6979_v2 = vpop.f32.mrb[113].mxu1 }
0x1091   : > { %v5196_v19 = vadd.f32 %v5167_v61, %v10853_v29  ;;  %5209 = vadd.xlane.f32.xlu1 %v5202_v27 }
0x1092   : > { %v5171_v41 = vpop.f32.mrb[114].mxu1 }
0x1093   : > { %v5203_v50 = vmul.f32 %v11184_v21, %v5196_v19  ;;  %v5172_v16 = vadd.f32 %v5817_v5, %v5171_v41  ;;  %v6982_v56 = vpop.f32.mrb[115].mxu1 }
0x1095   : > { %v5197_v6 = vadd.f32 %v5172_v16, %v10863_v8  ;;  %5211 = vadd.xlane.f32.xlu0 %v5203_v50 }
0x1096   : > { %v5176_v31 = vpop.f32.mrb[116].mxu1 }
0x1097   : > { %v5204_v51 = vmul.f32 %v11184_v21, %v5197_v6  ;;  %v5177_v37 = vadd.f32 %v5817_v5, %v5176_v31  ;;  %v6985_v44 = vpop.f32.mrb[117].mxu1 }
0x1099   : > { %v5198_v59 = vadd.f32 %v5177_v37, %v10873_v20  ;;  %5213 = vadd.xlane.f32.xlu1 %v5204_v51 }
0x109a   : > { %v5181_v18 = vpop.f32.mrb[118].mxu1 }
0x109b   : > { %v5205_v29 = vmul.f32 %v11184_v21, %v5198_v59  ;;  %v5182_v3 = vadd.f32 %v5817_v5, %v5181_v18  ;;  %v6988_v11 = vpop.f32.mrb[119].mxu1 }
0x109d   : > { %v5199_v0 = vadd.f32 %v5182_v3, %v10883_v22  ;;  %5215 = vadd.xlane.f32.xlu0 %v5205_v29 }
0x109f   : > { %v5206_v35 = vmul.f32 %v11184_v21, %v5199_v0 }
0x10a0   : > { %v5186_v8 = vpop.f32.mrb[120].mxu1 }
0x10a1   : > { %5217 = vadd.xlane.f32.xlu1 %v5206_v35  ;;  %v6991_v34 = vpop.f32.mrb[121].mxu1  ;;  %v5187_v40 = vadd.f32 %v5817_v5, %v5186_v8 }
0x10a3   : > { %v5200_v36 = vadd.f32 %v5187_v40, %v10894_v28 }
0x10a5   : > { %v5207_v22 = vmul.f32 %v11184_v21, %v5200_v36 }
0x10a8   : > { %v5191_v49 = vpop.f32.mrb[122].mxu1 }
0x10a9   : > { %v5192_v14 = vadd.f32 %v5817_v5, %v5191_v49  ;;  %v6994_v39 = vpop.f32.mrb[123].mxu1 }
0x10ab   : > { %v5201_v20 = vadd.f32 %v5192_v14, %v10906_v26 }
0x10ad   : > { %v5208_v15 = vmul.f32 %v11184_v21, %v5201_v20 }
0x10af   : > { %v5221_v7 = vsel %vm1720_vm11, %v5208_v15, 0.0 }
0x10b0   : > { %5222 = vadd.xlane.f32.xlu0 %v5221_v7 }
0x10b4   : > { %5219 = vadd.xlane.f32.xlu0 %v5207_v22 }
0x111e   : > { %v5210_v24 = vpop.xlane.xlu1 %5209 }
0x111f   : > { %v5224_v32 = vmul.f32 0.03125, %v5210_v24 }
0x1121   : > { %v5231_v38 = vsub.f32 %v5202_v27, %v5224_v32 }
0x1122   : > { %v5212_v17 = vpop.xlane.xlu0 %5211 }
0x1123   : > { %v5238_v46 = vmul.f32 %v11184_v21, %v5231_v38  ;;  %v5225_v55 = vmul.f32 0.03125, %v5212_v17 }
0x1125   : > { %v5232_v54 = vsub.f32 %v5203_v50, %v5225_v55  ;;  %v5245_v43 = vmul.f32 %v5238_v46, %v5238_v46 }
0x1126   : > { %v5214_v26 = vpop.xlane.xlu1 %5213 }
0x1127   : > { %v5239_v62 = vmul.f32 %v11184_v21, %v5232_v54  ;;  %v5226_v30 = vmul.f32 0.03125, %v5214_v26  ;;  %5252 = vadd.xlane.f32.xlu1 %v5245_v43 }
0x1129   : > { %v5233_v28 = vsub.f32 %v5204_v51, %v5226_v30  ;;  %v5246_v13 = vmul.f32 %v5239_v62, %v5239_v62 }
0x112a   : > { %v5216_v47 = vpop.xlane.xlu0 %5215 }
0x112b   : > { %v5240_v63 = vmul.f32 %v11184_v21, %v5233_v28  ;;  %v5227_v60 = vmul.f32 0.03125, %v5216_v47  ;;  %5254 = vadd.xlane.f32.xlu0 %v5246_v13 }
0x112d   : > { %v5234_v57 = vsub.f32 %v5205_v29, %v5227_v60  ;;  %v5247_v42 = vmul.f32 %v5240_v63, %v5240_v63  ;;  %v5308_v29 = vsub.s32 5, %v11201_v10 }
0x112e   : > { %v5218_v12 = vpop.xlane.xlu1 %5217 }
0x112f   : > { %v5241_v1 = vmul.f32 %v11184_v21, %v5234_v57  ;;  %v5228_v25 = vmul.f32 0.03125, %v5218_v12  ;;  %5256 = vadd.xlane.f32.xlu1 %v5247_v42  ;;  %v5309_v34 = vrot.slane %v10652_v4, %v5308_v29  ;;  %v5341_v29 = vld [vmem:[#allocation11 + $0x68] sm:$0xff] (!%p5818_p10) }
0x1131   : > { %v5235_v33 = vsub.f32 %v5206_v35, %v5228_v25  ;;  %v5248_v23 = vmul.f32 %v5241_v1, %v5241_v1 }
0x1133   : > { %v5242_v48 = vmul.f32 %v11184_v21, %v5235_v33  ;;  %5258 = vadd.xlane.f32.xlu0 %v5248_v23 }
0x1135   : > { %v5249_v5 = vmul.f32 %v5242_v48, %v5242_v48 }
0x1137   : > { %5260 = vadd.xlane.f32.xlu1 %v5249_v5 }
0x113d   : > { %v5223_v9 = vpop.xlane.xlu0 %5222 }
0x113e   : > { %v5230_v52 = vmul.f32 0.03125, %v5223_v9  ;;  %v5328_v9 = vld [vmem:[#allocation11] sm:$0xff] (!%p5818_p10) }
0x1140   : > { %v5237_v53 = vsub.f32 %v5208_v15, %v5230_v52  ;;  %v5329_v52 = vld [vmem:[#allocation11 + $0x8] sm:$0xff] (!%p5818_p10) }
0x1141   : > { %v5220_v45 = vpop.xlane.xlu0 %5219 }
0x1142   : > { %v10954_v58 = vmul.f32 %v11184_v21, %v5237_v53  ;;  %v5229_v27 = vmul.f32 0.03125, %v5220_v45  ;;  %v5330_v53 = vld [vmem:[#allocation11 + $0x10] sm:$0xff] (!%p5818_p10)  ;;  %v8167_v45 = vmov (!%p5818_p10), 0.0|0.0  }
0x1143   : > { %7352 = vmatprep.subr.bf16.mxu0 (!%p5818_p10), %v8167_v45  ;;  %7476 = vmatprep.subr.bf16.mxu1 (!%p5818_p10), %v8167_v45 }
0x1144   : > { %v5236_v61 = vsub.f32 %v5207_v22, %v5229_v27  ;;  %v5251_v2 = vmul.f32 %v10954_v58, %v10954_v58  ;;  %v5331_v27 = vld [vmem:[#allocation11 + $0x18] sm:$0xff] (!%p5818_p10) }
0x1146   : > { %v10959_v19 = vmul.f32 %v11184_v21, %v5236_v61  ;;  %v5264_v41 = vsel %vm1720_vm11, %v5251_v2, 0.0  ;;  %v5297_v21 = vsub.s32 4, %v11201_v10  ;;  %v8169_v61 = vmov (!%p5818_p10), 0.0  }
0x1147   : > { %5265 = vadd.xlane.f32.xlu1 %v5264_v41  ;;  %7027 = vmatprep.mubr.msk.f32.mxu0 (!%p5818_p10), %vm8168_vm1, %v8169_v61  ;;  %v7356_v2 = vpack.c.bf16 (!%p5818_p10), %v5331_v27, %v5330_v53  ;;  %v5333_v41 = vld [vmem:[#allocation11 + $0x28] sm:$0xff] (!%p5818_p10) }
0x1148   : > { %v5250_v50 = vmul.f32 %v10959_v19, %v10959_v19  ;;  %v5298_v0 = vrot.slane %v10652_v4, %v5297_v21  ;;  %7039 = vmatprep.mubr.msk.f32.mxu1 (!%p5818_p10), %vm8168_vm1, %v8169_v61 }
0x114a   : > { %5262 = vadd.xlane.f32.xlu0 %v5250_v50 }
0x11b4   : > { %v5253_v16 = vpop.xlane.xlu1 %5252 }
0x11b5   : > { %v5267_v56 = vmul.f32 0.03125, %v5253_v16  ;;  %v5334_v16 = vld [vmem:[#allocation11 + $0x30] sm:$0xff] (!%p5818_p10) }
0x11b7   : > { %v5274_v6 = vadd.f32 1e-05, %v5267_v56  ;;  %v5335_v56 = vld [vmem:[#allocation11 + $0x38] sm:$0xff] (!%p5818_p10) }
0x11b8   : > { %v5255_v31 = vpop.xlane.xlu0 %5254 }
0x11b9   : > { %7908 = vrsqrt.f32 %v5274_v6  ;;  %v5268_v51 = vmul.f32 0.03125, %v5255_v31  ;;  %v7362_v6 = vpack.c.bf16 (!%p5818_p10), %v5335_v56, %v5334_v16  ;;  %v5336_v31 = vld [vmem:[#allocation11 + $0x40] sm:$0xff] (!%p5818_p10) }
0x11bb   : > { %v5275_v37 = vadd.f32 1e-05, %v5268_v51  ;;  %v5337_v51 = vld [vmem:[#allocation11 + $0x48] sm:$0xff] (!%p5818_p10) }
0x11bc   : > { %v5257_v44 = vpop.xlane.xlu1 %5256 }
0x11bd   : > { %7910 = vrsqrt.f32 %v5275_v37  ;;  %v5269_v59 = vmul.f32 0.03125, %v5257_v44  ;;  %v7365_v37 = vpack.c.bf16 (!%p5818_p10), %v5337_v51, %v5336_v31  ;;  %v5338_v44 = vld [vmem:[#allocation11 + $0x50] sm:$0xff] (!%p5818_p10) }
0x11bf   : > { %v5276_v18 = vadd.f32 1e-05, %v5269_v59  ;;  %v5339_v59 = vld [vmem:[#allocation11 + $0x58] sm:$0xff] (!%p5818_p10) }
0x11c0   : > { %v5259_v3 = vpop.xlane.xlu0 %5258  ;;  %v7368_v21 = vpack.c.bf16 (!%p5818_p10), %v5339_v59, %v5338_v44 }
0x11c1   : > { %7912 = vrsqrt.f32 %v5276_v18  ;;  %v5270_v11 = vmul.f32 0.03125, %v5259_v3  ;;  %v5340_v18 = vld [vmem:[#allocation11 + $0x60] sm:$0xff] (!%p5818_p10) }
0x11c2   : > { %v7371_v3 = vpack.c.bf16 (!%p5818_p10), %v5341_v29, %v5340_v18 }
0x11c3   : > { %v7909_v35 = vpop.eup %7908  ;;  %v5277_v8 = vadd.f32 1e-05, %v5270_v11  ;;  %v5342_v11 = vld [vmem:[#allocation11 + $0x70] sm:$0xff] (!%p5818_p10) }
0x11c4   : > { %v5288_v49 = vmul.f32 %v7909_v35, %v5238_v46  ;;  %v5261_v14 = vpop.xlane.xlu1 %5260 }
0x11c5   : > { %7914 = vrsqrt.f32 %v5277_v8  ;;  %v5271_v39 = vmul.f32 0.03125, %v5261_v14  ;;  %v5819_v8 = vld [vmem:[%s11211_s4] ss:$0 sm:$0xff] (!%p5818_p10) }
0x11c6   : > { %v5299_v40 = vmul.f32 %v5298_v0, %v5288_v49 }
0x11c7   : > { %v7911_v20 = vpop.eup %7910  ;;  %v5278_v15 = vadd.f32 1e-05, %v5271_v39 }
0x11c8   : > { %v10968_v36 = vadd.f32 %v5309_v34, %v5299_v40  ;;  %v5289_v7 = vmul.f32 %v7911_v20, %v5239_v62 }
0x11c9   : > { %7916 = vrsqrt.f32 %v5278_v15 }
0x11ca   : > { %5317 = vst [vmem:[#allocation2] sm:$0xff] %v10968_v36  ;;  %v5300_v10 = vmul.f32 %v5298_v0, %v5289_v7 }
0x11cb   : > { %v7913_v22 = vpop.eup %7912 }
0x11cc   : > { %v10971_v24 = vadd.f32 %v5309_v34, %v5300_v10  ;;  %v5290_v32 = vmul.f32 %v7913_v22, %v5240_v63 }
0x11ce   : > { %5318 = vst [vmem:[#allocation2 + $0x8] sm:$0xff] %v10971_v24  ;;  %v5301_v4 = vmul.f32 %v5298_v0, %v5290_v32 }
0x11cf   : > { %v7915_v38 = vpop.eup %7914 }
0x11d0   : > { %v10974_v17 = vadd.f32 %v5309_v34, %v5301_v4  ;;  %v5291_v46 = vmul.f32 %v7915_v38, %v5241_v1 }
0x11d2   : > { %5319 = vst [vmem:[#allocation2 + $0x10] sm:$0xff] %v10974_v17  ;;  %v5302_v55 = vmul.f32 %v5298_v0, %v5291_v46 }
0x11d3   : > { %v7917_v54 = vpop.eup %7916 }
0x11d4   : > { %v10977_v43 = vadd.f32 %v5309_v34, %v5302_v55  ;;  %v5292_v26 = vmul.f32 %v7917_v54, %v5242_v48  ;;  %v5266_v62 = vpop.xlane.xlu1 %5265 }
0x11d5   : > { %v5273_v30 = vmul.f32 0.03125, %v5266_v62 }
0x11d6   : > { %5320 = vst [vmem:[#allocation2 + $0x18] sm:$0xff] %v10977_v43  ;;  %v5303_v28 = vmul.f32 %v5298_v0, %v5292_v26 }
0x11d7   : > { %v5280_v13 = vadd.f32 1e-05, %v5273_v30  ;;  %v5263_v47 = vpop.xlane.xlu0 %5262 }
0x11d8   : > { %v10980_v63 = vadd.f32 %v5309_v34, %v5303_v28  ;;  %v5272_v60 = vmul.f32 0.03125, %v5263_v47 }
0x11d9   : > { %7918 = vrsqrt.f32 %v5280_v13 }
0x11da   : > { %5321 = vst [vmem:[#allocation2 + $0x20] sm:$0xff] %v10980_v63  ;;  %v5279_v57 = vadd.f32 1e-05, %v5272_v60 }
0x11dc   : > { %7920 = vrsqrt.f32 %v5279_v57 }
0x11e3   : > { %v7919_v42 = vpop.eup %7918 }
0x11e4   : > { %v5294_v12 = vmul.f32 %v7919_v42, %v10954_v58  ;;  %v7353_v58 = vpack.c.bf16 (!%p5818_p10), %v5329_v52, %v5328_v9 }
0x11e6   : > { %v7921_v1 = vpop.eup %7920  ;;  %v5305_v25 = vmul.f32 %v5298_v0, %v5294_v12  ;;  %7354 = vmatpush3.bf16.msra.mxu0 (!%p5818_p10), %v7353_v58  ;;  %7484 = vmatpush3.bf16.msra.mxu1 (!%p5818_p10), %v7353_v58 }
0x11e7   : > { %v5293_v33 = vmul.f32 %v7921_v1, %v10959_v19  ;;  %5327 = sbr.rel (%p5818_p10) target bundleno = 4840 (0x12e8), region = 136  ;;  %7355 = vmatprep.subr.bf16.mxu0 (!%p5818_p10), %v8167_v45  ;;  %7477 = vmatprep.subr.bf16.mxu1 (!%p5818_p10), %v8167_v45  ;;  %v5332_v19 = vld [vmem:[#allocation11 + $0x20] sm:$0xff] (!%p5818_p10) }
0x11e8   : > { %v10985_v23 = vadd.f32 %v5309_v34, %v5305_v25  ;;  %v7359_v50 = vpack.c.bf16 (!%p5818_p10), %v5333_v41, %v5332_v19 }
0x11e9   : > { %v5304_v48 = vmul.f32 %v5298_v0, %v5293_v33  ;;  %v5343_v0 = vld [vmem:[#allocation11 + $0x78] sm:$0xff] (!%p5818_p10) }
0x11ea   : > { %5323 = vst [vmem:[#allocation2 + $0x30] sm:$0x3f] %v10985_v23  ;;  %7357 = vmatpush3.bf16.msra.mxu0 (!%p5818_p10), %v7356_v2  ;;  %7485 = vmatpush3.bf16.msra.mxu1 (!%p5818_p10), %v7356_v2  ;;  %v7374_v35 = vpack.c.bf16 (!%p5818_p10), %v5343_v0, %v5342_v11 }
0x11eb   : > { %v10988_v5 = vadd.f32 %v5309_v34, %v5304_v48  ;;  %7358 = vmatprep.subr.bf16.mxu0 (!%p5818_p10), %v8167_v45  ;;  %7478 = vmatprep.subr.bf16.mxu1 (!%p5818_p10), %v8167_v45 }
0x11ed   : > { %5322 = vst [vmem:[#allocation2 + $0x28] sm:$0xff] %v10988_v5 }
0x11ee   : > { %7360 = vmatpush3.bf16.msra.mxu0 %v7359_v50  ;;  %7486 = vmatpush3.bf16.msra.mxu1 %v7359_v50 }
0x11ef   : > { %7361 = vmatprep.subr.bf16.mxu0 %v8167_v45  ;;  %7479 = vmatprep.subr.bf16.mxu1 %v8167_v45 }
0x11f2   : > { %7363 = vmatpush3.bf16.msra.mxu0 %v7362_v6  ;;  %7487 = vmatpush3.bf16.msra.mxu1 %v7362_v6 }
0x11f3   : > { %7364 = vmatprep.subr.bf16.mxu0 %v8167_v45  ;;  %7480 = vmatprep.subr.bf16.mxu1 %v8167_v45 }
0x11f6   : > { %7366 = vmatpush3.bf16.msra.mxu0 %v7365_v37  ;;  %7488 = vmatpush3.bf16.msra.mxu1 %v7365_v37 }
0x11f7   : > { %7367 = vmatprep.subr.bf16.mxu0 %v8167_v45  ;;  %7481 = vmatprep.subr.bf16.mxu1 %v8167_v45 }
0x11fa   : > { %7369 = vmatpush3.bf16.msra.mxu0 %v7368_v21  ;;  %7489 = vmatpush3.bf16.msra.mxu1 %v7368_v21 }
0x11fb   : > { %7370 = vmatprep.subr.bf16.mxu0 %v8167_v45  ;;  %7482 = vmatprep.subr.bf16.mxu1 %v8167_v45 }
0x11fe   : > { %7372 = vmatpush3.bf16.msra.mxu0 %v7371_v3  ;;  %7490 = vmatpush3.bf16.msra.mxu1 %v7371_v3 }
0x11ff   : > { %7373 = vmatprep.subr.bf16.mxu0 %v8167_v45  ;;  %7483 = vmatprep.subr.bf16.mxu1 %v8167_v45 }
0x1202   : > { %7375 = vmatpush3.bf16.msra.mxu0 %v7374_v35  ;;  %7491 = vmatpush3.bf16.msra.mxu1 %v7374_v35 }
0x1205   : > { %7028 = vmatmul.mubr.f32.vlgmr.msra.gmra.mrb[0].mxu0 %v10968_v36  ;;  %7040 = vmatmul.mubr.f32.vlgmr.msra.gmra.mrb[0].mxu1 %v10980_v63 }
0x1206   : > { %7030 = vmatprep.mubr.msk.f32.mxu0 %vm8168_vm1, %v8169_v61  ;;  %7042 = vmatprep.mubr.msk.f32.mxu1 %vm8168_vm1, %v8169_v61 }
0x1209   : > { %7031 = vmatmul.mubr.f32.gmra.mrb[2].mxu0 %v10971_v24  ;;  %7043 = vmatmul.mubr.f32.gmra.mrb[2].mxu1 %v10988_v5 }
0x120a   : > { %7033 = vmatprep.mubr.msk.f32.mxu0 %vm8168_vm1, %v8169_v61  ;;  %7045 = vmatprep.mubr.msk.f32.mxu1 %vm8168_vm1, %v8169_v61 }
0x120d   : > { %7034 = vmatmul.mubr.f32.gmra.mrb[4].mxu0 %v10974_v17  ;;  %7046 = vmatmul.mubr.f32.gmra.mrb[4].mxu1 %v10985_v23 }
0x120e   : > { %7036 = vmatprep.mubr.msk.f32.mxu0 %vm8168_vm1, %v8169_v61 }
0x1211   : > { %7037 = vmatmul.mubr.f32.gmra.mrb[6].mxu0 %v10977_v43 }
0x12d8   : > { %v5417_v34 = vpop.f32.mrb[0].mxu0  ;;  %v5437_v49 = vpop.f32.mrb[0].mxu1 }
0x12d9   : > { %v5418_v14 = vadd.f32 %v5819_v8, %v5417_v34  ;;  %v7029_v39 = vpop.f32.mrb[1].mxu0  ;;  %v5438_v40 = vadd.f32 %v5819_v8, %v5437_v49  ;;  %v7041_v20 = vpop.f32.mrb[1].mxu1 }
0x12db   : > { %5451 = vst [vmem:[%s11212_s20] sm:$0xff] %v5418_v14  ;;  %5455 = vst [vmem:[%s11212_s20 + $0x20] sm:$0xff] %v5438_v40 }
0x12dc   : > { %v5422_v15 = vpop.f32.mrb[2].mxu0  ;;  %v5442_v36 = vpop.f32.mrb[2].mxu1 }
0x12dd   : > { %v5423_v7 = vadd.f32 %v5819_v8, %v5422_v15  ;;  %v7032_v10 = vpop.f32.mrb[3].mxu0  ;;  %v5443_v22 = vadd.f32 %v5819_v8, %v5442_v36  ;;  %v7044_v24 = vpop.f32.mrb[3].mxu1 }
0x12df   : > { %5452 = vst [vmem:[%s11212_s20 + $0x8] sm:$0xff] %v5423_v7  ;;  %5456 = vst [vmem:[%s11212_s20 + $0x28] sm:$0xff] %v5443_v22 }
0x12e0   : > { %v5427_v32 = vpop.f32.mrb[4].mxu0  ;;  %v5447_v4 = vpop.f32.mrb[4].mxu1 }
0x12e1   : > { %v5428_v38 = vadd.f32 %v5819_v8, %v5427_v32  ;;  %v7035_v17 = vpop.f32.mrb[5].mxu0  ;;  %v5448_v46 = vadd.f32 %v5819_v8, %v5447_v4  ;;  %v7047_v55 = vpop.f32.mrb[5].mxu1 }
0x12e3   : > { %5453 = vst [vmem:[%s11212_s20 + $0x10] sm:$0xff] %v5428_v38  ;;  %5457 = vst [vmem:[%s11212_s20 + $0x30] sm:$0x3f] %v5448_v46 }
0x12e4   : > { %v5432_v54 = vpop.f32.mrb[6].mxu0 }
0x12e5   : > { %v5433_v43 = vadd.f32 %v5819_v8, %v5432_v54  ;;  %v7038_v26 = vpop.f32.mrb[7].mxu0 }
0x12e7   : > { %5454 = vst [vmem:[%s11212_s20 + $0x18] sm:$0xff] %v5433_v43 }
0x12e8 PF: > { %s11213_s27 = sld [smem:[#allocation19_spill]]  ;;  %s11214_s2 = sld [smem:[#allocation17_spill]] }
0x12e9   : > { %s11215_s25 = sld [smem:[#allocation18_spill]]  ;;  %s11216_s26 = sld [smem:[#allocation20_spill]] }
0x12ee   : > { %p38_p12 = scmp.ge.s32.totalorder %s11213_s27, 4  }
0x12f0   :  { %40 = sbr.rel (!%p38_p12) target bundleno = 30 (0x1e), region = 230 }
0x12f7   :  { %5469 = vsyncpa [#allocation4], 1 }
0x12f8   :  { %5471 = vsyncpa [#allocation4 + $0x1], 1 }
0x12f9   :  { %5472 = vsyncpa [#allocation6], 1 }
0x12fa   :  { %5474 = vsyncpa [#allocation6 + $0x1], 1 }
0x12fb   :  { %5475 = vsyncpa [#allocation9], 1 }
0x12fc   :  { %5477 = vsyncpa [#allocation9 + $0x1], 1 }
0x12fd   :  { %5478 = vsyncpa [#allocation12], 1 }

</bundles_post_ra>
